<compile_context>
chip_gen: v5e
topology: v5e:2x2
jax: 0.10.0
libtpu: 0.0.40
codegen_flags: <defaults>
</compile_context>

<pallas_src>
import numpy as np
import jax
import jax.numpy as jnp
from jax.experimental import pallas as pl
from jax.experimental.pallas import tpu as pltpu

HIDDEN = 128
KSIZE = 3


# ---------------------------------------------------------------------------
# Pallas kernel
# ---------------------------------------------------------------------------
def _conv1d_im2col(h, w2d, b_row):
    """Valid 1-D conv as a single matmul.

    h:     (T_in, B, C_in)  f32, time-major
    w2d:   (K*C_in, C_out)  f32  (column index = k*C_in + c)
    b_row: (1, C_out)       f32
    returns (T_out, B, C_out) f32
    """
    t_in, batch, c_in = h.shape
    t_out = t_in - KSIZE + 1
    c_out = w2d.shape[1]
    # im2col: cols[t, b, k*C_in + c] = h[t + k, b, c]
    cols = jnp.concatenate([h[k:k + t_out] for k in range(KSIZE)], axis=-1)
    cols = cols.reshape(t_out * batch, KSIZE * c_in)
    y = jnp.dot(cols, w2d, preferred_element_type=jnp.float32) + b_row
    return y.reshape(t_out, batch, c_out)


def lstmnet_kernel(x_ref,
                   w1_ref, b1_ref, w2_ref, b2_ref, w3_ref, b3_ref,
                   wih_f_ref, whh_f_ref, bias_f_ref,
                   wih_b_ref, bias_b_ref,
                   wfc_f_ref, wfc_b_ref, bfc_ref,
                   out_ref):
    H = HIDDEN
    seq, batch, _ = x_ref.shape

    # ---- conv stack (batched im2col matmuls) --------------------------------
    x = x_ref[...].astype(jnp.float32)                 # (T,   B, C_in)
    h = _conv1d_im2col(x, w1_ref[...], b1_ref[...])    # (T-2, B, 128)
    h = _conv1d_im2col(h, w2_ref[...], b2_ref[...])    # (T-4, B, 256)
    h = _conv1d_im2col(h, w3_ref[...], b3_ref[...])    # (T-6, B, 256)
    t3 = h.shape[0]

    # ---- forward-LSTM input projections for ALL steps at once --------------
    xg = (jnp.dot(h.reshape(t3 * batch, 2 * H), wih_f_ref[...],
                  preferred_element_type=jnp.float32)
          + bias_f_ref[...])                           # (T3*B, 4H)
    xg = xg.reshape(t3, batch, 4 * H)

    # ---- backward direction (independent of forward chain -> issue first) --
    # lstm_out[:, -1] for the reverse direction == one cell step on x_{T3-1}
    # from zero state; f-gate * c_prev and W_hh_b @ h_prev are identically 0.
    gb = (jnp.dot(h[t3 - 1], wih_b_ref[...], preferred_element_type=jnp.float32)
          + bias_b_ref[...])                           # (B, 4H)
    ib = jax.nn.sigmoid(gb[:, 0 * H:1 * H])
    gbg = jnp.tanh(gb[:, 2 * H:3 * H])
    ob = jax.nn.sigmoid(gb[:, 3 * H:4 * H])
    hb = ob * jnp.tanh(ib * gbg)                       # (B, H)

    # backward half of the FC now (forward half added after the recurrence)
    y = (jnp.dot(hb, wfc_b_ref[...], preferred_element_type=jnp.float32)
         + bfc_ref[...])                               # (B, OUT_PAD)

    # ---- forward recurrence: only the hidden projection is on the chain ----
    whh_f = whh_f_ref[...]                             # (H, 4H)
    hf = jnp.zeros((batch, H), jnp.float32)
    cf = jnp.zeros((batch, H), jnp.float32)
    # t3 is small (10) -> static unroll.
    # TODO(synk): switch to lax.fori_loop with a VMEM scratch for xg if T grows large.
    for t in range(t3):
        gates = xg[t] + jnp.dot(hf, whh_f, preferred_element_type=jnp.float32)
        i = jax.nn.sigmoid(gates[:, 0 * H:1 * H])
        f = jax.nn.sigmoid(gates[:, 1 * H:2 * H])
        g = jnp.tanh(gates[:, 2 * H:3 * H])
        o = jax.nn.sigmoid(gates[:, 3 * H:4 * H])
        cf = f * cf + i * g
        hf = o * jnp.tanh(cf)

    # ---- forward half of the FC, single lane-dense store --------------------
    y = y + jnp.dot(hf, wfc_f_ref[...], preferred_element_type=jnp.float32)
    out_ref[...] = y.astype(out_ref.dtype)


# ---------------------------------------------------------------------------
# Wrapper
# ---------------------------------------------------------------------------
def lstmnet_forward(x, p):
    """x: (B, T, C_in) float32 (batch_first, matching the PyTorch module input)."""
    batch, seq, c_in = x.shape
    H = HIDDEN
    out_size = p["w_fc"].shape[0]
    out_pad = ((out_size + 127) // 128) * 128          # lane-dense output width

    # time-major activations inside the kernel
    x_tm = jnp.transpose(x, (1, 0, 2))                 # (T, B, C_in)

    def conv_w(w):                                     # (C_out, C_in, K) -> (K*C_in, C_out)
        c_out, ci, k = w.shape
        return jnp.transpose(w, (2, 1, 0)).reshape(k * ci, c_out)

    wfc = p["w_fc"].T                                  # (2H, out_size)
    wfc_p = jnp.zeros((2 * H, out_pad), jnp.float32).at[:, :out_size].set(wfc)
    bfc_p = jnp.zeros((1, out_pad), jnp.float32).at[0, :out_size].set(p["b_fc"])

    args = (
        x_tm,
        conv_w(p["w1"]), p["b1"].reshape(1, -1),
        conv_w(p["w2"]), p["b2"].reshape(1, -1),
        conv_w(p["w3"]), p["b3"].reshape(1, -1),
        p["w_ih_f"].T, p["w_hh_f"].T, (p["b_ih_f"] + p["b_hh_f"]).reshape(1, -1),
        p["w_ih_b"].T, (p["b_ih_b"] + p["b_hh_b"]).reshape(1, -1),
        wfc_p[:H, :], wfc_p[H:, :], bfc_p,
    )

    out = pl.pallas_call(
        lstmnet_kernel,
        out_shape=jax.ShapeDtypeStruct((batch, out_pad), jnp.float32),
        in_specs=[pl.BlockSpec(memory_space=pltpu.MemorySpace.VMEM)] * len(args),
        out_specs=pl.BlockSpec(memory_space=pltpu.MemorySpace.VMEM),
    )(*args)
    return out[:, :out_size]


# ---------------------------------------------------------------------------
# Deterministic parameter init (PyTorch-style uniform bounds, synthetic values)
# ---------------------------------------------------------------------------
def init_params(key, input_size, output_size, hidden=HIDDEN):
    def uni(k, shape, fan_in):
        bound = 1.0 / np.sqrt(fan_in)
        return jax.random.uniform(k, shape, jnp.float32, -bound, bound)

    ks = list(jax.random.split(key, 16))
    return dict(
        w1=uni(ks[0], (128, input_size, 3), input_size * 3),
        b1=uni(ks[1], (128,), input_size * 3),
        w2=uni(ks[2], (256, 128, 3), 128 * 3),
        b2=uni(ks[3], (256,), 128 * 3),
        w3=uni(ks[4], (256, 256, 3), 256 * 3),
        b3=uni(ks[5], (256,), 256 * 3),
        w_ih_f=uni(ks[6], (4 * hidden, 256), hidden),
        w_hh_f=uni(ks[7], (4 * hidden, hidden), hidden),
        b_ih_f=uni(ks[8], (4 * hidden,), hidden),
        b_hh_f=uni(ks[9], (4 * hidden,), hidden),
        w_ih_b=uni(ks[10], (4 * hidden, 256), hidden),
        w_hh_b=uni(ks[11], (4 * hidden, hidden), hidden),
        b_ih_b=uni(ks[12], (4 * hidden,), hidden),
        b_hh_b=uni(ks[13], (4 * hidden,), hidden),
        w_fc=uni(ks[14], (output_size, 2 * hidden), 2 * hidden),
        b_fc=uni(ks[15], (output_size,), 2 * hidden),
    )


# ---------------------------------------------------------------------------
# Pure-JAX reference (for sanity checking the Pallas kernel)
# ---------------------------------------------------------------------------
def reference_forward(x, p, hidden=HIDDEN):
    hi = jax.lax.Precision.HIGHEST

    def conv1d(h, w, bias):
        t_out = h.shape[1] - KSIZE + 1
        acc = 0.0
        for k in range(KSIZE):
            acc = acc + jnp.einsum("btc,oc->bto", h[:, k:k + t_out, :], w[:, :, k],
                                   precision=hi)
        return acc + bias[None, None, :]

    def cell(xt, hp, cp, wih, whh, bih, bhh):
        g = (jnp.matmul(xt, wih.T, precision=hi)
             + jnp.matmul(hp, whh.T, precision=hi) + bih + bhh)
        i = jax.nn.sigmoid(g[:, :hidden])
        f = jax.nn.sigmoid(g[:, hidden:2 * hidden])
        gg = jnp.tanh(g[:, 2 * hidden:3 * hidden])
        o = jax.nn.sigmoid(g[:, 3 * hidden:4 * hidden])
        c = f * cp + i * gg
        return o * jnp.tanh(c), c

    h = conv1d(x, p["w1"], p["b1"])
    h = conv1d(h, p["w2"], p["b2"])
    h = conv1d(h, p["w3"], p["b3"])
    B, T3, _ = h.shape

    hf = jnp.zeros((B, hidden), jnp.float32)
    cf = jnp.zeros((B, hidden), jnp.float32)
    for t in range(T3):
        hf, cf = cell(h[:, t, :], hf, cf, p["w_ih_f"], p["w_hh_f"],
                      p["b_ih_f"], p["b_hh_f"])

    hb = jnp.zeros((B, hidden), jnp.float32)
    cb = jnp.zeros((B, hidden), jnp.float32)
    hb, _ = cell(h[:, T3 - 1, :], hb, cb, p["w_ih_b"], p["w_hh_b"],
                 p["b_ih_b"], p["b_hh_b"])

    feat = jnp.concatenate([hf, hb], axis=1)
    return jnp.matmul(feat, p["w_fc"].T, precision=hi) + p["b_fc"]


# ---------------------------------------------------------------------------
if __name__ == "__main__":
    INPUT_SIZE = 4
    OUTPUT_SIZE = 8
    BATCH = 2
    SEQ = 16  # three valid k=3 convs -> LSTM sequence length 10

    key = jax.random.PRNGKey(0)
    kx, kp = jax.random.split(key)
    x = jax.random.normal(kx, (BATCH, SEQ, INPUT_SIZE), jnp.float32)
    params = init_params(kp, INPUT_SIZE, OUTPUT_SIZE)

    out = lstmnet_forward(x, params)
    out = jax.block_until_ready(out)

    ref = reference_forward(x, params)
    assert out.shape == (BATCH, OUTPUT_SIZE)
    assert jnp.allclose(out, ref, rtol=5e-3, atol=5e-3), (out, ref)

    # NOTE: self.softmax is declared in __init__ but never applied in forward(),
    # so it is intentionally not applied here either.
    print("KERNEL_OK")
</pallas_src>

<mosaic_0001>
module attributes {stable_mosaic.version = 11 : i64} {
  func.func @lstmnet_kernel(%arg0: memref<16x2x4xf32, #tpu.memory_space<vmem>>, %arg1: memref<12x128xf32, #tpu.memory_space<vmem>>, %arg2: memref<1x128xf32, #tpu.memory_space<vmem>>, %arg3: memref<384x256xf32, #tpu.memory_space<vmem>>, %arg4: memref<1x256xf32, #tpu.memory_space<vmem>>, %arg5: memref<768x256xf32, #tpu.memory_space<vmem>>, %arg6: memref<1x256xf32, #tpu.memory_space<vmem>>, %arg7: memref<256x512xf32, #tpu.memory_space<vmem>>, %arg8: memref<128x512xf32, #tpu.memory_space<vmem>>, %arg9: memref<1x512xf32, #tpu.memory_space<vmem>>, %arg10: memref<256x512xf32, #tpu.memory_space<vmem>>, %arg11: memref<1x512xf32, #tpu.memory_space<vmem>>, %arg12: memref<128x128xf32, #tpu.memory_space<vmem>>, %arg13: memref<128x128xf32, #tpu.memory_space<vmem>>, %arg14: memref<1x128xf32, #tpu.memory_space<vmem>>, %arg15: memref<2x128xf32, #tpu.memory_space<vmem>>) attributes {dimension_semantics = [], scalar_prefetch = 0 : i64, scratch_operands = 0 : i64, tpu.core_type = #tpu.core_type<tc>} {
    %c0 = arith.constant 0 : index
    %c0_0 = arith.constant 0 : index
    %c0_1 = arith.constant 0 : index
    %0 = vector.load %arg0[%c0, %c0_0, %c0_1] : memref<16x2x4xf32, #tpu.memory_space<vmem>>, vector<16x2x4xf32>
    %c0_2 = arith.constant 0 : index
    %c0_3 = arith.constant 0 : index
    %1 = vector.load %arg1[%c0_2, %c0_3] : memref<12x128xf32, #tpu.memory_space<vmem>>, vector<12x128xf32>
    %c0_4 = arith.constant 0 : index
    %c0_5 = arith.constant 0 : index
    %2 = vector.load %arg2[%c0_4, %c0_5] : memref<1x128xf32, #tpu.memory_space<vmem>>, vector<1x128xf32>
    %3 = vector.extract_strided_slice %0 {offsets = [0, 0, 0], sizes = [14, 2, 4], strides = [1, 1, 1]} : vector<16x2x4xf32> to vector<14x2x4xf32>
    %4 = vector.extract_strided_slice %0 {offsets = [1, 0, 0], sizes = [14, 2, 4], strides = [1, 1, 1]} : vector<16x2x4xf32> to vector<14x2x4xf32>
    %5 = vector.extract_strided_slice %0 {offsets = [2, 0, 0], sizes = [14, 2, 4], strides = [1, 1, 1]} : vector<16x2x4xf32> to vector<14x2x4xf32>
    %6 = tpu.concatenate %3, %4, %5 in 2 : vector<14x2x4xf32>, vector<14x2x4xf32>, vector<14x2x4xf32> -> vector<14x2x12xf32>
    %7 = vector.shape_cast %6 : vector<14x2x12xf32> to vector<28x12xf32>
    %cst = arith.constant dense<0.000000e+00> : vector<28x128xf32>
    %8 = tpu.matmul %7, %1, %cst {dimension_numbers = #tpu.dot_dimension_numbers<[1], [0], [0], [1], [0, 0, 1, 1], [], []>} : vector<28x12xf32>, vector<12x128xf32>, vector<28x128xf32> -> vector<28x128xf32>
    %9 = vector.broadcast %2 : vector<1x128xf32> to vector<28x128xf32>
    %10 = arith.addf %8, %9 : vector<28x128xf32>
    %11 = vector.shape_cast %10 : vector<28x128xf32> to vector<14x2x128xf32>
    %c0_6 = arith.constant 0 : index
    %c0_7 = arith.constant 0 : index
    %12 = vector.load %arg3[%c0_6, %c0_7] : memref<384x256xf32, #tpu.memory_space<vmem>>, vector<384x256xf32>
    %c0_8 = arith.constant 0 : index
    %c0_9 = arith.constant 0 : index
    %13 = vector.load %arg4[%c0_8, %c0_9] : memref<1x256xf32, #tpu.memory_space<vmem>>, vector<1x256xf32>
    %14 = vector.extract_strided_slice %11 {offsets = [0, 0, 0], sizes = [12, 2, 128], strides = [1, 1, 1]} : vector<14x2x128xf32> to vector<12x2x128xf32>
    %15 = vector.extract_strided_slice %11 {offsets = [1, 0, 0], sizes = [12, 2, 128], strides = [1, 1, 1]} : vector<14x2x128xf32> to vector<12x2x128xf32>
    %16 = vector.extract_strided_slice %11 {offsets = [2, 0, 0], sizes = [12, 2, 128], strides = [1, 1, 1]} : vector<14x2x128xf32> to vector<12x2x128xf32>
    %17 = tpu.concatenate %14, %15, %16 in 2 : vector<12x2x128xf32>, vector<12x2x128xf32>, vector<12x2x128xf32> -> vector<12x2x384xf32>
    %18 = vector.shape_cast %17 : vector<12x2x384xf32> to vector<24x384xf32>
    %cst_10 = arith.constant dense<0.000000e+00> : vector<24x256xf32>
    %19 = tpu.matmul %18, %12, %cst_10 {dimension_numbers = #tpu.dot_dimension_numbers<[1], [0], [0], [1], [0, 0, 1, 1], [], []>} : vector<24x384xf32>, vector<384x256xf32>, vector<24x256xf32> -> vector<24x256xf32>
    %20 = vector.broadcast %13 : vector<1x256xf32> to vector<24x256xf32>
    %21 = arith.addf %19, %20 : vector<24x256xf32>
    %22 = vector.shape_cast %21 : vector<24x256xf32> to vector<12x2x256xf32>
    %c0_11 = arith.constant 0 : index
    %c0_12 = arith.constant 0 : index
    %23 = vector.load %arg5[%c0_11, %c0_12] : memref<768x256xf32, #tpu.memory_space<vmem>>, vector<768x256xf32>
    %c0_13 = arith.constant 0 : index
    %c0_14 = arith.constant 0 : index
    %24 = vector.load %arg6[%c0_13, %c0_14] : memref<1x256xf32, #tpu.memory_space<vmem>>, vector<1x256xf32>
    %25 = vector.extract_strided_slice %22 {offsets = [0, 0, 0], sizes = [10, 2, 256], strides = [1, 1, 1]} : vector<12x2x256xf32> to vector<10x2x256xf32>
    %26 = vector.extract_strided_slice %22 {offsets = [1, 0, 0], sizes = [10, 2, 256], strides = [1, 1, 1]} : vector<12x2x256xf32> to vector<10x2x256xf32>
    %27 = vector.extract_strided_slice %22 {offsets = [2, 0, 0], sizes = [10, 2, 256], strides = [1, 1, 1]} : vector<12x2x256xf32> to vector<10x2x256xf32>
    %28 = tpu.concatenate %25, %26, %27 in 2 : vector<10x2x256xf32>, vector<10x2x256xf32>, vector<10x2x256xf32> -> vector<10x2x768xf32>
    %29 = vector.shape_cast %28 : vector<10x2x768xf32> to vector<20x768xf32>
    %cst_15 = arith.constant dense<0.000000e+00> : vector<20x256xf32>
    %30 = tpu.matmul %29, %23, %cst_15 {dimension_numbers = #tpu.dot_dimension_numbers<[1], [0], [0], [1], [0, 0, 1, 1], [], []>} : vector<20x768xf32>, vector<768x256xf32>, vector<20x256xf32> -> vector<20x256xf32>
    %31 = vector.broadcast %24 : vector<1x256xf32> to vector<20x256xf32>
    %32 = arith.addf %30, %31 : vector<20x256xf32>
    %33 = vector.shape_cast %32 : vector<20x256xf32> to vector<10x2x256xf32>
    %34 = vector.shape_cast %33 : vector<10x2x256xf32> to vector<20x256xf32>
    %c0_16 = arith.constant 0 : index
    %c0_17 = arith.constant 0 : index
    %35 = vector.load %arg7[%c0_16, %c0_17] : memref<256x512xf32, #tpu.memory_space<vmem>>, vector<256x512xf32>
    %cst_18 = arith.constant dense<0.000000e+00> : vector<20x512xf32>
    %36 = tpu.matmul %34, %35, %cst_18 {dimension_numbers = #tpu.dot_dimension_numbers<[1], [0], [0], [1], [0, 0, 1, 1], [], []>} : vector<20x256xf32>, vector<256x512xf32>, vector<20x512xf32> -> vector<20x512xf32>
    %c0_19 = arith.constant 0 : index
    %c0_20 = arith.constant 0 : index
    %37 = vector.load %arg9[%c0_19, %c0_20] : memref<1x512xf32, #tpu.memory_space<vmem>>, vector<1x512xf32>
    %38 = vector.broadcast %37 : vector<1x512xf32> to vector<20x512xf32>
    %39 = arith.addf %36, %38 : vector<20x512xf32>
    %40 = vector.shape_cast %39 : vector<20x512xf32> to vector<10x2x512xf32>
    %41 = vector.extract_strided_slice %33 {offsets = [9, 0, 0], sizes = [1, 2, 256], strides = [1, 1, 1]} : vector<10x2x256xf32> to vector<1x2x256xf32>
    %42 = vector.shape_cast %41 : vector<1x2x256xf32> to vector<2x256xf32>
    %c0_21 = arith.constant 0 : index
    %c0_22 = arith.constant 0 : index
    %43 = vector.load %arg10[%c0_21, %c0_22] : memref<256x512xf32, #tpu.memory_space<vmem>>, vector<256x512xf32>
    %cst_23 = arith.constant dense<0.000000e+00> : vector<2x512xf32>
    %44 = tpu.matmul %42, %43, %cst_23 {dimension_numbers = #tpu.dot_dimension_numbers<[1], [0], [0], [1], [0, 0, 1, 1], [], []>} : vector<2x256xf32>, vector<256x512xf32>, vector<2x512xf32> -> vector<2x512xf32>
    %c0_24 = arith.constant 0 : index
    %c0_25 = arith.constant 0 : index
    %45 = vector.load %arg11[%c0_24, %c0_25] : memref<1x512xf32, #tpu.memory_space<vmem>>, vector<1x512xf32>
    %46 = vector.broadcast %45 : vector<1x512xf32> to vector<2x512xf32>
    %47 = arith.addf %44, %46 : vector<2x512xf32>
    %48 = vector.extract_strided_slice %47 {offsets = [0, 0], sizes = [2, 128], strides = [1, 1]} : vector<2x512xf32> to vector<2x128xf32>
    %49 = arith.negf %48 : vector<2x128xf32>
    %50 = math.exp %49 : vector<2x128xf32>
    %cst_26 = arith.constant 1.000000e+00 : f32
    %51 = vector.broadcast %cst_26 : f32 to vector<2x128xf32>
    %52 = arith.addf %51, %50 : vector<2x128xf32>
    %53 = arith.divf %51, %52 : vector<2x128xf32>
    %54 = vector.extract_strided_slice %47 {offsets = [0, 256], sizes = [2, 128], strides = [1, 1]} : vector<2x512xf32> to vector<2x128xf32>
    %55 = math.tanh %54 : vector<2x128xf32>
    %56 = vector.extract_strided_slice %47 {offsets = [0, 384], sizes = [2, 128], strides = [1, 1]} : vector<2x512xf32> to vector<2x128xf32>
    %57 = arith.negf %56 : vector<2x128xf32>
    %58 = math.exp %57 : vector<2x128xf32>
    %cst_27 = arith.constant 1.000000e+00 : f32
    %59 = vector.broadcast %cst_27 : f32 to vector<2x128xf32>
    %60 = arith.addf %59, %58 : vector<2x128xf32>
    %61 = arith.divf %59, %60 : vector<2x128xf32>
    %62 = arith.mulf %53, %55 : vector<2x128xf32>
    %63 = math.tanh %62 : vector<2x128xf32>
    %64 = arith.mulf %61, %63 : vector<2x128xf32>
    %c0_28 = arith.constant 0 : index
    %c0_29 = arith.constant 0 : index
    %65 = vector.load %arg13[%c0_28, %c0_29] : memref<128x128xf32, #tpu.memory_space<vmem>>, vector<128x128xf32>
    %cst_30 = arith.constant dense<0.000000e+00> : vector<2x128xf32>
    %66 = tpu.matmul %64, %65, %cst_30 {dimension_numbers = #tpu.dot_dimension_numbers<[1], [0], [0], [1], [0, 0, 1, 1], [], []>} : vector<2x128xf32>, vector<128x128xf32>, vector<2x128xf32> -> vector<2x128xf32>
    %c0_31 = arith.constant 0 : index
    %c0_32 = arith.constant 0 : index
    %67 = vector.load %arg14[%c0_31, %c0_32] : memref<1x128xf32, #tpu.memory_space<vmem>>, vector<1x128xf32>
    %68 = vector.broadcast %67 : vector<1x128xf32> to vector<2x128xf32>
    %69 = arith.addf %66, %68 : vector<2x128xf32>
    %c0_33 = arith.constant 0 : index
    %c0_34 = arith.constant 0 : index
    %70 = vector.load %arg8[%c0_33, %c0_34] : memref<128x512xf32, #tpu.memory_space<vmem>>, vector<128x512xf32>
    %cst_35 = arith.constant 0.000000e+00 : f32
    %71 = vector.broadcast %cst_35 : f32 to vector<2x128xf32>
    %cst_36 = arith.constant 0.000000e+00 : f32
    %72 = vector.broadcast %cst_36 : f32 to vector<2x128xf32>
    %73 = vector.extract_strided_slice %40 {offsets = [0, 0, 0], sizes = [1, 2, 512], strides = [1, 1, 1]} : vector<10x2x512xf32> to vector<1x2x512xf32>
    %74 = vector.shape_cast %73 : vector<1x2x512xf32> to vector<2x512xf32>
    %cst_37 = arith.constant dense<0.000000e+00> : vector<2x512xf32>
    %75 = tpu.matmul %71, %70, %cst_37 {dimension_numbers = #tpu.dot_dimension_numbers<[1], [0], [0], [1], [0, 0, 1, 1], [], []>} : vector<2x128xf32>, vector<128x512xf32>, vector<2x512xf32> -> vector<2x512xf32>
    %76 = arith.addf %74, %75 : vector<2x512xf32>
    %77 = vector.extract_strided_slice %76 {offsets = [0, 0], sizes = [2, 128], strides = [1, 1]} : vector<2x512xf32> to vector<2x128xf32>
    %78 = arith.negf %77 : vector<2x128xf32>
    %79 = math.exp %78 : vector<2x128xf32>
    %cst_38 = arith.constant 1.000000e+00 : f32
    %80 = vector.broadcast %cst_38 : f32 to vector<2x128xf32>
    %81 = arith.addf %80, %79 : vector<2x128xf32>
    %82 = arith.divf %80, %81 : vector<2x128xf32>
    %83 = vector.extract_strided_slice %76 {offsets = [0, 128], sizes = [2, 128], strides = [1, 1]} : vector<2x512xf32> to vector<2x128xf32>
    %84 = arith.negf %83 : vector<2x128xf32>
    %85 = math.exp %84 : vector<2x128xf32>
    %cst_39 = arith.constant 1.000000e+00 : f32
    %86 = vector.broadcast %cst_39 : f32 to vector<2x128xf32>
    %87 = arith.addf %86, %85 : vector<2x128xf32>
    %88 = arith.divf %86, %87 : vector<2x128xf32>
    %89 = vector.extract_strided_slice %76 {offsets = [0, 256], sizes = [2, 128], strides = [1, 1]} : vector<2x512xf32> to vector<2x128xf32>
    %90 = math.tanh %89 : vector<2x128xf32>
    %91 = vector.extract_strided_slice %76 {offsets = [0, 384], sizes = [2, 128], strides = [1, 1]} : vector<2x512xf32> to vector<2x128xf32>
    %92 = arith.negf %91 : vector<2x128xf32>
    %93 = math.exp %92 : vector<2x128xf32>
    %cst_40 = arith.constant 1.000000e+00 : f32
    %94 = vector.broadcast %cst_40 : f32 to vector<2x128xf32>
    %95 = arith.addf %94, %93 : vector<2x128xf32>
    %96 = arith.divf %94, %95 : vector<2x128xf32>
    %97 = arith.mulf %88, %72 : vector<2x128xf32>
    %98 = arith.mulf %82, %90 : vector<2x128xf32>
    %99 = arith.addf %97, %98 : vector<2x128xf32>
    %100 = math.tanh %99 : vector<2x128xf32>
    %101 = arith.mulf %96, %100 : vector<2x128xf32>
    %102 = vector.extract_strided_slice %40 {offsets = [1, 0, 0], sizes = [1, 2, 512], strides = [1, 1, 1]} : vector<10x2x512xf32> to vector<1x2x512xf32>
    %103 = vector.shape_cast %102 : vector<1x2x512xf32> to vector<2x512xf32>
    %cst_41 = arith.constant dense<0.000000e+00> : vector<2x512xf32>
    %104 = tpu.matmul %101, %70, %cst_41 {dimension_numbers = #tpu.dot_dimension_numbers<[1], [0], [0], [1], [0, 0, 1, 1], [], []>} : vector<2x128xf32>, vector<128x512xf32>, vector<2x512xf32> -> vector<2x512xf32>
    %105 = arith.addf %103, %104 : vector<2x512xf32>
    %106 = vector.extract_strided_slice %105 {offsets = [0, 0], sizes = [2, 128], strides = [1, 1]} : vector<2x512xf32> to vector<2x128xf32>
    %107 = arith.negf %106 : vector<2x128xf32>
    %108 = math.exp %107 : vector<2x128xf32>
    %cst_42 = arith.constant 1.000000e+00 : f32
    %109 = vector.broadcast %cst_42 : f32 to vector<2x128xf32>
    %110 = arith.addf %109, %108 : vector<2x128xf32>
    %111 = arith.divf %109, %110 : vector<2x128xf32>
    %112 = vector.extract_strided_slice %105 {offsets = [0, 128], sizes = [2, 128], strides = [1, 1]} : vector<2x512xf32> to vector<2x128xf32>
    %113 = arith.negf %112 : vector<2x128xf32>
    %114 = math.exp %113 : vector<2x128xf32>
    %cst_43 = arith.constant 1.000000e+00 : f32
    %115 = vector.broadcast %cst_43 : f32 to vector<2x128xf32>
    %116 = arith.addf %115, %114 : vector<2x128xf32>
    %117 = arith.divf %115, %116 : vector<2x128xf32>
    %118 = vector.extract_strided_slice %105 {offsets = [0, 256], sizes = [2, 128], strides = [1, 1]} : vector<2x512xf32> to vector<2x128xf32>
    %119 = math.tanh %118 : vector<2x128xf32>
    %120 = vector.extract_strided_slice %105 {offsets = [0, 384], sizes = [2, 128], strides = [1, 1]} : vector<2x512xf32> to vector<2x128xf32>
    %121 = arith.negf %120 : vector<2x128xf32>
    %122 = math.exp %121 : vector<2x128xf32>
    %cst_44 = arith.constant 1.000000e+00 : f32
    %123 = vector.broadcast %cst_44 : f32 to vector<2x128xf32>
    %124 = arith.addf %123, %122 : vector<2x128xf32>
    %125 = arith.divf %123, %124 : vector<2x128xf32>
    %126 = arith.mulf %117, %99 : vector<2x128xf32>
    %127 = arith.mulf %111, %119 : vector<2x128xf32>
    %128 = arith.addf %126, %127 : vector<2x128xf32>
    %129 = math.tanh %128 : vector<2x128xf32>
    %130 = arith.mulf %125, %129 : vector<2x128xf32>
    %131 = vector.extract_strided_slice %40 {offsets = [2, 0, 0], sizes = [1, 2, 512], strides = [1, 1, 1]} : vector<10x2x512xf32> to vector<1x2x512xf32>
    %132 = vector.shape_cast %131 : vector<1x2x512xf32> to vector<2x512xf32>
    %cst_45 = arith.constant dense<0.000000e+00> : vector<2x512xf32>
    %133 = tpu.matmul %130, %70, %cst_45 {dimension_numbers = #tpu.dot_dimension_numbers<[1], [0], [0], [1], [0, 0, 1, 1], [], []>} : vector<2x128xf32>, vector<128x512xf32>, vector<2x512xf32> -> vector<2x512xf32>
    %134 = arith.addf %132, %133 : vector<2x512xf32>
    %135 = vector.extract_strided_slice %134 {offsets = [0, 0], sizes = [2, 128], strides = [1, 1]} : vector<2x512xf32> to vector<2x128xf32>
    %136 = arith.negf %135 : vector<2x128xf32>
    %137 = math.exp %136 : vector<2x128xf32>
    %cst_46 = arith.constant 1.000000e+00 : f32
    %138 = vector.broadcast %cst_46 : f32 to vector<2x128xf32>
    %139 = arith.addf %138, %137 : vector<2x128xf32>
    %140 = arith.divf %138, %139 : vector<2x128xf32>
    %141 = vector.extract_strided_slice %134 {offsets = [0, 128], sizes = [2, 128], strides = [1, 1]} : vector<2x512xf32> to vector<2x128xf32>
    %142 = arith.negf %141 : vector<2x128xf32>
    %143 = math.exp %142 : vector<2x128xf32>
    %cst_47 = arith.constant 1.000000e+00 : f32
    %144 = vector.broadcast %cst_47 : f32 to vector<2x128xf32>
    %145 = arith.addf %144, %143 : vector<2x128xf32>
    %146 = arith.divf %144, %145 : vector<2x128xf32>
    %147 = vector.extract_strided_slice %134 {offsets = [0, 256], sizes = [2, 128], strides = [1, 1]} : vector<2x512xf32> to vector<2x128xf32>
    %148 = math.tanh %147 : vector<2x128xf32>
    %149 = vector.extract_strided_slice %134 {offsets = [0, 384], sizes = [2, 128], strides = [1, 1]} : vector<2x512xf32> to vector<2x128xf32>
    %150 = arith.negf %149 : vector<2x128xf32>
    %151 = math.exp %150 : vector<2x128xf32>
    %cst_48 = arith.constant 1.000000e+00 : f32
    %152 = vector.broadcast %cst_48 : f32 to vector<2x128xf32>
    %153 = arith.addf %152, %151 : vector<2x128xf32>
    %154 = arith.divf %152, %153 : vector<2x128xf32>
    %155 = arith.mulf %146, %128 : vector<2x128xf32>
    %156 = arith.mulf %140, %148 : vector<2x128xf32>
    %157 = arith.addf %155, %156 : vector<2x128xf32>
    %158 = math.tanh %157 : vector<2x128xf32>
    %159 = arith.mulf %154, %158 : vector<2x128xf32>
    %160 = vector.extract_strided_slice %40 {offsets = [3, 0, 0], sizes = [1, 2, 512], strides = [1, 1, 1]} : vector<10x2x512xf32> to vector<1x2x512xf32>
    %161 = vector.shape_cast %160 : vector<1x2x512xf32> to vector<2x512xf32>
    %cst_49 = arith.constant dense<0.000000e+00> : vector<2x512xf32>
    %162 = tpu.matmul %159, %70, %cst_49 {dimension_numbers = #tpu.dot_dimension_numbers<[1], [0], [0], [1], [0, 0, 1, 1], [], []>} : vector<2x128xf32>, vector<128x512xf32>, vector<2x512xf32> -> vector<2x512xf32>
    %163 = arith.addf %161, %162 : vector<2x512xf32>
    %164 = vector.extract_strided_slice %163 {offsets = [0, 0], sizes = [2, 128], strides = [1, 1]} : vector<2x512xf32> to vector<2x128xf32>
    %165 = arith.negf %164 : vector<2x128xf32>
    %166 = math.exp %165 : vector<2x128xf32>
    %cst_50 = arith.constant 1.000000e+00 : f32
    %167 = vector.broadcast %cst_50 : f32 to vector<2x128xf32>
    %168 = arith.addf %167, %166 : vector<2x128xf32>
    %169 = arith.divf %167, %168 : vector<2x128xf32>
    %170 = vector.extract_strided_slice %163 {offsets = [0, 128], sizes = [2, 128], strides = [1, 1]} : vector<2x512xf32> to vector<2x128xf32>
    %171 = arith.negf %170 : vector<2x128xf32>
    %172 = math.exp %171 : vector<2x128xf32>
    %cst_51 = arith.constant 1.000000e+00 : f32
    %173 = vector.broadcast %cst_51 : f32 to vector<2x128xf32>
    %174 = arith.addf %173, %172 : vector<2x128xf32>
    %175 = arith.divf %173, %174 : vector<2x128xf32>
    %176 = vector.extract_strided_slice %163 {offsets = [0, 256], sizes = [2, 128], strides = [1, 1]} : vector<2x512xf32> to vector<2x128xf32>
    %177 = math.tanh %176 : vector<2x128xf32>
    %178 = vector.extract_strided_slice %163 {offsets = [0, 384], sizes = [2, 128], strides = [1, 1]} : vector<2x512xf32> to vector<2x128xf32>
    %179 = arith.negf %178 : vector<2x128xf32>
    %180 = math.exp %179 : vector<2x128xf32>
    %cst_52 = arith.constant 1.000000e+00 : f32
    %181 = vector.broadcast %cst_52 : f32 to vector<2x128xf32>
    %182 = arith.addf %181, %180 : vector<2x128xf32>
    %183 = arith.divf %181, %182 : vector<2x128xf32>
    %184 = arith.mulf %175, %157 : vector<2x128xf32>
    %185 = arith.mulf %169, %177 : vector<2x128xf32>
    %186 = arith.addf %184, %185 : vector<2x128xf32>
    %187 = math.tanh %186 : vector<2x128xf32>
    %188 = arith.mulf %183, %187 : vector<2x128xf32>
    %189 = vector.extract_strided_slice %40 {offsets = [4, 0, 0], sizes = [1, 2, 512], strides = [1, 1, 1]} : vector<10x2x512xf32> to vector<1x2x512xf32>
    %190 = vector.shape_cast %189 : vector<1x2x512xf32> to vector<2x512xf32>
    %cst_53 = arith.constant dense<0.000000e+00> : vector<2x512xf32>
    %191 = tpu.matmul %188, %70, %cst_53 {dimension_numbers = #tpu.dot_dimension_numbers<[1], [0], [0], [1], [0, 0, 1, 1], [], []>} : vector<2x128xf32>, vector<128x512xf32>, vector<2x512xf32> -> vector<2x512xf32>
    %192 = arith.addf %190, %191 : vector<2x512xf32>
    %193 = vector.extract_strided_slice %192 {offsets = [0, 0], sizes = [2, 128], strides = [1, 1]} : vector<2x512xf32> to vector<2x128xf32>
    %194 = arith.negf %193 : vector<2x128xf32>
    %195 = math.exp %194 : vector<2x128xf32>
    %cst_54 = arith.constant 1.000000e+00 : f32
    %196 = vector.broadcast %cst_54 : f32 to vector<2x128xf32>
    %197 = arith.addf %196, %195 : vector<2x128xf32>
    %198 = arith.divf %196, %197 : vector<2x128xf32>
    %199 = vector.extract_strided_slice %192 {offsets = [0, 128], sizes = [2, 128], strides = [1, 1]} : vector<2x512xf32> to vector<2x128xf32>
    %200 = arith.negf %199 : vector<2x128xf32>
    %201 = math.exp %200 : vector<2x128xf32>
    %cst_55 = arith.constant 1.000000e+00 : f32
    %202 = vector.broadcast %cst_55 : f32 to vector<2x128xf32>
    %203 = arith.addf %202, %201 : vector<2x128xf32>
    %204 = arith.divf %202, %203 : vector<2x128xf32>
    %205 = vector.extract_strided_slice %192 {offsets = [0, 256], sizes = [2, 128], strides = [1, 1]} : vector<2x512xf32> to vector<2x128xf32>
    %206 = math.tanh %205 : vector<2x128xf32>
    %207 = vector.extract_strided_slice %192 {offsets = [0, 384], sizes = [2, 128], strides = [1, 1]} : vector<2x512xf32> to vector<2x128xf32>
    %208 = arith.negf %207 : vector<2x128xf32>
    %209 = math.exp %208 : vector<2x128xf32>
    %cst_56 = arith.constant 1.000000e+00 : f32
    %210 = vector.broadcast %cst_56 : f32 to vector<2x128xf32>
    %211 = arith.addf %210, %209 : vector<2x128xf32>
    %212 = arith.divf %210, %211 : vector<2x128xf32>
    %213 = arith.mulf %204, %186 : vector<2x128xf32>
    %214 = arith.mulf %198, %206 : vector<2x128xf32>
    %215 = arith.addf %213, %214 : vector<2x128xf32>
    %216 = math.tanh %215 : vector<2x128xf32>
    %217 = arith.mulf %212, %216 : vector<2x128xf32>
    %218 = vector.extract_strided_slice %40 {offsets = [5, 0, 0], sizes = [1, 2, 512], strides = [1, 1, 1]} : vector<10x2x512xf32> to vector<1x2x512xf32>
    %219 = vector.shape_cast %218 : vector<1x2x512xf32> to vector<2x512xf32>
    %cst_57 = arith.constant dense<0.000000e+00> : vector<2x512xf32>
    %220 = tpu.matmul %217, %70, %cst_57 {dimension_numbers = #tpu.dot_dimension_numbers<[1], [0], [0], [1], [0, 0, 1, 1], [], []>} : vector<2x128xf32>, vector<128x512xf32>, vector<2x512xf32> -> vector<2x512xf32>
    %221 = arith.addf %219, %220 : vector<2x512xf32>
    %222 = vector.extract_strided_slice %221 {offsets = [0, 0], sizes = [2, 128], strides = [1, 1]} : vector<2x512xf32> to vector<2x128xf32>
    %223 = arith.negf %222 : vector<2x128xf32>
    %224 = math.exp %223 : vector<2x128xf32>
    %cst_58 = arith.constant 1.000000e+00 : f32
    %225 = vector.broadcast %cst_58 : f32 to vector<2x128xf32>
    %226 = arith.addf %225, %224 : vector<2x128xf32>
    %227 = arith.divf %225, %226 : vector<2x128xf32>
    %228 = vector.extract_strided_slice %221 {offsets = [0, 128], sizes = [2, 128], strides = [1, 1]} : vector<2x512xf32> to vector<2x128xf32>
    %229 = arith.negf %228 : vector<2x128xf32>
    %230 = math.exp %229 : vector<2x128xf32>
    %cst_59 = arith.constant 1.000000e+00 : f32
    %231 = vector.broadcast %cst_59 : f32 to vector<2x128xf32>
    %232 = arith.addf %231, %230 : vector<2x128xf32>
    %233 = arith.divf %231, %232 : vector<2x128xf32>
    %234 = vector.extract_strided_slice %221 {offsets = [0, 256], sizes = [2, 128], strides = [1, 1]} : vector<2x512xf32> to vector<2x128xf32>
    %235 = math.tanh %234 : vector<2x128xf32>
    %236 = vector.extract_strided_slice %221 {offsets = [0, 384], sizes = [2, 128], strides = [1, 1]} : vector<2x512xf32> to vector<2x128xf32>
    %237 = arith.negf %236 : vector<2x128xf32>
    %238 = math.exp %237 : vector<2x128xf32>
    %cst_60 = arith.constant 1.000000e+00 : f32
    %239 = vector.broadcast %cst_60 : f32 to vector<2x128xf32>
    %240 = arith.addf %239, %238 : vector<2x128xf32>
    %241 = arith.divf %239, %240 : vector<2x128xf32>
    %242 = arith.mulf %233, %215 : vector<2x128xf32>
    %243 = arith.mulf %227, %235 : vector<2x128xf32>
    %244 = arith.addf %242, %243 : vector<2x128xf32>
    %245 = math.tanh %244 : vector<2x128xf32>
    %246 = arith.mulf %241, %245 : vector<2x128xf32>
    %247 = vector.extract_strided_slice %40 {offsets = [6, 0, 0], sizes = [1, 2, 512], strides = [1, 1, 1]} : vector<10x2x512xf32> to vector<1x2x512xf32>
    %248 = vector.shape_cast %247 : vector<1x2x512xf32> to vector<2x512xf32>
    %cst_61 = arith.constant dense<0.000000e+00> : vector<2x512xf32>
    %249 = tpu.matmul %246, %70, %cst_61 {dimension_numbers = #tpu.dot_dimension_numbers<[1], [0], [0], [1], [0, 0, 1, 1], [], []>} : vector<2x128xf32>, vector<128x512xf32>, vector<2x512xf32> -> vector<2x512xf32>
    %250 = arith.addf %248, %249 : vector<2x512xf32>
    %251 = vector.extract_strided_slice %250 {offsets = [0, 0], sizes = [2, 128], strides = [1, 1]} : vector<2x512xf32> to vector<2x128xf32>
    %252 = arith.negf %251 : vector<2x128xf32>
    %253 = math.exp %252 : vector<2x128xf32>
    %cst_62 = arith.constant 1.000000e+00 : f32
    %254 = vector.broadcast %cst_62 : f32 to vector<2x128xf32>
    %255 = arith.addf %254, %253 : vector<2x128xf32>
    %256 = arith.divf %254, %255 : vector<2x128xf32>
    %257 = vector.extract_strided_slice %250 {offsets = [0, 128], sizes = [2, 128], strides = [1, 1]} : vector<2x512xf32> to vector<2x128xf32>
    %258 = arith.negf %257 : vector<2x128xf32>
    %259 = math.exp %258 : vector<2x128xf32>
    %cst_63 = arith.constant 1.000000e+00 : f32
    %260 = vector.broadcast %cst_63 : f32 to vector<2x128xf32>
    %261 = arith.addf %260, %259 : vector<2x128xf32>
    %262 = arith.divf %260, %261 : vector<2x128xf32>
    %263 = vector.extract_strided_slice %250 {offsets = [0, 256], sizes = [2, 128], strides = [1, 1]} : vector<2x512xf32> to vector<2x128xf32>
    %264 = math.tanh %263 : vector<2x128xf32>
    %265 = vector.extract_strided_slice %250 {offsets = [0, 384], sizes = [2, 128], strides = [1, 1]} : vector<2x512xf32> to vector<2x128xf32>
    %266 = arith.negf %265 : vector<2x128xf32>
    %267 = math.exp %266 : vector<2x128xf32>
    %cst_64 = arith.constant 1.000000e+00 : f32
    %268 = vector.broadcast %cst_64 : f32 to vector<2x128xf32>
    %269 = arith.addf %268, %267 : vector<2x128xf32>
    %270 = arith.divf %268, %269 : vector<2x128xf32>
    %271 = arith.mulf %262, %244 : vector<2x128xf32>
    %272 = arith.mulf %256, %264 : vector<2x128xf32>
    %273 = arith.addf %271, %272 : vector<2x128xf32>
    %274 = math.tanh %273 : vector<2x128xf32>
    %275 = arith.mulf %270, %274 : vector<2x128xf32>
    %276 = vector.extract_strided_slice %40 {offsets = [7, 0, 0], sizes = [1, 2, 512], strides = [1, 1, 1]} : vector<10x2x512xf32> to vector<1x2x512xf32>
    %277 = vector.shape_cast %276 : vector<1x2x512xf32> to vector<2x512xf32>
    %cst_65 = arith.constant dense<0.000000e+00> : vector<2x512xf32>
    %278 = tpu.matmul %275, %70, %cst_65 {dimension_numbers = #tpu.dot_dimension_numbers<[1], [0], [0], [1], [0, 0, 1, 1], [], []>} : vector<2x128xf32>, vector<128x512xf32>, vector<2x512xf32> -> vector<2x512xf32>
    %279 = arith.addf %277, %278 : vector<2x512xf32>
    %280 = vector.extract_strided_slice %279 {offsets = [0, 0], sizes = [2, 128], strides = [1, 1]} : vector<2x512xf32> to vector<2x128xf32>
    %281 = arith.negf %280 : vector<2x128xf32>
    %282 = math.exp %281 : vector<2x128xf32>
    %cst_66 = arith.constant 1.000000e+00 : f32
    %283 = vector.broadcast %cst_66 : f32 to vector<2x128xf32>
    %284 = arith.addf %283, %282 : vector<2x128xf32>
    %285 = arith.divf %283, %284 : vector<2x128xf32>
    %286 = vector.extract_strided_slice %279 {offsets = [0, 128], sizes = [2, 128], strides = [1, 1]} : vector<2x512xf32> to vector<2x128xf32>
    %287 = arith.negf %286 : vector<2x128xf32>
    %288 = math.exp %287 : vector<2x128xf32>
    %cst_67 = arith.constant 1.000000e+00 : f32
    %289 = vector.broadcast %cst_67 : f32 to vector<2x128xf32>
    %290 = arith.addf %289, %288 : vector<2x128xf32>
    %291 = arith.divf %289, %290 : vector<2x128xf32>
    %292 = vector.extract_strided_slice %279 {offsets = [0, 256], sizes = [2, 128], strides = [1, 1]} : vector<2x512xf32> to vector<2x128xf32>
    %293 = math.tanh %292 : vector<2x128xf32>
    %294 = vector.extract_strided_slice %279 {offsets = [0, 384], sizes = [2, 128], strides = [1, 1]} : vector<2x512xf32> to vector<2x128xf32>
    %295 = arith.negf %294 : vector<2x128xf32>
    %296 = math.exp %295 : vector<2x128xf32>
    %cst_68 = arith.constant 1.000000e+00 : f32
    %297 = vector.broadcast %cst_68 : f32 to vector<2x128xf32>
    %298 = arith.addf %297, %296 : vector<2x128xf32>
    %299 = arith.divf %297, %298 : vector<2x128xf32>
    %300 = arith.mulf %291, %273 : vector<2x128xf32>
    %301 = arith.mulf %285, %293 : vector<2x128xf32>
    %302 = arith.addf %300, %301 : vector<2x128xf32>
    %303 = math.tanh %302 : vector<2x128xf32>
    %304 = arith.mulf %299, %303 : vector<2x128xf32>
    %305 = vector.extract_strided_slice %40 {offsets = [8, 0, 0], sizes = [1, 2, 512], strides = [1, 1, 1]} : vector<10x2x512xf32> to vector<1x2x512xf32>
    %306 = vector.shape_cast %305 : vector<1x2x512xf32> to vector<2x512xf32>
    %cst_69 = arith.constant dense<0.000000e+00> : vector<2x512xf32>
    %307 = tpu.matmul %304, %70, %cst_69 {dimension_numbers = #tpu.dot_dimension_numbers<[1], [0], [0], [1], [0, 0, 1, 1], [], []>} : vector<2x128xf32>, vector<128x512xf32>, vector<2x512xf32> -> vector<2x512xf32>
    %308 = arith.addf %306, %307 : vector<2x512xf32>
    %309 = vector.extract_strided_slice %308 {offsets = [0, 0], sizes = [2, 128], strides = [1, 1]} : vector<2x512xf32> to vector<2x128xf32>
    %310 = arith.negf %309 : vector<2x128xf32>
    %311 = math.exp %310 : vector<2x128xf32>
    %cst_70 = arith.constant 1.000000e+00 : f32
    %312 = vector.broadcast %cst_70 : f32 to vector<2x128xf32>
    %313 = arith.addf %312, %311 : vector<2x128xf32>
    %314 = arith.divf %312, %313 : vector<2x128xf32>
    %315 = vector.extract_strided_slice %308 {offsets = [0, 128], sizes = [2, 128], strides = [1, 1]} : vector<2x512xf32> to vector<2x128xf32>
    %316 = arith.negf %315 : vector<2x128xf32>
    %317 = math.exp %316 : vector<2x128xf32>
    %cst_71 = arith.constant 1.000000e+00 : f32
    %318 = vector.broadcast %cst_71 : f32 to vector<2x128xf32>
    %319 = arith.addf %318, %317 : vector<2x128xf32>
    %320 = arith.divf %318, %319 : vector<2x128xf32>
    %321 = vector.extract_strided_slice %308 {offsets = [0, 256], sizes = [2, 128], strides = [1, 1]} : vector<2x512xf32> to vector<2x128xf32>
    %322 = math.tanh %321 : vector<2x128xf32>
    %323 = vector.extract_strided_slice %308 {offsets = [0, 384], sizes = [2, 128], strides = [1, 1]} : vector<2x512xf32> to vector<2x128xf32>
    %324 = arith.negf %323 : vector<2x128xf32>
    %325 = math.exp %324 : vector<2x128xf32>
    %cst_72 = arith.constant 1.000000e+00 : f32
    %326 = vector.broadcast %cst_72 : f32 to vector<2x128xf32>
    %327 = arith.addf %326, %325 : vector<2x128xf32>
    %328 = arith.divf %326, %327 : vector<2x128xf32>
    %329 = arith.mulf %320, %302 : vector<2x128xf32>
    %330 = arith.mulf %314, %322 : vector<2x128xf32>
    %331 = arith.addf %329, %330 : vector<2x128xf32>
    %332 = math.tanh %331 : vector<2x128xf32>
    %333 = arith.mulf %328, %332 : vector<2x128xf32>
    %334 = vector.extract_strided_slice %40 {offsets = [9, 0, 0], sizes = [1, 2, 512], strides = [1, 1, 1]} : vector<10x2x512xf32> to vector<1x2x512xf32>
    %335 = vector.shape_cast %334 : vector<1x2x512xf32> to vector<2x512xf32>
    %cst_73 = arith.constant dense<0.000000e+00> : vector<2x512xf32>
    %336 = tpu.matmul %333, %70, %cst_73 {dimension_numbers = #tpu.dot_dimension_numbers<[1], [0], [0], [1], [0, 0, 1, 1], [], []>} : vector<2x128xf32>, vector<128x512xf32>, vector<2x512xf32> -> vector<2x512xf32>
    %337 = arith.addf %335, %336 : vector<2x512xf32>
    %338 = vector.extract_strided_slice %337 {offsets = [0, 0], sizes = [2, 128], strides = [1, 1]} : vector<2x512xf32> to vector<2x128xf32>
    %339 = arith.negf %338 : vector<2x128xf32>
    %340 = math.exp %339 : vector<2x128xf32>
    %cst_74 = arith.constant 1.000000e+00 : f32
    %341 = vector.broadcast %cst_74 : f32 to vector<2x128xf32>
    %342 = arith.addf %341, %340 : vector<2x128xf32>
    %343 = arith.divf %341, %342 : vector<2x128xf32>
    %344 = vector.extract_strided_slice %337 {offsets = [0, 128], sizes = [2, 128], strides = [1, 1]} : vector<2x512xf32> to vector<2x128xf32>
    %345 = arith.negf %344 : vector<2x128xf32>
    %346 = math.exp %345 : vector<2x128xf32>
    %cst_75 = arith.constant 1.000000e+00 : f32
    %347 = vector.broadcast %cst_75 : f32 to vector<2x128xf32>
    %348 = arith.addf %347, %346 : vector<2x128xf32>
    %349 = arith.divf %347, %348 : vector<2x128xf32>
    %350 = vector.extract_strided_slice %337 {offsets = [0, 256], sizes = [2, 128], strides = [1, 1]} : vector<2x512xf32> to vector<2x128xf32>
    %351 = math.tanh %350 : vector<2x128xf32>
    %352 = vector.extract_strided_slice %337 {offsets = [0, 384], sizes = [2, 128], strides = [1, 1]} : vector<2x512xf32> to vector<2x128xf32>
    %353 = arith.negf %352 : vector<2x128xf32>
    %354 = math.exp %353 : vector<2x128xf32>
    %cst_76 = arith.constant 1.000000e+00 : f32
    %355 = vector.broadcast %cst_76 : f32 to vector<2x128xf32>
    %356 = arith.addf %355, %354 : vector<2x128xf32>
    %357 = arith.divf %355, %356 : vector<2x128xf32>
    %358 = arith.mulf %349, %331 : vector<2x128xf32>
    %359 = arith.mulf %343, %351 : vector<2x128xf32>
    %360 = arith.addf %358, %359 : vector<2x128xf32>
    %361 = math.tanh %360 : vector<2x128xf32>
    %362 = arith.mulf %357, %361 : vector<2x128xf32>
    %c0_77 = arith.constant 0 : index
    %c0_78 = arith.constant 0 : index
    %363 = vector.load %arg12[%c0_77, %c0_78] : memref<128x128xf32, #tpu.memory_space<vmem>>, vector<128x128xf32>
    %cst_79 = arith.constant dense<0.000000e+00> : vector<2x128xf32>
    %364 = tpu.matmul %362, %363, %cst_79 {dimension_numbers = #tpu.dot_dimension_numbers<[1], [0], [0], [1], [0, 0, 1, 1], [], []>} : vector<2x128xf32>, vector<128x128xf32>, vector<2x128xf32> -> vector<2x128xf32>
    %365 = arith.addf %69, %364 : vector<2x128xf32>
    %c0_80 = arith.constant 0 : index
    %c0_81 = arith.constant 0 : index
    %366 = vector.load %arg15[%c0_80, %c0_81] : memref<2x128xf32, #tpu.memory_space<vmem>>, vector<2x128xf32>
    tpu.vector_store %arg15[%c0_80, %c0_81], %365 {strides = array<i32>} : memref<2x128xf32, #tpu.memory_space<vmem>>, vector<2x128xf32>,
    return
  }
}

</mosaic_0001>

<bundles_post_ra>
// kernel: tpu_custom_call.1
= control target key start
LH: loop header
LB: loop body
LE: loop exit
PB: predicated region body
PF: predicated region fallthrough
CT: control target
= control target key end

     0   :  { %s6512_s0 = inlined_call_operand.vmem [shape: f32[16,2,4], index: 0, kind: input, shape index: {}]   ;;  %s6513_s1 = inlined_call_operand.vmem [shape: f32[12,128], index: 1, kind: input, shape index: {}]   ;;  %s6514_s2 = inlined_call_operand.vmem [shape: f32[1,128], index: 2, kind: input, shape index: {}]   ;;  %s6515_s3 = inlined_call_operand.hbm [shape: f32[384,256], index: 3, kind: input, shape index: {}]   ;;  %s6516_s4 = inlined_call_operand.vmem [shape: f32[1,256], index: 4, kind: input, shape index: {}]   ;;  %s6517_s5 = inlined_call_operand.hbm [shape: f32[768,256], index: 5, kind: input, shape index: {}]   ;;  %s6518_s6 = inlined_call_operand.vmem [shape: f32[1,256], index: 6, kind: input, shape index: {}]   ;;  %s6519_s7 = inlined_call_operand.hbm [shape: f32[256,512], index: 7, kind: input, shape index: {}]   ;;  %s6520_s8 = inlined_call_operand.hbm [shape: f32[128,512], index: 8, kind: input, shape index: {}]   ;;  %s6521_s9 = inlined_call_operand.vmem [shape: f32[1,512], index: 9, kind: input, shape index: {}]   ;;  %s6522_s10 = inlined_call_operand.hbm [shape: f32[256,512], index: 10, kind: input, shape index: {}]   ;;  %s6523_s11 = inlined_call_operand.vmem [shape: f32[1,512], index: 11, kind: input, shape index: {}]   ;;  %s6524_s12 = inlined_call_operand.hbm [shape: f32[128,128], index: 12, kind: input, shape index: {}]   ;;  %s6525_s13 = inlined_call_operand.hbm [shape: f32[128,128], index: 13, kind: input, shape index: {}]   ;;  %s6526_s14 = inlined_call_operand.vmem [shape: f32[1,128], index: 14, kind: input, shape index: {}]   ;;  %s6527_s15 = inlined_call_operand.hbm [shape: f32[2,128], index: 15, kind: output, shape index: {}]  }
   0x1   :  { %6646 = sst [smem:[#allocation58_spill]] %s6527_s15 }
   0x2   :  { %20 = vsyncpa [#allocation3], 0 }
   0x3   :  { %21 = vsyncpa [#allocation6], 0 }
   0x4   :  { %22 = vsyncpa [#allocation9], 0 }
   0x5   :  { %23 = vsyncpa [#allocation12], 0 }
   0x6   :  { %24 = vsyncpa [#allocation4], 0  ;;  %s50_s20 = sshll.u32 %s6517_s5, 4  ;;  %s4556_s21 = smov [#allocation5]   ;;  %s51_s20 = int_to_ptr.hbm [resolvable:$true] %s50_s20 }
   0x7   :  { %s52_s22 = sshll.u32 %s4556_s21, 4  ;;  %s4557_s23 = smov 256   ;;  %s53_s22 = int_to_ptr.vmem [resolvable:$true] %s52_s22 }
   0x8   :  { %s4558_s24 = smov 16   ;;  %s78_s27 = sshll.u32 %s6520_s8, 4  ;;  %s79_s27 = int_to_ptr.hbm [resolvable:$true] %s78_s27 }
   0x9   :  { %58 = dma.hbm_to_vmem [thread:$0]  %s51_s20, 24576, %s53_s22, [#allocation6], %s4557_s23, %s4557_s23, %s4558_s24  }
   0xa   :  { %s4559_s28 = smov [#allocation8]   ;;  %s108_s17 = sshll.u32 %s6524_s12, 4  ;;  %s109_s17 = int_to_ptr.hbm [resolvable:$true] %s108_s17 }
   0xb   :  { %s80_s29 = sshll.u32 %s4559_s28, 4  ;;  %s4560_s5 = smov 512   ;;  %s81_s29 = int_to_ptr.vmem [resolvable:$true] %s80_s29 }
   0xc   :  { %s4561_s18 = smov 32   ;;  %s4562_s19 = smov [#allocation11]  }
   0xd   :  { %86 = dma.hbm_to_vmem [thread:$0]  %s79_s27, 8192, %s81_s29, [#allocation9], %s4560_s5, %s4560_s5, %s4561_s18  }
   0xe   :  { %s110_s20 = sshll.u32 %s4562_s19, 4  ;;  %s35_s22 = sshll.u32 %s6515_s3, 4  ;;  %s111_s20 = int_to_ptr.vmem [resolvable:$true] %s110_s20  ;;  %s36_s22 = int_to_ptr.hbm [resolvable:$true] %s35_s22 }
   0xf   :  { %s4563_s25 = smov 128   ;;  %s4564_s26 = smov 8  }
  0x10   :  { %116 = dma.hbm_to_vmem [thread:$0]  %s109_s17, 2048, %s111_s20, [#allocation12], %s4563_s25, %s4563_s25, %s4564_s26  }
  0x11   :  { %s4565_s12 = smov [#allocation2]   ;;  %s65_s15 = sshll.u32 %s6519_s7, 4  ;;  %s66_s15 = int_to_ptr.hbm [resolvable:$true] %s65_s15 }
  0x12   :  { %s37_s28 = sshll.u32 %s4565_s12, 4  ;;  %s93_s19 = sshll.u32 %s6522_s10, 4  ;;  %s38_s28 = int_to_ptr.vmem [resolvable:$true] %s37_s28  ;;  %s94_s19 = int_to_ptr.hbm [resolvable:$true] %s93_s19 }
  0x13   :  { %43 = dma.hbm_to_vmem [thread:$0]  %s36_s22, 12288, %s38_s28, [#allocation3], %s4557_s23, %s4557_s23, %s4558_s24  }
  0x14   :  { %s4566_s21 = smov [#allocation7]   ;;  %s4567_s17 = smov [#allocation10]  }
  0x15   :  { %s67_s3 = sshll.u32 %s4566_s21, 4  ;;  %s95_s20 = sshll.u32 %s4567_s17, 4  ;;  %s68_s3 = int_to_ptr.vmem [resolvable:$true] %s67_s3  ;;  %s96_s20 = int_to_ptr.vmem [resolvable:$true] %s95_s20 }
  0x16   :  { %73 = dma.hbm_to_vmem [thread:$0]  %s66_s15, 16384, %s68_s3, [#allocation6], %s4560_s5, %s4560_s5, %s4561_s18  }
  0x17   :  { %s121_s7 = sshll.u32 %s6525_s13, 4  ;;  %s4568_s10 = smov [#allocation13]   ;;  %s122_s7 = int_to_ptr.hbm [resolvable:$true] %s121_s7 }
  0x18   :  { %101 = dma.hbm_to_vmem [thread:$0]  %s94_s19, 16384, %s96_s20, [#allocation9], %s4560_s5, %s4560_s5, %s4561_s18  }
  0x19   :  { %s123_s23 = sshll.u32 %s4568_s10, 4  ;;  %s124_s23 = int_to_ptr.vmem [resolvable:$true] %s123_s23 }
  0x1a   :  { %129 = dma.hbm_to_vmem [thread:$0]  %s122_s7, 2048, %s124_s23, [#allocation12], %s4563_s25, %s4563_s25, %s4564_s26  }
  0x1b   :  { %4546 = dma.done.wait [#allocation3], 12288  }
  0x1c   :  { %4547 = vsyncadd [#allocation3], 4294955008 }
  0x1d   :  { %4548 = dma.done.wait [#allocation6], 40960  }
  0x1e   :  { %4549 = vsyncadd [#allocation6], 4294926336 }
  0x1f   :  { %4550 = dma.done.wait [#allocation9], 24576  }
  0x20   :  { %4551 = vsyncadd [#allocation9], 4294942720 }
  0x21   :  { %4552 = dma.done.wait [#allocation12], 4096  }
  0x22   :  { %4553 = vsyncadd [#allocation12], 4294963200  ;;  %v4687_v0 = vld [vmem:[%s6512_s0 + $0x6] sm:$0x3]  ;;  %v4692_v1 = vld [vmem:[%s6512_s0 + $0x2] sm:$0x3] }
  0x23   :  { %s4569_s18 = smov 4   ;;  %v4701_v2 = vld [vmem:[%s6512_s0 + $0x4] sm:$0x3]  ;;  %v4708_v3 = vld [vmem:[%s6512_s0 + $0x8] sm:$0x3]  ;;  %vm359_vm0 = vcmask 1043456  }
  0x24   :  { %197 = vrot.lane.b32.xlu1 %v4687_v0, %s4569_s18  ;;  %193 = vrot.lane.b32.xlu0 %v4692_v1, %s4569_s18  ;;  %v4719_v4 = vld [vmem:[%s6512_s0 + $0xa] sm:$0x3]  ;;  %v4730_v5 = vld [vmem:[%s6512_s0 + $0xe] sm:$0x3]  ;;  %vm278_vm1 = vcmask 31744   ;;  %vm293_vm2 = vcmask 64512  }
  0x25   :  { %236 = vrot.lane.b32.xlu2 %v4701_v2, %s4564_s26  ;;  %v4735_v6 = vld [vmem:[%s6512_s0 + $0xc] sm:$0x3]  ;;  %v4740_v7 = vld [vmem:[%s6512_s0 + $0x10] sm:$0x3]  ;;  %v4757_v8 = vld [vmem:[%s6512_s0 + $0x12] sm:$0x3] }
  0x26   :  { %v4762_v9 = vld [vmem:[%s6512_s0 + $0x14] sm:$0x3]  ;;  %v4773_v10 = vld [vmem:[%s6512_s0 + $0x18] sm:$0x3]  ;;  %v4778_v11 = vld [vmem:[%s6512_s0 + $0x16] sm:$0x3] }
  0x27   :  { %v4793_v12 = vld [vmem:[%s6512_s0 + $0x1a] sm:$0x3]  ;;  %v174_v13 = vld [vmem:[%s6512_s0 + $0x1c] sm:$0x3]  ;;  %v175_v14 = vld [vmem:[%s6512_s0 + $0x1e] sm:$0x3] }
  0x28   :  { %v177_v17 = vld [vmem:[%s6513_s1 + $0x8] sm:$0xf]  ;;  %v176_v18 = vld [vmem:[%s6513_s1] sm:$0xff]  ;;  %vm350_vm3 = vcmask 97280   ;;  %vm523_vm4 = vcmask 1041408   ;;  %vm756_vm5 = vcmask 1043458  }
  0x29   :  { %3998 = vmatpush.msk.msra.mxu0 %vm359_vm0, %v177_v17  ;;  %v160_v20 = vld [vmem:[%s6512_s0] sm:$0x3]  ;;  %v468_v17 = vld [vmem:[#allocation2 + $0x1f0] sm:$0xff]  ;;  %vm759_vm6 = vcmask 1045508   ;;  %vm762_vm7 = vcmask 1045504   ;;  %vm1902_vm8 = vcmask 1045506  }
  0x2a   :  { %616 = vmatpush.msra.mxu2 %v468_v17  ;;  %s4571_s7 = smov [#allocation14]   ;;  %s6829_s15 = sld [smem:[#allocation58_spill]] }
  0x2b   :  { %378 = vmatpush.msra.mxu0 %v176_v18  ;;  %v437_v18 = vld [vmem:[#allocation2 + $0xf8] sm:$0xff]  ;;  %s3983_s10 = sshll.u32 %s4571_s7, 4  ;;  %s3984_s10 = int_to_ptr.vmem [resolvable:$true] %s3983_s10 }
  0x2c   :  { %199 = vrot.lane.b32.xlu1 %v4708_v3, %s4569_s18  ;;  %195 = vrot.lane.b32.xlu0 %v4701_v2, %s4569_s18 }
  0x2d   :  { %238 = vrot.lane.b32.xlu2 %v4687_v0, %s4564_s26  ;;  %668 = vmatpush.msrb.mxu0 %v437_v18  ;;  %v440_v18 = vld [vmem:[#allocation2 + $0x110] sm:$0xff] }
  0x30   :  { %s3985_s24 = sshll.u32 %s6829_s15, 4  ;;  %s3986_s24 = int_to_ptr.hbm [resolvable:$true] %s3985_s24 }
  0x34   :  { %242 = vrot.lane.b32.xlu1 %v4719_v4, %s4564_s26  ;;  %240 = vrot.lane.b32.xlu0 %v4708_v3, %s4564_s26 }
  0x35   :  { %201 = vrot.lane.b32.xlu2 %v4719_v4, %s4569_s18 }
  0x3c   :  { %205 = vrot.lane.b32.xlu1 %v4730_v5, %s4569_s18  ;;  %203 = vrot.lane.b32.xlu0 %v4735_v6, %s4569_s18 }
  0x3d   :  { %207 = vrot.lane.b32.xlu2 %v4740_v7, %s4569_s18 }
  0x44   :  { %246 = vrot.lane.b32.xlu1 %v4730_v5, %s4564_s26  ;;  %244 = vrot.lane.b32.xlu0 %v4735_v6, %s4564_s26 }
  0x45   :  { %248 = vrot.lane.b32.xlu2 %v4740_v7, %s4564_s26 }
  0x4c   :  { %209 = vrot.lane.b32.xlu1 %v4757_v8, %s4569_s18  ;;  %250 = vrot.lane.b32.xlu0 %v4757_v8, %s4564_s26 }
  0x4d   :  { %211 = vrot.lane.b32.xlu2 %v4762_v9, %s4569_s18 }
  0x54   :  { %215 = vrot.lane.b32.xlu1 %v4773_v10, %s4569_s18  ;;  %213 = vrot.lane.b32.xlu0 %v4778_v11, %s4569_s18 }
  0x55   :  { %252 = vrot.lane.b32.xlu2 %v4762_v9, %s4564_s26 }
  0x5c   :  { %256 = vrot.lane.b32.xlu1 %v4773_v10, %s4564_s26  ;;  %254 = vrot.lane.b32.xlu0 %v4778_v11, %s4564_s26 }
  0x5d   :  { %258 = vrot.lane.b32.xlu2 %v4793_v12, %s4564_s26 }
  0x64   :  { %217 = vrot.lane.b32.xlu0 %v4793_v12, %s4569_s18  ;;  %219 = vrot.lane.b32.xlu1 %v174_v13, %s4569_s18 }
  0x65   :  { %260 = vrot.lane.b32.xlu2 %v174_v13, %s4564_s26 }
  0x6c   :  { %262 = vrot.lane.b32.xlu0 %v175_v14, %s4564_s26 }
  0x7f   :  { %v237_v15 = vpop.permute.xlu2 %236 }
  0x87   :  { %v239_v16 = vpop.permute.xlu2 %238 }
  0x8f   :  { %v202_v19 = vpop.permute.xlu2 %201 }
  0x90   :  { %v283_v43 = vsel %vm278_vm1, %v4708_v3, %v202_v19  ;;  %v434_v19 = vld [vmem:[#allocation2 + $0xe0] sm:$0xff] }
  0x96   :  { %v198_v21 = vpop.permute.xlu1 %197  ;;  %v194_v22 = vpop.permute.xlu0 %193 }
  0x97   :  { %v279_v23 = vsel %vm278_vm1, %v160_v20, %v194_v22  ;;  %v208_v25 = vpop.permute.xlu2 %207  ;;  %v281_v31 = vsel %vm278_vm1, %v4701_v2, %v198_v21  ;;  %v466_v20 = vld [vmem:[#allocation2 + $0x1e0] sm:$0xff]  ;;  %v435_v22 = vld [vmem:[#allocation2 + $0xe8] sm:$0xff] }
  0x98   :  { %v294_v24 = vsel %vm293_vm2, %v279_v23, %v237_v15  ;;  %v286_v50 = vsel %vm278_vm1, %v4730_v5, %v208_v25  ;;  %v498_v21 = vld [vmem:[#allocation2 + $0x2e0] sm:$0xff]  ;;  %617 = vmatpush.msra.mxu2 %v466_v20  ;;  %v464_v23 = vld [vmem:[#allocation2 + $0x1d0] sm:$0xff]  ;;  %v433_v25 = vld [vmem:[#allocation2 + $0xd8] sm:$0xff]  ;;  %669 = vmatpush.msrb.mxu0 %v435_v22 }
  0x99   :  { %325 = vst [vmem:[#allocation1] ss:$4 sm:$0xff] %v294_v24  ;;  %v496_v24 = vld [vmem:[#allocation2 + $0x2d0] sm:$0xff]  ;;  %v409_v20 = vld [vmem:[#allocation2 + $0x18] sm:$0xff] }
  0x9a   :  { %618 = vmatpush.msra.mxu2 %v464_v23  ;;  %670 = vmatpush.msrb.mxu0 %v433_v25  ;;  %v438_v23 = vld [vmem:[#allocation2 + $0x100] sm:$0xff] }
  0x9e   :  { %v200_v26 = vpop.permute.xlu1 %199  ;;  %v196_v27 = vpop.permute.xlu0 %195 }
  0x9f   :  { %v280_v28 = vsel %vm278_vm1, %v4692_v1, %v196_v27  ;;  %v282_v30 = vsel %vm278_vm1, %v4687_v0, %v200_v26  ;;  %v249_v36 = vpop.permute.xlu2 %248  ;;  %v430_v26 = vld [vmem:[#allocation2 + $0xc0] sm:$0xff] }
  0xa0   :  { %v295_v29 = vsel %vm293_vm2, %v280_v28, %v239_v16  ;;  %v436_v16 = vld [vmem:[#allocation2 + $0xf0] sm:$0xff]  ;;  %v462_v27 = vld [vmem:[#allocation2 + $0x1c0] sm:$0xff] }
  0xa1   :  { %327 = vst [vmem:[#allocation1 + $0x1] ss:$4 sm:$0xff] %v295_v29  ;;  %590 = vmatpush.msra.mxu1 %v436_v16  ;;  %v494_v28 = vld [vmem:[#allocation2 + $0x2c0] sm:$0xff]  ;;  %v431_v29 = vld [vmem:[#allocation2 + $0xc8] sm:$0xff]  ;;  %619 = vmatpush.msra.mxu2 %v462_v27 }
  0xa2   :  { %671 = vmatpush.msrb.mxu0 %v431_v29  ;;  %v407_v27 = vld [vmem:[#allocation2 + $0x8] sm:$0xff]  ;;  %v501_v29 = vld [vmem:[#allocation2 + $0x2f8] sm:$0xff] }
  0xa3   :  { %591 = vmatpush.msra.mxu1 %v434_v19  ;;  %v472_v19 = vld [vmem:[#allocation2 + $0x210] sm:$0xff] }
  0xa6   :  { %v243_v32 = vpop.permute.xlu1 %242  ;;  %v241_v33 = vpop.permute.xlu0 %240 }
  0xa7   :  { %v297_v34 = vsel %vm293_vm2, %v282_v30, %v243_v32  ;;  %v296_v35 = vsel %vm293_vm2, %v281_v31, %v241_v33  ;;  %v212_v42 = vpop.permute.xlu2 %211  ;;  %v428_v30 = vld [vmem:[#allocation2 + $0xb0] sm:$0xff]  ;;  %v429_v33 = vld [vmem:[#allocation2 + $0xb8] sm:$0xff] }
  0xa8   :  { %331 = vst [vmem:[#allocation1 + $0x3] ss:$4 sm:$0xff] %v297_v34  ;;  %v288_v62 = vsel %vm278_vm1, %v4757_v8, %v212_v42  ;;  %v460_v31 = vld [vmem:[#allocation2 + $0x1b0] sm:$0xff]  ;;  %v426_v34 = vld [vmem:[#allocation2 + $0xa0] sm:$0xff]  ;;  %672 = vmatpush.msrb.mxu0 %v429_v33  ;;  %v497_v33 = vld [vmem:[#allocation2 + $0x2d8] sm:$0xff] }
  0xa9   :  { %329 = vst [vmem:[#allocation1 + $0x2] ss:$4 sm:$0xff] %v296_v35  ;;  %v492_v32 = vld [vmem:[#allocation2 + $0x2b0] sm:$0xff]  ;;  %v458_v35 = vld [vmem:[#allocation2 + $0x1a0] sm:$0xff]  ;;  %620 = vmatpush.msra.mxu2 %v460_v31  ;;  %v499_v31 = vld [vmem:[#allocation2 + $0x2e8] sm:$0xff] }
  0xaa   :  { %v422_v42 = vld [vmem:[#allocation2 + $0x80] sm:$0xff] }
  0xab   :  { %621 = vmatpush.msra.mxu2 %v458_v35  ;;  %v495_v35 = vld [vmem:[#allocation2 + $0x2c8] sm:$0xff] }
  0xae   :  { %v206_v37 = vpop.permute.xlu1 %205  ;;  %v204_v38 = vpop.permute.xlu0 %203 }
  0xaf   :  { %v285_v39 = vsel %vm278_vm1, %v4735_v6, %v206_v37  ;;  %v284_v44 = vsel %vm278_vm1, %v4719_v4, %v204_v38  ;;  %v253_v49 = vpop.permute.xlu2 %252  ;;  %v427_v37 = vld [vmem:[#allocation2 + $0xa8] sm:$0xff]  ;;  %v424_v38 = vld [vmem:[#allocation2 + $0x90] sm:$0xff] }
  0xb0   :  { %v340_v40 = vld.sshfl [vmem:[#allocation1] sm:$0xff pattern:$0x73625140]  ;;  %v300_v41 = vsel %vm293_vm2, %v285_v39, %v249_v36  ;;  %v490_v36 = vld [vmem:[#allocation2 + $0x2a0] sm:$0xff]  ;;  %v456_v39 = vld [vmem:[#allocation2 + $0x190] sm:$0xff]  ;;  %673 = vmatpush.msrb.mxu0 %v427_v37 }
  0xb1   :  { %3999 = vmatmul.msk.f32.vlgmr.msra.gmra.mxu0 %vm350_vm3, %v340_v40  ;;  %337 = vst [vmem:[#allocation1 + $0x22] ss:$4 sm:$0xff] %v300_v41  ;;  %v488_v40 = vld [vmem:[#allocation2 + $0x290] sm:$0xff]  ;;  %v425_v41 = vld [vmem:[#allocation2 + $0x98] sm:$0xff]  ;;  %622 = vmatpush.msra.mxu2 %v456_v39 }
  0xb2   :  { %674 = vmatpush.msrb.mxu0 %v425_v41  ;;  %v461_v39 = vld [vmem:[#allocation2 + $0x1b8] sm:$0xff] }
  0xb6   :  { %v247_v45 = vpop.permute.xlu1 %246  ;;  %v245_v46 = vpop.permute.xlu0 %244 }
  0xb7   :  { %v299_v47 = vsel %vm293_vm2, %v284_v44, %v247_v45  ;;  %v298_v48 = vsel %vm293_vm2, %v283_v43, %v245_v46  ;;  %v259_v56 = vpop.permute.xlu2 %258  ;;  %v454_v43 = vld [vmem:[#allocation2 + $0x180] sm:$0xff]  ;;  %v423_v45 = vld [vmem:[#allocation2 + $0x88] sm:$0xff]  ;;  %v420_v46 = vld [vmem:[#allocation2 + $0x70] sm:$0xff] }
  0xb8   :  { %335 = vst [vmem:[#allocation1 + $0x21] ss:$4 sm:$0xff] %v299_v47  ;;  %v486_v44 = vld [vmem:[#allocation2 + $0x280] sm:$0xff]  ;;  %623 = vmatpush.msra.mxu2 %v454_v43  ;;  %675 = vmatpush.msrb.mxu0 %v423_v45  ;;  %v452_v47 = vld [vmem:[#allocation2 + $0x170] sm:$0xff]  ;;  %v491_v45 = vld [vmem:[#allocation2 + $0x2a8] sm:$0xff] }
  0xb9   :  { %333 = vst [vmem:[#allocation1 + $0x20] ss:$4 sm:$0xff] %v298_v48  ;;  %v484_v48 = vld [vmem:[#allocation2 + $0x270] sm:$0xff] }
  0xba   :  { %624 = vmatpush.msra.mxu2 %v452_v47 }
  0xbe   :  { %v210_v51 = vpop.permute.xlu1 %209  ;;  %v251_v52 = vpop.permute.xlu0 %250 }
  0xbf   :  { %v287_v53 = vsel %vm278_vm1, %v4740_v7, %v210_v51  ;;  %v301_v54 = vsel %vm293_vm2, %v286_v50, %v251_v52  ;;  %v261_v4 = vpop.permute.xlu2 %260  ;;  %v418_v50 = vld [vmem:[#allocation2 + $0x60] sm:$0xff] }
  0xc0   :  { %339 = vst [vmem:[#allocation1 + $0x23] ss:$4 sm:$0xff] %v301_v54  ;;  %v302_v55 = vsel %vm293_vm2, %v287_v53, %v253_v49  ;;  %v421_v49 = vld [vmem:[#allocation2 + $0x78] sm:$0xff]  ;;  %v450_v51 = vld [vmem:[#allocation2 + $0x160] sm:$0xff]  ;;  %v419_v54 = vld [vmem:[#allocation2 + $0x68] sm:$0xff] }
  0xc1   :  { %342 = vst [vmem:[#allocation1] ss:$4 sm:$0xff] %v302_v55  ;;  %676 = vmatpush.msrb.mxu0 %v421_v49  ;;  %v482_v52 = vld [vmem:[#allocation2 + $0x260] sm:$0xff]  ;;  %v4866_v53 = vld [vmem:[%s6514_s2] ss:$0 sm:$0xff]  ;;  %625 = vmatpush.msra.mxu2 %v450_v51  ;;  %v416_v55 = vld [vmem:[#allocation2 + $0x50] sm:$0xff] }
  0xc2   :  { %v457_v51 = vld [vmem:[#allocation2 + $0x198] sm:$0xff] }
  0xc3   :  { %677 = vmatpush.msrb.mxu0 %v419_v54 }
  0xc6   :  { %v216_v57 = vpop.permute.xlu1 %215  ;;  %v214_v58 = vpop.permute.xlu0 %213 }
  0xc7   :  { %v341_v59 = vld.sshfl [vmem:[#allocation1 + $0x20] sm:$0xff pattern:$0x73625140]  ;;  %v290_v60 = vsel %vm278_vm1, %v4778_v11, %v216_v57  ;;  %v289_v63 = vsel %vm278_vm1, %v4762_v9, %v214_v58  ;;  %v480_v57 = vld [vmem:[#allocation2 + $0x250] sm:$0xff] }
  0xc8   :  { %4000 = vmatmul.msk.f32.gmra.mxu0 %vm350_vm3, %v341_v59  ;;  %v305_v61 = vsel %vm293_vm2, %v290_v60, %v259_v56  ;;  %v448_v56 = vld [vmem:[#allocation2 + $0x150] sm:$0xff]  ;;  %v417_v58 = vld [vmem:[#allocation2 + $0x58] sm:$0xff]  ;;  %v414_v59 = vld [vmem:[#allocation2 + $0x40] sm:$0xff] }
  0xc9   :  { %345 = vst [vmem:[#allocation1 + $0x3] ss:$4 sm:$0xff] %v305_v61  ;;  %626 = vmatpush.msra.mxu2 %v448_v56  ;;  %678 = vmatpush.msrb.mxu0 %v417_v58  ;;  %v446_v60 = vld [vmem:[#allocation2 + $0x140] sm:$0xff] }
  0xca   :  { %v478_v61 = vld [vmem:[#allocation2 + $0x240] sm:$0xff] }
  0xcb   :  { %627 = vmatpush.msra.mxu2 %v446_v60  ;;  %v455_v60 = vld [vmem:[#allocation2 + $0x188] sm:$0xff] }
  0xce   :  { %v257_v0 = vpop.permute.xlu1 %256  ;;  %v255_v1 = vpop.permute.xlu0 %254 }
  0xcf   :  { %v304_v2 = vsel %vm293_vm2, %v289_v63, %v257_v0  ;;  %v303_v3 = vsel %vm293_vm2, %v288_v62, %v255_v1  ;;  %v415_v63 = vld [vmem:[#allocation2 + $0x48] sm:$0xff]  ;;  %v412_v1 = vld [vmem:[#allocation2 + $0x30] sm:$0xff] }
  0xd0   :  { %344 = vst [vmem:[#allocation1 + $0x2] ss:$4 sm:$0xff] %v304_v2  ;;  %679 = vmatpush.msrb.mxu0 %v415_v63  ;;  %v444_v2 = vld [vmem:[#allocation2 + $0x130] sm:$0xff] }
  0xd1   :  { %343 = vst [vmem:[#allocation1 + $0x1] ss:$4 sm:$0xff] %v303_v3  ;;  %v476_v3 = vld [vmem:[#allocation2 + $0x230] sm:$0xff]  ;;  %628 = vmatpush.msra.mxu2 %v444_v2  ;;  %v451_v2 = vld [vmem:[#allocation2 + $0x168] sm:$0xff] }
  0xd6   :  { %v218_v5 = vpop.permute.xlu0 %217  ;;  %v220_v8 = vpop.permute.xlu1 %219 }
  0xd7   :  { %v291_v6 = vsel %vm278_vm1, %v4773_v10, %v218_v5  ;;  %v292_v9 = vsel %vm278_vm1, %v4793_v12, %v220_v8  ;;  %v500_v10 = vld [vmem:[#allocation2 + $0x2f0] sm:$0xff]  ;;  %v442_v8 = vld [vmem:[#allocation2 + $0x120] sm:$0xff] }
  0xd8   :  { %v348_v7 = vld.sshfl [vmem:[#allocation1] sm:$0xff pattern:$0x73625140]  ;;  %v306_v11 = vsel %vm293_vm2, %v291_v6, %v261_v4  ;;  %642 = vmatpush.msra.mxu3 %v500_v10  ;;  %v432_v12 = vld [vmem:[#allocation2 + $0xd0] sm:$0xff]  ;;  %629 = vmatpush.msra.mxu2 %v442_v8  ;;  %v447_v8 = vld [vmem:[#allocation2 + $0x148] sm:$0xff] }
  0xd9   :  { %346 = vst [vmem:[#allocation1 + $0x20] ss:$4 sm:$0xff] %v306_v11  ;;  %4001 = vmatmul.msk.f32.gmra.mxu0 %vm350_vm3, %v348_v7  ;;  %592 = vmatpush.msra.mxu1 %v432_v12  ;;  %v413_v4 = vld [vmem:[#allocation2 + $0x38] sm:$0xff]  ;;  %v410_v11 = vld [vmem:[#allocation2 + $0x20] sm:$0xff]  ;;  %v408_v10 = vld [vmem:[#allocation2 + $0x10] sm:$0xff] }
  0xda   :  { %643 = vmatpush.msra.mxu3 %v498_v21  ;;  %680 = vmatpush.msrb.mxu0 %v413_v4  ;;  %v406_v12 = vld [vmem:[#allocation2] sm:$0xff]  ;;  %v449_v4 = vld [vmem:[#allocation2 + $0x158] sm:$0xff] }
  0xdb   :  { %593 = vmatpush.msra.mxu1 %v430_v26  ;;  %630 = vmatpush.msra.mxu2 %v440_v18  ;;  %v475_v18 = vld [vmem:[#allocation2 + $0x228] sm:$0xff] }
  0xdc   :  { %644 = vmatpush.msra.mxu3 %v496_v24  ;;  %v470_v24 = vld [vmem:[#allocation2 + $0x200] sm:$0xff] }
  0xdd   :  { %594 = vmatpush.msra.mxu1 %v428_v30  ;;  %631 = vmatpush.msra.mxu2 %v438_v23  ;;  %v467_v30 = vld [vmem:[#allocation2 + $0x1e8] sm:$0xff]  ;;  %v473_v23 = vld [vmem:[#allocation2 + $0x218] sm:$0xff] }
  0xde   :  { %v263_v13 = vpop.permute.xlu0 %262  ;;  %645 = vmatpush.msra.mxu3 %v494_v28  ;;  %v469_v28 = vld [vmem:[#allocation2 + $0x1f8] sm:$0xff] }
  0xdf   :  { %v307_v14 = vsel %vm293_vm2, %v292_v9, %v263_v13  ;;  %595 = vmatpush.msra.mxu1 %v426_v34  ;;  %v474_v9 = vld [vmem:[#allocation2 + $0x220] sm:$0xff]  ;;  %v411_v13 = vld [vmem:[#allocation2 + $0x28] sm:$0xff]  ;;  %720 = vmatpush.msrb.mxu2 %v501_v29 }
  0xe0   :  { %347 = vst [vmem:[#allocation1 + $0x21] ss:$4 sm:$0xff] %v307_v14  ;;  %646 = vmatpush.msra.mxu3 %v492_v32  ;;  %681 = vmatpush.msrb.mxu0 %v411_v13  ;;  %v465_v32 = vld [vmem:[#allocation2 + $0x1d8] sm:$0xff]  ;;  %v463_v34 = vld [vmem:[#allocation2 + $0x1c8] sm:$0xff] }
  0xe1   :  { %596 = vmatpush.msra.mxu1 %v424_v38  ;;  %721 = vmatpush.msrb.mxu2 %v499_v31  ;;  %v439_v31 = vld [vmem:[#allocation2 + $0x108] sm:$0xff] }
  0xe2   :  { %647 = vmatpush.msra.mxu3 %v490_v36  ;;  %682 = vmatpush.msrb.mxu0 %v409_v20 }
  0xe3   :  { %597 = vmatpush.msra.mxu1 %v422_v42  ;;  %722 = vmatpush.msrb.mxu2 %v497_v33 }
  0xe4   :  { %648 = vmatpush.msra.mxu3 %v488_v40  ;;  %683 = vmatpush.msrb.mxu0 %v407_v27  ;;  %v493_v40 = vld [vmem:[#allocation2 + $0x2b8] sm:$0xff] }
  0xe5   :  { %598 = vmatpush.msra.mxu1 %v420_v46  ;;  %723 = vmatpush.msrb.mxu2 %v495_v35 }
  0xe6   :  { %649 = vmatpush.msra.mxu3 %v486_v44  ;;  %v459_v44 = vld [vmem:[#allocation2 + $0x1a8] sm:$0xff] }
  0xe7   :  { %v349_v15 = vld.sshfl [vmem:[#allocation1 + $0x20] sm:$0xff pattern:$0x73625140]  ;;  %599 = vmatpush.msra.mxu1 %v418_v50  ;;  %724 = vmatpush.msrb.mxu2 %v493_v40 }
  0xe8   :  { %4002 = vmatmul.msk.f32.gmra.mxu0 %vm350_vm3, %v349_v15  ;;  %650 = vmatpush.msra.mxu3 %v484_v48 }
  0xe9   :  { %600 = vmatpush.msra.mxu1 %v416_v55  ;;  %725 = vmatpush.msrb.mxu2 %v491_v45 }
  0xea   :  { %651 = vmatpush.msra.mxu3 %v482_v52  ;;  %v489_v52 = vld [vmem:[#allocation2 + $0x298] sm:$0xff] }
  0xeb   :  { %601 = vmatpush.msra.mxu1 %v414_v59  ;;  %726 = vmatpush.msrb.mxu2 %v489_v52 }
  0xec   :  { %652 = vmatpush.msra.mxu3 %v480_v57 }
  0xed   :  { %602 = vmatpush.msra.mxu1 %v412_v1  ;;  %v485_v1 = vld [vmem:[#allocation2 + $0x278] sm:$0xff] }
  0xee   :  { %653 = vmatpush.msra.mxu3 %v478_v61  ;;  %v487_v61 = vld [vmem:[#allocation2 + $0x288] sm:$0xff] }
  0xef   :  { %603 = vmatpush.msra.mxu1 %v410_v11  ;;  %727 = vmatpush.msrb.mxu2 %v487_v61 }
  0xf0   :  { %654 = vmatpush.msra.mxu3 %v476_v3  ;;  %v483_v3 = vld [vmem:[#allocation2 + $0x268] sm:$0xff] }
  0xf1   :  { %604 = vmatpush.msra.mxu1 %v408_v10  ;;  %728 = vmatpush.msrb.mxu2 %v485_v1  ;;  %v443_v10 = vld [vmem:[#allocation2 + $0x128] sm:$0xff] }
  0xf2   :  { %655 = vmatpush.msra.mxu3 %v474_v9  ;;  %v479_v9 = vld [vmem:[#allocation2 + $0x248] sm:$0xff] }
  0xf3   :  { %605 = vmatpush.msra.mxu1 %v406_v12  ;;  %729 = vmatpush.msrb.mxu2 %v483_v3  ;;  %v441_v12 = vld [vmem:[#allocation2 + $0x118] sm:$0xff] }
  0xf4   :  { %656 = vmatpush.msra.mxu3 %v472_v19 }
  0xf5   :  { %694 = vmatpush.msrb.mxu1 %v469_v28 }
  0xf6   :  { %657 = vmatpush.msra.mxu3 %v470_v24 }
  0xf7   :  { %695 = vmatpush.msrb.mxu1 %v467_v30 }
  0xf9   :  { %696 = vmatpush.msrb.mxu1 %v465_v32  ;;  %v471_v32 = vld [vmem:[#allocation2 + $0x208] sm:$0xff] }
  0xfb   :  { %697 = vmatpush.msrb.mxu1 %v463_v34 }
  0xfd   :  { %698 = vmatpush.msrb.mxu1 %v461_v39 }
  0xff   :  { %699 = vmatpush.msrb.mxu1 %v459_v44 }
 0x101   :  { %700 = vmatpush.msrb.mxu1 %v457_v51 }
 0x103   :  { %701 = vmatpush.msrb.mxu1 %v455_v60 }
 0x12e   :  { %v380_v62 = vpop.f32.mrf.mxu0 }
 0x12f   :  { %v381_v0 = vadd.f32 %v4866_v53, %v380_v62 }
 0x131   :  { %v396_v5 = vrot.slane %v381_v0, 2  ;;  %v4869_v6 = vrot.slane %v381_v0, 4  ;;  %v4871_v7 = vrot.slane %v381_v0, 6 }
 0x133   :  { %v503_v14 = vrot.slane %v396_v5, 6  ;;  %v504_v15 = vrot.slane %v4869_v6, 4  ;;  %v505_v16 = vrot.slane %v4869_v6, 6  ;;  %v506_v17 = vrot.slane %v4871_v7, 4 }
 0x134   :  { %v507_v36 = vrot.slane %v4871_v7, 6 }
 0x135   :  { %v524_v21 = vsel %vm523_vm4, %v381_v0, %v503_v14  ;;  %v526_v22 = vsel %vm523_vm4, %v396_v5, %v505_v16  ;;  %v453_v0 = vld [vmem:[#allocation2 + $0x178] sm:$0xff] }
 0x136   :  { %v525_v25 = vsel %vm359_vm0, %v524_v21, %v504_v15  ;;  %v527_v26 = vsel %vm359_vm0, %v526_v22, %v506_v17  ;;  %v528_v46 = vsel %vm523_vm4, %v4869_v6, %v507_v36  ;;  %702 = vmatpush.msrb.mxu1 %v453_v0  ;;  %v481_v5 = vld [vmem:[#allocation2 + $0x258] sm:$0xff] }
 0x137   :  { %553 = vst [vmem:[#allocation1] ss:$4 sm:$0xff] %v525_v25  ;;  %730 = vmatpush.msrb.mxu2 %v481_v5  ;;  %v445_v15 = vld [vmem:[#allocation2 + $0x138] sm:$0xff] }
 0x138   :  { %555 = vst [vmem:[#allocation1 + $0x1] ss:$4 sm:$0xff] %v527_v26  ;;  %703 = vmatpush.msrb.mxu1 %v451_v2  ;;  %v477_v16 = vld [vmem:[#allocation2 + $0x238] sm:$0xff] }
 0x139   :  { %731 = vmatpush.msrb.mxu2 %v479_v9 }
 0x13a   :  { %704 = vmatpush.msrb.mxu1 %v449_v4 }
 0x13b   :  { %732 = vmatpush.msrb.mxu2 %v477_v16 }
 0x13c   :  { %705 = vmatpush.msrb.mxu1 %v447_v8 }
 0x13d   :  { %733 = vmatpush.msrb.mxu2 %v475_v18 }
 0x13e   :  { %706 = vmatpush.msrb.mxu1 %v445_v15 }
 0x13f   :  { %734 = vmatpush.msrb.mxu2 %v473_v23 }
 0x140   :  { %707 = vmatpush.msrb.mxu1 %v443_v10 }
 0x141   :  { %735 = vmatpush.msrb.mxu2 %v471_v32 }
 0x142   :  { %708 = vmatpush.msrb.mxu1 %v441_v12 }
 0x144   :  { %709 = vmatpush.msrb.mxu1 %v439_v31 }
 0x145   :  { %v383_v37 = vpop.f32.mrf.mxu0 }
 0x146   :  { %v384_v38 = vadd.f32 %v4866_v53, %v383_v37 }
 0x148   :  { %v399_v41 = vrot.slane %v384_v38, 2  ;;  %v4882_v42 = vrot.slane %v384_v38, 4  ;;  %v4884_v43 = vrot.slane %v384_v38, 6 }
 0x14a   :  { %v508_v47 = vrot.slane %v399_v41, 4  ;;  %v509_v48 = vrot.slane %v399_v41, 6  ;;  %v510_v49 = vrot.slane %v4882_v42, 4  ;;  %v511_v50 = vrot.slane %v4882_v42, 6 }
 0x14b   :  { %v512_v54 = vrot.slane %v4884_v43, 4  ;;  %v529_v55 = vsel %vm359_vm0, %v528_v46, %v4882_v42  ;;  %v530_v56 = vsel %vm523_vm4, %v4871_v7, %v4884_v43  ;;  %v513_v13 = vrot.slane %v4884_v43, 6 }
 0x14c   :  { %v531_v57 = vsel %vm359_vm0, %v530_v56, %v508_v47  ;;  %v532_v58 = vsel %vm523_vm4, %v384_v38, %v509_v48  ;;  %v534_v59 = vsel %vm523_vm4, %v399_v41, %v511_v50  ;;  %557 = vst [vmem:[#allocation1 + $0x2] ss:$4 sm:$0xff] %v529_v55 }
 0x14d   :  { %v533_v62 = vsel %vm359_vm0, %v532_v58, %v510_v49  ;;  %v535_v63 = vsel %vm359_vm0, %v534_v59, %v512_v54  ;;  %559 = vst [vmem:[#allocation1 + $0x3] ss:$4 sm:$0xff] %v531_v57  ;;  %v536_v22 = vsel %vm523_vm4, %v4882_v42, %v513_v13  ;;  %v502_v58 = vld [vmem:[%s6516_s4] sm:$0x3] }
 0x14e   :  { %561 = vst [vmem:[#allocation1 + $0x20] ss:$4 sm:$0xff] %v533_v62  ;;  %v549_v60 = vperm.slane %v502_v58, 0  ;;  %v550_v61 = vperm.slane %v502_v58, 1 }
 0x14f   :  { %563 = vst [vmem:[#allocation1 + $0x21] ss:$4 sm:$0xff] %v535_v63 }
 0x154   :  { %v568_v6 = vld.sshfl [vmem:[#allocation1] sm:$0xff pattern:$0x73625140]  ;;  %v4901_v7 = vld.sshfl [vmem:[#allocation1 + $0x8] sm:$0xff pattern:$0x73625140] }
 0x155   :  { %v4903_v11 = vld.sshfl [vmem:[#allocation1 + $0x10] sm:$0xff pattern:$0x73625140]  ;;  %606 = vmatmul.f32.vlgmr.msra.gmra.mxu1 %v568_v6  ;;  %632 = vmatmul.f32.vlgmr.msra.gmra.mxu2 %v4901_v7 }
 0x156   :  { %v386_v14 = vpop.f32.mrf.mxu0  ;;  %658 = vmatmul.f32.vlgmr.msra.gmra.mxu3 %v4903_v11  ;;  %684 = vmatmul.f32.vlgmr.msrb.gmra.mxu0 %v568_v6 }
 0x157   :  { %v387_v17 = vadd.f32 %v4866_v53, %v386_v14 }
 0x159   :  { %v402_v19 = vrot.slane %v387_v17, 2  ;;  %v403_v20 = vrot.slane %v387_v17, 4  ;;  %v404_v21 = vrot.slane %v387_v17, 6 }
 0x15b   :  { %v514_v24 = vrot.slane %v402_v19, 4  ;;  %v515_v25 = vrot.slane %v402_v19, 6  ;;  %v516_v26 = vrot.slane %v403_v20, 4  ;;  %v517_v27 = vrot.slane %v403_v20, 6 }
 0x15c   :  { %v518_v28 = vrot.slane %v404_v21, 4  ;;  %v537_v29 = vsel %vm359_vm0, %v536_v22, %v403_v20  ;;  %v538_v30 = vsel %vm523_vm4, %v4884_v43, %v404_v21  ;;  %v519_v38 = vrot.slane %v404_v21, 6 }
 0x15d   :  { %v539_v33 = vsel %vm359_vm0, %v538_v30, %v514_v24  ;;  %v540_v34 = vsel %vm523_vm4, %v387_v17, %v515_v25  ;;  %v542_v35 = vsel %vm523_vm4, %v402_v19, %v517_v27  ;;  %565 = vst [vmem:[#allocation1 + $0x22] ss:$4 sm:$0xff] %v537_v29 }
 0x15e   :  { %v541_v36 = vsel %vm359_vm0, %v540_v34, %v516_v26  ;;  %v543_v37 = vsel %vm359_vm0, %v542_v35, %v518_v28  ;;  %567 = vst [vmem:[#allocation1 + $0x23] ss:$4 sm:$0xff] %v539_v33  ;;  %v544_v46 = vsel %vm523_vm4, %v403_v20, %v519_v38 }
 0x15f   :  { %574 = vst [vmem:[#allocation1] ss:$4 sm:$0xff] %v541_v36 }
 0x160   :  { %575 = vst [vmem:[#allocation1 + $0x1] ss:$4 sm:$0xff] %v543_v37 }
 0x165   :  { %v571_v39 = vld.sshfl [vmem:[#allocation1 + $0x20] sm:$0xff pattern:$0x73625140]  ;;  %v572_v40 = vld.sshfl [vmem:[#allocation1 + $0x28] sm:$0xff pattern:$0x73625140]  ;;  %v389_v41 = vpop.f32.mrf.mxu0 }
 0x166   :  { %v573_v42 = vld.sshfl [vmem:[#allocation1 + $0x30] sm:$0xff pattern:$0x73625140]  ;;  %v390_v43 = vadd.f32 %v4866_v53, %v389_v41  ;;  %609 = vmatmul.f32.gmra.mxu1 %v571_v39  ;;  %635 = vmatmul.f32.gmra.mxu2 %v572_v40 }
 0x167   :  { %661 = vmatmul.f32.gmra.mxu3 %v573_v42  ;;  %687 = vmatmul.f32.gmra.mxu0 %v571_v39 }
 0x168   :  { %v520_v44 = vrot.slane %v390_v43, 4  ;;  %v521_v45 = vrot.slane %v390_v43, 6 }
 0x16a   :  { %v545_v47 = vsel %vm359_vm0, %v544_v46, %v520_v44  ;;  %v546_v48 = vsel %vm523_vm4, %v404_v21, %v521_v45 }
 0x16b   :  { %v547_v49 = vsel %vm359_vm0, %v546_v48, %v521_v45  ;;  %576 = vst [vmem:[#allocation1 + $0x2] ss:$4 sm:$0xff] %v545_v47 }
 0x16c   :  { %577 = vst [vmem:[#allocation1 + $0x3] ss:$4 sm:$0xff] %v547_v49 }
 0x173   :  { %v578_v50 = vld.sshfl [vmem:[#allocation1] sm:$0xff pattern:$0x73625140]  ;;  %v579_v51 = vld.sshfl [vmem:[#allocation1 + $0x8] sm:$0xff pattern:$0x73625140] }
 0x174   :  { %v580_v52 = vld.sshfl [vmem:[#allocation1 + $0x10] sm:$0xff pattern:$0x73625140]  ;;  %612 = vmatmul.f32.gmra.mxu1 %v578_v50  ;;  %638 = vmatmul.f32.gmra.mxu2 %v579_v51 }
 0x175   :  { %664 = vmatmul.f32.gmra.mxu3 %v580_v52  ;;  %690 = vmatmul.f32.gmra.mxu0 %v578_v50 }
 0x17c   :  { %710 = vmatmul.f32.vlgmr.msrb.gmra.mxu1 %v4901_v7  ;;  %736 = vmatmul.f32.vlgmr.msrb.gmra.mxu2 %v4903_v11 }
 0x184   :  { %713 = vmatmul.f32.gmra.mxu1 %v572_v40  ;;  %739 = vmatmul.f32.gmra.mxu2 %v573_v42 }
 0x18c   :  { %716 = vmatmul.f32.gmra.mxu1 %v579_v51  ;;  %742 = vmatmul.f32.gmra.mxu2 %v580_v52 }
 0x1d2   :  { %v607_v53 = vpop.f32.mrf.mxu1 }
 0x1d3   :  { %v685_v62 = vpop.f32.mrf.mxu0  ;;  %v608_v0 = vadd.f32 %v607_v53, %v549_v60 }
 0x1d4   :  { %v686_v1 = vadd.f32 %v685_v62, %v550_v61 }
 0x1d8   :  { %v633_v54 = vpop.f32.mrf.mxu2 }
 0x1d9   :  { %v634_v2 = vadd.f32 %v633_v54, %v608_v0  ;;  %v659_v5 = vpop.f32.mrf.mxu3 }
 0x1db   :  { %v660_v8 = vadd.f32 %v659_v5, %v634_v2 }
 0x1e3   :  { %v610_v55 = vpop.f32.mrf.mxu1 }
 0x1e4   :  { %v688_v7 = vpop.f32.mrf.mxu0  ;;  %v611_v22 = vadd.f32 %v610_v55, %v549_v60 }
 0x1e5   :  { %v689_v15 = vadd.f32 %v688_v7, %v550_v61 }
 0x1e9   :  { %v636_v56 = vpop.f32.mrf.mxu2 }
 0x1ea   :  { %v662_v19 = vpop.f32.mrf.mxu3  ;;  %v637_v25 = vadd.f32 %v636_v56, %v611_v22 }
 0x1ec   :  { %v663_v37 = vadd.f32 %v662_v19, %v637_v25  ;;  %v903_v19 = vld [vmem:[#allocation5 + $0x3e0] sm:$0xff]  ;;  %v901_v25 = vld [vmem:[#allocation5 + $0x3d0] sm:$0xff] }
 0x1f1   :  { %v613_v57 = vpop.f32.mrf.mxu1 }
 0x1f2   :  { %v691_v20 = vpop.f32.mrf.mxu0  ;;  %v614_v26 = vadd.f32 %v613_v57, %v549_v60 }
 0x1f3   :  { %v692_v27 = vadd.f32 %v691_v20, %v550_v61  ;;  %v805_v20 = vld [vmem:[#allocation5 + $0xd0] sm:$0xff] }
 0x1f7   :  { %v639_v59 = vpop.f32.mrf.mxu2 }
 0x1f8   :  { %v640_v32 = vadd.f32 %v639_v59, %v614_v26  ;;  %v665_v39 = vpop.f32.mrf.mxu3  ;;  %v803_v26 = vld [vmem:[#allocation5 + $0xc0] sm:$0xff] }
 0x1f9   :  { %v711_v63 = vpop.f32.mrf.mxu1 }
 0x1fa   :  { %v712_v3 = vadd.f32 %v711_v63, %v686_v1  ;;  %v4952_v40 = vadd.f32 %v665_v39, %v640_v32  ;;  %v899_v32 = vld [vmem:[#allocation5 + $0x3c0] sm:$0xff] }
 0x1fb   :  { %v799_v39 = vld [vmem:[#allocation5 + $0xa0] sm:$0xff] }
 0x1ff   :  { %v737_v4 = vpop.f32.mrf.mxu2 }
 0x200   :  { %v738_v6 = vadd.f32 %v737_v4, %v712_v3 }
 0x201   :  { %v714_v11 = vpop.f32.mrf.mxu1 }
 0x202   :  { %v752_v9 = vrot.slane %v738_v6, 6  ;;  %v715_v17 = vadd.f32 %v714_v11, %v689_v15  ;;  %v807_v15 = vld [vmem:[#allocation5 + $0xe0] sm:$0xff] }
 0x204   :  { %v755_v13 = vsel %vm523_vm4, %v660_v8, %v752_v9  ;;  %v4931_v14 = vsel %vm756_vm5, %v660_v8, %v752_v9  ;;  %v760_v18 = vsel %vm759_vm6, %v660_v8, %v752_v9  ;;  %v763_v12 = vsel %vm762_vm7, %v752_v9, %v660_v8  ;;  %v809_v8 = vld [vmem:[#allocation5 + $0xf0] sm:$0xff] }
 0x205   :  { %v758_v16 = vrot.slane %v4931_v14, 2  ;;  %972 = vst [vmem:[#allocation1] ss:$4 sm:$0xff] %v755_v13  ;;  %v4938_v23 = vrot.slane %v760_v18, 4  ;;  %v4944_v30 = vrot.slane %v763_v12, 6  ;;  %v841_v9 = vld [vmem:[#allocation5 + $0x1f0] sm:$0xff]  ;;  %1213 = vmatpush.msrb.mxu3 %v809_v8 }
 0x206   :  { %v873_v13 = vld [vmem:[#allocation5 + $0x2f0] sm:$0xff]  ;;  %1239 = vmatpush.msra.mxu0 %v841_v9  ;;  %v895_v8 = vld [vmem:[#allocation5 + $0x3a0] sm:$0xff] }
 0x207   :  { %976 = vst [vmem:[#allocation1 + $0x20] ss:$4 sm:$0xff] %v758_v16  ;;  %v740_v10 = vpop.f32.mrf.mxu2  ;;  %v905_v14 = vld [vmem:[#allocation5 + $0x3f0] sm:$0xff]  ;;  %1265 = vmatpush.msra.mxu1 %v873_v13  ;;  %1214 = vmatpush.msrb.mxu3 %v807_v15 }
 0x208   :  { %v741_v21 = vadd.f32 %v740_v10, %v715_v17  ;;  %1291 = vmatpush.msra.mxu2 %v905_v14  ;;  %v871_v17 = vld [vmem:[#allocation5 + $0x2e0] sm:$0xff]  ;;  %v837_v12 = vld [vmem:[#allocation5 + $0x1d0] sm:$0xff] }
 0x209   :  { %v717_v24 = vpop.f32.mrf.mxu1  ;;  %1266 = vmatpush.msra.mxu1 %v871_v17  ;;  %1215 = vmatpush.msrb.mxu3 %v805_v20  ;;  %v797_v9 = vld [vmem:[#allocation5 + $0x90] sm:$0xff]  ;;  %v827_v20 = vld [vmem:[#allocation5 + $0x180] sm:$0xff] }
 0x20a   :  { %v753_v31 = vrot.slane %v741_v21, 6  ;;  %v718_v35 = vadd.f32 %v717_v24, %v692_v27  ;;  %1292 = vmatpush.msra.mxu2 %v903_v19  ;;  %v869_v24 = vld [vmem:[#allocation5 + $0x2d0] sm:$0xff]  ;;  %v835_v27 = vld [vmem:[#allocation5 + $0x1c0] sm:$0xff] }
 0x20b   :  { %1267 = vmatpush.msra.mxu1 %v869_v24  ;;  %1216 = vmatpush.msrb.mxu3 %v803_v26  ;;  %v829_v15 = vld [vmem:[#allocation5 + $0x190] sm:$0xff]  ;;  %v795_v19 = vld [vmem:[#allocation5 + $0x80] sm:$0xff] }
 0x20c   :  { %v4940_v28 = vld.sshfl [vmem:[#allocation1] sm:$0xff pattern:$0x73625140]  ;;  %v4942_v29 = vld.sshfl [vmem:[#allocation1 + $0x8] sm:$0xff pattern:$0x73625140]  ;;  %v766_v41 = vsel %vm756_vm5, %v663_v37, %v753_v31  ;;  %v4962_v45 = vsel %vm523_vm4, %v663_v37, %v753_v31  ;;  %v768_v50 = vsel %vm759_vm6, %v663_v37, %v753_v31  ;;  %v770_v51 = vsel %vm762_vm7, %v753_v31, %v663_v37  ;;  %1293 = vmatpush.msra.mxu2 %v901_v25 }
 0x20d   :  { %979 = vst [vmem:[#allocation1] ss:$4 sm:$0xff] %v4938_v23  ;;  %v4969_v47 = vrot.slane %v766_v41, 2  ;;  %v4979_v52 = vrot.slane %v768_v50, 4  ;;  %v4985_v55 = vrot.slane %v770_v51, 6  ;;  %v867_v31 = vld [vmem:[#allocation5 + $0x2c0] sm:$0xff] }
 0x20e   :  { %v4947_v33 = vld.sshfl [vmem:[#allocation1 + $0x20] sm:$0xff pattern:$0x73625140]  ;;  %v4949_v34 = vld.sshfl [vmem:[#allocation1 + $0x28] sm:$0xff pattern:$0x73625140]  ;;  %1268 = vmatpush.msra.mxu1 %v867_v31  ;;  %1294 = vmatpush.msra.mxu2 %v899_v32 }
 0x20f   :  { %982 = vst [vmem:[#allocation1 + $0x20] ss:$4 sm:$0xff] %v4944_v30  ;;  %v743_v36 = vpop.f32.mrf.mxu2  ;;  %v865_v37 = vld [vmem:[#allocation5 + $0x2b0] sm:$0xff]  ;;  %v831_v41 = vld [vmem:[#allocation5 + $0x1a0] sm:$0xff] }
 0x210   :  { %v744_v38 = vadd.f32 %v743_v36, %v718_v35  ;;  %v801_v35 = vld [vmem:[#allocation5 + $0xb0] sm:$0xff]  ;;  %v863_v50 = vld [vmem:[#allocation5 + $0x2a0] sm:$0xff]  ;;  %1269 = vmatpush.msra.mxu1 %v865_v37 }
 0x211   :  { %v833_v36 = vld [vmem:[#allocation5 + $0x1b0] sm:$0xff]  ;;  %1217 = vmatpush.msrb.mxu3 %v801_v35  ;;  %v891_v24 = vld [vmem:[#allocation5 + $0x380] sm:$0xff] }
 0x212   :  { %v4955_v42 = vrot.slane %v744_v38, 6  ;;  %v897_v38 = vld [vmem:[#allocation5 + $0x3b0] sm:$0xff]  ;;  %1270 = vmatpush.msra.mxu1 %v863_v50  ;;  %v791_v35 = vld [vmem:[#allocation5 + $0x60] sm:$0xff] }
 0x213   :  { %1295 = vmatpush.msra.mxu2 %v897_v38  ;;  %1218 = vmatpush.msrb.mxu3 %v799_v39  ;;  %v893_v17 = vld [vmem:[#allocation5 + $0x390] sm:$0xff]  ;;  %v855_v37 = vld [vmem:[#allocation5 + $0x260] sm:$0xff] }
 0x214   :  { %v4957_v43 = vld.sshfl [vmem:[#allocation1] sm:$0xff pattern:$0x73625140]  ;;  %v4959_v44 = vld.sshfl [vmem:[#allocation1 + $0x8] sm:$0xff pattern:$0x73625140]  ;;  %v4967_v46 = vsel %vm762_vm7, %v4955_v42, %v4952_v40  ;;  %v773_v58 = vsel %vm756_vm5, %v4952_v40, %v4955_v42  ;;  %v5003_v61 = vsel %vm523_vm4, %v4952_v40, %v4955_v42  ;;  %v5057_v26 = vsel %vm759_vm6, %v4952_v40, %v4955_v42 }
 0x215   :  { %985 = vst [vmem:[#allocation1] ss:$4 sm:$0xff] %v4962_v45  ;;  %v5005_v62 = vrot.slane %v773_v58, 2  ;;  %1296 = vmatpush.msra.mxu2 %v895_v8  ;;  %1219 = vmatpush.msrb.mxu3 %v797_v9  ;;  %v793_v25 = vld [vmem:[#allocation5 + $0x70] sm:$0xff]  ;;  %v887_v40 = vld [vmem:[#allocation5 + $0x360] sm:$0xff] }
 0x216   :  { %v4972_v48 = vld.sshfl [vmem:[#allocation1 + $0x20] sm:$0xff pattern:$0x73625140]  ;;  %v4974_v49 = vld.sshfl [vmem:[#allocation1 + $0x28] sm:$0xff pattern:$0x73625140] }
 0x217   :  { %988 = vst [vmem:[#allocation1 + $0x20] ss:$4 sm:$0xff] %v4969_v47  ;;  %1297 = vmatpush.msra.mxu2 %v893_v17  ;;  %1220 = vmatpush.msrb.mxu3 %v795_v19  ;;  %v857_v31 = vld [vmem:[#allocation5 + $0x270] sm:$0xff]  ;;  %v787_v17 = vld [vmem:[#allocation5 + $0x40] sm:$0xff] }
 0x218   :  { %v889_v32 = vld [vmem:[#allocation5 + $0x370] sm:$0xff]  ;;  %v819_v19 = vld [vmem:[#allocation5 + $0x140] sm:$0xff] }
 0x219   :  { %1298 = vmatpush.msra.mxu2 %v891_v24  ;;  %1221 = vmatpush.msrb.mxu3 %v793_v25  ;;  %v789_v42 = vld [vmem:[#allocation5 + $0x50] sm:$0xff] }
 0x21a   :  { %v821_v9 = vld [vmem:[#allocation5 + $0x150] sm:$0xff] }
 0x21b   :  { %1299 = vmatpush.msra.mxu2 %v889_v32  ;;  %1222 = vmatpush.msrb.mxu3 %v791_v35  ;;  %v785_v24 = vld [vmem:[#allocation5 + $0x30] sm:$0xff]  ;;  %v783_v32 = vld [vmem:[#allocation5 + $0x20] sm:$0xff] }
 0x21c   :  { %v4981_v53 = vld.sshfl [vmem:[#allocation1] sm:$0xff pattern:$0x73625140]  ;;  %v4983_v54 = vld.sshfl [vmem:[#allocation1 + $0x8] sm:$0xff pattern:$0x73625140] }
 0x21d   :  { %991 = vst [vmem:[#allocation1] ss:$4 sm:$0xff] %v4979_v52  ;;  %1300 = vmatpush.msra.mxu2 %v887_v40  ;;  %1223 = vmatpush.msrb.mxu3 %v789_v42  ;;  %v817_v25 = vld [vmem:[#allocation5 + $0x130] sm:$0xff]  ;;  %v815_v35 = vld [vmem:[#allocation5 + $0x120] sm:$0xff] }
 0x21e   :  { %v4988_v56 = vld.sshfl [vmem:[#allocation1 + $0x20] sm:$0xff pattern:$0x73625140]  ;;  %v4990_v57 = vld.sshfl [vmem:[#allocation1 + $0x28] sm:$0xff pattern:$0x73625140] }
 0x21f   :  { %994 = vst [vmem:[#allocation1 + $0x20] ss:$4 sm:$0xff] %v4985_v55  ;;  %1224 = vmatpush.msrb.mxu3 %v787_v17  ;;  %v879_v42 = vld [vmem:[#allocation5 + $0x320] sm:$0xff]  ;;  %v813_v17 = vld [vmem:[#allocation5 + $0x110] sm:$0xff] }
 0x221   :  { %1225 = vmatpush.msrb.mxu3 %v785_v24  ;;  %v843_v24 = vld [vmem:[#allocation5 + $0x200] sm:$0xff] }
 0x223   :  { %1226 = vmatpush.msrb.mxu3 %v783_v32  ;;  %v810_v32 = vld [vmem:[#allocation5 + $0xf8] sm:$0xff] }
 0x224   :  { %v4996_v59 = vld.sshfl [vmem:[#allocation1] sm:$0xff pattern:$0x73625140]  ;;  %v4998_v60 = vld.sshfl [vmem:[#allocation1 + $0x8] sm:$0xff pattern:$0x73625140] }
 0x225   :  { %997 = vst [vmem:[#allocation1] ss:$4 sm:$0xff] %v5003_v61 }
 0x226   :  { %v5008_v63 = vld.sshfl [vmem:[#allocation1 + $0x20] sm:$0xff pattern:$0x73625140]  ;;  %v5010_v0 = vld.sshfl [vmem:[#allocation1 + $0x28] sm:$0xff pattern:$0x73625140] }
 0x227   :  { %1000 = vst [vmem:[#allocation1 + $0x20] ss:$4 sm:$0xff] %v5005_v62 }
 0x22c   :  { %v5013_v1 = vld.sshfl [vmem:[#allocation1] sm:$0xff pattern:$0x73625140]  ;;  %v5015_v2 = vld.sshfl [vmem:[#allocation1 + $0x8] sm:$0xff pattern:$0x73625140] }
 0x22d   :  { %6647 = vst [vmem:[#allocation20_spill] sm:$0xff] %v5013_v1  ;;  %v925_v1 = vld [vmem:[#allocation5 + $0x490] sm:$0xff] }
 0x22e   :  { %1003 = vst [vmem:[#allocation1] ss:$4 sm:$0xff] %v758_v16  ;;  %v5019_v3 = vld.sshfl [vmem:[#allocation1 + $0x20] sm:$0xff pattern:$0x73625140]  ;;  %v839_v16 = vld [vmem:[#allocation5 + $0x1e0] sm:$0xff] }
 0x22f   :  { %6648 = vst [vmem:[#allocation21_spill] sm:$0xff] %v5019_v3  ;;  %v5021_v4 = vld.sshfl [vmem:[#allocation1 + $0x28] sm:$0xff pattern:$0x73625140]  ;;  %1240 = vmatpush.msra.mxu0 %v839_v16  ;;  %v861_v16 = vld [vmem:[#allocation5 + $0x290] sm:$0xff]  ;;  %v802_v3 = vld [vmem:[#allocation5 + $0xb8] sm:$0xff] }
 0x230   :  { %1007 = vst [vmem:[#allocation1 + $0x20] ss:$4 sm:$0xff] %v4938_v23  ;;  %1271 = vmatpush.msra.mxu1 %v861_v16  ;;  %v885_v16 = vld [vmem:[#allocation5 + $0x350] sm:$0xff] }
 0x231   :  { %1241 = vmatpush.msra.mxu0 %v837_v12  ;;  %v859_v12 = vld [vmem:[#allocation5 + $0x280] sm:$0xff]  ;;  %1301 = vmatpush.msra.mxu2 %v885_v16 }
 0x232   :  { %1272 = vmatpush.msra.mxu1 %v859_v12  ;;  %v883_v12 = vld [vmem:[#allocation5 + $0x340] sm:$0xff] }
 0x233   :  { %1242 = vmatpush.msra.mxu0 %v835_v27  ;;  %v825_v27 = vld [vmem:[#allocation5 + $0x170] sm:$0xff]  ;;  %1302 = vmatpush.msra.mxu2 %v883_v12  ;;  %v811_v12 = vld [vmem:[#allocation5 + $0x100] sm:$0xff] }
 0x234   :  { %1273 = vmatpush.msra.mxu1 %v857_v31  ;;  %v881_v31 = vld [vmem:[#allocation5 + $0x330] sm:$0xff] }
 0x235   :  { %v5024_v5 = vld.sshfl [vmem:[#allocation1] sm:$0xff pattern:$0x73625140]  ;;  %v5026_v6 = vld.sshfl [vmem:[#allocation1 + $0x8] sm:$0xff pattern:$0x73625140]  ;;  %1243 = vmatpush.msra.mxu0 %v833_v36  ;;  %1303 = vmatpush.msra.mxu2 %v881_v31 }
 0x236   :  { %1010 = vst [vmem:[#allocation1] ss:$4 sm:$0xff] %v4944_v30  ;;  %v823_v36 = vld [vmem:[#allocation5 + $0x160] sm:$0xff]  ;;  %1274 = vmatpush.msra.mxu1 %v855_v37  ;;  %v969_v31 = vld [vmem:[#allocation5 + $0x5f0] sm:$0xff] }
 0x237   :  { %v5029_v7 = vld.sshfl [vmem:[#allocation1 + $0x20] sm:$0xff pattern:$0x73625140]  ;;  %v5031_v11 = vld.sshfl [vmem:[#allocation1 + $0x28] sm:$0xff pattern:$0x73625140]  ;;  %1244 = vmatpush.msra.mxu0 %v831_v41  ;;  %1304 = vmatpush.msra.mxu2 %v879_v42 }
 0x238   :  { %1013 = vst [vmem:[#allocation1 + $0x20] ss:$4 sm:$0xff] %v4962_v45  ;;  %v6528_v41 = vrot.slane %v5057_v26, 4  ;;  %v808_v42 = vld [vmem:[#allocation5 + $0xe8] sm:$0xff] }
 0x239   :  { %1245 = vmatpush.msra.mxu0 %v829_v15  ;;  %v853_v15 = vld [vmem:[#allocation5 + $0x250] sm:$0xff] }
 0x23a   :  { %1275 = vmatpush.msra.mxu1 %v853_v15 }
 0x23b   :  { %1246 = vmatpush.msra.mxu0 %v827_v20  ;;  %v851_v20 = vld [vmem:[#allocation5 + $0x240] sm:$0xff] }
 0x23c   :  { %1276 = vmatpush.msra.mxu1 %v851_v20  ;;  %v877_v20 = vld [vmem:[#allocation5 + $0x310] sm:$0xff] }
 0x23d   :  { %v5034_v10 = vld.sshfl [vmem:[#allocation1] sm:$0xff pattern:$0x73625140]  ;;  %v5036_v18 = vld.sshfl [vmem:[#allocation1 + $0x8] sm:$0xff pattern:$0x73625140]  ;;  %1247 = vmatpush.msra.mxu0 %v825_v27  ;;  %1305 = vmatpush.msra.mxu2 %v877_v20 }
 0x23e   :  { %1016 = vst [vmem:[#allocation1] ss:$4 sm:$0xff] %v4969_v47  ;;  %v849_v27 = vld [vmem:[#allocation5 + $0x230] sm:$0xff] }
 0x23f   :  { %v5039_v21 = vld.sshfl [vmem:[#allocation1 + $0x20] sm:$0xff pattern:$0x73625140]  ;;  %v5041_v22 = vld.sshfl [vmem:[#allocation1 + $0x28] sm:$0xff pattern:$0x73625140]  ;;  %1248 = vmatpush.msra.mxu0 %v823_v36  ;;  %1277 = vmatpush.msra.mxu1 %v849_v27 }
 0x240   :  { %1019 = vst [vmem:[#allocation1 + $0x20] ss:$4 sm:$0xff] %v4979_v52  ;;  %v847_v36 = vld [vmem:[#allocation5 + $0x220] sm:$0xff]  ;;  %v937_v27 = vld [vmem:[#allocation5 + $0x4f0] sm:$0xff] }
 0x241   :  { %1249 = vmatpush.msra.mxu0 %v821_v9  ;;  %v781_v9 = vld [vmem:[#allocation5 + $0x10] sm:$0xff]  ;;  %1278 = vmatpush.msra.mxu1 %v847_v36  ;;  %v967_v36 = vld [vmem:[#allocation5 + $0x5e0] sm:$0xff] }
 0x242   :  { %1227 = vmatpush.msrb.mxu3 %v781_v9  ;;  %v933_v20 = vld [vmem:[#allocation5 + $0x4d0] sm:$0xff] }
 0x243   :  { %1250 = vmatpush.msra.mxu0 %v819_v19  ;;  %v845_v19 = vld [vmem:[#allocation5 + $0x210] sm:$0xff] }
 0x244   :  { %1279 = vmatpush.msra.mxu1 %v845_v19  ;;  %v840_v19 = vld [vmem:[#allocation5 + $0x1e8] sm:$0xff] }
 0x245   :  { %v5044_v51 = vld.sshfl [vmem:[#allocation1] sm:$0xff pattern:$0x73625140]  ;;  %v5046_v58 = vld.sshfl [vmem:[#allocation1 + $0x8] sm:$0xff pattern:$0x73625140]  ;;  %1251 = vmatpush.msra.mxu0 %v817_v25 }
 0x246   :  { %1022 = vst [vmem:[#allocation1] ss:$4 sm:$0xff] %v4985_v55  ;;  %v875_v25 = vld [vmem:[#allocation5 + $0x300] sm:$0xff]  ;;  %1280 = vmatpush.msra.mxu1 %v843_v24 }
 0x247   :  { %v5049_v13 = vld.sshfl [vmem:[#allocation1 + $0x20] sm:$0xff pattern:$0x73625140]  ;;  %v5051_v14 = vld.sshfl [vmem:[#allocation1 + $0x28] sm:$0xff pattern:$0x73625140]  ;;  %1252 = vmatpush.msra.mxu0 %v815_v35  ;;  %1306 = vmatpush.msra.mxu2 %v875_v25 }
 0x248   :  { %1025 = vst [vmem:[#allocation1 + $0x20] ss:$4 sm:$0xff] %v5003_v61  ;;  %v842_v35 = vld [vmem:[#allocation5 + $0x1f8] sm:$0xff]  ;;  %1369 = vmatpush.msrb.mxu1 %v810_v32  ;;  %v804_v32 = vld [vmem:[#allocation5 + $0xc8] sm:$0xff] }
 0x249   :  { %1253 = vmatpush.msra.mxu0 %v813_v17  ;;  %1395 = vmatpush.msrb.mxu2 %v842_v35  ;;  %v806_v25 = vld [vmem:[#allocation5 + $0xd8] sm:$0xff]  ;;  %v836_v35 = vld [vmem:[#allocation5 + $0x1c8] sm:$0xff] }
 0x24a   :  { %1370 = vmatpush.msrb.mxu1 %v808_v42  ;;  %v927_v42 = vld [vmem:[#allocation5 + $0x4a0] sm:$0xff] }
 0x24b   :  { %1254 = vmatpush.msra.mxu0 %v811_v12  ;;  %1396 = vmatpush.msrb.mxu2 %v840_v19  ;;  %v800_v19 = vld [vmem:[#allocation5 + $0xa8] sm:$0xff] }
 0x24c   :  { %1371 = vmatpush.msrb.mxu1 %v806_v25 }
 0x24d   :  { %v5059_v38 = vld.sshfl [vmem:[#allocation1] sm:$0xff pattern:$0x73625140]  ;;  %v5061_v39 = vld.sshfl [vmem:[#allocation1 + $0x8] sm:$0xff pattern:$0x73625140]  ;;  %1343 = vmatpush.msrb.mxu0 %v969_v31 }
 0x24e   :  { %1028 = vst [vmem:[#allocation1] ss:$4 sm:$0xff] %v5005_v62  ;;  %v931_v31 = vld [vmem:[#allocation5 + $0x4c0] sm:$0xff]  ;;  %1372 = vmatpush.msrb.mxu1 %v804_v32 }
 0x24f   :  { %v5065_v50 = vld.sshfl [vmem:[#allocation1 + $0x20] sm:$0xff pattern:$0x73625140]  ;;  %v5067_v8 = vld.sshfl [vmem:[#allocation1 + $0x28] sm:$0xff pattern:$0x73625140]  ;;  %1344 = vmatpush.msrb.mxu0 %v967_v36 }
 0x250   :  { %1031 = vst [vmem:[#allocation1 + $0x20] ss:$4 sm:$0xff] %v6528_v41  ;;  %v961_v41 = vld [vmem:[#allocation5 + $0x5b0] sm:$0xff]  ;;  %v834_v36 = vld [vmem:[#allocation5 + $0x1b8] sm:$0xff]  ;;  %1373 = vmatpush.msrb.mxu1 %v802_v3  ;;  %v923_v3 = vld [vmem:[#allocation5 + $0x480] sm:$0xff] }
 0x252   :  { %1374 = vmatpush.msrb.mxu1 %v800_v19  ;;  %v826_v19 = vld [vmem:[#allocation5 + $0x178] sm:$0xff] }
 0x255   :  { %v5071_v37 = vld.sshfl [vmem:[#allocation1] sm:$0xff pattern:$0x73625140]  ;;  %v5073_v40 = vld.sshfl [vmem:[#allocation1 + $0x8] sm:$0xff pattern:$0x73625140] }
 0x256   :  { %1034 = vst [vmem:[#allocation1] ss:$4 sm:$0xff] %v4938_v23  ;;  %v779_v23 = vld [vmem:[#allocation5] sm:$0xff] }
 0x257   :  { %v5076_v15 = vld.sshfl [vmem:[#allocation1 + $0x20] sm:$0xff pattern:$0x73625140]  ;;  %v5078_v16 = vld.sshfl [vmem:[#allocation1 + $0x28] sm:$0xff pattern:$0x73625140]  ;;  %1228 = vmatpush.msrb.mxu3 %v779_v23 }
 0x258   :  { %1038 = vst [vmem:[#allocation1 + $0x20] ss:$4 sm:$0xff] %v4944_v30  ;;  %v935_v30 = vld [vmem:[#allocation5 + $0x4e0] sm:$0xff]  ;;  %v965_v23 = vld [vmem:[#allocation5 + $0x5d0] sm:$0xff] }
 0x259   :  { %1317 = vmatpush.msra.mxu3 %v937_v27  ;;  %v838_v27 = vld [vmem:[#allocation5 + $0x1d8] sm:$0xff]  ;;  %1345 = vmatpush.msrb.mxu0 %v965_v23 }
 0x25a   :  { %1397 = vmatpush.msrb.mxu2 %v838_v27  ;;  %v957_v27 = vld [vmem:[#allocation5 + $0x590] sm:$0xff] }
 0x25b   :  { %1318 = vmatpush.msra.mxu3 %v935_v30  ;;  %v929_v30 = vld [vmem:[#allocation5 + $0x4b0] sm:$0xff] }
 0x25c   :  { %1398 = vmatpush.msrb.mxu2 %v836_v35 }
 0x25d   :  { %v5081_v9 = vld.sshfl [vmem:[#allocation1] sm:$0xff pattern:$0x73625140]  ;;  %v5083_v17 = vld.sshfl [vmem:[#allocation1 + $0x8] sm:$0xff pattern:$0x73625140]  ;;  %1319 = vmatpush.msra.mxu3 %v933_v20 }
 0x25e   :  { %1041 = vst [vmem:[#allocation1] ss:$4 sm:$0xff] %v4962_v45  ;;  %v963_v45 = vld [vmem:[#allocation5 + $0x5c0] sm:$0xff]  ;;  %v832_v20 = vld [vmem:[#allocation5 + $0x1a8] sm:$0xff]  ;;  %1399 = vmatpush.msrb.mxu2 %v834_v36 }
 0x25f   :  { %v5086_v12 = vld.sshfl [vmem:[#allocation1 + $0x20] sm:$0xff pattern:$0x73625140]  ;;  %v5088_v24 = vld.sshfl [vmem:[#allocation1 + $0x28] sm:$0xff pattern:$0x73625140]  ;;  %1320 = vmatpush.msra.mxu3 %v931_v31  ;;  %1346 = vmatpush.msrb.mxu0 %v963_v45 }
 0x260   :  { %1044 = vst [vmem:[#allocation1 + $0x20] ss:$4 sm:$0xff] %v4969_v47  ;;  %v959_v47 = vld [vmem:[#allocation5 + $0x5a0] sm:$0xff]  ;;  %v798_v31 = vld [vmem:[#allocation5 + $0x98] sm:$0xff]  ;;  %1400 = vmatpush.msrb.mxu2 %v832_v20 }
 0x261   :  { %1321 = vmatpush.msra.mxu3 %v929_v30  ;;  %1347 = vmatpush.msrb.mxu0 %v961_v41  ;;  %v830_v45 = vld [vmem:[#allocation5 + $0x198] sm:$0xff]  ;;  %v796_v41 = vld [vmem:[#allocation5 + $0x88] sm:$0xff]  ;;  %v919_v20 = vld [vmem:[#allocation5 + $0x460] sm:$0xff] }
 0x262   :  { %1375 = vmatpush.msrb.mxu1 %v798_v31  ;;  %1401 = vmatpush.msrb.mxu2 %v830_v45  ;;  %v792_v31 = vld [vmem:[#allocation5 + $0x68] sm:$0xff] }
 0x263   :  { %1322 = vmatpush.msra.mxu3 %v927_v42  ;;  %1348 = vmatpush.msrb.mxu0 %v959_v47  ;;  %v828_v42 = vld [vmem:[#allocation5 + $0x188] sm:$0xff]  ;;  %v921_v47 = vld [vmem:[#allocation5 + $0x470] sm:$0xff] }
 0x264   :  { %1376 = vmatpush.msrb.mxu1 %v796_v41  ;;  %1402 = vmatpush.msrb.mxu2 %v828_v42  ;;  %v824_v45 = vld [vmem:[#allocation5 + $0x168] sm:$0xff] }
 0x265   :  { %v5091_v23 = vld.sshfl [vmem:[#allocation1] sm:$0xff pattern:$0x73625140]  ;;  %v5093_v25 = vld.sshfl [vmem:[#allocation1 + $0x8] sm:$0xff pattern:$0x73625140]  ;;  %1323 = vmatpush.msra.mxu3 %v925_v1  ;;  %1349 = vmatpush.msrb.mxu0 %v957_v27 }
 0x266   :  { %1047 = vst [vmem:[#allocation1] ss:$4 sm:$0xff] %v4979_v52  ;;  %v955_v52 = vld [vmem:[#allocation5 + $0x580] sm:$0xff]  ;;  %v953_v1 = vld [vmem:[#allocation5 + $0x570] sm:$0xff]  ;;  %1403 = vmatpush.msrb.mxu2 %v826_v19  ;;  %v1067_v19 = vrot.slane %v5026_v6, 2  ;;  %v1075_v6 = vrot.slane %v5036_v18, 2 }
 0x267   :  { %v5096_v32 = vld.sshfl [vmem:[#allocation1 + $0x20] sm:$0xff pattern:$0x73625140]  ;;  %v5098_v35 = vld.sshfl [vmem:[#allocation1 + $0x28] sm:$0xff pattern:$0x73625140]  ;;  %1324 = vmatpush.msra.mxu3 %v923_v3  ;;  %1350 = vmatpush.msrb.mxu0 %v955_v52 }
 0x268   :  { %1050 = vst [vmem:[#allocation1 + $0x20] ss:$4 sm:$0xff] %v4985_v55  ;;  %v794_v55 = vld [vmem:[#allocation5 + $0x78] sm:$0xff]  ;;  %v951_v27 = vld [vmem:[#allocation5 + $0x560] sm:$0xff]  ;;  %v917_v3 = vld [vmem:[#allocation5 + $0x450] sm:$0xff]  ;;  %1404 = vmatpush.msrb.mxu2 %v824_v45 }
 0x269   :  { %1325 = vmatpush.msra.mxu3 %v921_v47  ;;  %1351 = vmatpush.msrb.mxu0 %v953_v1  ;;  %v949_v52 = vld [vmem:[#allocation5 + $0x550] sm:$0xff]  ;;  %v1066_v47 = vrot.slane %v5024_v5, 4  ;;  %v788_v45 = vld [vmem:[#allocation5 + $0x48] sm:$0xff]  ;;  %v1071_v5 = vrot.slane %v5031_v11, 2  ;;  %v1078_v11 = vrot.slane %v5039_v21, 4  ;;  %v782_v21 = vld [vmem:[#allocation5 + $0x18] sm:$0xff] }
 0x26a   :  { %1377 = vmatpush.msrb.mxu1 %v794_v55 }
 0x26b   :  { %1326 = vmatpush.msra.mxu3 %v919_v20  ;;  %1352 = vmatpush.msrb.mxu0 %v951_v27  ;;  %v6654_v20 = vrot.slane %v5057_v26, 4  ;;  %v915_v27 = vld [vmem:[#allocation5 + $0x440] sm:$0xff]  ;;  %v786_v26 = vld [vmem:[#allocation5 + $0x38] sm:$0xff]  ;;  %v1106_v18 = vsel %vm759_vm6, %v1066_v47, %v1067_v19 }
 0x26c   :  { %1378 = vmatpush.msrb.mxu1 %v792_v31  ;;  %v947_v31 = vld [vmem:[#allocation5 + $0x540] sm:$0xff] }
 0x26d   :  { %v5101_v30 = vld.sshfl [vmem:[#allocation1] sm:$0xff pattern:$0x73625140]  ;;  %v5103_v36 = vld.sshfl [vmem:[#allocation1 + $0x8] sm:$0xff pattern:$0x73625140]  ;;  %1327 = vmatpush.msra.mxu3 %v917_v3  ;;  %1353 = vmatpush.msrb.mxu0 %v949_v52 }
 0x26e   :  { %6649 = vst [vmem:[#allocation22_spill] sm:$0xff] %v5101_v30  ;;  %v790_v30 = vld [vmem:[#allocation5 + $0x58] sm:$0xff]  ;;  %v1070_v3 = vrot.slane %v5029_v7, 4  ;;  %v945_v52 = vld [vmem:[#allocation5 + $0x530] sm:$0xff]  ;;  %v1069_v7 = vrot.slane %v4949_v34, 6 }
 0x26f   :  { %6650 = vst [vmem:[#allocation23_spill] sm:$0xff] %v5103_v36  ;;  %v5106_v41 = vld.sshfl [vmem:[#allocation1 + $0x20] sm:$0xff pattern:$0x73625140]  ;;  %1379 = vmatpush.msrb.mxu1 %v790_v30  ;;  %1328 = vmatpush.msra.mxu3 %v915_v27  ;;  %v913_v30 = vld [vmem:[#allocation5 + $0x430] sm:$0xff]  ;;  %v1079_v27 = vrot.slane %v5041_v22, 2 }
 0x270   :  { %1053 = vst [vmem:[#allocation1] ss:$4 sm:$0xff] %v5003_v61  ;;  %v822_v61 = vld [vmem:[#allocation5 + $0x158] sm:$0xff]  ;;  %v5108_v42 = vld.sshfl [vmem:[#allocation1 + $0x28] sm:$0xff pattern:$0x73625140]  ;;  %1354 = vmatpush.msrb.mxu0 %v947_v31  ;;  %v1110_v34 = vsel %vm759_vm6, %v1070_v3, %v1071_v5 }
 0x271   :  { %6651 = vst [vmem:[#allocation24_spill] sm:$0xff] %v5106_v41  ;;  %1405 = vmatpush.msrb.mxu2 %v822_v61  ;;  %v1065_v41 = vrot.slane %v4942_v29, 6  ;;  %v1074_v61 = vrot.slane %v5034_v10, 4  ;;  %1380 = vmatpush.msrb.mxu1 %v788_v45  ;;  %v943_v31 = vld [vmem:[#allocation5 + $0x520] sm:$0xff]  ;;  %v816_v29 = vld [vmem:[#allocation5 + $0x128] sm:$0xff]  ;;  %v1073_v10 = vrot.slane %v4959_v44, 6  ;;  %v1109_v44 = vsel %vm523_vm4, %v4947_v33, %v1069_v7 }
 0x272   :  { %6652 = vst [vmem:[#allocation25_spill] sm:$0xff] %v5108_v42  ;;  %1329 = vmatpush.msra.mxu3 %v913_v30  ;;  %1355 = vmatpush.msrb.mxu0 %v945_v52  ;;  %v784_v42 = vld [vmem:[#allocation5 + $0x28] sm:$0xff]  ;;  %v909_v45 = vld [vmem:[#allocation5 + $0x410] sm:$0xff]  ;;  %v1077_v36 = vrot.slane %v4974_v49, 6  ;;  %v814_v22 = vld [vmem:[#allocation5 + $0x118] sm:$0xff]  ;;  %v1118_v49 = vsel %vm759_vm6, %v1078_v11, %v1079_v27  ;;  %v1082_v11 = vrot.slane %v5044_v51, 4 }
 0x273   :  { %1056 = vst [vmem:[#allocation1 + $0x20] ss:$4 sm:$0xff] %v5005_v62  ;;  %v820_v62 = vld [vmem:[#allocation5 + $0x148] sm:$0xff]  ;;  %1381 = vmatpush.msrb.mxu1 %v786_v26  ;;  %v1105_v30 = vsel %vm523_vm4, %v4940_v28, %v1065_v41  ;;  %v1114_v52 = vsel %vm759_vm6, %v1074_v61, %v1075_v6  ;;  %v1113_v28 = vsel %vm523_vm4, %v4957_v43, %v1073_v10  ;;  %v907_v61 = vld [vmem:[#allocation5 + $0x400] sm:$0xff]  ;;  %v1087_v27 = vrot.slane %v5051_v14, 2 }
 0x274   :  { %1406 = vmatpush.msrb.mxu2 %v820_v62  ;;  %v941_v62 = vld [vmem:[#allocation5 + $0x510] sm:$0xff]  ;;  %1356 = vmatpush.msrb.mxu0 %v943_v31  ;;  %v1107_v47 = vsel %vm359_vm0, %v1105_v30, %v1106_v18  ;;  %v1111_v41 = vsel %vm359_vm0, %v1109_v44, %v1110_v34  ;;  %v1115_v5 = vsel %vm359_vm0, %v1113_v28, %v1114_v52  ;;  %v939_v6 = vld [vmem:[#allocation5 + $0x500] sm:$0xff]  ;;  %v780_v26 = vld [vmem:[#allocation5 + $0x8] sm:$0xff]  ;;  %v1090_v31 = vrot.slane %v5059_v38, 4 }
 0x275   :  { %1382 = vmatpush.msrb.mxu1 %v784_v42  ;;  %v1117_v42 = vsel %vm523_vm4, %v4972_v48, %v1077_v36  ;;  %v812_v7 = vld [vmem:[#allocation5 + $0x108] sm:$0xff]  ;;  %v1083_v48 = vrot.slane %v5046_v58, 2  ;;  %v1086_v36 = vrot.slane %v5049_v13, 4  ;;  %v1085_v10 = vrot.slane %v4990_v57, 6  ;;  %v938_v34 = vld [vmem:[#allocation5 + $0x4f8] sm:$0xff] }
 0x276   :  { %1357 = vmatpush.msrb.mxu0 %v941_v62  ;;  %v1119_v43 = vsel %vm359_vm0, %v1117_v42, %v1118_v49  ;;  %v1094_v18 = vrot.slane %v5065_v50, 4  ;;  %v1089_v51 = vrot.slane %v4998_v60, 6  ;;  %v1093_v58 = vrot.slane %v5010_v0, 6  ;;  %v874_v62 = vld [vmem:[#allocation5 + $0x2f8] sm:$0xff]  ;;  %v904_v30 = vld [vmem:[#allocation5 + $0x3e8] sm:$0xff] }
 0x277   :  { %v5112_v1 = vld.sshfl [vmem:[#allocation1] sm:$0xff pattern:$0x73625140]  ;;  %v5114_v55 = vld.sshfl [vmem:[#allocation1 + $0x8] sm:$0xff pattern:$0x73625140]  ;;  %1383 = vmatpush.msrb.mxu1 %v782_v21  ;;  %v1122_v13 = vsel %vm759_vm6, %v1082_v11, %v1083_v48  ;;  %v1126_v14 = vsel %vm759_vm6, %v1086_v36, %v1087_v27  ;;  %v1125_v52 = vsel %vm523_vm4, %v4988_v56, %v1085_v10 }
 0x278   :  { %6653 = vst [vmem:[#allocation26_spill] sm:$0xff] %v5112_v1  ;;  %v911_v1 = vld [vmem:[#allocation5 + $0x420] sm:$0xff]  ;;  %1358 = vmatpush.msrb.mxu0 %v939_v6  ;;  %v970_v38 = vld [vmem:[#allocation5 + $0x5f8] sm:$0xff]  ;;  %v1072_v57 = vrot.slane %v5088_v24, 6  ;;  %v1076_v50 = vrot.slane %v5093_v25, 6  ;;  %v1129_v44 = vsel %vm523_vm4, %v4996_v59, %v1089_v51  ;;  %v936_v56 = vld [vmem:[#allocation5 + $0x4e8] sm:$0xff]  ;;  %v1133_v28 = vsel %vm523_vm4, %v5008_v63, %v1093_v58 }
 0x279   :  { %1059 = vst [vmem:[#allocation1] ss:$4 sm:$0xff] %v6654_v20  ;;  %v818_v20 = vld [vmem:[#allocation5 + $0x138] sm:$0xff]  ;;  %1330 = vmatpush.msra.mxu3 %v911_v1  ;;  %1384 = vmatpush.msrb.mxu1 %v780_v26  ;;  %v968_v42 = vld [vmem:[#allocation5 + $0x5e8] sm:$0xff]  ;;  %v1080_v26 = vrot.slane %v5098_v35, 6  ;;  %v1099_v11 = vrot.slane %v5073_v40, 2 }
 0x27a   :  { %1407 = vmatpush.msrb.mxu2 %v818_v20  ;;  %v5142_v3 = vld.sshfl [vmem:[#allocation1 + $0x20] sm:$0xff pattern:$0x73625140]  ;;  %v5147_v33 = vld.sshfl [vmem:[#allocation1 + $0x28] sm:$0xff pattern:$0x73625140]  ;;  %v1112_v27 = vsel %vm523_vm4, %v5086_v12, %v1072_v57 }
 0x27b   :  { %1331 = vmatpush.msra.mxu3 %v909_v45  ;;  %v778_v20 = vrot.slane %v4967_v46, 6  ;;  %v1081_v46 = vrot.slane %v4983_v54, 6  ;;  %v1095_v45 = vrot.slane %v5067_v8, 2  ;;  %v906_v54 = vld [vmem:[#allocation5 + $0x3f8] sm:$0xff]  ;;  %v868_v48 = vld [vmem:[#allocation5 + $0x2c8] sm:$0xff]  ;;  %v1102_v35 = vrot.slane %v5076_v15, 4 }
 0x27c   :  { %1408 = vmatpush.msrb.mxu2 %v816_v29  ;;  %v1091_v29 = vrot.slane %v5061_v39, 2  ;;  %v1068_v39 = vrot.slane %v5083_v17, 6  ;;  %v902_v6 = vld [vmem:[#allocation5 + $0x3d8] sm:$0xff]  ;;  %v900_v36 = vld [vmem:[#allocation5 + $0x3c8] sm:$0xff]  ;;  %v1097_v40 = vrot.slane %v5015_v2, 6  ;;  %v1120_v12 = vsel %vm523_vm4, %v5096_v32, %v1080_v26 }
 0x27d   :  { %1332 = vmatpush.msra.mxu3 %v907_v61  ;;  %1062 = vst [vmem:[#allocation1 + $0x20] ss:$4 sm:$0xff] %v778_v20  ;;  %v1121_v8 = vsel %vm523_vm4, %v4981_v53, %v1081_v46  ;;  %v1134_v24 = vsel %vm759_vm6, %v1094_v18, %v1095_v45  ;;  %v870_v61 = vld [vmem:[#allocation5 + $0x2d8] sm:$0xff]  ;;  %v1103_v46 = vrot.slane %v5078_v16, 2  ;;  %v1101_v16 = vrot.slane %v5021_v4, 6  ;;  %v864_v2 = vld [vmem:[#allocation5 + $0x2a8] sm:$0xff] }
 0x27e   :  { %1409 = vmatpush.msrb.mxu2 %v814_v22  ;;  %v1130_v60 = vsel %vm759_vm6, %v1090_v31, %v1091_v29  ;;  %v872_v22 = vld [vmem:[#allocation5 + $0x2e8] sm:$0xff]  ;;  %v1123_v17 = vsel %vm359_vm0, %v1121_v8, %v1122_v13  ;;  %v934_v63 = vld [vmem:[#allocation5 + $0x4d8] sm:$0xff]  ;;  %v1092_v45 = vrot.slane %v5114_v55, 6 }
 0x27f   :  { %v966_v20 = vld [vmem:[#allocation5 + $0x5d8] sm:$0xff]  ;;  %v932_v31 = vld [vmem:[#allocation5 + $0x4c8] sm:$0xff]  ;;  %v1142_v51 = vsel %vm759_vm6, %v1102_v35, %v1103_v46 }
 0x280   :  { %v5138_v19 = vld.sshfl [vmem:[#allocation1] sm:$0xff pattern:$0x73625140]  ;;  %v5140_v1 = vld.sshfl [vmem:[#allocation1 + $0x8] sm:$0xff pattern:$0x73625140]  ;;  %1410 = vmatpush.msrb.mxu2 %v812_v7 }
 0x281   :  { %1150 = vst [vmem:[#allocation1] ss:$4 sm:$0xff] %v1107_v47  ;;  %v1127_v47 = vsel %vm359_vm0, %v1125_v52, %v1126_v14  ;;  %v1098_v7 = vrot.slane %v5071_v37, 4  ;;  %v1116_v37 = vsel %vm523_vm4, %v5091_v23, %v1076_v50  ;;  %v866_v29 = vld [vmem:[#allocation5 + $0x2b8] sm:$0xff]  ;;  %v896_v32 = vld [vmem:[#allocation5 + $0x3a8] sm:$0xff] }
 0x282   :  { %1152 = vst [vmem:[#allocation1 + $0x1] ss:$4 sm:$0xff] %v1111_v41  ;;  %v1131_v41 = vsel %vm359_vm0, %v1129_v44, %v1130_v60  ;;  %v898_v15 = vld [vmem:[#allocation5 + $0x3b8] sm:$0xff]  ;;  %v928_v58 = vld [vmem:[#allocation5 + $0x4a8] sm:$0xff] }
 0x283   :  { %1154 = vst [vmem:[#allocation1 + $0x2] ss:$4 sm:$0xff] %v1115_v5  ;;  %v1135_v5 = vsel %vm359_vm0, %v1133_v28, %v1134_v24  ;;  %v930_v10 = vld [vmem:[#allocation5 + $0x4b8] sm:$0xff]  ;;  %v1138_v23 = vsel %vm759_vm6, %v1098_v7, %v1099_v11  ;;  %v960_v13 = vld [vmem:[#allocation5 + $0x5a8] sm:$0xff]  ;;  %v1096_v28 = vrot.slane %v5147_v33, 6 }
 0x284   :  { %1156 = vst [vmem:[#allocation1 + $0x3] ss:$4 sm:$0xff] %v1119_v43  ;;  %v5193_v49 = vld.sshfl [vmem:[#allocation1 + $0x20] sm:$0xff pattern:$0x73625140]  ;;  %v1108_v43 = vsel %vm523_vm4, %v5081_v9, %v1068_v39  ;;  %v964_v9 = vld [vmem:[#allocation5 + $0x5c8] sm:$0xff] }
 0x285   :  { %v5198_v59 = vld.sshfl [vmem:[#allocation1 + $0x28] sm:$0xff pattern:$0x73625140]  ;;  %v962_v18 = vld [vmem:[#allocation5 + $0x5b8] sm:$0xff]  ;;  %v6657_v39 = vld [vmem:[#allocation21_spill] sm:$0xff] }
 0x286   :  { %1158 = vst [vmem:[#allocation1 + $0x20] ss:$4 sm:$0xff] %v1108_v43  ;;  %v6655_v4 = vld [vmem:[#allocation23_spill] sm:$0xff]  ;;  %v6656_v14 = vld [vmem:[#allocation20_spill] sm:$0xff]  ;;  %v1141_v57 = vsel %vm523_vm4, %v6657_v39, %v1101_v16  ;;  %v1104_v46 = vrot.slane %v5198_v59, 6  ;;  %v1100_v16 = vrot.slane %v5140_v1, 6 }
 0x287   :  { %1160 = vst [vmem:[#allocation1 + $0x21] ss:$4 sm:$0xff] %v1112_v27  ;;  %v1143_v60 = vsel %vm359_vm0, %v1141_v57, %v1142_v51  ;;  %v926_v52 = vld [vmem:[#allocation5 + $0x498] sm:$0xff]  ;;  %v956_v26 = vld [vmem:[#allocation5 + $0x588] sm:$0xff] }
 0x288   :  { %1162 = vst [vmem:[#allocation1 + $0x22] ss:$4 sm:$0xff] %v1116_v37  ;;  %v958_v44 = vld [vmem:[#allocation5 + $0x598] sm:$0xff]  ;;  %v6661_v33 = vld [vmem:[#allocation24_spill] sm:$0xff]  ;;  %v1140_v1 = vsel %vm523_vm4, %v5138_v19, %v1100_v16  ;;  %v1580_v16 = vld [vmem:[#allocation7 + $0x190] sm:$0xff] }
 0x289   :  { %1164 = vst [vmem:[#allocation1 + $0x23] ss:$4 sm:$0xff] %v1120_v12  ;;  %v858_v7 = vld [vmem:[#allocation5 + $0x278] sm:$0xff]  ;;  %v856_v35 = vld [vmem:[#allocation5 + $0x268] sm:$0xff] }
 0x28a   :  { %v890_v11 = vld [vmem:[#allocation5 + $0x378] sm:$0xff]  ;;  %v952_v37 = vld [vmem:[#allocation5 + $0x568] sm:$0xff] }
 0x28b   :  { %v5174_v0 = vld.sshfl [vmem:[#allocation1] sm:$0xff pattern:$0x73625140]  ;;  %v5176_v21 = vld.sshfl [vmem:[#allocation1 + $0x8] sm:$0xff pattern:$0x73625140] }
 0x28c   :  { %1229 = vmatmul.f32.vlgmr.msrb.gmra.mxu3 %v5174_v0  ;;  %1255 = vmatmul.f32.vlgmr.msra.gmra.mxu0 %v5176_v21  ;;  %v5184_v53 = vld.sshfl [vmem:[#allocation1 + $0x10] sm:$0xff pattern:$0x73625140]  ;;  %v5186_v25 = vld.sshfl [vmem:[#allocation1 + $0x18] sm:$0xff pattern:$0x73625140] }
 0x28d   :  { %1281 = vmatmul.f32.vlgmr.msra.gmra.mxu1 %v5184_v53  ;;  %1307 = vmatmul.f32.vlgmr.msra.gmra.mxu2 %v5186_v25  ;;  %1171 = vst [vmem:[#allocation1] ss:$4 sm:$0xff] %v1123_v17  ;;  %v6658_v17 = vld [vmem:[#allocation25_spill] sm:$0xff]  ;;  %v954_v27 = vld [vmem:[#allocation5 + $0x578] sm:$0xff] }
 0x28e   :  { %1172 = vst [vmem:[#allocation1 + $0x1] ss:$4 sm:$0xff] %v1127_v47  ;;  %1421 = vmatpush.msrb.mxu3 %v874_v62  ;;  %1447 = vmatpush.msra.mxu0 %v906_v54  ;;  %v1084_v62 = vrot.slane %v6655_v4, 6  ;;  %v1137_v54 = vsel %vm523_vm4, %v6656_v14, %v1097_v40  ;;  %v1088_v24 = vrot.slane %v6658_v17, 6  ;;  %v860_v47 = vld [vmem:[#allocation5 + $0x288] sm:$0xff]  ;;  %v854_v59 = vld [vmem:[#allocation5 + $0x258] sm:$0xff] }
 0x28f   :  { %1173 = vst [vmem:[#allocation1 + $0x2] ss:$4 sm:$0xff] %v1131_v41  ;;  %1473 = vmatpush.msra.mxu1 %v938_v34  ;;  %1499 = vmatpush.msra.mxu2 %v970_v38  ;;  %v1139_v55 = vsel %vm359_vm0, %v1137_v54, %v1138_v23  ;;  %v6659_v41 = vld [vmem:[#allocation26_spill] sm:$0xff]  ;;  %v852_v23 = vld [vmem:[#allocation5 + $0x248] sm:$0xff] }
 0x290   :  { %1174 = vst [vmem:[#allocation1 + $0x3] ss:$4 sm:$0xff] %v1135_v5  ;;  %1422 = vmatpush.msrb.mxu3 %v872_v22  ;;  %1448 = vmatpush.msra.mxu0 %v904_v30  ;;  %v862_v22 = vld [vmem:[#allocation5 + $0x298] sm:$0xff]  ;;  %v1128_v43 = vsel %vm523_vm4, %v6661_v33, %v1088_v24  ;;  %v948_v51 = vld [vmem:[#allocation5 + $0x548] sm:$0xff]  ;;  %v1590_v24 = vld [vmem:[#allocation7 + $0x1e0] sm:$0xff] }
 0x291   :  { %1474 = vmatpush.msra.mxu1 %v936_v56  ;;  %1500 = vmatpush.msra.mxu2 %v968_v42  ;;  %v894_v30 = vld [vmem:[#allocation5 + $0x398] sm:$0xff]  ;;  %v892_v56 = vld [vmem:[#allocation5 + $0x388] sm:$0xff]  ;;  %v1132_v42 = vsel %vm523_vm4, %v6659_v41, %v1092_v45  ;;  %v1538_v33 = vld [vmem:[#allocation7 + $0x40] sm:$0xff] }
 0x292   :  { %1423 = vmatpush.msrb.mxu3 %v870_v61  ;;  %1449 = vmatpush.msra.mxu0 %v902_v6  ;;  %v5242_v5 = vld.sshfl [vmem:[#allocation1 + $0x20] sm:$0xff pattern:$0x73625140]  ;;  %v5244_v61 = vld.sshfl [vmem:[#allocation1 + $0x28] sm:$0xff pattern:$0x73625140] }
 0x293   :  { %1475 = vmatpush.msra.mxu1 %v934_v63  ;;  %1501 = vmatpush.msra.mxu2 %v966_v20  ;;  %1177 = vst [vmem:[#allocation1 + $0x22] ss:$4 sm:$0xff] %v1132_v42  ;;  %v924_v6 = vld [vmem:[#allocation5 + $0x488] sm:$0xff]  ;;  %v6660_v63 = vld [vmem:[#allocation22_spill] sm:$0xff]  ;;  %v1582_v42 = vld [vmem:[#allocation7 + $0x1a0] sm:$0xff] }
 0x294   :  { %1424 = vmatpush.msrb.mxu3 %v868_v48  ;;  %1450 = vmatpush.msra.mxu0 %v900_v36  ;;  %v1124_v20 = vsel %vm523_vm4, %v6660_v63, %v1084_v62  ;;  %v1136_v48 = vsel %vm523_vm4, %v5142_v3, %v1096_v28  ;;  %1176 = vst [vmem:[#allocation1 + $0x21] ss:$4 sm:$0xff] %v1128_v43  ;;  %v922_v36 = vld [vmem:[#allocation5 + $0x478] sm:$0xff]  ;;  %v916_v45 = vld [vmem:[#allocation5 + $0x448] sm:$0xff]  ;;  %v1562_v63 = vld [vmem:[#allocation7 + $0x100] sm:$0xff] }
 0x295   :  { %1476 = vmatpush.msra.mxu1 %v932_v31  ;;  %1502 = vmatpush.msra.mxu2 %v964_v9  ;;  %1175 = vst [vmem:[#allocation1 + $0x20] ss:$4 sm:$0xff] %v1124_v20  ;;  %v888_v31 = vld [vmem:[#allocation5 + $0x368] sm:$0xff]  ;;  %v850_v4 = vld [vmem:[#allocation5 + $0x238] sm:$0xff]  ;;  %v1558_v20 = vld [vmem:[#allocation7 + $0xe0] sm:$0xff] }
 0x296   :  { %1425 = vmatpush.msrb.mxu3 %v866_v29  ;;  %1451 = vmatpush.msra.mxu0 %v898_v15  ;;  %1178 = vst [vmem:[#allocation1 + $0x23] ss:$4 sm:$0xff] %v1136_v48  ;;  %v920_v9 = vld [vmem:[#allocation5 + $0x468] sm:$0xff]  ;;  %v886_v15 = vld [vmem:[#allocation5 + $0x358] sm:$0xff]  ;;  %v1650_v43 = vld [vmem:[#allocation7 + $0x3c0] sm:$0xff] }
 0x297   :  { %v5222_v34 = vld.sshfl [vmem:[#allocation1] sm:$0xff pattern:$0x73625140]  ;;  %v5224_v38 = vld.sshfl [vmem:[#allocation1 + $0x8] sm:$0xff pattern:$0x73625140]  ;;  %1477 = vmatpush.msra.mxu1 %v930_v10  ;;  %1503 = vmatpush.msra.mxu2 %v962_v18 }
 0x298   :  { %1232 = vmatmul.f32.gmra.mxu3 %v5222_v34  ;;  %1258 = vmatmul.f32.gmra.mxu0 %v5224_v38  ;;  %v5231_v50 = vld.sshfl [vmem:[#allocation1 + $0x10] sm:$0xff pattern:$0x73625140]  ;;  %v5233_v8 = vld.sshfl [vmem:[#allocation1 + $0x18] sm:$0xff pattern:$0x73625140] }
 0x299   :  { %1284 = vmatmul.f32.gmra.mxu1 %v5231_v50  ;;  %1310 = vmatmul.f32.gmra.mxu2 %v5233_v8  ;;  %1185 = vst [vmem:[#allocation1] ss:$4 sm:$0xff] %v1139_v55  ;;  %v918_v10 = vld [vmem:[#allocation5 + $0x458] sm:$0xff]  ;;  %v848_v54 = vld [vmem:[#allocation5 + $0x228] sm:$0xff]  ;;  %v1646_v48 = vld [vmem:[#allocation7 + $0x3a0] sm:$0xff] }
 0x29a   :  { %1186 = vst [vmem:[#allocation1 + $0x1] ss:$4 sm:$0xff] %v1143_v60  ;;  %1426 = vmatpush.msrb.mxu3 %v864_v2  ;;  %1452 = vmatpush.msra.mxu0 %v896_v32  ;;  %v950_v18 = vld [vmem:[#allocation5 + $0x558] sm:$0xff]  ;;  %v884_v2 = vld [vmem:[#allocation5 + $0x348] sm:$0xff]  ;;  %v1144_v32 = vsel %vm523_vm4, %v5193_v49, %v1104_v46 }
 0x29b   :  { %1478 = vmatpush.msra.mxu1 %v928_v58  ;;  %1504 = vmatpush.msra.mxu2 %v960_v13  ;;  %v882_v62 = vld [vmem:[#allocation5 + $0x338] sm:$0xff]  ;;  %v880_v55 = vld [vmem:[#allocation5 + $0x328] sm:$0xff] }
 0x29c   :  { %1427 = vmatpush.msrb.mxu3 %v862_v22  ;;  %1453 = vmatpush.msra.mxu0 %v894_v30  ;;  %v914_v49 = vld [vmem:[#allocation5 + $0x438] sm:$0xff]  ;;  %v912_v19 = vld [vmem:[#allocation5 + $0x428] sm:$0xff] }
 0x29d   :  { %1479 = vmatpush.msra.mxu1 %v926_v52  ;;  %1505 = vmatpush.msra.mxu2 %v958_v44  ;;  %v5268_v58 = vld.sshfl [vmem:[#allocation1 + $0x20] sm:$0xff pattern:$0x73625140]  ;;  %v5270_v13 = vld.sshfl [vmem:[#allocation1 + $0x28] sm:$0xff pattern:$0x73625140] }
 0x29e   :  { %1428 = vmatpush.msrb.mxu3 %v860_v47  ;;  %1454 = vmatpush.msra.mxu0 %v892_v56  ;;  %1188 = vst [vmem:[#allocation1 + $0x21] ss:$4 sm:$0xff] %v1144_v32  ;;  %v946_v14 = vld [vmem:[#allocation5 + $0x538] sm:$0xff]  ;;  %v944_v39 = vld [vmem:[#allocation5 + $0x528] sm:$0xff]  ;;  %v1586_v44 = vld [vmem:[#allocation7 + $0x1c0] sm:$0xff] }
 0x29f   :  { %1480 = vmatpush.msra.mxu1 %v924_v6  ;;  %1506 = vmatpush.msra.mxu2 %v956_v26  ;;  %1187 = vst [vmem:[#allocation1 + $0x20] ss:$4 sm:$0xff] %v1140_v1  ;;  %v846_v57 = vld [vmem:[#allocation5 + $0x218] sm:$0xff]  ;;  %v908_v52 = vld [vmem:[#allocation5 + $0x408] sm:$0xff]  ;;  %v1570_v6 = vld [vmem:[#allocation7 + $0x140] sm:$0xff] }
 0x2a0   :  { %1429 = vmatpush.msrb.mxu3 %v858_v7  ;;  %1455 = vmatpush.msra.mxu0 %v890_v11  ;;  %v878_v60 = vld [vmem:[#allocation5 + $0x318] sm:$0xff]  ;;  %v940_v17 = vld [vmem:[#allocation5 + $0x508] sm:$0xff]  ;;  %v1566_v26 = vld [vmem:[#allocation7 + $0x120] sm:$0xff] }
 0x2a1   :  { %v5253_v40 = vld.sshfl [vmem:[#allocation1] sm:$0xff pattern:$0x73625140]  ;;  %v5255_v12 = vld.sshfl [vmem:[#allocation1 + $0x8] sm:$0xff pattern:$0x73625140]  ;;  %1481 = vmatpush.msra.mxu1 %v922_v36  ;;  %1507 = vmatpush.msra.mxu2 %v954_v27 }
 0x2a2   :  { %1235 = vmatmul.f32.gmra.mxu3 %v5253_v40  ;;  %1261 = vmatmul.f32.gmra.mxu0 %v5255_v12  ;;  %v5259_v3 = vld.sshfl [vmem:[#allocation1 + $0x10] sm:$0xff pattern:$0x73625140]  ;;  %v5261_v29 = vld.sshfl [vmem:[#allocation1 + $0x18] sm:$0xff pattern:$0x73625140] }
 0x2a3   :  { %1287 = vmatmul.f32.gmra.mxu1 %v5259_v3  ;;  %1313 = vmatmul.f32.gmra.mxu2 %v5261_v29  ;;  %v910_v22 = vld [vmem:[#allocation5 + $0x418] sm:$0xff]  ;;  %v1591_v47 = vld [vmem:[#allocation7 + $0x1e8] sm:$0xff]  ;;  %v1534_v11 = vld [vmem:[#allocation7 + $0x20] sm:$0xff] }
 0x2a4   :  { %1430 = vmatpush.msrb.mxu3 %v856_v35  ;;  %1456 = vmatpush.msra.mxu0 %v888_v31  ;;  %v942_v30 = vld [vmem:[#allocation5 + $0x518] sm:$0xff]  ;;  %v1587_v56 = vld [vmem:[#allocation7 + $0x1c8] sm:$0xff]  ;;  %v1530_v27 = vld [vmem:[#allocation7] sm:$0xff] }
 0x2a5   :  { %1482 = vmatpush.msra.mxu1 %v920_v9  ;;  %1508 = vmatpush.msra.mxu2 %v952_v37  ;;  %v1579_v7 = vld [vmem:[#allocation7 + $0x188] sm:$0xff]  ;;  %v1642_v35 = vld [vmem:[#allocation7 + $0x380] sm:$0xff]  ;;  %v1592_v31 = vld [vmem:[#allocation7 + $0x1f0] sm:$0xff] }
 0x2a6   :  { %1431 = vmatpush.msrb.mxu3 %v854_v59  ;;  %1457 = vmatpush.msra.mxu0 %v886_v15  ;;  %v1193_v28 = vld.sshfl [vmem:[#allocation1 + $0x20] sm:$0xff pattern:$0x73625140]  ;;  %v1194_v41 = vld.sshfl [vmem:[#allocation1 + $0x28] sm:$0xff pattern:$0x73625140] }
 0x2a7   :  { %1483 = vmatpush.msra.mxu1 %v918_v10  ;;  %1509 = vmatpush.msra.mxu2 %v950_v18  ;;  %v1575_v36 = vld [vmem:[#allocation7 + $0x168] sm:$0xff]  ;;  %v1638_v9 = vld [vmem:[#allocation7 + $0x360] sm:$0xff]  ;;  %v1568_v1 = vld [vmem:[#allocation7 + $0x130] sm:$0xff] }
 0x2a8   :  { %1432 = vmatpush.msrb.mxu3 %v852_v23  ;;  %1458 = vmatpush.msra.mxu0 %v884_v2  ;;  %v1571_v46 = vld [vmem:[#allocation7 + $0x148] sm:$0xff]  ;;  %v1630_v59 = vld [vmem:[#allocation7 + $0x320] sm:$0xff]  ;;  %v1576_v23 = vld [vmem:[#allocation7 + $0x170] sm:$0xff] }
 0x2a9   :  { %1484 = vmatpush.msra.mxu1 %v916_v45  ;;  %1510 = vmatpush.msra.mxu2 %v948_v51  ;;  %v1567_v37 = vld [vmem:[#allocation7 + $0x128] sm:$0xff]  ;;  %v1626_v10 = vld [vmem:[#allocation7 + $0x300] sm:$0xff]  ;;  %v1572_v51 = vld [vmem:[#allocation7 + $0x150] sm:$0xff] }
 0x2aa   :  { %1333 = vmatmul.f32.vlgmr.msra.gmra.mxu3 %v5242_v5  ;;  %1359 = vmatmul.f32.vlgmr.msrb.gmra.mxu0 %v5244_v61  ;;  %v1559_v15 = vld [vmem:[#allocation7 + $0xe8] sm:$0xff]  ;;  %v1622_v2 = vld [vmem:[#allocation7 + $0x2e0] sm:$0xff] }
 0x2ab   :  { %1385 = vmatmul.f32.vlgmr.msrb.gmra.mxu1 %v5174_v0  ;;  %1411 = vmatmul.f32.vlgmr.msrb.gmra.mxu2 %v5176_v21  ;;  %v844_v0 = vld [vmem:[#allocation5 + $0x208] sm:$0xff] }
 0x2ac   :  { %1433 = vmatpush.msrb.mxu3 %v850_v4  ;;  %1459 = vmatpush.msra.mxu0 %v882_v62  ;;  %v876_v21 = vld [vmem:[#allocation5 + $0x308] sm:$0xff]  ;;  %v1614_v62 = vld [vmem:[#allocation7 + $0x2a0] sm:$0xff] }
 0x2ad   :  { %1485 = vmatpush.msra.mxu1 %v914_v49  ;;  %1511 = vmatpush.msra.mxu2 %v946_v14  ;;  %v1555_v18 = vld [vmem:[#allocation7 + $0xc8] sm:$0xff]  ;;  %v1564_v14 = vld [vmem:[#allocation7 + $0x110] sm:$0xff] }
 0x2ae   :  { %1434 = vmatpush.msrb.mxu3 %v848_v54  ;;  %1460 = vmatpush.msra.mxu0 %v880_v55  ;;  %v1551_v45 = vld [vmem:[#allocation7 + $0xa8] sm:$0xff] }
 0x2af   :  { %1486 = vmatpush.msra.mxu1 %v912_v19  ;;  %1512 = vmatpush.msra.mxu2 %v944_v39  ;;  %v1655_v32 = vld [vmem:[#allocation7 + $0x3e8] sm:$0xff]  ;;  %v1610_v39 = vld [vmem:[#allocation7 + $0x280] sm:$0xff] }
 0x2b0   :  { %1435 = vmatpush.msrb.mxu3 %v846_v57  ;;  %1461 = vmatpush.msra.mxu0 %v878_v60  ;;  %v1651_v4 = vld [vmem:[#allocation7 + $0x3c8] sm:$0xff]  ;;  %v1560_v60 = vld [vmem:[#allocation7 + $0xf0] sm:$0xff] }
 0x2b1   :  { %1487 = vmatpush.msra.mxu1 %v910_v22  ;;  %1513 = vmatpush.msra.mxu2 %v942_v30  ;;  %v1543_v49 = vld [vmem:[#allocation7 + $0x68] sm:$0xff]  ;;  %v1606_v30 = vld [vmem:[#allocation7 + $0x260] sm:$0xff] }
 0x2b2   :  { %1336 = vmatmul.f32.gmra.mxu3 %v5268_v58  ;;  %1362 = vmatmul.f32.gmra.mxu0 %v5270_v13  ;;  %v1647_v19 = vld [vmem:[#allocation7 + $0x3a8] sm:$0xff] }
 0x2b3   :  { %1388 = vmatmul.f32.gmra.mxu1 %v5222_v34  ;;  %1414 = vmatmul.f32.gmra.mxu2 %v5224_v38  ;;  %v1578_v34 = vld [vmem:[#allocation7 + $0x180] sm:$0xff]  ;;  %v1539_v57 = vld [vmem:[#allocation7 + $0x48] sm:$0xff] }
 0x2b4   :  { %1436 = vmatpush.msrb.mxu3 %v844_v0  ;;  %1462 = vmatpush.msra.mxu0 %v876_v21  ;;  %v1574_v38 = vld [vmem:[#allocation7 + $0x160] sm:$0xff]  ;;  %v1643_v22 = vld [vmem:[#allocation7 + $0x388] sm:$0xff]  ;;  %v1556_v21 = vld [vmem:[#allocation7 + $0xd0] sm:$0xff] }
 0x2b5   :  { %1488 = vmatpush.msra.mxu1 %v908_v52  ;;  %1514 = vmatpush.msra.mxu2 %v940_v17  ;;  %v1535_v0 = vld [vmem:[#allocation7 + $0x28] sm:$0xff]  ;;  %v1602_v17 = vld [vmem:[#allocation7 + $0x240] sm:$0xff] }
 0x2b6   :  { %1668 = vmatpush.msra.mxu3 %v1590_v24  ;;  %v1639_v52 = vld [vmem:[#allocation7 + $0x368] sm:$0xff] }
 0x2b7   :  { %1720 = vmatpush.msrb.mxu1 %v1591_v47  ;;  %1746 = vmatpush.msrb.mxu2 %v1655_v32  ;;  %v1531_v24 = vld [vmem:[#allocation7 + $0x8] sm:$0xff]  ;;  %v1561_v32 = vld [vmem:[#allocation7 + $0xf8] sm:$0xff] }
 0x2b8   :  { %1669 = vmatpush.msra.mxu3 %v1586_v44  ;;  %v1552_v44 = vld [vmem:[#allocation7 + $0xb0] sm:$0xff]  ;;  %v1635_v47 = vld [vmem:[#allocation7 + $0x348] sm:$0xff] }
 0x2b9   :  { %1721 = vmatpush.msrb.mxu1 %v1587_v56  ;;  %1747 = vmatpush.msrb.mxu2 %v1651_v4  ;;  %v1593_v56 = vld [vmem:[#allocation7 + $0x1f8] sm:$0xff] }
 0x2ba   :  { %1339 = vmatmul.f32.gmra.mxu3 %v1193_v28  ;;  %1365 = vmatmul.f32.gmra.mxu0 %v1194_v41 }
 0x2bb   :  { %1391 = vmatmul.f32.gmra.mxu1 %v5253_v40  ;;  %1417 = vmatmul.f32.gmra.mxu2 %v5255_v12  ;;  %v1588_v40 = vld [vmem:[#allocation7 + $0x1d0] sm:$0xff]  ;;  %v1634_v12 = vld [vmem:[#allocation7 + $0x340] sm:$0xff] }
 0x2bc   :  { %1670 = vmatpush.msra.mxu3 %v1582_v42  ;;  %1748 = vmatpush.msrb.mxu2 %v1647_v19  ;;  %v1548_v42 = vld [vmem:[#allocation7 + $0x90] sm:$0xff]  ;;  %v1553_v19 = vld [vmem:[#allocation7 + $0xb8] sm:$0xff] }
 0x2be   :  { %1671 = vmatpush.msra.mxu3 %v1578_v34  ;;  %1749 = vmatpush.msrb.mxu2 %v1643_v22 }
 0x2c0   :  { %1672 = vmatpush.msra.mxu3 %v1574_v38  ;;  %1750 = vmatpush.msrb.mxu2 %v1639_v52  ;;  %v1631_v38 = vld [vmem:[#allocation7 + $0x328] sm:$0xff] }
 0x2c2   :  { %1437 = vmatmul.f32.vlgmr.msrb.gmra.mxu3 %v5184_v53  ;;  %1463 = vmatmul.f32.vlgmr.msra.gmra.mxu0 %v5186_v25  ;;  %v1554_v53 = vld [vmem:[#allocation7 + $0xc0] sm:$0xff] }
 0x2c3   :  { %1489 = vmatmul.f32.vlgmr.msra.gmra.mxu1 %v5242_v5  ;;  %1515 = vmatmul.f32.vlgmr.msra.gmra.mxu2 %v5244_v61  ;;  %v1550_v25 = vld [vmem:[#allocation7 + $0xa0] sm:$0xff] }
 0x2c4   :  { %1673 = vmatpush.msra.mxu3 %v1570_v6  ;;  %v1546_v5 = vld [vmem:[#allocation7 + $0x80] sm:$0xff]  ;;  %v1589_v6 = vld [vmem:[#allocation7 + $0x1d8] sm:$0xff]  ;;  %1751 = vmatpush.msrb.mxu2 %v1635_v47 }
 0x2c5   :  { %v1654_v61 = vld [vmem:[#allocation7 + $0x3e0] sm:$0xff] }
 0x2c6   :  { %1674 = vmatpush.msra.mxu3 %v1566_v26  ;;  %1694 = vmatpush.msrb.mxu0 %v1654_v61  ;;  %v1594_v26 = vld [vmem:[#allocation7 + $0x200] sm:$0xff] }
 0x2c7   :  { %1752 = vmatpush.msrb.mxu2 %v1631_v38  ;;  %v1608_v38 = vld [vmem:[#allocation7 + $0x270] sm:$0xff] }
 0x2c8   :  { %1675 = vmatpush.msra.mxu3 %v1562_v63  ;;  %1695 = vmatpush.msrb.mxu0 %v1650_v43  ;;  %v1544_v63 = vld [vmem:[#allocation7 + $0x70] sm:$0xff]  ;;  %v1581_v43 = vld [vmem:[#allocation7 + $0x198] sm:$0xff] }
 0x2ca   :  { %1440 = vmatmul.f32.gmra.mxu3 %v5231_v50  ;;  %1466 = vmatmul.f32.gmra.mxu0 %v5233_v8  ;;  %v1542_v50 = vld [vmem:[#allocation7 + $0x60] sm:$0xff]  ;;  %v1583_v8 = vld [vmem:[#allocation7 + $0x1a8] sm:$0xff] }
 0x2cb   :  { %1492 = vmatmul.f32.gmra.mxu1 %v5268_v58  ;;  %1518 = vmatmul.f32.gmra.mxu2 %v5270_v13  ;;  %v1618_v58 = vld [vmem:[#allocation7 + $0x2c0] sm:$0xff]  ;;  %v1547_v13 = vld [vmem:[#allocation7 + $0x88] sm:$0xff] }
 0x2cc   :  { %1676 = vmatpush.msra.mxu3 %v1558_v20  ;;  %1722 = vmatpush.msrb.mxu1 %v1583_v8  ;;  %v1627_v20 = vld [vmem:[#allocation7 + $0x308] sm:$0xff] }
 0x2cd   :  { %1696 = vmatpush.msrb.mxu0 %v1646_v48  ;;  %v1623_v8 = vld [vmem:[#allocation7 + $0x2e8] sm:$0xff]  ;;  %1753 = vmatpush.msrb.mxu2 %v1627_v20  ;;  %v1648_v48 = vld [vmem:[#allocation7 + $0x3b0] sm:$0xff]  ;;  %v1641_v20 = vld [vmem:[#allocation7 + $0x378] sm:$0xff] }
 0x2ce   :  { %1677 = vmatpush.msra.mxu3 %v1554_v53  ;;  %1723 = vmatpush.msrb.mxu1 %v1579_v7  ;;  %v1656_v53 = vld [vmem:[#allocation7 + $0x3f0] sm:$0xff] }
 0x2cf   :  { %1697 = vmatpush.msrb.mxu0 %v1642_v35  ;;  %v1536_v7 = vld [vmem:[#allocation7 + $0x30] sm:$0xff]  ;;  %1754 = vmatpush.msrb.mxu2 %v1623_v8  ;;  %v1990_v8 = vld [vmem:[#allocation10 + $0x1e0] sm:$0xff] }
 0x2d0   :  { %1678 = vmatpush.msra.mxu3 %v1550_v25  ;;  %1724 = vmatpush.msrb.mxu1 %v1575_v36  ;;  %v5309_v36 = vld [vmem:[%s6518_s6] sm:$0x3]  ;;  %v1532_v35 = vld [vmem:[#allocation7 + $0x10] sm:$0xff] }
 0x2d1   :  { %1698 = vmatpush.msrb.mxu0 %v1638_v9 }
 0x2d2   :  { %1443 = vmatmul.f32.gmra.mxu3 %v5259_v3  ;;  %1469 = vmatmul.f32.gmra.mxu0 %v5261_v29  ;;  %v1563_v3 = vld [vmem:[#allocation7 + $0x108] sm:$0xff]  ;;  %v1584_v29 = vld [vmem:[#allocation7 + $0x1b0] sm:$0xff] }
 0x2d3   :  { %1495 = vmatmul.f32.gmra.mxu1 %v1193_v28  ;;  %1521 = vmatmul.f32.gmra.mxu2 %v1194_v41  ;;  %v1598_v41 = vld [vmem:[#allocation7 + $0x220] sm:$0xff] }
 0x2d4   :  { %1679 = vmatpush.msra.mxu3 %v1546_v5  ;;  %1725 = vmatpush.msrb.mxu1 %v1571_v46  ;;  %v1585_v5 = vld [vmem:[#allocation7 + $0x1b8] sm:$0xff]  ;;  %v1615_v46 = vld [vmem:[#allocation7 + $0x2a8] sm:$0xff] }
 0x2d5   :  { %1699 = vmatpush.msrb.mxu0 %v1634_v12 }
 0x2d6   :  { %1680 = vmatpush.msra.mxu3 %v1542_v50  ;;  %1726 = vmatpush.msrb.mxu1 %v1567_v37  ;;  %v1540_v50 = vld [vmem:[#allocation7 + $0x50] sm:$0xff]  ;;  %v1573_v37 = vld [vmem:[#allocation7 + $0x158] sm:$0xff] }
 0x2d7   :  { %1700 = vmatpush.msrb.mxu0 %v1630_v59  ;;  %v1569_v59 = vld [vmem:[#allocation7 + $0x138] sm:$0xff] }
 0x2d8   :  { %1681 = vmatpush.msra.mxu3 %v1538_v33  ;;  %1727 = vmatpush.msrb.mxu1 %v1563_v3  ;;  %v1652_v33 = vld [vmem:[#allocation7 + $0x3d0] sm:$0xff]  ;;  %v1611_v3 = vld [vmem:[#allocation7 + $0x288] sm:$0xff] }
 0x2d9   :  { %1701 = vmatpush.msrb.mxu0 %v1626_v10 }
 0x2da   :  { %1682 = vmatpush.msra.mxu3 %v1534_v11  ;;  %1728 = vmatpush.msrb.mxu1 %v1559_v15  ;;  %v1619_v11 = vld [vmem:[#allocation7 + $0x2c8] sm:$0xff] }
 0x2db   :  { %1702 = vmatpush.msrb.mxu0 %v1622_v2  ;;  %1755 = vmatpush.msrb.mxu2 %v1619_v11  ;;  %v1607_v15 = vld [vmem:[#allocation7 + $0x268] sm:$0xff]  ;;  %v1600_v11 = vld [vmem:[#allocation7 + $0x230] sm:$0xff] }
 0x2dc   :  { %1683 = vmatpush.msra.mxu3 %v1530_v27  ;;  %1729 = vmatpush.msrb.mxu1 %v1555_v18  ;;  %v1577_v27 = vld [vmem:[#allocation7 + $0x178] sm:$0xff] }
 0x2dd   :  { %1703 = vmatpush.msrb.mxu0 %v1618_v58  ;;  %1756 = vmatpush.msrb.mxu2 %v1615_v46  ;;  %v1565_v18 = vld [vmem:[#allocation7 + $0x118] sm:$0xff]  ;;  %v1599_v58 = vld [vmem:[#allocation7 + $0x228] sm:$0xff] }
 0x2de   :  { %1772 = vmatpush.msrb.mxu3 %v1592_v31  ;;  %1730 = vmatpush.msrb.mxu1 %v1551_v45  ;;  %v1644_v31 = vld [vmem:[#allocation7 + $0x390] sm:$0xff]  ;;  %v1603_v45 = vld [vmem:[#allocation7 + $0x248] sm:$0xff] }
 0x2df   :  { %1704 = vmatpush.msrb.mxu0 %v1614_v62  ;;  %1757 = vmatpush.msrb.mxu2 %v1611_v3  ;;  %v1595_v62 = vld [vmem:[#allocation7 + $0x208] sm:$0xff]  ;;  %v1988_v3 = vld [vmem:[#allocation10 + $0x1d0] sm:$0xff] }
 0x2e0   :  { %1773 = vmatpush.msrb.mxu3 %v1588_v40  ;;  %1731 = vmatpush.msrb.mxu1 %v1547_v13  ;;  %v5312_v40 = vperm.slane %v5309_v36, 0  ;;  %v1628_v13 = vld [vmem:[#allocation7 + $0x310] sm:$0xff] }
 0x2e1   :  { %1705 = vmatpush.msrb.mxu0 %v1610_v39  ;;  %1758 = vmatpush.msrb.mxu2 %v1607_v15  ;;  %v1657_v39 = vld [vmem:[#allocation7 + $0x3f8] sm:$0xff]  ;;  %v1981_v15 = vld [vmem:[#allocation10 + $0x180] sm:$0xff] }
 0x2e2   :  { %1774 = vmatpush.msrb.mxu3 %v1584_v29  ;;  %1732 = vmatpush.msrb.mxu1 %v1543_v49  ;;  %v1640_v29 = vld [vmem:[#allocation7 + $0x370] sm:$0xff] }
 0x2e3   :  { %1706 = vmatpush.msrb.mxu0 %v1606_v30  ;;  %1759 = vmatpush.msrb.mxu2 %v1603_v45  ;;  %v1624_v49 = vld [vmem:[#allocation7 + $0x2f0] sm:$0xff]  ;;  %v1549_v30 = vld [vmem:[#allocation7 + $0x98] sm:$0xff] }
 0x2e4   :  { %1775 = vmatpush.msrb.mxu3 %v1580_v16  ;;  %1733 = vmatpush.msrb.mxu1 %v1539_v57  ;;  %v1636_v16 = vld [vmem:[#allocation7 + $0x350] sm:$0xff] }
 0x2e5   :  { %1707 = vmatpush.msrb.mxu0 %v1602_v17  ;;  %1760 = vmatpush.msrb.mxu2 %v1599_v58  ;;  %v1616_v17 = vld [vmem:[#allocation7 + $0x2b0] sm:$0xff]  ;;  %v1621_v58 = vld [vmem:[#allocation7 + $0x2d8] sm:$0xff] }
 0x2e6   :  { %1776 = vmatpush.msrb.mxu3 %v1576_v23  ;;  %1734 = vmatpush.msrb.mxu1 %v1535_v0  ;;  %v1653_v0 = vld [vmem:[#allocation7 + $0x3d8] sm:$0xff] }
 0x2e7   :  { %1708 = vmatpush.msrb.mxu0 %v1598_v41  ;;  %1761 = vmatpush.msrb.mxu2 %v1595_v62  ;;  %v1617_v62 = vld [vmem:[#allocation7 + $0x2b8] sm:$0xff] }
 0x2e8   :  { %1777 = vmatpush.msrb.mxu3 %v1572_v51  ;;  %1735 = vmatpush.msrb.mxu1 %v1531_v24  ;;  %v1632_v51 = vld [vmem:[#allocation7 + $0x330] sm:$0xff]  ;;  %v1545_v24 = vld [vmem:[#allocation7 + $0x78] sm:$0xff] }
 0x2e9   :  { %1709 = vmatpush.msrb.mxu0 %v1594_v26  ;;  %1850 = vmatpush.msra.mxu2 %v1657_v39 }
 0x2ea   :  { %1778 = vmatpush.msrb.mxu3 %v1568_v1  ;;  %1824 = vmatpush.msra.mxu1 %v1593_v56  ;;  %v1557_v1 = vld [vmem:[#allocation7 + $0xd8] sm:$0xff] }
 0x2eb   :  { %1798 = vmatpush.msra.mxu0 %v1656_v53  ;;  %1851 = vmatpush.msra.mxu2 %v1653_v0  ;;  %v1604_v53 = vld [vmem:[#allocation7 + $0x250] sm:$0xff] }
 0x2ec   :  { %1779 = vmatpush.msrb.mxu3 %v1564_v14  ;;  %1825 = vmatpush.msra.mxu1 %v1589_v6  ;;  %v1537_v6 = vld [vmem:[#allocation7 + $0x38] sm:$0xff]  ;;  %v1976_v0 = vld [vmem:[#allocation10 + $0x150] sm:$0xff] }
 0x2ed   :  { %1799 = vmatpush.msra.mxu0 %v1652_v33  ;;  %v1533_v33 = vld [vmem:[#allocation7 + $0x18] sm:$0xff] }
 0x2ee   :  { %1780 = vmatpush.msrb.mxu3 %v1560_v60  ;;  %1826 = vmatpush.msra.mxu1 %v1585_v5  ;;  %v1620_v60 = vld [vmem:[#allocation7 + $0x2d0] sm:$0xff] }
 0x2ef   :  { %1800 = vmatpush.msra.mxu0 %v1648_v48  ;;  %v1987_v48 = vld [vmem:[#allocation10 + $0x1c0] sm:$0xff] }
 0x2f0   :  { %1781 = vmatpush.msrb.mxu3 %v1556_v21  ;;  %1827 = vmatpush.msra.mxu1 %v1581_v43 }
 0x2f1   :  { %1801 = vmatpush.msra.mxu0 %v1644_v31  ;;  %v1984_v31 = vld [vmem:[#allocation10 + $0x1a0] sm:$0xff] }
 0x2f2   :  { %1782 = vmatpush.msrb.mxu3 %v1552_v44  ;;  %1828 = vmatpush.msra.mxu1 %v1577_v27  ;;  %v1649_v44 = vld [vmem:[#allocation7 + $0x3b8] sm:$0xff]  ;;  %v1991_v27 = vld [vmem:[#allocation10 + $0x1f0] sm:$0xff] }
 0x2f3   :  { %1802 = vmatpush.msra.mxu0 %v1640_v29  ;;  %1852 = vmatpush.msra.mxu2 %v1649_v44 }
 0x2f4   :  { %1783 = vmatpush.msrb.mxu3 %v1548_v42  ;;  %1829 = vmatpush.msra.mxu1 %v1573_v37  ;;  %v1645_v42 = vld [vmem:[#allocation7 + $0x398] sm:$0xff] }
 0x2f5   :  { %1803 = vmatpush.msra.mxu0 %v1636_v16  ;;  %1853 = vmatpush.msra.mxu2 %v1645_v42  ;;  %v1985_v16 = vld [vmem:[#allocation10 + $0x1b0] sm:$0xff]  ;;  %v1957_v42 = vld [vmem:[#allocation10 + $0x80] sm:$0xff] }
 0x2f6   :  { %1784 = vmatpush.msrb.mxu3 %v1544_v63  ;;  %1830 = vmatpush.msra.mxu1 %v1569_v59 }
 0x2f7   :  { %1804 = vmatpush.msra.mxu0 %v1632_v51  ;;  %1854 = vmatpush.msra.mxu2 %v1641_v20  ;;  %v1982_v51 = vld [vmem:[#allocation10 + $0x190] sm:$0xff]  ;;  %v1954_v20 = vld [vmem:[#allocation10 + $0x60] sm:$0xff] }
 0x2f8   :  { %1785 = vmatpush.msrb.mxu3 %v1540_v50  ;;  %1831 = vmatpush.msra.mxu1 %v1565_v18  ;;  %v1978_v18 = vld [vmem:[#allocation10 + $0x160] sm:$0xff] }
 0x2f9   :  { %1805 = vmatpush.msra.mxu0 %v1628_v13 }
 0x2fa   :  { %1786 = vmatpush.msrb.mxu3 %v1536_v7  ;;  %1832 = vmatpush.msra.mxu1 %v1561_v32  ;;  %v1637_v7 = vld [vmem:[#allocation7 + $0x358] sm:$0xff]  ;;  %v1975_v32 = vld [vmem:[#allocation10 + $0x140] sm:$0xff] }
 0x2fb   :  { %1806 = vmatpush.msra.mxu0 %v1624_v49  ;;  %1855 = vmatpush.msra.mxu2 %v1637_v7 }
 0x2fc   :  { %1787 = vmatpush.msrb.mxu3 %v1532_v35  ;;  %1833 = vmatpush.msra.mxu1 %v1557_v1 }
 0x2fd   :  { %1807 = vmatpush.msra.mxu0 %v1620_v60  ;;  %v1969_v60 = vld [vmem:[#allocation10 + $0x100] sm:$0xff] }
 0x2fe   :  { %1834 = vmatpush.msra.mxu1 %v1553_v19 }
 0x2ff   :  { %1808 = vmatpush.msra.mxu0 %v1616_v17  ;;  %v1609_v17 = vld [vmem:[#allocation7 + $0x278] sm:$0xff] }
 0x300   :  { %1835 = vmatpush.msra.mxu1 %v1549_v30  ;;  %v1966_v30 = vld [vmem:[#allocation10 + $0xe0] sm:$0xff] }
 0x302   :  { %1836 = vmatpush.msra.mxu1 %v1545_v24  ;;  %v1973_v24 = vld [vmem:[#allocation10 + $0x130] sm:$0xff] }
 0x309   :  { %v5294_v54 = vpop.f32.mrf.mxu0 }
 0x30a   :  { %v5296_v55 = vpop.f32.mrf.mxu1 }
 0x30f   :  { %v5298_v28 = vpop.f32.mrf.mxu3 }
 0x310   :  { %v5300_v34 = vpop.f32.mrf.mxu2  ;;  %v1231_v23 = vadd.f32 %v5298_v28, %v5312_v40  ;;  %v1541_v28 = vld [vmem:[#allocation7 + $0x58] sm:$0xff] }
 0x311   :  { %1837 = vmatpush.msra.mxu1 %v1541_v28 }
 0x312   :  { %v1257_v4 = vadd.f32 %v5294_v54, %v1231_v23  ;;  %v1625_v23 = vld [vmem:[#allocation7 + $0x2f8] sm:$0xff] }
 0x313   :  { %1838 = vmatpush.msra.mxu1 %v1537_v6 }
 0x314   :  { %v1283_v21 = vadd.f32 %v5296_v55, %v1257_v4  ;;  %v1612_v55 = vld [vmem:[#allocation7 + $0x290] sm:$0xff]  ;;  %v1972_v4 = vld [vmem:[#allocation10 + $0x120] sm:$0xff] }
 0x315   :  { %v5302_v25 = vpop.f32.mrf.mxu0  ;;  %1809 = vmatpush.msra.mxu0 %v1612_v55  ;;  %1839 = vmatpush.msra.mxu1 %v1533_v33 }
 0x316   :  { %v5304_v61 = vpop.f32.mrf.mxu1  ;;  %v1309_v47 = vadd.f32 %v5300_v34, %v1283_v21 }
 0x317   :  { %1810 = vmatpush.msra.mxu0 %v1608_v38  ;;  %v1601_v38 = vld [vmem:[#allocation7 + $0x238] sm:$0xff] }
 0x319   :  { %1811 = vmatpush.msra.mxu0 %v1604_v53  ;;  %v1967_v53 = vld [vmem:[#allocation10 + $0xf0] sm:$0xff] }
 0x31b   :  { %v1233_v9 = vpop.f32.mrf.mxu3  ;;  %1812 = vmatpush.msra.mxu0 %v1600_v11  ;;  %v2038_v11 = vld [vmem:[#allocation10 + $0x3e0] sm:$0xff] }
 0x31c   :  { %v5314_v12 = vpop.f32.mrf.mxu2  ;;  %v1234_v54 = vadd.f32 %v1233_v9, %v5312_v40  ;;  %v1596_v9 = vld [vmem:[#allocation7 + $0x210] sm:$0xff] }
 0x31d   :  { %1813 = vmatpush.msra.mxu0 %v1596_v9 }
 0x31e   :  { %v1260_v56 = vadd.f32 %v5302_v25, %v1234_v54 }
 0x31f   :  { %v5316_v10 = vpop.f32.mrf.mxu0 }
 0x320   :  { %v5320_v2 = vpop.f32.mrf.mxu1  ;;  %v1286_v34 = vadd.f32 %v5304_v61, %v1260_v56  ;;  %v1633_v61 = vld [vmem:[#allocation7 + $0x338] sm:$0xff] }
 0x321   :  { %1856 = vmatpush.msra.mxu2 %v1633_v61  ;;  %v1605_v56 = vld [vmem:[#allocation7 + $0x258] sm:$0xff] }
 0x322   :  { %v1312_v35 = vadd.f32 %v5314_v12, %v1286_v34 }
 0x325   :  { %v1236_v14 = vpop.f32.mrf.mxu3 }
 0x326   :  { %v5323_v57 = vpop.f32.mrf.mxu2  ;;  %v1237_v25 = vadd.f32 %v1236_v14, %v5312_v40  ;;  %v1629_v40 = vld [vmem:[#allocation7 + $0x318] sm:$0xff]  ;;  %v5354_v14 = vperm.slane %v5309_v36, 1  ;;  %v1963_v36 = vld [vmem:[#allocation10 + $0xc0] sm:$0xff] }
 0x327   :  { %v1360_v22 = vpop.f32.mrf.mxu0  ;;  %1857 = vmatpush.msra.mxu2 %v1629_v40  ;;  %v2032_v40 = vld [vmem:[#allocation10 + $0x3a0] sm:$0xff] }
 0x328   :  { %v5327_v52 = vpop.f32.mrf.mxu1  ;;  %v1263_v46 = vadd.f32 %v5316_v10, %v1237_v25  ;;  %v1951_v25 = vld [vmem:[#allocation10 + $0x40] sm:$0xff] }
 0x329   :  { %1858 = vmatpush.msra.mxu2 %v1625_v23  ;;  %v1387_v21 = vadd.f32 %v5327_v52, %v5354_v14  ;;  %v1970_v52 = vld [vmem:[#allocation10 + $0x110] sm:$0xff]  ;;  %v1989_v23 = vld [vmem:[#allocation10 + $0x1d8] sm:$0xff] }
 0x32a   :  { %v1289_v12 = vadd.f32 %v5320_v2, %v1263_v46  ;;  %v1979_v2 = vld [vmem:[#allocation10 + $0x170] sm:$0xff] }
 0x32b   :  { %1859 = vmatpush.msra.mxu2 %v1621_v58  ;;  %v1986_v58 = vld [vmem:[#allocation10 + $0x1b8] sm:$0xff] }
 0x32c   :  { %v1315_v1 = vadd.f32 %v5323_v57, %v1289_v12  ;;  %v1613_v57 = vld [vmem:[#allocation7 + $0x298] sm:$0xff] }
 0x32d   :  { %v1334_v41 = vpop.f32.mrf.mxu3  ;;  %1860 = vmatpush.msra.mxu2 %v1617_v62  ;;  %v1983_v62 = vld [vmem:[#allocation10 + $0x198] sm:$0xff] }
 0x32e   :  { %v1335_v26 = vadd.f32 %v1334_v41, %v1309_v47  ;;  %v5331_v63 = vpop.f32.mrf.mxu2  ;;  %v1960_v47 = vld [vmem:[#allocation10 + $0xa0] sm:$0xff] }
 0x32f   :  { %v1363_v5 = vpop.f32.mrf.mxu0  ;;  %1861 = vmatpush.msra.mxu2 %v1613_v57  ;;  %v1413_v44 = vadd.f32 %v5331_v63, %v1387_v21  ;;  %v1597_v63 = vld [vmem:[#allocation7 + $0x218] sm:$0xff]  ;;  %v1952_v57 = vld [vmem:[#allocation10 + $0x50] sm:$0xff]  ;;  %v2017_v21 = vld [vmem:[#allocation10 + $0x300] sm:$0xff] }
 0x330   :  { %v5335_v50 = vadd.f32 %v1360_v22, %v1335_v26  ;;  %v5337_v43 = vpop.f32.mrf.mxu1 }
 0x331   :  { %1862 = vmatpush.msra.mxu2 %v1609_v17 }
 0x332   :  { %1684 = vmatmul.f32.vlgmr.msra.gmra.mxu3 %v5335_v50  ;;  %1736 = vmatmul.f32.vlgmr.msrb.gmra.mxu1 %v5335_v50 }
 0x333   :  { %2054 = vmatpush.msra.mxu3 %v1990_v8  ;;  %2094 = vmatpush.msrb.mxu1 %v1991_v27  ;;  %v1964_v8 = vld [vmem:[#allocation10 + $0xd0] sm:$0xff] }
 0x334   :  { %1863 = vmatpush.msra.mxu2 %v1605_v56  ;;  %v1949_v56 = vld [vmem:[#allocation10 + $0x30] sm:$0xff] }
 0x335   :  { %v1337_v37 = vpop.f32.mrf.mxu3  ;;  %2055 = vmatpush.msra.mxu3 %v1987_v48  ;;  %2095 = vmatpush.msrb.mxu1 %v1988_v3  ;;  %v1948_v48 = vld [vmem:[#allocation10 + $0x20] sm:$0xff]  ;;  %v1992_v3 = vld [vmem:[#allocation10 + $0x1f8] sm:$0xff] }
 0x336   :  { %v1338_v29 = vadd.f32 %v1337_v37, %v1312_v35  ;;  %v5343_v59 = vpop.f32.mrf.mxu2  ;;  %1864 = vmatpush.msra.mxu2 %v1601_v38  ;;  %v1961_v35 = vld [vmem:[#allocation10 + $0xb0] sm:$0xff] }
 0x337   :  { %2056 = vmatpush.msra.mxu3 %v1984_v31  ;;  %v1366_v45 = vpop.f32.mrf.mxu0  ;;  %2096 = vmatpush.msrb.mxu1 %v1985_v16  ;;  %v1945_v31 = vld [vmem:[#allocation10] sm:$0xff] }
 0x338   :  { %v5346_v10 = vadd.f32 %v1363_v5, %v1338_v29  ;;  %v5350_v13 = vpop.f32.mrf.mxu1  ;;  %v1390_v5 = vadd.f32 %v5337_v43, %v5354_v14  ;;  %1865 = vmatpush.msra.mxu2 %v1597_v63  ;;  %v2039_v43 = vld [vmem:[#allocation10 + $0x3f0] sm:$0xff]  ;;  %v2005_v63 = vld [vmem:[#allocation10 + $0x280] sm:$0xff] }
 0x339   :  { %2057 = vmatpush.msra.mxu3 %v1981_v15  ;;  %2097 = vmatpush.msrb.mxu1 %v1982_v51  ;;  %v1958_v15 = vld [vmem:[#allocation10 + $0x90] sm:$0xff]  ;;  %v1393_v16 = vadd.f32 %v5350_v13, %v5354_v14 }
 0x33a   :  { %1687 = vmatmul.f32.gmra.mxu3 %v5346_v10  ;;  %1739 = vmatmul.f32.gmra.mxu1 %v5346_v10  ;;  %v1416_v33 = vadd.f32 %v5343_v59, %v1390_v5  ;;  %v2036_v59 = vld [vmem:[#allocation10 + $0x3d0] sm:$0xff]  ;;  %v1965_v5 = vld [vmem:[#allocation10 + $0xd8] sm:$0xff] }
 0x33b   :  { %2058 = vmatpush.msra.mxu3 %v1978_v18  ;;  %2098 = vmatpush.msrb.mxu1 %v1979_v2  ;;  %v2029_v18 = vld [vmem:[#allocation10 + $0x380] sm:$0xff]  ;;  %v2033_v13 = vld [vmem:[#allocation10 + $0x3b0] sm:$0xff] }
 0x33d   :  { %v1340_v49 = vpop.f32.mrf.mxu3  ;;  %2059 = vmatpush.msra.mxu3 %v1975_v32  ;;  %2099 = vmatpush.msrb.mxu1 %v1976_v0  ;;  %v2026_v32 = vld [vmem:[#allocation10 + $0x360] sm:$0xff] }
 0x33e   :  { %v1341_v19 = vadd.f32 %v1340_v49, %v1315_v1  ;;  %v5356_v39 = vpop.f32.mrf.mxu2  ;;  %v1955_v1 = vld [vmem:[#allocation10 + $0x70] sm:$0xff] }
 0x33f   :  { %2060 = vmatpush.msra.mxu3 %v1972_v4  ;;  %v1464_v54 = vpop.f32.mrf.mxu0  ;;  %2100 = vmatpush.msrb.mxu1 %v1973_v24  ;;  %v2014_v24 = vld [vmem:[#allocation10 + $0x2e0] sm:$0xff] }
 0x340   :  { %v5358_v22 = vadd.f32 %v1366_v45, %v1341_v19  ;;  %v1490_v55 = vpop.f32.mrf.mxu1  ;;  %v1419_v45 = vadd.f32 %v5356_v39, %v1393_v16  ;;  %v2020_v19 = vld [vmem:[#allocation10 + $0x320] sm:$0xff]  ;;  %v1980_v39 = vld [vmem:[#allocation10 + $0x178] sm:$0xff]  ;;  %v2000_v16 = vld [vmem:[#allocation10 + $0x250] sm:$0xff] }
 0x341   :  { %2061 = vmatpush.msra.mxu3 %v1969_v60  ;;  %2101 = vmatpush.msrb.mxu1 %v1970_v52  ;;  %v1971_v52 = vld [vmem:[#allocation10 + $0x118] sm:$0xff] }
 0x342   :  { %1690 = vmatmul.f32.gmra.mxu3 %v5358_v22  ;;  %1742 = vmatmul.f32.gmra.mxu1 %v5358_v22 }
 0x343   :  { %2062 = vmatpush.msra.mxu3 %v1966_v30  ;;  %2102 = vmatpush.msrb.mxu1 %v1967_v53  ;;  %v2030_v30 = vld [vmem:[#allocation10 + $0x390] sm:$0xff] }
 0x344   :  { %v2021_v53 = vld [vmem:[#allocation10 + $0x330] sm:$0xff] }
 0x345   :  { %v1438_v28 = vpop.f32.mrf.mxu3  ;;  %2063 = vmatpush.msra.mxu3 %v1963_v36  ;;  %2103 = vmatpush.msrb.mxu1 %v1964_v8  ;;  %v1977_v36 = vld [vmem:[#allocation10 + $0x158] sm:$0xff]  ;;  %v1999_v8 = vld [vmem:[#allocation10 + $0x240] sm:$0xff] }
 0x346   :  { %v1439_v41 = vadd.f32 %v1438_v28, %v1413_v44  ;;  %v1516_v6 = vpop.f32.mrf.mxu2  ;;  %v1974_v44 = vld [vmem:[#allocation10 + $0x138] sm:$0xff]  ;;  %v2011_v28 = vld [vmem:[#allocation10 + $0x2c0] sm:$0xff] }
 0x347   :  { %2064 = vmatpush.msra.mxu3 %v1960_v47  ;;  %v1467_v27 = vpop.f32.mrf.mxu0  ;;  %2104 = vmatpush.msrb.mxu1 %v1961_v35  ;;  %v2027_v47 = vld [vmem:[#allocation10 + $0x370] sm:$0xff] }
 0x348   :  { %v1465_v26 = vadd.f32 %v1464_v54, %v1439_v41  ;;  %v1493_v9 = vpop.f32.mrf.mxu1  ;;  %v2024_v41 = vld [vmem:[#allocation10 + $0x350] sm:$0xff] }
 0x349   :  { %2065 = vmatpush.msra.mxu3 %v1957_v42  ;;  %2105 = vmatpush.msrb.mxu1 %v1958_v15  ;;  %v1946_v42 = vld [vmem:[#allocation10 + $0x10] sm:$0xff]  ;;  %v2028_v15 = vld [vmem:[#allocation10 + $0x378] sm:$0xff] }
 0x34a   :  { %v1491_v34 = vadd.f32 %v1490_v55, %v1465_v26  ;;  %1788 = vmatmul.f32.vlgmr.msrb.gmra.mxu3 %v5335_v50  ;;  %1840 = vmatmul.f32.vlgmr.msra.gmra.mxu1 %v5335_v50  ;;  %v2035_v50 = vld [vmem:[#allocation10 + $0x3c0] sm:$0xff]  ;;  %v1968_v26 = vld [vmem:[#allocation10 + $0xf8] sm:$0xff]  ;;  %v2012_v35 = vld [vmem:[#allocation10 + $0x2d0] sm:$0xff] }
 0x34b   :  { %2066 = vmatpush.msra.mxu3 %v1954_v20  ;;  %2106 = vmatpush.msrb.mxu1 %v1955_v1  ;;  %v2007_v1 = vld [vmem:[#allocation10 + $0x298] sm:$0xff] }
 0x34c   :  { %v5370_v7 = vadd.f32 %v1516_v6, %v1491_v34  ;;  %v2008_v6 = vld [vmem:[#allocation10 + $0x2a0] sm:$0xff] }
 0x34d   :  { %v1441_v61 = vpop.f32.mrf.mxu3  ;;  %2067 = vmatpush.msra.mxu3 %v1951_v25  ;;  %2107 = vmatpush.msrb.mxu1 %v1952_v57  ;;  %v2002_v34 = vld [vmem:[#allocation10 + $0x260] sm:$0xff]  ;;  %v1962_v25 = vld [vmem:[#allocation10 + $0xb8] sm:$0xff] }
 0x34e   :  { %v1442_v46 = vadd.f32 %v1441_v61, %v1416_v33  ;;  %1710 = vmatmul.f32.vlgmr.msrb.gmra.mxu0 %v5370_v7  ;;  %1762 = vmatmul.f32.vlgmr.msrb.gmra.mxu2 %v5370_v7  ;;  %v1519_v29 = vpop.f32.mrf.mxu2  ;;  %v1959_v33 = vld [vmem:[#allocation10 + $0x98] sm:$0xff] }
 0x34f   :  { %2074 = vmatpush.msrb.mxu0 %v2038_v11  ;;  %2068 = vmatpush.msra.mxu3 %v1948_v48  ;;  %v1470_v49 = vpop.f32.mrf.mxu0  ;;  %v2015_v11 = vld [vmem:[#allocation10 + $0x2f0] sm:$0xff]  ;;  %v1996_v48 = vld [vmem:[#allocation10 + $0x220] sm:$0xff] }
 0x350   :  { %v1468_v37 = vadd.f32 %v1467_v27, %v1442_v46  ;;  %2114 = vmatpush.msrb.mxu2 %v2039_v43  ;;  %v1496_v60 = vpop.f32.mrf.mxu1  ;;  %2108 = vmatpush.msrb.mxu1 %v1949_v56  ;;  %v1956_v27 = vld [vmem:[#allocation10 + $0x78] sm:$0xff]  ;;  %v1993_v43 = vld [vmem:[#allocation10 + $0x200] sm:$0xff] }
 0x351   :  { %2075 = vmatpush.msrb.mxu0 %v2035_v50  ;;  %2069 = vmatpush.msra.mxu3 %v1945_v31  ;;  %v2040_v46 = vld [vmem:[#allocation10 + $0x3f8] sm:$0xff]  ;;  %v2009_v31 = vld [vmem:[#allocation10 + $0x2b0] sm:$0xff] }
 0x352   :  { %v1494_v12 = vadd.f32 %v1493_v9, %v1468_v37  ;;  %1791 = vmatmul.f32.gmra.mxu3 %v5346_v10  ;;  %1843 = vmatmul.f32.gmra.mxu1 %v5346_v10  ;;  %v2023_v10 = vld [vmem:[#allocation10 + $0x340] sm:$0xff]  ;;  %v2037_v50 = vld [vmem:[#allocation10 + $0x3d8] sm:$0xff] }
 0x353   :  { %2076 = vmatpush.msrb.mxu0 %v2032_v40  ;;  %2134 = vmatpush.msrb.mxu3 %v1992_v3  ;;  %v1950_v9 = vld [vmem:[#allocation10 + $0x38] sm:$0xff]  ;;  %v2006_v40 = vld [vmem:[#allocation10 + $0x290] sm:$0xff] }
 0x354   :  { %v5379_v51 = vadd.f32 %v1519_v29, %v1494_v12  ;;  %2115 = vmatpush.msrb.mxu2 %v2036_v59  ;;  %2109 = vmatpush.msrb.mxu1 %v1946_v42  ;;  %v2034_v37 = vld [vmem:[#allocation10 + $0x3b8] sm:$0xff]  ;;  %v2003_v59 = vld [vmem:[#allocation10 + $0x270] sm:$0xff] }
 0x355   :  { %2077 = vmatpush.msrb.mxu0 %v2029_v18  ;;  %v1444_v2 = vpop.f32.mrf.mxu3  ;;  %2135 = vmatpush.msrb.mxu3 %v1989_v23  ;;  %v1947_v3 = vld [vmem:[#allocation10 + $0x18] sm:$0xff]  ;;  %v1997_v18 = vld [vmem:[#allocation10 + $0x230] sm:$0xff] }
 0x356   :  { %v1445_v4 = vadd.f32 %v1444_v2, %v1419_v45  ;;  %1713 = vmatmul.f32.gmra.mxu0 %v5379_v51  ;;  %1765 = vmatmul.f32.gmra.mxu2 %v5379_v51  ;;  %v1522_v54 = vpop.f32.mrf.mxu2  ;;  %v2031_v29 = vld [vmem:[#allocation10 + $0x398] sm:$0xff]  ;;  %v1994_v45 = vld [vmem:[#allocation10 + $0x210] sm:$0xff] }
 0x357   :  { %2078 = vmatpush.msrb.mxu0 %v2026_v32  ;;  %2136 = vmatpush.msrb.mxu3 %v1986_v58  ;;  %v2025_v12 = vld [vmem:[#allocation10 + $0x358] sm:$0xff] }
 0x358   :  { %v1471_v14 = vadd.f32 %v1470_v49, %v1445_v4  ;;  %2116 = vmatpush.msrb.mxu2 %v2033_v13  ;;  %v2022_v23 = vld [vmem:[#allocation10 + $0x338] sm:$0xff] }
 0x359   :  { %2079 = vmatpush.msrb.mxu0 %v2023_v10  ;;  %2137 = vmatpush.msrb.mxu3 %v1983_v62  ;;  %v2016_v32 = vld [vmem:[#allocation10 + $0x2f8] sm:$0xff] }
 0x35a   :  { %v1497_v0 = vadd.f32 %v1496_v60, %v1471_v14  ;;  %1794 = vmatmul.f32.gmra.mxu3 %v5358_v22  ;;  %1846 = vmatmul.f32.gmra.mxu1 %v5358_v22  ;;  %v2013_v2 = vld [vmem:[#allocation10 + $0x2d8] sm:$0xff] }
 0x35b   :  { %2080 = vmatpush.msrb.mxu0 %v2020_v19  ;;  %2138 = vmatpush.msrb.mxu3 %v1980_v39  ;;  %v2010_v13 = vld [vmem:[#allocation10 + $0x2b8] sm:$0xff] }
 0x35c   :  { %v5385_v17 = vadd.f32 %v1522_v54, %v1497_v0  ;;  %2117 = vmatpush.msrb.mxu2 %v2030_v30  ;;  %v2004_v4 = vld [vmem:[#allocation10 + $0x278] sm:$0xff] }
 0x35d   :  { %2081 = vmatpush.msrb.mxu0 %v2017_v21  ;;  %2139 = vmatpush.msrb.mxu3 %v1977_v36  ;;  %v2001_v10 = vld [vmem:[#allocation10 + $0x258] sm:$0xff] }
 0x35e   :  { %v1527_v55 = vrot.slane %v5385_v17, 6  ;;  %1716 = vmatmul.f32.gmra.mxu0 %v5385_v17  ;;  %1768 = vmatmul.f32.gmra.mxu2 %v5385_v17  ;;  %v1998_v62 = vld [vmem:[#allocation10 + $0x238] sm:$0xff] }
 0x35f   :  { %2082 = vmatpush.msrb.mxu0 %v2014_v24  ;;  %2140 = vmatpush.msrb.mxu3 %v1974_v44  ;;  %v1995_v49 = vld [vmem:[#allocation10 + $0x218] sm:$0xff] }
 0x360   :  { %v1528_v38 = vsel %vm756_vm5, %v5358_v22, %v1527_v55  ;;  %2118 = vmatpush.msrb.mxu2 %v2027_v47  ;;  %v2018_v22 = vld [vmem:[#allocation10 + $0x310] sm:$0xff]  ;;  %v1658_v19 = vld [vmem:[%s6521_s9] sm:$0xf] }
 0x361   :  { %v1529_v20 = vrot.slane %v1528_v38, 2  ;;  %2083 = vmatpush.msrb.mxu0 %v2011_v28  ;;  %2141 = vmatpush.msrb.mxu3 %v1971_v52  ;;  %v1661_v60 = vperm.slane %v1658_v19, 1  ;;  %v1660_v0 = vperm.slane %v1658_v19, 0 }
 0x362   :  { %2119 = vmatpush.msrb.mxu2 %v2024_v41  ;;  %v1663_v41 = vperm.slane %v1658_v19, 3 }
 0x363   :  { %2049 = vst [vmem:[#allocation1] ss:$4 sm:$0xff] %v1529_v20  ;;  %2084 = vmatpush.msrb.mxu0 %v2008_v6  ;;  %2142 = vmatpush.msrb.mxu3 %v1968_v26 }
 0x364   :  { %2120 = vmatpush.msrb.mxu2 %v2021_v53 }
 0x365   :  { %2085 = vmatpush.msrb.mxu0 %v2005_v63  ;;  %2143 = vmatpush.msrb.mxu3 %v1965_v5  ;;  %v1662_v63 = vperm.slane %v1658_v19, 2 }
 0x366   :  { %1814 = vmatmul.f32.vlgmr.msra.gmra.mxu0 %v5370_v7  ;;  %1866 = vmatmul.f32.vlgmr.msra.gmra.mxu2 %v5370_v7  ;;  %v1953_v7 = vld [vmem:[#allocation10 + $0x58] sm:$0xff] }
 0x367   :  { %2086 = vmatpush.msrb.mxu0 %v2002_v34  ;;  %2144 = vmatpush.msrb.mxu3 %v1962_v25 }
 0x368   :  { %2121 = vmatpush.msrb.mxu2 %v2018_v22 }
 0x369   :  { %2087 = vmatpush.msrb.mxu0 %v1999_v8  ;;  %2145 = vmatpush.msrb.mxu3 %v1959_v33 }
 0x36a   :  { %v2050_v61 = vld.sshfl [vmem:[#allocation1] sm:$0xff pattern:$0x73625140]  ;;  %2122 = vmatpush.msrb.mxu2 %v2015_v11  ;;  %v2051_v58 = vld.sshfl [vmem:[#allocation1 + $0x8] sm:$0xff pattern:$0x73625140] }
 0x36b   :  { %2088 = vmatpush.msrb.mxu0 %v1996_v48  ;;  %2070 = vmatmul.f32.vlgmr.msra.gmra.mxu3 %v2050_v61 }
 0x36c   :  { %2110 = vmatmul.f32.vlgmr.msrb.gmra.mxu1 %v2050_v61  ;;  %2146 = vmatpush.msrb.mxu3 %v1956_v27  ;;  %v2231_v27 = vld [vmem:[#allocation13 + $0x78] sm:$0xff] }
 0x36d   :  { %2089 = vmatpush.msrb.mxu0 %v1993_v43  ;;  %2123 = vmatpush.msrb.mxu2 %v2012_v35  ;;  %v2230_v35 = vld [vmem:[#allocation13 + $0x70] sm:$0xff] }
 0x36e   :  { %1869 = vmatmul.f32.gmra.mxu2 %v5379_v51  ;;  %1817 = vmatmul.f32.gmra.mxu0 %v5379_v51  ;;  %v2019_v51 = vld [vmem:[#allocation10 + $0x318] sm:$0xff] }
 0x36f   :  { %2154 = vmatpush.msra.mxu0 %v2040_v46  ;;  %2147 = vmatpush.msrb.mxu3 %v1953_v7  ;;  %v2229_v7 = vld [vmem:[#allocation13 + $0x68] sm:$0xff] }
 0x370   :  { %2124 = vmatpush.msrb.mxu2 %v2009_v31  ;;  %2236 = vmatpush.msra.mxu1 %v2231_v27 }
 0x371   :  { %2155 = vmatpush.msra.mxu0 %v2037_v50  ;;  %2148 = vmatpush.msrb.mxu3 %v1950_v9 }
 0x372   :  { %2125 = vmatpush.msrb.mxu2 %v2006_v40  ;;  %2237 = vmatpush.msra.mxu1 %v2230_v35 }
 0x373   :  { %2156 = vmatpush.msra.mxu0 %v2034_v37  ;;  %2149 = vmatpush.msrb.mxu3 %v1947_v3 }
 0x374   :  { %2150 = vmatmul.f32.vlgmr.msrb.gmra.mxu3 %v2050_v61  ;;  %2126 = vmatpush.msrb.mxu2 %v2003_v59 }
 0x375   :  { %2157 = vmatpush.msra.mxu0 %v2031_v29  ;;  %2238 = vmatpush.msra.mxu1 %v2229_v7  ;;  %v2218_v7 = vld [vmem:[#allocation13 + $0x10] sm:$0xff] }
 0x376   :  { %1872 = vmatmul.f32.gmra.mxu2 %v5385_v17  ;;  %1820 = vmatmul.f32.gmra.mxu0 %v5385_v17 }
 0x377   :  { %2158 = vmatpush.msra.mxu0 %v2028_v15  ;;  %2127 = vmatpush.msrb.mxu2 %v2000_v16 }
 0x379   :  { %2159 = vmatpush.msra.mxu0 %v2025_v12  ;;  %2128 = vmatpush.msrb.mxu2 %v1997_v18  ;;  %v2228_v12 = vld [vmem:[#allocation13 + $0x60] sm:$0xff] }
 0x37a   :  { %2239 = vmatpush.msra.mxu1 %v2228_v12  ;;  %v2216_v12 = vld [vmem:[#allocation13] sm:$0xff] }
 0x37b   :  { %2160 = vmatpush.msra.mxu0 %v2022_v23  ;;  %2129 = vmatpush.msrb.mxu2 %v1994_v45 }
 0x37d   :  { %2161 = vmatpush.msra.mxu0 %v2019_v51 }
 0x37e   :  { %2130 = vmatmul.f32.vlgmr.msrb.gmra.mxu2 %v2051_v58  ;;  %2090 = vmatmul.f32.vlgmr.msrb.gmra.mxu0 %v2051_v58 }
 0x37f   :  { %2162 = vmatpush.msra.mxu0 %v2016_v32 }
 0x381   :  { %2163 = vmatpush.msra.mxu0 %v2013_v2 }
 0x383   :  { %2164 = vmatpush.msra.mxu0 %v2010_v13 }
 0x385   :  { %2165 = vmatpush.msra.mxu0 %v2007_v1  ;;  %v2227_v1 = vld [vmem:[#allocation13 + $0x58] sm:$0xff] }
 0x386   :  { %2240 = vmatpush.msra.mxu1 %v2227_v1 }
 0x387   :  { %2166 = vmatpush.msra.mxu0 %v2004_v4 }
 0x389   :  { %2167 = vmatpush.msra.mxu0 %v2001_v10 }
 0x38b   :  { %2168 = vmatpush.msra.mxu0 %v1998_v62  ;;  %v2226_v62 = vld [vmem:[#allocation13 + $0x50] sm:$0xff] }
 0x38c   :  { %2241 = vmatpush.msra.mxu1 %v2226_v62  ;;  %v5499_v62 = vld [vmem:[#allocation8 + $0x180] sm:$0xff] }
 0x38d   :  { %2169 = vmatpush.msra.mxu0 %v1995_v49 }
 0x38e   :  { %2170 = vmatmul.f32.vlgmr.msra.gmra.mxu0 %v2051_v58 }
 0x3af   :  { %v1737_v14 = vpop.f32.mrf.mxu1 }
 0x3b0   :  { %v1738_v38 = vadd.f32 %v1737_v14, %v1661_v60  ;;  %v2225_v14 = vld [vmem:[#allocation13 + $0x48] sm:$0xff] }
 0x3b1   :  { %2242 = vmatpush.msra.mxu1 %v2225_v14  ;;  %v5509_v14 = vld [vmem:[#allocation8 + $0x160] sm:$0xff] }
 0x3b5   :  { %v1685_v39 = vpop.f32.mrf.mxu3 }
 0x3b6   :  { %v1686_v56 = vadd.f32 %v1685_v39, %v1660_v0 }
 0x3b7   :  { %v1740_v30 = vpop.f32.mrf.mxu1 }
 0x3b8   :  { %v1741_v57 = vadd.f32 %v1740_v30, %v1661_v60 }
 0x3bd   :  { %v1688_v21 = vpop.f32.mrf.mxu3 }
 0x3be   :  { %v1689_v36 = vadd.f32 %v1688_v21, %v1660_v0 }
 0x3bf   :  { %v1743_v54 = vpop.f32.mrf.mxu1 }
 0x3c0   :  { %v1744_v17 = vadd.f32 %v1743_v54, %v1661_v60 }
 0x3c5   :  { %v1691_v24 = vpop.f32.mrf.mxu3 }
 0x3c6   :  { %v1692_v44 = vadd.f32 %v1691_v24, %v1660_v0 }
 0x3c7   :  { %v1841_v47 = vpop.f32.mrf.mxu1 }
 0x3c8   :  { %v1842_v4 = vadd.f32 %v1841_v47, %v1663_v41 }
 0x3cb   :  { %v1711_v55 = vpop.f32.mrf.mxu0 }
 0x3cc   :  { %v1712_v28 = vadd.f32 %v1711_v55, %v1686_v56 }
 0x3cd   :  { %v1789_v52 = vpop.f32.mrf.mxu3 }
 0x3ce   :  { %v1790_v23 = vadd.f32 %v1789_v52, %v1662_v63 }
 0x3cf   :  { %v1844_v42 = vpop.f32.mrf.mxu1 }
 0x3d0   :  { %v5401_v6 = vadd.f32 %v1844_v42, %v1663_v41 }
 0x3d1   :  { %v1763_v26 = vpop.f32.mrf.mxu2 }
 0x3d2   :  { %v1764_v20 = vadd.f32 %v1763_v26, %v1738_v38 }
 0x3d3   :  { %v1714_v53 = vpop.f32.mrf.mxu0 }
 0x3d4   :  { %v1888_v5 = vrot.slane %v1764_v20, 6  ;;  %v1715_v34 = vadd.f32 %v1714_v53, %v1689_v36  ;;  %v2220_v53 = vld [vmem:[#allocation13 + $0x20] sm:$0xff] }
 0x3d5   :  { %v1792_v25 = vpop.f32.mrf.mxu3 }
 0x3d6   :  { %v1900_v22 = vsel %vm756_vm5, %v1712_v28, %v1888_v5  ;;  %v1905_v8 = vsel %vm759_vm6, %v1712_v28, %v1888_v5  ;;  %v1909_v33 = vsel %vm762_vm7, %v1888_v5, %v1712_v28  ;;  %v1793_v11 = vadd.f32 %v1792_v25, %v1662_v63 }
 0x3d7   :  { %v1847_v48 = vpop.f32.mrf.mxu1  ;;  %v1897_v61 = vsel %vm523_vm4, %v1712_v28, %v1888_v5  ;;  %v2222_v28 = vld [vmem:[#allocation13 + $0x30] sm:$0xff] }
 0x3d8   :  { %v5407_v43 = vadd.f32 %v1847_v48, %v1663_v41  ;;  %v2221_v41 = vld [vmem:[#allocation13 + $0x28] sm:$0xff] }
 0x3d9   :  { %v1766_v46 = vpop.f32.mrf.mxu2 }
 0x3da   :  { %v1767_v50 = vadd.f32 %v1766_v46, %v1741_v57  ;;  %v2224_v57 = vld [vmem:[#allocation13 + $0x40] sm:$0xff] }
 0x3db   :  { %v1717_v31 = vpop.f32.mrf.mxu0  ;;  %2243 = vmatpush.msra.mxu1 %v2224_v57  ;;  %v5523_v57 = vld [vmem:[#allocation8 + $0x128] sm:$0xff] }
 0x3dc   :  { %v1891_v9 = vrot.slane %v1767_v50, 6  ;;  %v1718_v37 = vadd.f32 %v1717_v31, %v1692_v44  ;;  %v5465_v31 = vld [vmem:[#allocation8 + $0x1e0] sm:$0xff] }
 0x3dd   :  { %v1795_v40 = vpop.f32.mrf.mxu3  ;;  %2320 = vmatpush.msra.mxu2 %v5465_v31 }
 0x3de   :  { %v1913_v3 = vsel %vm523_vm4, %v1715_v34, %v1891_v9  ;;  %v1916_v29 = vsel %vm756_vm5, %v1715_v34, %v1891_v9  ;;  %v1920_v59 = vsel %vm759_vm6, %v1715_v34, %v1891_v9  ;;  %v5413_v15 = vsel %vm762_vm7, %v1891_v9, %v1715_v34  ;;  %v5467_v9 = vld [vmem:[#allocation8 + $0x1c8] sm:$0xff] }
 0x3df   :  { %v1796_v16 = vadd.f32 %v1795_v40, %v1662_v63  ;;  %v5441_v63 = vld [vmem:[%s6523_s11] sm:$0xf]  ;;  %v2217_v40 = vld [vmem:[#allocation13 + $0x8] sm:$0xff] }
 0x3e1   :  { %v1769_v18 = vpop.f32.mrf.mxu2 }
 0x3e2   :  { %v1770_v45 = vadd.f32 %v1769_v18, %v1744_v17  ;;  %v2223_v17 = vld [vmem:[#allocation13 + $0x38] sm:$0xff] }
 0x3e3   :  { %v1815_v51 = vpop.f32.mrf.mxu0  ;;  %2244 = vmatpush.msra.mxu1 %v2223_v17  ;;  %v2045_v17 = vperm.slane %v5441_v63, 3 }
 0x3e4   :  { %v1894_v32 = vrot.slane %v1770_v45, 6  ;;  %v1816_v58 = vadd.f32 %v1815_v51, %v1790_v23  ;;  %v5479_v45 = vld [vmem:[#allocation8 + $0x1a0] sm:$0xff]  ;;  %v5481_v51 = vld [vmem:[#allocation8 + $0x188] sm:$0xff] }
 0x3e5   :  { %2245 = vmatpush.msra.mxu1 %v2222_v28  ;;  %v5540_v28 = vld [vmem:[#allocation8 + $0x178] sm:$0xff] }
 0x3e6   :  { %v5416_v2 = vsel %vm523_vm4, %v1718_v37, %v1894_v32  ;;  %v5419_v13 = vsel %vm756_vm5, %v1718_v37, %v1894_v32  ;;  %v1889_v19 = vrot.slane %v1816_v58, 4  ;;  %v5483_v32 = vld [vmem:[#allocation8 + $0x1f0] sm:$0xff] }
 0x3e7   :  { %2246 = vmatpush.msra.mxu1 %v2221_v41  ;;  %2360 = vmatpush.msrb.mxu0 %v5483_v32  ;;  %v5544_v41 = vld [vmem:[#allocation8 + $0x100] sm:$0xff] }
 0x3e9   :  { %v1867_v10 = vpop.f32.mrf.mxu2  ;;  %2247 = vmatpush.msra.mxu1 %v2220_v53 }
 0x3ea   :  { %v1868_v49 = vadd.f32 %v1867_v10, %v1842_v4  ;;  %v5495_v10 = vld [vmem:[#allocation8 + $0x1f8] sm:$0xff] }
 0x3eb   :  { %v1818_v60 = vpop.f32.mrf.mxu0 }
 0x3ec   :  { %v1890_v39 = vrot.slane %v1868_v49, 2  ;;  %v1819_v30 = vadd.f32 %v1818_v60, %v1793_v11  ;;  %v5501_v49 = vld [vmem:[#allocation8 + $0x168] sm:$0xff]  ;;  %v5517_v60 = vld [vmem:[#allocation8 + $0x1b8] sm:$0xff] }
 0x3ee   :  { %v1901_v0 = vsel %vm762_vm7, %v1890_v39, %v1889_v19  ;;  %v1906_v21 = vsel %vm523_vm4, %v1889_v19, %v1890_v39  ;;  %v1910_v36 = vsel %vm756_vm5, %v1889_v19, %v1890_v39  ;;  %v1898_v54 = vsel %vm759_vm6, %v1889_v19, %v1890_v39  ;;  %v2071_v27 = vpop.f32.mrf.mxu3  ;;  %v5511_v19 = vld [vmem:[#allocation8 + $0x148] sm:$0xff]  ;;  %v5515_v39 = vld [vmem:[#allocation8 + $0x1b0] sm:$0xff] }
 0x3ef   :  { %v5426_v24 = vsel %vm359_vm0, %v1897_v61, %v1898_v54  ;;  %v5429_v44 = vsel %vm1902_vm8, %v1900_v22, %v1901_v0  ;;  %v5432_v47 = vsel %vm359_vm0, %v1906_v21, %v1905_v8  ;;  %v5435_v56 = vsel %vm1902_vm8, %v1910_v36, %v1909_v33  ;;  %v2219_v8 = vld [vmem:[#allocation13 + $0x18] sm:$0xff]  ;;  %v5457_v61 = vld [vmem:[#allocation8 + $0x1e8] sm:$0xff]  ;;  %v5525_v0 = vld [vmem:[#allocation8 + $0x190] sm:$0xff] }
 0x3f0   :  { %6662 = vst [vmem:[#allocation23_spill] sm:$0xff] %v5426_v24  ;;  %v1892_v42 = vrot.slane %v1819_v30, 4  ;;  %v2043_v22 = vperm.slane %v5441_v63, 0  ;;  %2248 = vmatpush.msra.mxu1 %v2219_v8  ;;  %2340 = vmatpush.msra.mxu3 %v5457_v61  ;;  %v5519_v30 = vld [vmem:[#allocation8 + $0x140] sm:$0xff]  ;;  %v5527_v21 = vld [vmem:[#allocation8 + $0x198] sm:$0xff]  ;;  %v5533_v54 = vld [vmem:[#allocation8 + $0x108] sm:$0xff] }
 0x3f1   :  { %6663 = vst [vmem:[#allocation20_spill] sm:$0xff] %v5429_v44  ;;  %v1870_v55 = vpop.f32.mrf.mxu2  ;;  %v5531_v36 = vld [vmem:[#allocation8 + $0x120] sm:$0xff] }
 0x3f2   :  { %6664 = vst [vmem:[#allocation21_spill] sm:$0xff] %v5432_v47  ;;  %v1871_v52 = vadd.f32 %v1870_v55, %v5401_v6  ;;  %2249 = vmatpush.msra.mxu1 %v2218_v7  ;;  %v2072_v37 = vadd.f32 %v2071_v27, %v2043_v22  ;;  %2341 = vmatpush.msra.mxu3 %v5467_v9  ;;  %v5538_v55 = vld [vmem:[#allocation8 + $0x170] sm:$0xff]  ;;  %v5566_v22 = vld [vmem:[#allocation8 + $0x138] sm:$0xff]  ;;  %v5571_v27 = vld [vmem:[#allocation8 + $0xc0] sm:$0xff] }
 0x3f3   :  { %6665 = vst [vmem:[#allocation25_spill] sm:$0xff] %v5435_v56  ;;  %v1821_v26 = vpop.f32.mrf.mxu0  ;;  %v5633_v56 = vld [vmem:[#allocation8 + $0x20] sm:$0xff]  ;;  %v5635_v47 = vld [vmem:[#allocation8 + $0x8] sm:$0xff] }
 0x3f4   :  { %v1893_v38 = vrot.slane %v1871_v52, 2  ;;  %v1822_v20 = vadd.f32 %v1821_v26, %v1796_v16  ;;  %2250 = vmatpush.msra.mxu1 %v2217_v40  ;;  %v5473_v16 = vld [vmem:[#allocation8 + $0x1a8] sm:$0xff]  ;;  %v5550_v26 = vld [vmem:[#allocation8 + $0x150] sm:$0xff]  ;;  %v5583_v40 = vld [vmem:[#allocation8 + $0xa0] sm:$0xff]  ;;  %6689 = vst [vmem:[#allocation47_spill] sm:$0xff] %v5633_v56 }
 0x3f5   :  { %2342 = vmatpush.msra.mxu3 %v5473_v16  ;;  %6674 = vst [vmem:[#allocation32_spill] sm:$0xff] %v5583_v40 }
 0x3f6   :  { %v1914_v5 = vsel %vm759_vm6, %v1892_v42, %v1893_v38  ;;  %v1917_v34 = vsel %vm762_vm7, %v1893_v38, %v1892_v42  ;;  %v1921_v25 = vsel %vm523_vm4, %v1892_v42, %v1893_v38  ;;  %v1925_v6 = vsel %vm756_vm5, %v1892_v42, %v1893_v38  ;;  %2251 = vmatpush.msra.mxu1 %v2216_v12  ;;  %v5546_v42 = vld [vmem:[#allocation8 + $0xe8] sm:$0xff]  ;;  %v5592_v12 = vld [vmem:[#allocation8 + $0xf8] sm:$0xff] }
 0x3f7   :  { %v5449_v33 = vsel %vm359_vm0, %v1913_v3, %v1914_v5  ;;  %v5452_v11 = vsel %vm1902_vm8, %v1916_v29, %v1917_v34  ;;  %v5455_v48 = vsel %vm359_vm0, %v1921_v25, %v1920_v59  ;;  %v5461_v35 = vsel %vm1902_vm8, %v1925_v6, %v5413_v15  ;;  %v5471_v15 = vld [vmem:[#allocation8 + $0x1c0] sm:$0xff]  ;;  %2343 = vmatpush.msra.mxu3 %v5481_v51  ;;  %v2151_v52 = vpop.f32.mrf.mxu3  ;;  %v5560_v34 = vld [vmem:[#allocation8 + $0xc8] sm:$0xff]  ;;  %v5564_v6 = vld [vmem:[#allocation8 + $0x130] sm:$0xff] }
 0x3f8   :  { %6666 = vst [vmem:[#allocation26_spill] sm:$0xff] %v5449_v33  ;;  %v1895_v3 = vrot.slane %v1822_v20, 4  ;;  %2321 = vmatpush.msra.mxu2 %v5471_v15  ;;  %2380 = vmatpush.msrb.mxu1 %v5495_v10  ;;  %v5552_v20 = vld [vmem:[#allocation8 + $0x158] sm:$0xff]  ;;  %v5558_v5 = vld [vmem:[#allocation8 + $0xe0] sm:$0xff]  ;;  %v2152_v25 = vadd.f32 %v2151_v52, %v2045_v17 }
 0x3f9   :  { %6667 = vst [vmem:[#allocation22_spill] sm:$0xff] %v5452_v11  ;;  %v1873_v46 = vpop.f32.mrf.mxu2  ;;  %2344 = vmatpush.msra.mxu3 %v5501_v49  ;;  %v5604_v17 = vld [vmem:[#allocation8 + $0xd8] sm:$0xff] }
 0x3fa   :  { %6668 = vst [vmem:[#allocation24_spill] sm:$0xff] %v5455_v48  ;;  %v1874_v50 = vadd.f32 %v1873_v46, %v5407_v43  ;;  %2322 = vmatpush.msra.mxu2 %v5479_v45  ;;  %v5573_v46 = vld [vmem:[#allocation8 + $0xa8] sm:$0xff]  ;;  %v5629_v33 = vld [vmem:[#allocation8 + $0x98] sm:$0xff] }
 0x3fb   :  { %6669 = vst [vmem:[#allocation27_spill] sm:$0xff] %v5461_v35  ;;  %v2091_v59 = vpop.f32.mrf.mxu0  ;;  %2345 = vmatpush.msra.mxu3 %v5511_v19  ;;  %v5621_v35 = vld [vmem:[#allocation8 + $0x40] sm:$0xff]  ;;  %v5623_v48 = vld [vmem:[#allocation8 + $0x28] sm:$0xff] }
 0x3fc   :  { %v1896_v29 = vrot.slane %v1874_v50, 2  ;;  %v2092_v43 = vadd.f32 %v2091_v59, %v2072_v37  ;;  %2323 = vmatpush.msra.mxu2 %v5499_v62  ;;  %6672 = vst [vmem:[#allocation30_spill] sm:$0xff] %v5573_v46  ;;  %v5577_v50 = vld [vmem:[#allocation8 + $0x110] sm:$0xff]  ;;  %v5579_v37 = vld [vmem:[#allocation8 + $0x118] sm:$0xff] }
 0x3fd   :  { %2346 = vmatpush.msra.mxu3 %v5523_v57  ;;  %6673 = vst [vmem:[#allocation31_spill] sm:$0xff] %v5579_v37 }
 0x3fe   :  { %v1929_v18 = vsel %vm759_vm6, %v1895_v3, %v1896_v29  ;;  %v1932_v23 = vsel %vm762_vm7, %v1896_v29, %v1895_v3  ;;  %v4004_v4 = vmul.f32 -1.442695, %v2092_v43  ;;  %2324 = vmatpush.msra.mxu2 %v5509_v14  ;;  %v5585_v3 = vld [vmem:[#allocation8 + $0x88] sm:$0xff]  ;;  %v2044_v29 = vperm.slane %v5441_v63, 2  ;;  %v5590_v43 = vld [vmem:[#allocation8 + $0xf0] sm:$0xff]  ;;  %6676 = vst [vmem:[#allocation34_spill] sm:$0xff] %v5592_v12 }
 0x3ff   :  { %v5487_v58 = vsel %vm359_vm0, %v5416_v2, %v1929_v18  ;;  %v5491_v1 = vsel %vm1902_vm8, %v5419_v13, %v1932_v23  ;;  %v5503_v2 = vld [vmem:[#allocation8 + $0x1d0] sm:$0xff]  ;;  %v5507_v13 = vld [vmem:[#allocation8 + $0x1d8] sm:$0xff]  ;;  %2347 = vmatpush.msra.mxu3 %v5533_v54  ;;  %6675 = vst [vmem:[#allocation33_spill] sm:$0xff] %v5585_v3  ;;  %v2111_v18 = vpop.f32.mrf.mxu1  ;;  %v5596_v23 = vld [vmem:[#allocation8 + $0x80] sm:$0xff] }
 0x400   :  { %6670 = vst [vmem:[#allocation28_spill] sm:$0xff] %v5487_v58  ;;  %4054 = vpow2.f32 %v4004_v4  ;;  %2361 = vmatpush.msrb.mxu0 %v5503_v2  ;;  %2381 = vmatpush.msrb.mxu1 %v5507_v13  ;;  %v5598_v4 = vld [vmem:[#allocation8 + $0x68] sm:$0xff]  ;;  %v5602_v63 = vld [vmem:[#allocation8 + $0xd0] sm:$0xff]  ;;  %v5617_v58 = vld [vmem:[#allocation8 + $0xb8] sm:$0xff] }
 0x401   :  { %6671 = vst [vmem:[#allocation29_spill] sm:$0xff] %v5491_v1  ;;  %2325 = vmatpush.msra.mxu2 %v5519_v30  ;;  %2348 = vmatpush.msra.mxu3 %v5546_v42  ;;  %v5615_v1 = vld [vmem:[#allocation8 + $0xb0] sm:$0xff] }
 0x402   :  { %2362 = vmatpush.msrb.mxu0 %v5515_v39  ;;  %2382 = vmatpush.msrb.mxu1 %v5517_v60  ;;  %6677 = vst [vmem:[#allocation35_spill] sm:$0xff] %v5596_v23 }
 0x403   :  { %2326 = vmatpush.msra.mxu2 %v5531_v36  ;;  %2349 = vmatpush.msra.mxu3 %v5560_v34  ;;  %6678 = vst [vmem:[#allocation36_spill] sm:$0xff] %v5598_v4 }
 0x404   :  { %2363 = vmatpush.msrb.mxu0 %v5525_v0  ;;  %2383 = vmatpush.msrb.mxu1 %v5527_v21  ;;  %6679 = vst [vmem:[#allocation37_spill] sm:$0xff] %v5602_v63 }
 0x405   :  { %2327 = vmatpush.msra.mxu2 %v5544_v41  ;;  %2350 = vmatpush.msra.mxu3 %v5573_v46  ;;  %6680 = vst [vmem:[#allocation38_spill] sm:$0xff] %v5604_v17 }
 0x406   :  { %v4055_v38 = vpop.eup %4054  ;;  %2364 = vmatpush.msrb.mxu0 %v5538_v55  ;;  %2384 = vmatpush.msrb.mxu1 %v5540_v28  ;;  %6683 = vst [vmem:[#allocation41_spill] sm:$0xff] %v5615_v1 }
 0x407   :  { %v5554_v53 = vadd.f32 1.0, %v4055_v38  ;;  %2328 = vmatpush.msra.mxu2 %v5558_v5  ;;  %2351 = vmatpush.msra.mxu3 %v5585_v3  ;;  %v2131_v38 = vpop.f32.mrf.mxu2  ;;  %6684 = vst [vmem:[#allocation42_spill] sm:$0xff] %v5617_v58 }
 0x408   :  { %2365 = vmatpush.msrb.mxu0 %v5550_v26  ;;  %2385 = vmatpush.msrb.mxu1 %v5552_v20  ;;  %6685 = vst [vmem:[#allocation43_spill] sm:$0xff] %v5621_v35 }
 0x409   :  { %4056 = vrcp.f32 %v5554_v53  ;;  %2329 = vmatpush.msra.mxu2 %v5571_v27  ;;  %2352 = vmatpush.msra.mxu3 %v5598_v4  ;;  %6686 = vst [vmem:[#allocation44_spill] sm:$0xff] %v5623_v48  ;;  %vm2183_vm10 = vweird.f32 %v5554_v53 }
 0x40a   :  { %2366 = vmatpush.msrb.mxu0 %v5564_v6  ;;  %2386 = vmatpush.msrb.mxu1 %v5566_v22  ;;  %6688 = vst [vmem:[#allocation46_spill] sm:$0xff] %v5629_v33 }
 0x40b   :  { %v2171_v8 = vpop.f32.mrf.mxu0  ;;  %2330 = vmatpush.msra.mxu2 %v5583_v40  ;;  %6690 = vst [vmem:[#allocation48_spill] sm:$0xff] %v5635_v47 }
 0x40c   :  { %v2172_v7 = vadd.f32 %v2171_v8, %v2152_v25  ;;  %2367 = vmatpush.msrb.mxu0 %v5577_v50  ;;  %2387 = vmatpush.msrb.mxu1 %v5579_v37  ;;  %v5608_v25 = vld [vmem:[#allocation8 + $0x60] sm:$0xff]  ;;  %v5610_v8 = vld [vmem:[#allocation8 + $0x48] sm:$0xff]  ;;  %v5656_v37 = vld [vmem:[#allocation8 + $0x58] sm:$0xff] }
 0x40d   :  { %6681 = vst [vmem:[#allocation39_spill] sm:$0xff] %v5608_v25  ;;  %2331 = vmatpush.msra.mxu2 %v5596_v23  ;;  %2353 = vmatpush.msra.mxu3 %v5610_v8 }
 0x40e   :  { %v4005_v59 = vmul.f32 -1.442695, %v2172_v7  ;;  %2368 = vmatpush.msrb.mxu0 %v5590_v43  ;;  %2388 = vmatpush.msrb.mxu1 %v5592_v12  ;;  %6682 = vst [vmem:[#allocation40_spill] sm:$0xff] %v5610_v8  ;;  %v2112_v7 = vadd.f32 %v2111_v18, %v2044_v29  ;;  %v5627_v18 = vld [vmem:[#allocation8 + $0x90] sm:$0xff] }
 0x40f   :  { %v4057_v52 = vpop.eup %4056  ;;  %2332 = vmatpush.msra.mxu2 %v5608_v25  ;;  %6687 = vst [vmem:[#allocation45_spill] sm:$0xff] %v5627_v18  ;;  %2354 = vmatpush.msra.mxu3 %v5623_v48  ;;  %v5654_v48 = vld [vmem:[#allocation8 + $0x50] sm:$0xff] }
 0x410   :  { %4058 = vpow2.f32 %v4005_v59  ;;  %v2179_v59 = vmul.f32 %v4057_v52, %v5554_v53  ;;  %2369 = vmatpush.msrb.mxu0 %v5602_v63  ;;  %2389 = vmatpush.msrb.mxu1 %v5604_v17  ;;  %v2132_v29 = vadd.f32 %v2131_v38, %v2112_v7  ;;  %vm2184_vm9 = vweird.f32 %v4057_v52  ;;  %v5640_v7 = vld [vmem:[#allocation8 + $0x70] sm:$0xff]  ;;  %6694 = vst [vmem:[#allocation52_spill] sm:$0xff] %v5654_v48 }
 0x411   :  { %v2189_v38 = vand.u32 2147483648, %v5554_v53  ;;  %2333 = vmatpush.msra.mxu2 %v5621_v35  ;;  %6691 = vst [vmem:[#allocation49_spill] sm:$0xff] %v5640_v7  ;;  %v2187_v17 = vand.u32 2147483647, %v5554_v53  ;;  %2355 = vmatpush.msra.mxu3 %v5635_v47  ;;  %vm2185_vm11 = vmor %vm2183_vm10, %vm2184_vm9  ;;  %v6545_v53 = vmov 0.0  }
 0x412   :  { %v2180_v11 = vsub.f32 1.0, %v2179_v59  ;;  %2370 = vmatpush.msrb.mxu0 %v5615_v1  ;;  %2390 = vmatpush.msrb.mxu1 %v5617_v58  ;;  %v5642_v59 = vld [vmem:[#allocation8 + $0x78] sm:$0xff]  ;;  %4060 = vtanh.f32 %v2132_v29  ;;  %6695 = vst [vmem:[#allocation53_spill] sm:$0xff] %v5656_v37  ;;  %v5664_v29 = vld [vmem:[#allocation8 + $0x30] sm:$0xff] }
 0x413   :  { %6692 = vst [vmem:[#allocation50_spill] sm:$0xff] %v5642_v59  ;;  %2334 = vmatpush.msra.mxu2 %v5633_v56  ;;  %2356 = vmatmul.f32.vlgmr.msra.gmra.mxu3 %v6545_v53  ;;  %vm2188_vm12 = vcmp.eq.f32.partialorder %v2187_v17, 8.507059e+37 }
 0x414   :  { %v2181_v24 = vmul.f32 %v4057_v52, %v2180_v11  ;;  %2371 = vmatpush.msrb.mxu0 %v5627_v18  ;;  %2391 = vmatpush.msrb.mxu1 %v5629_v33  ;;  %v5649_v11 = vld [vmem:[#allocation8] sm:$0xff]  ;;  %6696 = vst [vmem:[#allocation54_spill] sm:$0xff] %v5664_v29  ;;  %v5666_v33 = vld [vmem:[#allocation8 + $0x38] sm:$0xff] }
 0x415   :  { %6693 = vst [vmem:[#allocation51_spill] sm:$0xff] %v5649_v11  ;;  %2335 = vmatpush.msra.mxu2 %v5649_v11  ;;  %2502 = vmatpush.msrb.mxu3 %v5457_v61 }
 0x416   :  { %v4059_v44 = vpop.eup %4058  ;;  %v2182_v12 = vadd.f32 %v4057_v52, %v2181_v24  ;;  %2372 = vmatpush.msrb.mxu0 %v5640_v7  ;;  %2392 = vmatpush.msrb.mxu1 %v5642_v59  ;;  %6697 = vst [vmem:[#allocation55_spill] sm:$0xff] %v5666_v33  ;;  %v5671_v59 = vld [vmem:[#allocation8 + $0x10] sm:$0xff] }
 0x417   :  { %v5645_v58 = vadd.f32 1.0, %v4059_v44  ;;  %v2190_v44 = vor.u32 1.1754944e-38, %v2189_v38  ;;  %2336 = vmatmul.f32.vlgmr.msra.gmra.mxu2 %v6545_v53  ;;  %6698 = vst [vmem:[#allocation56_spill] sm:$0xff] %v5671_v59  ;;  %2503 = vmatpush.msrb.mxu3 %v5467_v9 }
 0x418   :  { %v2186_v24 = vsel %vm2185_vm11, %v4057_v52, %v2182_v12  ;;  %2373 = vmatpush.msrb.mxu0 %v5654_v48  ;;  %2393 = vmatpush.msrb.mxu1 %v5656_v37  ;;  %v5673_v12 = vld [vmem:[#allocation8 + $0x18] sm:$0xff]  ;;  %v4061_v52 = vpop.eup %4060 }
 0x419   :  { %4062 = vrcp.f32 %v5645_v58  ;;  %v2191_v47 = vsel %vm2188_vm12, %v2190_v44, %v2186_v24  ;;  %6699 = vst [vmem:[#allocation57_spill] sm:$0xff] %v5673_v12  ;;  %2482 = vmatpush.msrb.mxu2 %v5465_v31  ;;  %2504 = vmatpush.msrb.mxu3 %v5473_v16  ;;  %vm2203_vm14 = vweird.f32 %v5645_v58 }
 0x41a   :  { %2374 = vmatpush.msrb.mxu0 %v5664_v29  ;;  %2394 = vmatpush.msrb.mxu1 %v5666_v33  ;;  %v2213_v38 = vmul.f32 %v4061_v52, %v2191_v47  ;;  %v2209_v47 = vand.u32 2147483648, %v5645_v58 }
 0x41b   :  { %2483 = vmatpush.msrb.mxu2 %v5471_v15  ;;  %2505 = vmatpush.msrb.mxu3 %v5481_v51 }
 0x41c   :  { %2375 = vmatpush.msrb.mxu0 %v5671_v59  ;;  %2395 = vmatpush.msrb.mxu1 %v5673_v12  ;;  %4064 = vtanh.f32 %v2213_v38  ;;  %v2210_v38 = vor.u32 1.1754944e-38, %v2209_v47  ;;  %v6705_v47 = vld [vmem:[#allocation38_spill] sm:$0xff] }
 0x41d   :  { %2376 = vmatmul.f32.vlgmr.msrb.gmra.mxu0 %v6545_v53  ;;  %2484 = vmatpush.msrb.mxu2 %v5479_v45  ;;  %v2207_v53 = vand.u32 2147483647, %v5645_v58 }
 0x41e   :  { %2522 = vmatpush.msra.mxu0 %v5483_v32  ;;  %2506 = vmatpush.msrb.mxu3 %v5501_v49 }
 0x41f   :  { %v4063_v17 = vpop.eup %4062  ;;  %2485 = vmatpush.msrb.mxu2 %v5499_v62  ;;  %vm2208_vm1 = vcmp.eq.f32.partialorder %v2207_v53, 8.507059e+37  ;;  %v6702_v53 = vld [vmem:[#allocation44_spill] sm:$0xff] }
 0x420   :  { %v2199_v24 = vmul.f32 %v4063_v17, %v5645_v58  ;;  %2523 = vmatpush.msra.mxu0 %v5503_v2  ;;  %vm2204_vm13 = vweird.f32 %v4063_v17  ;;  %2507 = vmatpush.msrb.mxu3 %v5511_v19  ;;  %v6701_v58 = vld [vmem:[#allocation31_spill] sm:$0xff] }
 0x421   :  { %2486 = vmatpush.msrb.mxu2 %v5509_v14  ;;  %vm2205_vm15 = vmor %vm2203_vm14, %vm2204_vm13 }
 0x422   :  { %v2200_v44 = vsub.f32 1.0, %v2199_v24  ;;  %2524 = vmatpush.msra.mxu0 %v5515_v39  ;;  %v4065_v12 = vpop.eup %4064  ;;  %2508 = vmatpush.msrb.mxu3 %v5523_v57 }
 0x423   :  { %2487 = vmatpush.msrb.mxu2 %v5519_v30 }
 0x424   :  { %v2201_v52 = vmul.f32 %v4063_v17, %v2200_v44  ;;  %2525 = vmatpush.msra.mxu0 %v5525_v0  ;;  %2509 = vmatpush.msrb.mxu3 %v5533_v54 }
 0x425   :  { %2488 = vmatpush.msrb.mxu2 %v5531_v36 }
 0x426   :  { %v2202_v24 = vadd.f32 %v4063_v17, %v2201_v52  ;;  %2526 = vmatpush.msra.mxu0 %v5538_v55  ;;  %2510 = vmatpush.msrb.mxu3 %v5546_v42 }
 0x427   :  { %2489 = vmatpush.msrb.mxu2 %v5544_v41 }
 0x428   :  { %v2206_v44 = vsel %vm2205_vm15, %v4063_v17, %v2202_v24  ;;  %2527 = vmatpush.msra.mxu0 %v5550_v26  ;;  %2511 = vmatpush.msrb.mxu3 %v5560_v34  ;;  %v6704_v17 = vld [vmem:[#allocation48_spill] sm:$0xff]  ;;  %v6706_v24 = vld [vmem:[#allocation42_spill] sm:$0xff] }
 0x429   :  { %v2211_v33 = vsel %vm2208_vm1, %v2210_v38, %v2206_v44  ;;  %2490 = vmatpush.msrb.mxu2 %v5558_v5  ;;  %v6707_v38 = vld [vmem:[#allocation46_spill] sm:$0xff] }
 0x42a   :  { %v2215_v52 = vmul.f32 %v4065_v12, %v2211_v33  ;;  %2528 = vmatpush.msra.mxu0 %v5564_v6  ;;  %2512 = vmatpush.msrb.mxu3 %v5573_v46  ;;  %v6700_v33 = vmov 0.0   ;;  %v6703_v12 = vld [vmem:[#allocation34_spill] sm:$0xff] }
 0x42b   :  { %2491 = vmatpush.msrb.mxu2 %v5571_v27  ;;  %v6708_v44 = vld [vmem:[#allocation50_spill] sm:$0xff] }
 0x42c   :  { %2252 = vmatmul.f32.vlgmr.msra.gmra.mxu1 %v2215_v52  ;;  %2529 = vmatpush.msra.mxu0 %v5577_v50  ;;  %v6709_v52 = vld [vmem:[#allocation55_spill] sm:$0xff] }
 0x42d   :  { %2542 = vmatpush.msra.mxu1 %v5495_v10  ;;  %2492 = vmatpush.msrb.mxu2 %v5583_v40 }
 0x42e   :  { %2530 = vmatpush.msra.mxu0 %v5590_v43  ;;  %2513 = vmatpush.msrb.mxu3 %v5585_v3 }
 0x42f   :  { %2543 = vmatpush.msra.mxu1 %v5507_v13  ;;  %2493 = vmatpush.msrb.mxu2 %v5596_v23 }
 0x430   :  { %2531 = vmatpush.msra.mxu0 %v5602_v63  ;;  %2514 = vmatpush.msrb.mxu3 %v5598_v4 }
 0x431   :  { %2544 = vmatpush.msra.mxu1 %v5517_v60  ;;  %2494 = vmatpush.msrb.mxu2 %v5608_v25 }
 0x432   :  { %2532 = vmatpush.msra.mxu0 %v5615_v1  ;;  %2515 = vmatpush.msrb.mxu3 %v5610_v8 }
 0x433   :  { %2545 = vmatpush.msra.mxu1 %v5527_v21  ;;  %2495 = vmatpush.msrb.mxu2 %v5621_v35 }
 0x434   :  { %2396 = vmatmul.f32.vlgmr.msrb.gmra.mxu1 %v6700_v33  ;;  %2533 = vmatpush.msra.mxu0 %v5627_v18  ;;  %v6710_v33 = vld [vmem:[#allocation57_spill] sm:$0xff] }
 0x435   :  { %2546 = vmatpush.msra.mxu1 %v5540_v28  ;;  %2496 = vmatpush.msrb.mxu2 %v5633_v56 }
 0x436   :  { %2534 = vmatpush.msra.mxu0 %v5640_v7  ;;  %2516 = vmatpush.msrb.mxu3 %v6702_v53 }
 0x437   :  { %2547 = vmatpush.msra.mxu1 %v5552_v20  ;;  %2497 = vmatpush.msrb.mxu2 %v5649_v11 }
 0x438   :  { %2535 = vmatpush.msra.mxu0 %v5654_v48  ;;  %2517 = vmatpush.msrb.mxu3 %v6704_v17 }
 0x439   :  { %2548 = vmatpush.msra.mxu1 %v5566_v22  ;;  %2644 = vmatpush.msra.mxu2 %v5465_v31 }
 0x43a   :  { %2536 = vmatpush.msra.mxu0 %v5664_v29  ;;  %2664 = vmatpush.msra.mxu3 %v5457_v61 }
 0x43b   :  { %2549 = vmatpush.msra.mxu1 %v6701_v58  ;;  %2645 = vmatpush.msra.mxu2 %v5471_v15 }
 0x43c   :  { %2537 = vmatpush.msra.mxu0 %v5671_v59  ;;  %2665 = vmatpush.msra.mxu3 %v5467_v9 }
 0x43d   :  { %2550 = vmatpush.msra.mxu1 %v6703_v12  ;;  %2646 = vmatpush.msra.mxu2 %v5479_v45 }
 0x43e   :  { %2684 = vmatpush.msrb.mxu0 %v5483_v32  ;;  %2666 = vmatpush.msra.mxu3 %v5473_v16 }
 0x43f   :  { %2551 = vmatpush.msra.mxu1 %v6705_v47  ;;  %2647 = vmatpush.msra.mxu2 %v5499_v62 }
 0x440   :  { %2685 = vmatpush.msrb.mxu0 %v5503_v2  ;;  %2667 = vmatpush.msra.mxu3 %v5481_v51 }
 0x441   :  { %2552 = vmatpush.msra.mxu1 %v6706_v24  ;;  %2648 = vmatpush.msra.mxu2 %v5509_v14 }
 0x442   :  { %2686 = vmatpush.msrb.mxu0 %v5515_v39  ;;  %2668 = vmatpush.msra.mxu3 %v5501_v49 }
 0x443   :  { %2553 = vmatpush.msra.mxu1 %v6707_v38  ;;  %2649 = vmatpush.msra.mxu2 %v5519_v30 }
 0x444   :  { %2687 = vmatpush.msrb.mxu0 %v5525_v0  ;;  %2669 = vmatpush.msra.mxu3 %v5511_v19 }
 0x445   :  { %2554 = vmatpush.msra.mxu1 %v6708_v44  ;;  %2650 = vmatpush.msra.mxu2 %v5531_v36 }
 0x446   :  { %2688 = vmatpush.msrb.mxu0 %v5538_v55  ;;  %2670 = vmatpush.msra.mxu3 %v5523_v57 }
 0x447   :  { %2555 = vmatpush.msra.mxu1 %v5656_v37  ;;  %2651 = vmatpush.msra.mxu2 %v5544_v41 }
 0x448   :  { %2689 = vmatpush.msrb.mxu0 %v5550_v26  ;;  %2671 = vmatpush.msra.mxu3 %v5533_v54 }
 0x449   :  { %2556 = vmatpush.msra.mxu1 %v6709_v52  ;;  %2652 = vmatpush.msra.mxu2 %v5558_v5 }
 0x44a   :  { %2690 = vmatpush.msrb.mxu0 %v5564_v6  ;;  %2672 = vmatpush.msra.mxu3 %v5546_v42 }
 0x44b   :  { %2557 = vmatpush.msra.mxu1 %v6710_v33  ;;  %2653 = vmatpush.msra.mxu2 %v5571_v27 }
 0x44c   :  { %2691 = vmatpush.msrb.mxu0 %v5577_v50  ;;  %2673 = vmatpush.msra.mxu3 %v5560_v34 }
 0x44d   :  { %2704 = vmatpush.msrb.mxu1 %v5495_v10  ;;  %2654 = vmatpush.msra.mxu2 %v5583_v40 }
 0x44e   :  { %2692 = vmatpush.msrb.mxu0 %v5590_v43  ;;  %2674 = vmatpush.msra.mxu3 %v5573_v46 }
 0x44f   :  { %2705 = vmatpush.msrb.mxu1 %v5507_v13  ;;  %2655 = vmatpush.msra.mxu2 %v5596_v23 }
 0x450   :  { %2693 = vmatpush.msrb.mxu0 %v5602_v63  ;;  %2675 = vmatpush.msra.mxu3 %v5585_v3 }
 0x451   :  { %2706 = vmatpush.msrb.mxu1 %v5517_v60  ;;  %2656 = vmatpush.msra.mxu2 %v5608_v25 }
 0x452   :  { %2694 = vmatpush.msrb.mxu0 %v5615_v1  ;;  %2676 = vmatpush.msra.mxu3 %v5598_v4 }
 0x453   :  { %2707 = vmatpush.msrb.mxu1 %v5527_v21  ;;  %2657 = vmatpush.msra.mxu2 %v5621_v35 }
 0x454   :  { %2695 = vmatpush.msrb.mxu0 %v5627_v18  ;;  %2677 = vmatpush.msra.mxu3 %v5610_v8 }
 0x455   :  { %2708 = vmatpush.msrb.mxu1 %v5540_v28  ;;  %2658 = vmatpush.msra.mxu2 %v5633_v56 }
 0x456   :  { %2696 = vmatpush.msrb.mxu0 %v5640_v7  ;;  %2678 = vmatpush.msra.mxu3 %v6702_v53 }
 0x457   :  { %2709 = vmatpush.msrb.mxu1 %v5552_v20  ;;  %2659 = vmatpush.msra.mxu2 %v5649_v11 }
 0x458   :  { %2697 = vmatpush.msrb.mxu0 %v5654_v48  ;;  %2679 = vmatpush.msra.mxu3 %v6704_v17 }
 0x459   :  { %2710 = vmatpush.msrb.mxu1 %v5566_v22 }
 0x45a   :  { %2698 = vmatpush.msrb.mxu0 %v5664_v29 }
 0x45b   :  { %2711 = vmatpush.msrb.mxu1 %v6701_v58 }
 0x45c   :  { %2699 = vmatpush.msrb.mxu0 %v5671_v59 }
 0x45d   :  { %2712 = vmatpush.msrb.mxu1 %v6703_v12 }
 0x45f   :  { %2713 = vmatpush.msrb.mxu1 %v6705_v47 }
 0x461   :  { %2714 = vmatpush.msrb.mxu1 %v6706_v24 }
 0x463   :  { %2715 = vmatpush.msrb.mxu1 %v6707_v38 }
 0x465   :  { %2716 = vmatpush.msrb.mxu1 %v6708_v44 }
 0x467   :  { %2717 = vmatpush.msrb.mxu1 %v5656_v37  ;;  %v6712_v37 = vld [vmem:[#allocation23_spill] sm:$0xff] }
 0x469   :  { %2718 = vmatpush.msrb.mxu1 %v6709_v52 }
 0x46b   :  { %2719 = vmatpush.msrb.mxu1 %v6710_v33 }
 0x496   :  { %v2357_v11 = vpop.f32.mrf.mxu3 }
 0x497   :  { %v2404_v56 = vrot.slane %v2357_v11, 6 }
 0x49a   :  { %v2377_v53 = vpop.f32.mrf.mxu0  ;;  %v2337_v17 = vpop.f32.mrf.mxu2 }
 0x49b   :  { %v2405_v48 = vrot.slane %v2377_v53, 4  ;;  %v2407_v35 = vsel %vm523_vm4, %v2337_v17, %v2404_v56 }
 0x4a9   :  { %v5813_v29 = vpop.f32.mrf.mxu1 }
 0x4aa   :  { %6711 = vst [vmem:[#allocation31_spill] sm:$0xff] %v5813_v29 }
 0x4b1   :  { %v2397_v59 = vpop.f32.mrf.mxu1 }
 0x4b2   :  { %v2406_v8 = vrot.slane %v2397_v59, 2 }
 0x4b4   :  { %v2408_v7 = vsel %vm759_vm6, %v2405_v48, %v2406_v8 }
 0x4b5   :  { %v2409_v44 = vsel %vm359_vm0, %v2407_v35, %v2408_v7 }
 0x4b6   :  { %v2411_v4 = vadd.f32 %v2409_v44, %v6712_v37 }
 0x4b8   :  { %v4006_v52 = vmul.f32 -1.442695, %v2411_v4  ;;  %v2432_v25 = vrot.slane %v2411_v4, 2  ;;  %v2456_v33 = vrot.slane %v2411_v4, 6  ;;  %v2453_v8 = vrot.slane %v2411_v4, 4 }
 0x4ba   :  { %4066 = vpow2.f32 %v4006_v52  ;;  %v4007_v29 = vmul.f32 -1.442695, %v2432_v25  ;;  %v4008_v38 = vmul.f32 -1.442695, %v2456_v33 }
 0x4bc   :  { %4068 = vpow2.f32 %v4007_v29 }
 0x4bd   :  { %4070 = vpow2.f32 %v4008_v38 }
 0x4c0   :  { %v4067_v11 = vpop.eup %4066 }
 0x4c1   :  { %v2415_v53 = vadd.f32 1.0, %v4067_v11 }
 0x4c2   :  { %v4069_v18 = vpop.eup %4068 }
 0x4c3   :  { %v4071_v59 = vpop.eup %4070  ;;  %4072 = vrcp.f32 %v2415_v53  ;;  %v2437_v56 = vadd.f32 1.0, %v4069_v18  ;;  %v2427_v25 = vand.u32 2147483648, %v2415_v53  ;;  %v2425_v11 = vand.u32 2147483647, %v2415_v53 }
 0x4c4   :  { %v2461_v17 = vadd.f32 1.0, %v4071_v59  ;;  %vm2421_vm3 = vweird.f32 %v2415_v53 }
 0x4c5   :  { %4074 = vrcp.f32 %v2437_v56  ;;  %v2449_v3 = vand.u32 2147483648, %v2437_v56  ;;  %v2447_v23 = vand.u32 2147483647, %v2437_v56  ;;  %v2428_v24 = vor.u32 1.1754944e-38, %v2427_v25 }
 0x4c6   :  { %4076 = vrcp.f32 %v2461_v17  ;;  %vm2426_vm8 = vcmp.eq.f32.partialorder %v2425_v11, 8.507059e+37  ;;  %vm2443_vm9 = vweird.f32 %v2437_v56  ;;  %v2473_v25 = vand.u32 2147483648, %v2461_v17 }
 0x4c7   :  { %4078 = vtanh.f32 %v2453_v8  ;;  %vm2448_vm11 = vcmp.eq.f32.partialorder %v2447_v23, 8.507059e+37  ;;  %vm2467_vm13 = vweird.f32 %v2461_v17 }
 0x4c9   :  { %v4073_v48 = vpop.eup %4072 }
 0x4ca   :  { %v2417_v35 = vmul.f32 %v4073_v48, %v2415_v53  ;;  %vm2422_vm2 = vweird.f32 %v4073_v48 }
 0x4cb   :  { %v4075_v37 = vpop.eup %4074  ;;  %vm2423_vm7 = vmor %vm2421_vm3, %vm2422_vm2 }
 0x4cc   :  { %v4077_v7 = vpop.eup %4076  ;;  %v2418_v44 = vsub.f32 1.0, %v2417_v35  ;;  %v2439_v52 = vmul.f32 %v4075_v37, %v2437_v56  ;;  %vm2444_vm5 = vweird.f32 %v4075_v37  ;;  %v2474_v56 = vor.u32 1.1754944e-38, %v2473_v25 }
 0x4cd   :  { %v2463_v33 = vmul.f32 %v4077_v7, %v2461_v17  ;;  %vm2445_vm10 = vmor %vm2443_vm9, %vm2444_vm5  ;;  %v4079_v40 = vpop.eup %4078  ;;  %vm2468_vm12 = vweird.f32 %v4077_v7 }
 0x4ce   :  { %v2440_v29 = vsub.f32 1.0, %v2439_v52  ;;  %v2419_v38 = vmul.f32 %v4073_v48, %v2418_v44  ;;  %v2450_v52 = vor.u32 1.1754944e-38, %v2449_v3  ;;  %vm2469_vm14 = vmor %vm2467_vm13, %vm2468_vm12 }
 0x4cf   :  { %v2464_v1 = vsub.f32 1.0, %v2463_v33 }
 0x4d0   :  { %v2420_v18 = vadd.f32 %v4073_v48, %v2419_v38  ;;  %v2441_v59 = vmul.f32 %v4075_v37, %v2440_v29 }
 0x4d1   :  { %v2465_v53 = vmul.f32 %v4077_v7, %v2464_v1  ;;  %v6721_v1 = vld [vmem:[#allocation45_spill] sm:$0xff] }
 0x4d2   :  { %v2424_v4 = vsel %vm2423_vm7, %v4073_v48, %v2420_v18  ;;  %v2442_v35 = vadd.f32 %v4075_v37, %v2441_v59  ;;  %v2471_v48 = vand.u32 2147483647, %v2461_v17 }
 0x4d3   :  { %v2429_v46 = vsel %vm2426_vm8, %v2428_v24, %v2424_v4  ;;  %v2466_v63 = vadd.f32 %v4077_v7, %v2465_v53 }
 0x4d4   :  { %v2446_v44 = vsel %vm2445_vm10, %v4075_v37, %v2442_v35  ;;  %v2478_v38 = vmul.f32 %v4079_v40, %v2429_v46  ;;  %vm2472_vm15 = vcmp.eq.f32.partialorder %v2471_v48, 8.507059e+37  ;;  %v6739_v40 = vld [vmem:[#allocation20_spill] sm:$0xff] }
 0x4d5   :  { %v2451_v8 = vsel %vm2448_vm11, %v2450_v52, %v2446_v44  ;;  %v2470_v24 = vsel %vm2469_vm14, %v4077_v7, %v2466_v63  ;;  %v1904_v63 = vrot.slane %v6739_v40, 2 }
 0x4d6   :  { %v2477_v47 = vmul.f32 0.0, %v2451_v8  ;;  %v2475_v23 = vsel %vm2472_vm15, %v2474_v56, %v2470_v24 }
 0x4d8   :  { %v5819_v29 = vadd.f32 %v2478_v38, %v2477_v47 }
 0x4da   :  { %4080 = vtanh.f32 %v5819_v29 }
 0x4e0   :  { %v4081_v3 = vpop.eup %4080 }
 0x4e1   :  { %v2481_v37 = vmul.f32 %v4081_v3, %v2475_v23 }
 0x4e3   :  { %2498 = vmatmul.f32.vlgmr.msrb.gmra.mxu2 %v2481_v37  ;;  %2518 = vmatmul.f32.vlgmr.msrb.gmra.mxu3 %v2481_v37 }
 0x4e4   :  { %2538 = vmatmul.f32.vlgmr.msra.gmra.mxu0 %v2481_v37  ;;  %2558 = vmatmul.f32.vlgmr.msra.gmra.mxu1 %v2481_v37 }
 0x4e5   :  { %2806 = vmatpush.msrb.mxu2 %v5465_v31  ;;  %2826 = vmatpush.msrb.mxu3 %v5457_v61  ;;  %v6713_v61 = vld [vmem:[#allocation37_spill] sm:$0xff]  ;;  %v6714_v31 = vld [vmem:[#allocation38_spill] sm:$0xff] }
 0x4e6   :  { %2846 = vmatpush.msra.mxu0 %v5483_v32  ;;  %2866 = vmatpush.msra.mxu1 %v5495_v10  ;;  %v6720_v32 = vld [vmem:[#allocation33_spill] sm:$0xff]  ;;  %v6722_v10 = vld [vmem:[#allocation46_spill] sm:$0xff] }
 0x4e7   :  { %2807 = vmatpush.msrb.mxu2 %v5471_v15  ;;  %2827 = vmatpush.msrb.mxu3 %v5467_v9  ;;  %v6715_v9 = vld [vmem:[#allocation32_spill] sm:$0xff]  ;;  %v6716_v15 = vld [vmem:[#allocation30_spill] sm:$0xff] }
 0x4e8   :  { %2847 = vmatpush.msra.mxu0 %v5503_v2  ;;  %2867 = vmatpush.msra.mxu1 %v5507_v13  ;;  %v6725_v2 = vld [vmem:[#allocation49_spill] sm:$0xff]  ;;  %v6726_v13 = vld [vmem:[#allocation50_spill] sm:$0xff] }
 0x4e9   :  { %2808 = vmatpush.msrb.mxu2 %v5479_v45  ;;  %2828 = vmatpush.msrb.mxu3 %v5473_v16  ;;  %v6717_v16 = vld [vmem:[#allocation41_spill] sm:$0xff]  ;;  %v6718_v45 = vld [vmem:[#allocation42_spill] sm:$0xff] }
 0x4ea   :  { %2848 = vmatpush.msra.mxu0 %v5515_v39  ;;  %2868 = vmatpush.msra.mxu1 %v5517_v60  ;;  %v6729_v39 = vld [vmem:[#allocation52_spill] sm:$0xff]  ;;  %v6730_v60 = vld [vmem:[#allocation53_spill] sm:$0xff] }
 0x4eb   :  { %2809 = vmatpush.msrb.mxu2 %v5499_v62  ;;  %2829 = vmatpush.msrb.mxu3 %v5481_v51  ;;  %v6719_v51 = vld [vmem:[#allocation35_spill] sm:$0xff] }
 0x4ec   :  { %2849 = vmatpush.msra.mxu0 %v5525_v0  ;;  %2869 = vmatpush.msra.mxu1 %v5527_v21  ;;  %v6723_v62 = vld [vmem:[#allocation39_spill] sm:$0xff]  ;;  %v6733_v0 = vld [vmem:[#allocation54_spill] sm:$0xff] }
 0x4ed   :  { %2810 = vmatpush.msrb.mxu2 %v5509_v14  ;;  %2830 = vmatpush.msrb.mxu3 %v5501_v49  ;;  %v6724_v49 = vld [vmem:[#allocation36_spill] sm:$0xff]  ;;  %v6727_v14 = vld [vmem:[#allocation43_spill] sm:$0xff] }
 0x4ee   :  { %2850 = vmatpush.msra.mxu0 %v5538_v55  ;;  %2870 = vmatpush.msra.mxu1 %v5540_v28  ;;  %v6734_v21 = vld [vmem:[#allocation55_spill] sm:$0xff]  ;;  %v6737_v55 = vld [vmem:[#allocation56_spill] sm:$0xff]  ;;  %v6738_v28 = vld [vmem:[#allocation57_spill] sm:$0xff] }
 0x4ef   :  { %2811 = vmatpush.msrb.mxu2 %v5519_v30  ;;  %2831 = vmatpush.msrb.mxu3 %v5511_v19  ;;  %v6728_v19 = vld [vmem:[#allocation40_spill] sm:$0xff]  ;;  %v6731_v30 = vld [vmem:[#allocation47_spill] sm:$0xff] }
 0x4f0   :  { %2851 = vmatpush.msra.mxu0 %v5550_v26  ;;  %2871 = vmatpush.msra.mxu1 %v5552_v20 }
 0x4f1   :  { %2812 = vmatpush.msrb.mxu2 %v5531_v36  ;;  %2832 = vmatpush.msrb.mxu3 %v5523_v57  ;;  %v6732_v57 = vld [vmem:[#allocation44_spill] sm:$0xff]  ;;  %v6735_v36 = vld [vmem:[#allocation51_spill] sm:$0xff] }
 0x4f2   :  { %2852 = vmatpush.msra.mxu0 %v5564_v6  ;;  %2872 = vmatpush.msra.mxu1 %v5566_v22 }
 0x4f3   :  { %2813 = vmatpush.msrb.mxu2 %v5544_v41  ;;  %2833 = vmatpush.msrb.mxu3 %v5533_v54  ;;  %v6736_v54 = vld [vmem:[#allocation48_spill] sm:$0xff] }
 0x4f4   :  { %2853 = vmatpush.msra.mxu0 %v5577_v50  ;;  %2873 = vmatpush.msra.mxu1 %v6701_v58 }
 0x4f5   :  { %2814 = vmatpush.msrb.mxu2 %v5558_v5  ;;  %2834 = vmatpush.msrb.mxu3 %v5546_v42 }
 0x4f6   :  { %2854 = vmatpush.msra.mxu0 %v5590_v43  ;;  %2874 = vmatpush.msra.mxu1 %v6703_v12 }
 0x4f7   :  { %2815 = vmatpush.msrb.mxu2 %v5571_v27  ;;  %2835 = vmatpush.msrb.mxu3 %v5560_v34 }
 0x4f8   :  { %2855 = vmatpush.msra.mxu0 %v6713_v61  ;;  %2875 = vmatpush.msra.mxu1 %v6714_v31 }
 0x4f9   :  { %2816 = vmatpush.msrb.mxu2 %v6715_v9  ;;  %2836 = vmatpush.msrb.mxu3 %v6716_v15 }
 0x4fa   :  { %2856 = vmatpush.msra.mxu0 %v6717_v16  ;;  %2876 = vmatpush.msra.mxu1 %v6718_v45 }
 0x4fb   :  { %2817 = vmatpush.msrb.mxu2 %v6719_v51  ;;  %2837 = vmatpush.msrb.mxu3 %v6720_v32 }
 0x4fc   :  { %2857 = vmatpush.msra.mxu0 %v6721_v1  ;;  %2877 = vmatpush.msra.mxu1 %v6722_v10 }
 0x4fd   :  { %2818 = vmatpush.msrb.mxu2 %v6723_v62  ;;  %2838 = vmatpush.msrb.mxu3 %v6724_v49 }
 0x4fe   :  { %2858 = vmatpush.msra.mxu0 %v6725_v2  ;;  %2878 = vmatpush.msra.mxu1 %v6726_v13 }
 0x4ff   :  { %2819 = vmatpush.msrb.mxu2 %v6727_v14  ;;  %2839 = vmatpush.msrb.mxu3 %v6728_v19 }
 0x500   :  { %2859 = vmatpush.msra.mxu0 %v6729_v39  ;;  %2879 = vmatpush.msra.mxu1 %v6730_v60 }
 0x501   :  { %2820 = vmatpush.msrb.mxu2 %v6731_v30  ;;  %2840 = vmatpush.msrb.mxu3 %v6732_v57 }
 0x502   :  { %2860 = vmatpush.msra.mxu0 %v6733_v0  ;;  %2880 = vmatpush.msra.mxu1 %v6734_v21 }
 0x503   :  { %2821 = vmatpush.msrb.mxu2 %v6735_v36  ;;  %2841 = vmatpush.msrb.mxu3 %v6736_v54 }
 0x504   :  { %2861 = vmatpush.msra.mxu0 %v6737_v55  ;;  %2881 = vmatpush.msra.mxu1 %v6738_v28 }
 0x561   :  { %v2539_v41 = vpop.f32.mrf.mxu0  ;;  %v2559_v42 = vpop.f32.mrf.mxu1 }
 0x562   :  { %v2567_v26 = vrot.slane %v2539_v41, 4  ;;  %v2568_v20 = vrot.slane %v2559_v42, 2 }
 0x564   :  { %v2570_v46 = vsel %vm759_vm6, %v2567_v26, %v2568_v20 }
 0x566   :  { %v2519_v5 = vpop.f32.mrf.mxu3  ;;  %v2499_v27 = vpop.f32.mrf.mxu2 }
 0x567   :  { %v2566_v34 = vrot.slane %v2519_v5, 6 }
 0x569   :  { %v2569_v47 = vsel %vm523_vm4, %v2499_v27, %v2566_v34 }
 0x56a   :  { %v2571_v17 = vsel %vm359_vm0, %v2569_v47, %v2570_v46 }
 0x56b   :  { %v2573_v7 = vadd.f32 %v2571_v17, %v1904_v63 }
 0x56d   :  { %v4009_v33 = vmul.f32 -1.442695, %v2573_v7  ;;  %v2594_v11 = vrot.slane %v2573_v7, 2  ;;  %v2618_v18 = vrot.slane %v2573_v7, 6  ;;  %v2615_v56 = vrot.slane %v2573_v7, 4 }
 0x56f   :  { %4082 = vpow2.f32 %v4009_v33  ;;  %v4010_v59 = vmul.f32 -1.442695, %v2594_v11  ;;  %v4011_v4 = vmul.f32 -1.442695, %v2618_v18 }
 0x571   :  { %4084 = vpow2.f32 %v4010_v59 }
 0x572   :  { %4086 = vpow2.f32 %v4011_v4 }
 0x575   :  { %v4083_v35 = vpop.eup %4082 }
 0x576   :  { %v2577_v52 = vadd.f32 1.0, %v4083_v35 }
 0x577   :  { %v4085_v44 = vpop.eup %4084 }
 0x578   :  { %v4087_v8 = vpop.eup %4086  ;;  %4088 = vrcp.f32 %v2577_v52  ;;  %v2599_v53 = vadd.f32 1.0, %v4085_v44  ;;  %v2589_v15 = vand.u32 2147483648, %v2577_v52  ;;  %v2587_v26 = vand.u32 2147483647, %v2577_v52 }
 0x579   :  { %v2623_v38 = vadd.f32 1.0, %v4087_v8  ;;  %vm2583_vm2 = vweird.f32 %v2577_v52 }
 0x57a   :  { %4090 = vrcp.f32 %v2599_v53  ;;  %v2611_v20 = vand.u32 2147483648, %v2599_v53  ;;  %v2609_v27 = vand.u32 2147483647, %v2599_v53  ;;  %v2590_v46 = vor.u32 1.1754944e-38, %v2589_v15  ;;  %v5906_v15 = vld [vmem:[#allocation8 + $0x1c0] sm:$0xff] }
 0x57b   :  { %4092 = vrcp.f32 %v2623_v38  ;;  %vm2588_vm7 = vcmp.eq.f32.partialorder %v2587_v26, 8.507059e+37  ;;  %vm2605_vm8 = vweird.f32 %v2599_v53  ;;  %v2635_v8 = vand.u32 2147483648, %v2623_v38  ;;  %v5918_v26 = vld [vmem:[#allocation8 + $0x1a0] sm:$0xff] }
 0x57c   :  { %4094 = vtanh.f32 %v2615_v56  ;;  %v2612_v7 = vor.u32 1.1754944e-38, %v2611_v20  ;;  %vm2610_vm10 = vcmp.eq.f32.partialorder %v2609_v27, 8.507059e+37  ;;  %vm2629_vm12 = vweird.f32 %v2623_v38  ;;  %v5921_v20 = vld [vmem:[#allocation8 + $0x1a8] sm:$0xff]  ;;  %v5930_v27 = vld [vmem:[#allocation8 + $0x180] sm:$0xff] }
 0x57e   :  { %v4089_v25 = vpop.eup %4088 }
 0x57f   :  { %v2579_v48 = vmul.f32 %v4089_v25, %v2577_v52  ;;  %vm2584_vm1 = vweird.f32 %v4089_v25 }
 0x580   :  { %v4091_v24 = vpop.eup %4090  ;;  %vm2585_vm5 = vmor %vm2583_vm2, %vm2584_vm1 }
 0x581   :  { %v4093_v3 = vpop.eup %4092  ;;  %v2580_v23 = vsub.f32 1.0, %v2579_v48  ;;  %v2601_v37 = vmul.f32 %v4091_v24, %v2599_v53  ;;  %vm2606_vm3 = vweird.f32 %v4091_v24  ;;  %v2633_v53 = vand.u32 2147483647, %v2623_v38 }
 0x582   :  { %v2625_v32 = vmul.f32 %v4093_v3, %v2623_v38  ;;  %vm2607_vm9 = vmor %vm2605_vm8, %vm2606_vm3  ;;  %v4095_v11 = vpop.eup %4094  ;;  %vm2630_vm11 = vweird.f32 %v4093_v3  ;;  %v2636_v48 = vor.u32 1.1754944e-38, %v2635_v8  ;;  %v5900_v38 = vld [vmem:[#allocation8 + $0x1f0] sm:$0xff]  ;;  %v5974_v8 = vld [vmem:[#allocation8 + $0x100] sm:$0xff] }
 0x583   :  { %v2602_v41 = vsub.f32 1.0, %v2601_v37  ;;  %v2581_v42 = vmul.f32 %v4089_v25, %v2580_v23  ;;  %vm2631_vm13 = vmor %vm2629_vm12, %vm2630_vm11  ;;  %vm2634_vm14 = vcmp.eq.f32.partialorder %v2633_v53, 8.507059e+37  ;;  %v5897_v37 = vld [vmem:[#allocation8 + $0x1e8] sm:$0xff] }
 0x584   :  { %v2626_v40 = vsub.f32 1.0, %v2625_v32  ;;  %v5909_v32 = vld [vmem:[#allocation8 + $0x1c8] sm:$0xff] }
 0x585   :  { %v2582_v5 = vadd.f32 %v4089_v25, %v2581_v42  ;;  %v2603_v34 = vmul.f32 %v4091_v24, %v2602_v41  ;;  %v5912_v41 = vld [vmem:[#allocation8 + $0x1d0] sm:$0xff]  ;;  %v5915_v42 = vld [vmem:[#allocation8 + $0x1d8] sm:$0xff]  ;;  %v5977_v53 = vld [vmem:[#allocation8 + $0x108] sm:$0xff] }
 0x586   :  { %v2627_v59 = vmul.f32 %v4093_v3, %v2626_v40  ;;  %v5936_v40 = vld [vmem:[#allocation8 + $0x190] sm:$0xff] }
 0x587   :  { %v2586_v63 = vsel %vm2585_vm5, %v4089_v25, %v2582_v5  ;;  %v2604_v47 = vadd.f32 %v4091_v24, %v2603_v34  ;;  %v5924_v5 = vld [vmem:[#allocation8 + $0x1b0] sm:$0xff]  ;;  %v5927_v34 = vld [vmem:[#allocation8 + $0x1b8] sm:$0xff] }
 0x588   :  { %v2591_v17 = vsel %vm2588_vm7, %v2590_v46, %v2586_v63  ;;  %v2628_v44 = vadd.f32 %v4093_v3, %v2627_v59  ;;  %v5933_v46 = vld [vmem:[#allocation8 + $0x188] sm:$0xff]  ;;  %v5939_v63 = vld [vmem:[#allocation8 + $0x198] sm:$0xff]  ;;  %v5960_v59 = vld [vmem:[#allocation8 + $0x150] sm:$0xff] }
 0x589   :  { %v2608_v33 = vsel %vm2607_vm9, %v4091_v24, %v2604_v47  ;;  %v2640_v35 = vmul.f32 %v4095_v11, %v2591_v17  ;;  %v5942_v47 = vld [vmem:[#allocation8 + $0x160] sm:$0xff]  ;;  %v5945_v17 = vld [vmem:[#allocation8 + $0x168] sm:$0xff] }
 0x58a   :  { %v2613_v18 = vsel %vm2610_vm10, %v2612_v7, %v2608_v33  ;;  %v2632_v25 = vsel %vm2631_vm13, %v4093_v3, %v2628_v44  ;;  %v5903_v3 = vld [vmem:[#allocation8 + $0x1f8] sm:$0xff]  ;;  %v5948_v7 = vld [vmem:[#allocation8 + $0x170] sm:$0xff]  ;;  %v5954_v11 = vld [vmem:[#allocation8 + $0x140] sm:$0xff] }
 0x58b   :  { %v2639_v4 = vmul.f32 %v2613_v18, %v5819_v29  ;;  %v2637_v56 = vsel %vm2634_vm14, %v2636_v48, %v2632_v25  ;;  %v5894_v29 = vld [vmem:[#allocation8 + $0x1e0] sm:$0xff]  ;;  %v5951_v33 = vld [vmem:[#allocation8 + $0x178] sm:$0xff]  ;;  %v5957_v18 = vld [vmem:[#allocation8 + $0x148] sm:$0xff] }
 0x58c   :  { %v5969_v44 = vld [vmem:[#allocation8 + $0x128] sm:$0xff]  ;;  %v5982_v25 = vld [vmem:[#allocation8 + $0xe0] sm:$0xff] }
 0x58d   :  { %v5891_v52 = vadd.f32 %v2640_v35, %v2639_v4  ;;  %v5963_v4 = vld [vmem:[#allocation8 + $0x158] sm:$0xff]  ;;  %v5966_v35 = vld [vmem:[#allocation8 + $0x120] sm:$0xff]  ;;  %v5985_v48 = vld [vmem:[#allocation8 + $0xe8] sm:$0xff] }
 0x58f   :  { %4096 = vtanh.f32 %v5891_v52 }
 0x595   :  { %v4097_v24 = vpop.eup %4096 }
 0x596   :  { %v2643_v23 = vmul.f32 %v4097_v24, %v2637_v56 }
 0x598   :  { %2660 = vmatmul.f32.vlgmr.msra.gmra.mxu2 %v2643_v23  ;;  %2680 = vmatmul.f32.vlgmr.msra.gmra.mxu3 %v2643_v23 }
 0x599   :  { %2700 = vmatmul.f32.vlgmr.msrb.gmra.mxu0 %v2643_v23  ;;  %2720 = vmatmul.f32.vlgmr.msrb.gmra.mxu1 %v2643_v23 }
 0x59a   :  { %2968 = vmatpush.msra.mxu2 %v5894_v29  ;;  %2988 = vmatpush.msra.mxu3 %v5897_v37 }
 0x59b   :  { %3008 = vmatpush.msrb.mxu0 %v5900_v38  ;;  %3028 = vmatpush.msrb.mxu1 %v5903_v3 }
 0x59c   :  { %2969 = vmatpush.msra.mxu2 %v5906_v15  ;;  %2989 = vmatpush.msra.mxu3 %v5909_v32 }
 0x59d   :  { %3009 = vmatpush.msrb.mxu0 %v5912_v41  ;;  %3029 = vmatpush.msrb.mxu1 %v5915_v42 }
 0x59e   :  { %2970 = vmatpush.msra.mxu2 %v5918_v26  ;;  %2990 = vmatpush.msra.mxu3 %v5921_v20 }
 0x59f   :  { %3010 = vmatpush.msrb.mxu0 %v5924_v5  ;;  %3030 = vmatpush.msrb.mxu1 %v5927_v34 }
 0x5a0   :  { %2971 = vmatpush.msra.mxu2 %v5930_v27  ;;  %2991 = vmatpush.msra.mxu3 %v5933_v46 }
 0x5a1   :  { %3011 = vmatpush.msrb.mxu0 %v5936_v40  ;;  %3031 = vmatpush.msrb.mxu1 %v5939_v63 }
 0x5a2   :  { %2972 = vmatpush.msra.mxu2 %v5942_v47  ;;  %2992 = vmatpush.msra.mxu3 %v5945_v17 }
 0x5a3   :  { %3012 = vmatpush.msrb.mxu0 %v5948_v7  ;;  %3032 = vmatpush.msrb.mxu1 %v5951_v33 }
 0x5a4   :  { %2973 = vmatpush.msra.mxu2 %v5954_v11  ;;  %2993 = vmatpush.msra.mxu3 %v5957_v18 }
 0x5a5   :  { %3013 = vmatpush.msrb.mxu0 %v5960_v59  ;;  %3033 = vmatpush.msrb.mxu1 %v5963_v4 }
 0x5a6   :  { %2974 = vmatpush.msra.mxu2 %v5966_v35  ;;  %2994 = vmatpush.msra.mxu3 %v5969_v44 }
 0x5a7   :  { %3014 = vmatpush.msrb.mxu0 %v5564_v6  ;;  %3034 = vmatpush.msrb.mxu1 %v5566_v22  ;;  %v5990_v6 = vld [vmem:[#allocation8 + $0xc0] sm:$0xff]  ;;  %v5993_v22 = vld [vmem:[#allocation8 + $0xc8] sm:$0xff] }
 0x5a8   :  { %2975 = vmatpush.msra.mxu2 %v5974_v8  ;;  %2995 = vmatpush.msra.mxu3 %v5977_v53  ;;  %6740 = vst [vmem:[#allocation34_spill] sm:$0xff] %v5993_v22 }
 0x5a9   :  { %3015 = vmatpush.msrb.mxu0 %v5577_v50  ;;  %3035 = vmatpush.msrb.mxu1 %v6701_v58  ;;  %v5999_v50 = vld [vmem:[#allocation8 + $0xa8] sm:$0xff] }
 0x5aa   :  { %2976 = vmatpush.msra.mxu2 %v5982_v25  ;;  %2996 = vmatpush.msra.mxu3 %v5985_v48  ;;  %6741 = vst [vmem:[#allocation23_spill] sm:$0xff] %v5999_v50 }
 0x5ab   :  { %3016 = vmatpush.msrb.mxu0 %v5590_v43  ;;  %3036 = vmatpush.msrb.mxu1 %v6703_v12  ;;  %v6005_v43 = vld [vmem:[#allocation8 + $0x88] sm:$0xff] }
 0x5ac   :  { %2977 = vmatpush.msra.mxu2 %v5990_v6  ;;  %2997 = vmatpush.msra.mxu3 %v5993_v22  ;;  %6742 = vst [vmem:[#allocation37_spill] sm:$0xff] %v6005_v43 }
 0x5ad   :  { %3017 = vmatpush.msrb.mxu0 %v6713_v61  ;;  %3037 = vmatpush.msrb.mxu1 %v6714_v31 }
 0x5ae   :  { %2978 = vmatpush.msra.mxu2 %v6715_v9  ;;  %2998 = vmatpush.msra.mxu3 %v5999_v50 }
 0x5af   :  { %3018 = vmatpush.msrb.mxu0 %v6717_v16  ;;  %3038 = vmatpush.msrb.mxu1 %v6718_v45 }
 0x5b0   :  { %2979 = vmatpush.msra.mxu2 %v6719_v51  ;;  %2999 = vmatpush.msra.mxu3 %v6005_v43 }
 0x5b1   :  { %3019 = vmatpush.msrb.mxu0 %v6721_v1  ;;  %3039 = vmatpush.msrb.mxu1 %v6722_v10  ;;  %v6743_v1 = vld [vmem:[#allocation21_spill] sm:$0xff] }
 0x5b2   :  { %2980 = vmatpush.msra.mxu2 %v6723_v62  ;;  %3000 = vmatpush.msra.mxu3 %v6724_v49  ;;  %v1908_v10 = vrot.slane %v6743_v1, 4 }
 0x5b3   :  { %3020 = vmatpush.msrb.mxu0 %v6725_v2  ;;  %3040 = vmatpush.msrb.mxu1 %v6726_v13 }
 0x5b4   :  { %2981 = vmatpush.msra.mxu2 %v6727_v14  ;;  %3001 = vmatpush.msra.mxu3 %v6728_v19 }
 0x5b5   :  { %3021 = vmatpush.msrb.mxu0 %v6729_v39  ;;  %3041 = vmatpush.msrb.mxu1 %v6730_v60 }
 0x5b6   :  { %2982 = vmatpush.msra.mxu2 %v6731_v30  ;;  %3002 = vmatpush.msra.mxu3 %v6732_v57 }
 0x5b7   :  { %3022 = vmatpush.msrb.mxu0 %v6733_v0  ;;  %3042 = vmatpush.msrb.mxu1 %v6734_v21 }
 0x5b8   :  { %2983 = vmatpush.msra.mxu2 %v6735_v36  ;;  %3003 = vmatpush.msra.mxu3 %v6736_v54 }
 0x5b9   :  { %3023 = vmatpush.msrb.mxu0 %v6737_v55  ;;  %3043 = vmatpush.msrb.mxu1 %v6738_v28 }
 0x616   :  { %v2701_v58 = vpop.f32.mrf.mxu0  ;;  %v2721_v12 = vpop.f32.mrf.mxu1 }
 0x617   :  { %v2729_v61 = vrot.slane %v2701_v58, 4  ;;  %v2730_v31 = vrot.slane %v2721_v12, 2 }
 0x619   :  { %v2732_v51 = vsel %vm759_vm6, %v2729_v61, %v2730_v31 }
 0x61b   :  { %v2681_v9 = vpop.f32.mrf.mxu3  ;;  %v2661_v45 = vpop.f32.mrf.mxu2 }
 0x61c   :  { %v2728_v16 = vrot.slane %v2681_v9, 6 }
 0x61e   :  { %v2731_v62 = vsel %vm523_vm4, %v2661_v45, %v2728_v16 }
 0x61f   :  { %v2733_v49 = vsel %vm359_vm0, %v2731_v62, %v2732_v51 }
 0x620   :  { %v2735_v2 = vadd.f32 %v2733_v49, %v1908_v10 }
 0x622   :  { %v4012_v13 = vmul.f32 -1.442695, %v2735_v2  ;;  %v2756_v14 = vrot.slane %v2735_v2, 2  ;;  %v2780_v19 = vrot.slane %v2735_v2, 6  ;;  %v2777_v56 = vrot.slane %v2735_v2, 4 }
 0x624   :  { %4098 = vpow2.f32 %v4012_v13  ;;  %v4013_v39 = vmul.f32 -1.442695, %v2756_v14  ;;  %v4014_v60 = vmul.f32 -1.442695, %v2780_v19 }
 0x626   :  { %4100 = vpow2.f32 %v4013_v39 }
 0x627   :  { %4102 = vpow2.f32 %v4014_v60 }
 0x62a   :  { %v4099_v30 = vpop.eup %4098 }
 0x62b   :  { %v2739_v57 = vadd.f32 1.0, %v4099_v30 }
 0x62c   :  { %v4101_v0 = vpop.eup %4100 }
 0x62d   :  { %v4103_v21 = vpop.eup %4102  ;;  %4104 = vrcp.f32 %v2739_v57  ;;  %v2761_v36 = vadd.f32 1.0, %v4101_v0  ;;  %v2751_v61 = vand.u32 2147483648, %v2739_v57  ;;  %v2749_v45 = vand.u32 2147483647, %v2739_v57 }
 0x62e   :  { %v2785_v54 = vadd.f32 1.0, %v4103_v21  ;;  %vm2745_vm1 = vweird.f32 %v2739_v57 }
 0x62f   :  { %4106 = vrcp.f32 %v2761_v36  ;;  %v2773_v51 = vand.u32 2147483648, %v2761_v36  ;;  %v2771_v62 = vand.u32 2147483647, %v2761_v36  ;;  %v2752_v49 = vor.u32 1.1754944e-38, %v2751_v61 }
 0x630   :  { %4108 = vrcp.f32 %v2785_v54  ;;  %vm2750_vm5 = vcmp.eq.f32.partialorder %v2749_v45, 8.507059e+37  ;;  %vm2767_vm7 = vweird.f32 %v2761_v36  ;;  %vm2791_vm11 = vweird.f32 %v2785_v54  ;;  %v6076_v45 = vld [vmem:[#allocation8 + $0xf0] sm:$0xff] }
 0x631   :  { %4110 = vtanh.f32 %v2777_v56  ;;  %v2774_v39 = vor.u32 1.1754944e-38, %v2773_v51  ;;  %vm2772_vm9 = vcmp.eq.f32.partialorder %v2771_v62, 8.507059e+37  ;;  %v6079_v51 = vld [vmem:[#allocation8 + $0xf8] sm:$0xff]  ;;  %v6090_v62 = vld [vmem:[#allocation8 + $0xa0] sm:$0xff] }
 0x632   :  { %6746 = vst [vmem:[#allocation30_spill] sm:$0xff] %v6090_v62 }
 0x633   :  { %v4105_v55 = vpop.eup %4104 }
 0x634   :  { %v2741_v28 = vmul.f32 %v4105_v55, %v2739_v57  ;;  %vm2746_vm15 = vweird.f32 %v4105_v55 }
 0x635   :  { %v4107_v24 = vpop.eup %4106  ;;  %vm2747_vm3 = vmor %vm2745_vm1, %vm2746_vm15 }
 0x636   :  { %v4109_v23 = vpop.eup %4108  ;;  %v2742_v58 = vsub.f32 1.0, %v2741_v28  ;;  %v2763_v12 = vmul.f32 %v4107_v24, %v2761_v36  ;;  %vm2768_vm2 = vweird.f32 %v4107_v24  ;;  %v2795_v36 = vand.u32 2147483647, %v2785_v54 }
 0x637   :  { %v2787_v31 = vmul.f32 %v4109_v23, %v2785_v54  ;;  %vm2769_vm8 = vmor %vm2767_vm7, %vm2768_vm2  ;;  %v4111_v30 = vpop.eup %4110  ;;  %vm2792_vm10 = vweird.f32 %v4109_v23 }
 0x638   :  { %v2764_v9 = vsub.f32 1.0, %v2763_v12  ;;  %v2743_v16 = vmul.f32 %v4105_v55, %v2742_v58  ;;  %v2797_v12 = vand.u32 2147483648, %v2785_v54  ;;  %vm2793_vm12 = vmor %vm2791_vm11, %vm2792_vm10  ;;  %vm2796_vm13 = vcmp.eq.f32.partialorder %v2795_v36, 8.507059e+37  ;;  %v6063_v54 = vld [vmem:[#allocation8 + $0x138] sm:$0xff]  ;;  %v6137_v36 = vld [vmem:[#allocation8 + $0x28] sm:$0xff] }
 0x639   :  { %v2788_v13 = vsub.f32 1.0, %v2787_v31  ;;  %6761 = vst [vmem:[#allocation47_spill] sm:$0xff] %v6137_v36 }
 0x63a   :  { %v2744_v1 = vadd.f32 %v4105_v55, %v2743_v16  ;;  %v2765_v10 = vmul.f32 %v4107_v24, %v2764_v9  ;;  %v2798_v61 = vor.u32 1.1754944e-38, %v2797_v12  ;;  %v6071_v16 = vld [vmem:[#allocation8 + $0x118] sm:$0xff]  ;;  %v6134_v12 = vld [vmem:[#allocation8 + $0x20] sm:$0xff] }
 0x63b   :  { %v2789_v57 = vmul.f32 %v4109_v23, %v2788_v13  ;;  %v6097_v13 = vld [vmem:[#allocation8 + $0xb8] sm:$0xff]  ;;  %6760 = vst [vmem:[#allocation53_spill] sm:$0xff] %v6134_v12 }
 0x63c   :  { %v2748_v2 = vsel %vm2747_vm3, %v4105_v55, %v2744_v1  ;;  %v2766_v14 = vadd.f32 %v4107_v24, %v2765_v10  ;;  %v6084_v1 = vld [vmem:[#allocation8 + $0xd0] sm:$0xff]  ;;  %v6087_v10 = vld [vmem:[#allocation8 + $0xd8] sm:$0xff]  ;;  %6748 = vst [vmem:[#allocation42_spill] sm:$0xff] %v6097_v13 }
 0x63d   :  { %v2753_v19 = vsel %vm2750_vm5, %v2752_v49, %v2748_v2  ;;  %v2790_v58 = vadd.f32 %v4109_v23, %v2789_v57  ;;  %6744 = vst [vmem:[#allocation38_spill] sm:$0xff] %v6084_v1  ;;  %v6094_v49 = vld [vmem:[#allocation8 + $0xb0] sm:$0xff]  ;;  %v6100_v2 = vld [vmem:[#allocation8 + $0x80] sm:$0xff] }
 0x63e   :  { %v2770_v60 = vsel %vm2769_vm8, %v4107_v24, %v2766_v14  ;;  %v2802_v28 = vmul.f32 %v4111_v30, %v2753_v19  ;;  %6745 = vst [vmem:[#allocation32_spill] sm:$0xff] %v6087_v10  ;;  %v6104_v14 = vld [vmem:[#allocation8 + $0x90] sm:$0xff]  ;;  %v6107_v19 = vld [vmem:[#allocation8 + $0x98] sm:$0xff]  ;;  %v6122_v57 = vld [vmem:[#allocation8 + $0x40] sm:$0xff] }
 0x63f   :  { %v2775_v0 = vsel %vm2772_vm9, %v2774_v39, %v2770_v60  ;;  %v2794_v55 = vsel %vm2793_vm12, %v4109_v23, %v2790_v58  ;;  %v6068_v23 = vld [vmem:[#allocation8 + $0x110] sm:$0xff]  ;;  %6747 = vst [vmem:[#allocation41_spill] sm:$0xff] %v6094_v49  ;;  %v6110_v39 = vld [vmem:[#allocation8 + $0x60] sm:$0xff]  ;;  %v6113_v60 = vld [vmem:[#allocation8 + $0x68] sm:$0xff] }
 0x640   :  { %v2801_v21 = vmul.f32 %v2775_v0, %v5891_v52  ;;  %v2799_v31 = vsel %vm2796_vm13, %v2798_v61, %v2794_v55  ;;  %v6060_v52 = vld [vmem:[#allocation8 + $0x130] sm:$0xff]  ;;  %6749 = vst [vmem:[#allocation35_spill] sm:$0xff] %v6100_v2  ;;  %v6119_v0 = vld [vmem:[#allocation8 + $0x78] sm:$0xff] }
 0x641   :  { %6750 = vst [vmem:[#allocation33_spill] sm:$0xff] %v6104_v14  ;;  %v6116_v30 = vld [vmem:[#allocation8 + $0x70] sm:$0xff]  ;;  %v6131_v58 = vld [vmem:[#allocation8 + $0x58] sm:$0xff] }
 0x642   :  { %v6031_v56 = vadd.f32 %v2802_v28, %v2801_v21  ;;  %6751 = vst [vmem:[#allocation45_spill] sm:$0xff] %v6107_v19  ;;  %v6125_v21 = vld [vmem:[#allocation8 + $0x48] sm:$0xff]  ;;  %v6128_v28 = vld [vmem:[#allocation8 + $0x50] sm:$0xff]  ;;  %v6143_v61 = vld [vmem:[#allocation8 + $0x38] sm:$0xff] }
 0x643   :  { %6752 = vst [vmem:[#allocation46_spill] sm:$0xff] %v6110_v39  ;;  %v6140_v55 = vld [vmem:[#allocation8 + $0x30] sm:$0xff] }
 0x644   :  { %4112 = vtanh.f32 %v6031_v56  ;;  %6753 = vst [vmem:[#allocation39_spill] sm:$0xff] %v6113_v60 }
 0x645   :  { %6754 = vst [vmem:[#allocation36_spill] sm:$0xff] %v6116_v30 }
 0x646   :  { %6755 = vst [vmem:[#allocation49_spill] sm:$0xff] %v6119_v0 }
 0x647   :  { %6756 = vst [vmem:[#allocation50_spill] sm:$0xff] %v6122_v57 }
 0x648   :  { %6757 = vst [vmem:[#allocation43_spill] sm:$0xff] %v6125_v21 }
 0x649   :  { %6758 = vst [vmem:[#allocation40_spill] sm:$0xff] %v6128_v28 }
 0x64a   :  { %v4113_v24 = vpop.eup %4112  ;;  %6759 = vst [vmem:[#allocation52_spill] sm:$0xff] %v6131_v58 }
 0x64b   :  { %v2805_v9 = vmul.f32 %v4113_v24, %v2799_v31  ;;  %6762 = vst [vmem:[#allocation44_spill] sm:$0xff] %v6140_v55  ;;  %v6146_v24 = vld [vmem:[#allocation8] sm:$0xff]  ;;  %v6149_v31 = vld [vmem:[#allocation8 + $0x8] sm:$0xff] }
 0x64c   :  { %6763 = vst [vmem:[#allocation54_spill] sm:$0xff] %v6143_v61 }
 0x64d   :  { %2822 = vmatmul.f32.vlgmr.msrb.gmra.mxu2 %v2805_v9  ;;  %2842 = vmatmul.f32.vlgmr.msrb.gmra.mxu3 %v2805_v9  ;;  %6764 = vst [vmem:[#allocation55_spill] sm:$0xff] %v6146_v24 }
 0x64e   :  { %2862 = vmatmul.f32.vlgmr.msra.gmra.mxu0 %v2805_v9  ;;  %2882 = vmatmul.f32.vlgmr.msra.gmra.mxu1 %v2805_v9  ;;  %6765 = vst [vmem:[#allocation51_spill] sm:$0xff] %v6149_v31  ;;  %v6152_v9 = vld [vmem:[#allocation8 + $0x10] sm:$0xff] }
 0x64f   :  { %3130 = vmatpush.msrb.mxu2 %v5894_v29  ;;  %3150 = vmatpush.msrb.mxu3 %v5897_v37  ;;  %6766 = vst [vmem:[#allocation48_spill] sm:$0xff] %v6152_v9 }
 0x650   :  { %3170 = vmatpush.msra.mxu0 %v5900_v38  ;;  %3190 = vmatpush.msra.mxu1 %v5903_v3 }
 0x651   :  { %3131 = vmatpush.msrb.mxu2 %v5906_v15  ;;  %3151 = vmatpush.msrb.mxu3 %v5909_v32 }
 0x652   :  { %3171 = vmatpush.msra.mxu0 %v5912_v41  ;;  %3191 = vmatpush.msra.mxu1 %v5915_v42 }
 0x653   :  { %3132 = vmatpush.msrb.mxu2 %v5918_v26  ;;  %3152 = vmatpush.msrb.mxu3 %v5921_v20 }
 0x654   :  { %3172 = vmatpush.msra.mxu0 %v5924_v5  ;;  %3192 = vmatpush.msra.mxu1 %v5927_v34 }
 0x655   :  { %3133 = vmatpush.msrb.mxu2 %v5930_v27  ;;  %3153 = vmatpush.msrb.mxu3 %v5933_v46 }
 0x656   :  { %3173 = vmatpush.msra.mxu0 %v5936_v40  ;;  %3193 = vmatpush.msra.mxu1 %v5939_v63 }
 0x657   :  { %3134 = vmatpush.msrb.mxu2 %v5942_v47  ;;  %3154 = vmatpush.msrb.mxu3 %v5945_v17 }
 0x658   :  { %3174 = vmatpush.msra.mxu0 %v5948_v7  ;;  %3194 = vmatpush.msra.mxu1 %v5951_v33 }
 0x659   :  { %3135 = vmatpush.msrb.mxu2 %v5954_v11  ;;  %3155 = vmatpush.msrb.mxu3 %v5957_v18 }
 0x65a   :  { %3175 = vmatpush.msra.mxu0 %v5960_v59  ;;  %3195 = vmatpush.msra.mxu1 %v5963_v4 }
 0x65b   :  { %3136 = vmatpush.msrb.mxu2 %v5966_v35  ;;  %3156 = vmatpush.msrb.mxu3 %v5969_v44 }
 0x65c   :  { %3176 = vmatpush.msra.mxu0 %v6060_v52  ;;  %3196 = vmatpush.msra.mxu1 %v6063_v54 }
 0x65d   :  { %3137 = vmatpush.msrb.mxu2 %v5974_v8  ;;  %3157 = vmatpush.msrb.mxu3 %v5977_v53 }
 0x65e   :  { %3177 = vmatpush.msra.mxu0 %v6068_v23  ;;  %3197 = vmatpush.msra.mxu1 %v6071_v16 }
 0x65f   :  { %3138 = vmatpush.msrb.mxu2 %v5982_v25  ;;  %3158 = vmatpush.msrb.mxu3 %v5985_v48 }
 0x660   :  { %3178 = vmatpush.msra.mxu0 %v6076_v45  ;;  %3198 = vmatpush.msra.mxu1 %v6079_v51 }
 0x661   :  { %3139 = vmatpush.msrb.mxu2 %v5990_v6  ;;  %3159 = vmatpush.msrb.mxu3 %v5993_v22 }
 0x662   :  { %3179 = vmatpush.msra.mxu0 %v6084_v1  ;;  %3199 = vmatpush.msra.mxu1 %v6087_v10 }
 0x663   :  { %3140 = vmatpush.msrb.mxu2 %v6090_v62  ;;  %3160 = vmatpush.msrb.mxu3 %v5999_v50 }
 0x664   :  { %3180 = vmatpush.msra.mxu0 %v6094_v49  ;;  %3200 = vmatpush.msra.mxu1 %v6097_v13 }
 0x665   :  { %3141 = vmatpush.msrb.mxu2 %v6100_v2  ;;  %3161 = vmatpush.msrb.mxu3 %v6005_v43 }
 0x666   :  { %3181 = vmatpush.msra.mxu0 %v6104_v14  ;;  %3201 = vmatpush.msra.mxu1 %v6107_v19 }
 0x667   :  { %3142 = vmatpush.msrb.mxu2 %v6110_v39  ;;  %3162 = vmatpush.msrb.mxu3 %v6113_v60 }
 0x668   :  { %3182 = vmatpush.msra.mxu0 %v6116_v30  ;;  %3202 = vmatpush.msra.mxu1 %v6119_v0  ;;  %v6768_v0 = vld [vmem:[#allocation25_spill] sm:$0xff] }
 0x669   :  { %3143 = vmatpush.msrb.mxu2 %v6122_v57  ;;  %3163 = vmatpush.msrb.mxu3 %v6125_v21  ;;  %v1912_v30 = vrot.slane %v6768_v0, 6 }
 0x66a   :  { %3183 = vmatpush.msra.mxu0 %v6128_v28  ;;  %3203 = vmatpush.msra.mxu1 %v6131_v58 }
 0x66b   :  { %3144 = vmatpush.msrb.mxu2 %v6134_v12  ;;  %3164 = vmatpush.msrb.mxu3 %v6137_v36  ;;  %v6155_v36 = vld [vmem:[#allocation8 + $0x18] sm:$0xff] }
 0x66c   :  { %3184 = vmatpush.msra.mxu0 %v6140_v55  ;;  %3204 = vmatpush.msra.mxu1 %v6143_v61  ;;  %6767 = vst [vmem:[#allocation56_spill] sm:$0xff] %v6155_v36 }
 0x66d   :  { %3145 = vmatpush.msrb.mxu2 %v6146_v24  ;;  %3165 = vmatpush.msrb.mxu3 %v6149_v31 }
 0x66e   :  { %3185 = vmatpush.msra.mxu0 %v6152_v9  ;;  %3205 = vmatpush.msra.mxu1 %v6155_v36 }
 0x6cb   :  { %v2863_v55 = vpop.f32.mrf.mxu0  ;;  %v2883_v12 = vpop.f32.mrf.mxu1 }
 0x6cc   :  { %v2891_v58 = vrot.slane %v2863_v55, 4  ;;  %v2892_v61 = vrot.slane %v2883_v12, 2 }
 0x6ce   :  { %v2894_v24 = vsel %vm759_vm6, %v2891_v58, %v2892_v61 }
 0x6d0   :  { %v2843_v28 = vpop.f32.mrf.mxu3  ;;  %v2823_v57 = vpop.f32.mrf.mxu2 }
 0x6d1   :  { %v2890_v21 = vrot.slane %v2843_v28, 6 }
 0x6d3   :  { %v2893_v31 = vsel %vm523_vm4, %v2823_v57, %v2890_v21 }
 0x6d4   :  { %v2895_v60 = vsel %vm359_vm0, %v2893_v31, %v2894_v24 }
 0x6d5   :  { %v2897_v9 = vadd.f32 %v2895_v60, %v1912_v30 }
 0x6d7   :  { %v4015_v39 = vmul.f32 -1.442695, %v2897_v9  ;;  %v2918_v19 = vrot.slane %v2897_v9, 2  ;;  %v2942_v14 = vrot.slane %v2897_v9, 6  ;;  %v2939_v30 = vrot.slane %v2897_v9, 4 }
 0x6d9   :  { %4114 = vpow2.f32 %v4015_v39  ;;  %v4016_v36 = vmul.f32 -1.442695, %v2918_v19  ;;  %v4017_v43 = vmul.f32 -1.442695, %v2942_v14 }
 0x6db   :  { %4116 = vpow2.f32 %v4016_v36 }
 0x6dc   :  { %4118 = vpow2.f32 %v4017_v43 }
 0x6df   :  { %v4115_v12 = vpop.eup %4114 }
 0x6e0   :  { %v2901_v28 = vadd.f32 1.0, %v4115_v12 }
 0x6e1   :  { %v4117_v55 = vpop.eup %4116 }
 0x6e2   :  { %v4119_v2 = vpop.eup %4118  ;;  %4120 = vrcp.f32 %v2901_v28  ;;  %v2923_v58 = vadd.f32 1.0, %v4117_v55  ;;  %v2913_v19 = vand.u32 2147483648, %v2901_v28  ;;  %v2911_v31 = vand.u32 2147483647, %v2901_v28 }
 0x6e3   :  { %v2947_v0 = vadd.f32 1.0, %v4119_v2  ;;  %vm2907_vm15 = vweird.f32 %v2901_v28 }
 0x6e4   :  { %4122 = vrcp.f32 %v2923_v58  ;;  %v2935_v12 = vand.u32 2147483648, %v2923_v58  ;;  %v2933_v13 = vand.u32 2147483647, %v2923_v58  ;;  %v2914_v49 = vor.u32 1.1754944e-38, %v2913_v19 }
 0x6e5   :  { %4124 = vrcp.f32 %v2947_v0  ;;  %vm2912_vm3 = vcmp.eq.f32.partialorder %v2911_v31, 8.507059e+37  ;;  %vm2929_vm5 = vweird.f32 %v2923_v58  ;;  %v2959_v19 = vand.u32 2147483648, %v2947_v0  ;;  %v6776_v31 = vld [vmem:[#allocation35_spill] sm:$0xff] }
 0x6e6   :  { %4126 = vtanh.f32 %v2939_v30  ;;  %vm2934_vm8 = vcmp.eq.f32.partialorder %v2933_v13, 8.507059e+37  ;;  %vm2953_vm10 = vweird.f32 %v2947_v0 }
 0x6e8   :  { %v4121_v57 = vpop.eup %4120 }
 0x6e9   :  { %v2903_v21 = vmul.f32 %v4121_v57, %v2901_v28  ;;  %vm2908_vm14 = vweird.f32 %v4121_v57 }
 0x6ea   :  { %v4123_v60 = vpop.eup %4122  ;;  %vm2909_vm2 = vmor %vm2907_vm15, %vm2908_vm14 }
 0x6eb   :  { %v4125_v61 = vpop.eup %4124  ;;  %v2904_v24 = vsub.f32 1.0, %v2903_v21  ;;  %v2925_v39 = vmul.f32 %v4123_v60, %v2923_v58  ;;  %vm2930_vm1 = vweird.f32 %v4123_v60  ;;  %v2957_v58 = vand.u32 2147483647, %v2947_v0 }
 0x6ec   :  { %v2949_v14 = vmul.f32 %v4125_v61, %v2947_v0  ;;  %vm2931_vm7 = vmor %vm2929_vm5, %vm2930_vm1  ;;  %v4127_v10 = vpop.eup %4126  ;;  %vm2954_vm9 = vweird.f32 %v4125_v61  ;;  %v6774_v0 = vld [vmem:[#allocation41_spill] sm:$0xff] }
 0x6ed   :  { %v2926_v36 = vsub.f32 1.0, %v2925_v39  ;;  %v2905_v43 = vmul.f32 %v4121_v57, %v2904_v24  ;;  %v2936_v39 = vor.u32 1.1754944e-38, %v2935_v12  ;;  %vm2955_vm11 = vmor %vm2953_vm10, %vm2954_vm9  ;;  %vm2958_vm12 = vcmp.eq.f32.partialorder %v2957_v58, 8.507059e+37  ;;  %v6777_v12 = vld [vmem:[#allocation37_spill] sm:$0xff]  ;;  %v6789_v58 = vld [vmem:[#allocation47_spill] sm:$0xff] }
 0x6ee   :  { %v2950_v50 = vsub.f32 1.0, %v2949_v14 }
 0x6ef   :  { %v2906_v55 = vadd.f32 %v4121_v57, %v2905_v43  ;;  %v2927_v2 = vmul.f32 %v4123_v60, %v2926_v36 }
 0x6f0   :  { %v2951_v28 = vmul.f32 %v4125_v61, %v2950_v50  ;;  %v6770_v50 = vld [vmem:[#allocation38_spill] sm:$0xff] }
 0x6f1   :  { %v2910_v9 = vsel %vm2909_vm2, %v4121_v57, %v2906_v55  ;;  %v2928_v21 = vadd.f32 %v4123_v60, %v2927_v2  ;;  %v2960_v57 = vor.u32 1.1754944e-38, %v2959_v19  ;;  %v6778_v55 = vld [vmem:[#allocation33_spill] sm:$0xff] }
 0x6f2   :  { %v2915_v62 = vsel %vm2912_vm3, %v2914_v49, %v2910_v9  ;;  %v2952_v22 = vadd.f32 %v4125_v61, %v2951_v28  ;;  %v6779_v2 = vld [vmem:[#allocation45_spill] sm:$0xff]  ;;  %v6780_v9 = vld [vmem:[#allocation46_spill] sm:$0xff]  ;;  %v6785_v28 = vld [vmem:[#allocation43_spill] sm:$0xff] }
 0x6f3   :  { %v2932_v24 = vsel %vm2931_vm7, %v4123_v60, %v2928_v21  ;;  %v2964_v36 = vmul.f32 %v4127_v10, %v2915_v62  ;;  %v6772_v10 = vld [vmem:[#allocation30_spill] sm:$0xff]  ;;  %v6773_v62 = vld [vmem:[#allocation23_spill] sm:$0xff]  ;;  %v6788_v19 = vld [vmem:[#allocation53_spill] sm:$0xff] }
 0x6f4   :  { %v2937_v30 = vsel %vm2934_vm8, %v2936_v39, %v2932_v24  ;;  %v2956_v49 = vsel %vm2955_vm11, %v4125_v61, %v2952_v22  ;;  %v6769_v22 = vld [vmem:[#allocation34_spill] sm:$0xff]  ;;  %v6781_v21 = vld [vmem:[#allocation39_spill] sm:$0xff]  ;;  %v6782_v39 = vld [vmem:[#allocation36_spill] sm:$0xff] }
 0x6f5   :  { %v2963_v43 = vmul.f32 %v2937_v30, %v6031_v56  ;;  %v2961_v60 = vsel %vm2958_vm12, %v2960_v57, %v2956_v49  ;;  %v6771_v56 = vld [vmem:[#allocation32_spill] sm:$0xff]  ;;  %v6775_v61 = vld [vmem:[#allocation42_spill] sm:$0xff]  ;;  %v6783_v24 = vld [vmem:[#allocation49_spill] sm:$0xff] }
 0x6f6   :  { %v6784_v30 = vld [vmem:[#allocation50_spill] sm:$0xff]  ;;  %v6790_v49 = vld [vmem:[#allocation44_spill] sm:$0xff] }
 0x6f7   :  { %v6163_v1 = vadd.f32 %v2964_v36, %v2963_v43  ;;  %v6786_v43 = vld [vmem:[#allocation40_spill] sm:$0xff]  ;;  %v6791_v57 = vld [vmem:[#allocation54_spill] sm:$0xff] }
 0x6f8   :  { %v6787_v36 = vld [vmem:[#allocation52_spill] sm:$0xff] }
 0x6f9   :  { %4128 = vtanh.f32 %v6163_v1 }
 0x6ff   :  { %v4129_v13 = vpop.eup %4128 }
 0x700   :  { %v2967_v14 = vmul.f32 %v4129_v13, %v2961_v60  ;;  %v6792_v13 = vld [vmem:[#allocation55_spill] sm:$0xff] }
 0x701   :  { %v6793_v60 = vld [vmem:[#allocation51_spill] sm:$0xff] }
 0x702   :  { %2984 = vmatmul.f32.vlgmr.msra.gmra.mxu2 %v2967_v14  ;;  %3004 = vmatmul.f32.vlgmr.msra.gmra.mxu3 %v2967_v14 }
 0x703   :  { %3024 = vmatmul.f32.vlgmr.msrb.gmra.mxu0 %v2967_v14  ;;  %3044 = vmatmul.f32.vlgmr.msrb.gmra.mxu1 %v2967_v14  ;;  %v6794_v14 = vld [vmem:[#allocation48_spill] sm:$0xff] }
 0x704   :  { %3292 = vmatpush.msra.mxu2 %v5894_v29  ;;  %3312 = vmatpush.msra.mxu3 %v5897_v37 }
 0x705   :  { %3332 = vmatpush.msrb.mxu0 %v5900_v38  ;;  %3352 = vmatpush.msrb.mxu1 %v5903_v3 }
 0x706   :  { %3293 = vmatpush.msra.mxu2 %v5906_v15  ;;  %3313 = vmatpush.msra.mxu3 %v5909_v32 }
 0x707   :  { %3333 = vmatpush.msrb.mxu0 %v5912_v41  ;;  %3353 = vmatpush.msrb.mxu1 %v5915_v42 }
 0x708   :  { %3294 = vmatpush.msra.mxu2 %v5918_v26  ;;  %3314 = vmatpush.msra.mxu3 %v5921_v20 }
 0x709   :  { %3334 = vmatpush.msrb.mxu0 %v5924_v5  ;;  %3354 = vmatpush.msrb.mxu1 %v5927_v34 }
 0x70a   :  { %3295 = vmatpush.msra.mxu2 %v5930_v27  ;;  %3315 = vmatpush.msra.mxu3 %v5933_v46 }
 0x70b   :  { %3335 = vmatpush.msrb.mxu0 %v5936_v40  ;;  %3355 = vmatpush.msrb.mxu1 %v5939_v63 }
 0x70c   :  { %3296 = vmatpush.msra.mxu2 %v5942_v47  ;;  %3316 = vmatpush.msra.mxu3 %v5945_v17 }
 0x70d   :  { %3336 = vmatpush.msrb.mxu0 %v5948_v7  ;;  %3356 = vmatpush.msrb.mxu1 %v5951_v33 }
 0x70e   :  { %3297 = vmatpush.msra.mxu2 %v5954_v11  ;;  %3317 = vmatpush.msra.mxu3 %v5957_v18 }
 0x70f   :  { %3337 = vmatpush.msrb.mxu0 %v5960_v59  ;;  %3357 = vmatpush.msrb.mxu1 %v5963_v4 }
 0x710   :  { %3298 = vmatpush.msra.mxu2 %v5966_v35  ;;  %3318 = vmatpush.msra.mxu3 %v5969_v44 }
 0x711   :  { %3338 = vmatpush.msrb.mxu0 %v6060_v52  ;;  %3358 = vmatpush.msrb.mxu1 %v6063_v54 }
 0x712   :  { %3299 = vmatpush.msra.mxu2 %v5974_v8  ;;  %3319 = vmatpush.msra.mxu3 %v5977_v53 }
 0x713   :  { %3339 = vmatpush.msrb.mxu0 %v6068_v23  ;;  %3359 = vmatpush.msrb.mxu1 %v6071_v16 }
 0x714   :  { %3300 = vmatpush.msra.mxu2 %v5982_v25  ;;  %3320 = vmatpush.msra.mxu3 %v5985_v48 }
 0x715   :  { %3340 = vmatpush.msrb.mxu0 %v6076_v45  ;;  %3360 = vmatpush.msrb.mxu1 %v6079_v51 }
 0x716   :  { %3301 = vmatpush.msra.mxu2 %v5990_v6  ;;  %3321 = vmatpush.msra.mxu3 %v6769_v22 }
 0x717   :  { %3341 = vmatpush.msrb.mxu0 %v6770_v50  ;;  %3361 = vmatpush.msrb.mxu1 %v6771_v56 }
 0x718   :  { %3302 = vmatpush.msra.mxu2 %v6772_v10  ;;  %3322 = vmatpush.msra.mxu3 %v6773_v62 }
 0x719   :  { %3342 = vmatpush.msrb.mxu0 %v6774_v0  ;;  %3362 = vmatpush.msrb.mxu1 %v6775_v61 }
 0x71a   :  { %3303 = vmatpush.msra.mxu2 %v6776_v31  ;;  %3323 = vmatpush.msra.mxu3 %v6777_v12 }
 0x71b   :  { %3343 = vmatpush.msrb.mxu0 %v6778_v55  ;;  %3363 = vmatpush.msrb.mxu1 %v6779_v2 }
 0x71c   :  { %3304 = vmatpush.msra.mxu2 %v6780_v9  ;;  %3324 = vmatpush.msra.mxu3 %v6781_v21 }
 0x71d   :  { %3344 = vmatpush.msrb.mxu0 %v6782_v39  ;;  %3364 = vmatpush.msrb.mxu1 %v6783_v24 }
 0x71e   :  { %3305 = vmatpush.msra.mxu2 %v6784_v30  ;;  %3325 = vmatpush.msra.mxu3 %v6785_v28  ;;  %v6795_v30 = vld [vmem:[#allocation56_spill] sm:$0xff] }
 0x71f   :  { %3345 = vmatpush.msrb.mxu0 %v6786_v43  ;;  %3365 = vmatpush.msrb.mxu1 %v6787_v36 }
 0x720   :  { %3306 = vmatpush.msra.mxu2 %v6788_v19  ;;  %3326 = vmatpush.msra.mxu3 %v6789_v58 }
 0x721   :  { %3346 = vmatpush.msrb.mxu0 %v6790_v49  ;;  %3366 = vmatpush.msrb.mxu1 %v6791_v57 }
 0x722   :  { %3307 = vmatpush.msra.mxu2 %v6792_v13  ;;  %3327 = vmatpush.msra.mxu3 %v6793_v60  ;;  %v6796_v13 = vld [vmem:[#allocation26_spill] sm:$0xff] }
 0x723   :  { %3347 = vmatpush.msrb.mxu0 %v6794_v14  ;;  %3367 = vmatpush.msrb.mxu1 %v6795_v30 }
 0x780   :  { %v3025_v28 = vpop.f32.mrf.mxu0  ;;  %v3045_v43 = vpop.f32.mrf.mxu1 }
 0x781   :  { %v3053_v24 = vrot.slane %v3025_v28, 4  ;;  %v3054_v36 = vrot.slane %v3045_v43, 2 }
 0x783   :  { %v3056_v58 = vsel %vm759_vm6, %v3053_v24, %v3054_v36 }
 0x785   :  { %v3005_v39 = vpop.f32.mrf.mxu3  ;;  %v2985_v21 = vpop.f32.mrf.mxu2 }
 0x786   :  { %v3052_v19 = vrot.slane %v3005_v39, 6 }
 0x788   :  { %v3055_v49 = vsel %vm523_vm4, %v2985_v21, %v3052_v19 }
 0x789   :  { %v3057_v57 = vsel %vm359_vm0, %v3055_v49, %v3056_v58 }
 0x78a   :  { %v3059_v9 = vadd.f32 %v3057_v57, %v6796_v13 }
 0x78c   :  { %v4018_v60 = vmul.f32 -1.442695, %v3059_v9  ;;  %v3080_v2 = vrot.slane %v3059_v9, 2  ;;  %v3104_v14 = vrot.slane %v3059_v9, 6  ;;  %v3101_v49 = vrot.slane %v3059_v9, 4 }
 0x78e   :  { %4130 = vpow2.f32 %v4018_v60  ;;  %v4019_v30 = vmul.f32 -1.442695, %v3080_v2  ;;  %v4020_v55 = vmul.f32 -1.442695, %v3104_v14 }
 0x790   :  { %4132 = vpow2.f32 %v4019_v30 }
 0x791   :  { %4134 = vpow2.f32 %v4020_v55 }
 0x794   :  { %v4131_v28 = vpop.eup %4130 }
 0x795   :  { %v3063_v43 = vadd.f32 1.0, %v4131_v28 }
 0x796   :  { %v4133_v39 = vpop.eup %4132 }
 0x797   :  { %v4135_v12 = vpop.eup %4134  ;;  %4136 = vrcp.f32 %v3063_v43  ;;  %v3085_v24 = vadd.f32 1.0, %v4133_v39  ;;  %v3075_v2 = vand.u32 2147483648, %v3063_v43  ;;  %v3073_v28 = vand.u32 2147483647, %v3063_v43 }
 0x798   :  { %v3109_v36 = vadd.f32 1.0, %v4135_v12  ;;  %vm3069_vm14 = vweird.f32 %v3063_v43 }
 0x799   :  { %4138 = vrcp.f32 %v3085_v24  ;;  %v3097_v31 = vand.u32 2147483648, %v3085_v24  ;;  %v3095_v61 = vand.u32 2147483647, %v3085_v24  ;;  %v3076_v0 = vor.u32 1.1754944e-38, %v3075_v2 }
 0x79a   :  { %4140 = vrcp.f32 %v3109_v36  ;;  %vm3074_vm2 = vcmp.eq.f32.partialorder %v3073_v28, 8.507059e+37  ;;  %vm3091_vm3 = vweird.f32 %v3085_v24  ;;  %v3121_v2 = vand.u32 2147483648, %v3109_v36 }
 0x79b   :  { %4142 = vtanh.f32 %v3101_v49  ;;  %vm3096_vm7 = vcmp.eq.f32.partialorder %v3095_v61, 8.507059e+37  ;;  %vm3115_vm9 = vweird.f32 %v3109_v36 }
 0x79d   :  { %v4137_v21 = vpop.eup %4136 }
 0x79e   :  { %v3065_v19 = vmul.f32 %v4137_v21, %v3063_v43  ;;  %vm3070_vm13 = vweird.f32 %v4137_v21 }
 0x79f   :  { %v4139_v58 = vpop.eup %4138  ;;  %vm3071_vm1 = vmor %vm3069_vm14, %vm3070_vm13 }
 0x7a0   :  { %v4141_v57 = vpop.eup %4140  ;;  %v3066_v13 = vsub.f32 1.0, %v3065_v19  ;;  %v3087_v60 = vmul.f32 %v4139_v58, %v3085_v24  ;;  %vm3092_vm15 = vweird.f32 %v4139_v58  ;;  %v3119_v24 = vand.u32 2147483647, %v3109_v36 }
 0x7a1   :  { %v3111_v14 = vmul.f32 %v4141_v57, %v3109_v36  ;;  %vm3093_vm5 = vmor %vm3091_vm3, %vm3092_vm15  ;;  %v4143_v56 = vpop.eup %4142  ;;  %vm3116_vm8 = vweird.f32 %v4141_v57 }
 0x7a2   :  { %v3088_v30 = vsub.f32 1.0, %v3087_v60  ;;  %v3067_v55 = vmul.f32 %v4137_v21, %v3066_v13  ;;  %v3098_v60 = vor.u32 1.1754944e-38, %v3097_v31  ;;  %vm3117_vm10 = vmor %vm3115_vm9, %vm3116_vm8  ;;  %v3122_v31 = vor.u32 1.1754944e-38, %v3121_v2 }
 0x7a3   :  { %v3112_v62 = vsub.f32 1.0, %v3111_v14  ;;  %vm3120_vm11 = vcmp.eq.f32.partialorder %v3119_v24, 8.507059e+37 }
 0x7a4   :  { %v3068_v39 = vadd.f32 %v4137_v21, %v3067_v55  ;;  %v3089_v12 = vmul.f32 %v4139_v58, %v3088_v30 }
 0x7a5   :  { %v3113_v43 = vmul.f32 %v4141_v57, %v3112_v62  ;;  %v6824_v62 = vld [vmem:[#allocation22_spill] sm:$0xff] }
 0x7a6   :  { %v3072_v9 = vsel %vm3071_vm1, %v4137_v21, %v3068_v39  ;;  %v3090_v19 = vadd.f32 %v4139_v58, %v3089_v12  ;;  %v1919_v36 = vrot.slane %v6824_v62, 2 }
 0x7a7   :  { %v3077_v10 = vsel %vm3074_vm2, %v3076_v0, %v3072_v9  ;;  %v3114_v22 = vadd.f32 %v4141_v57, %v3113_v43 }
 0x7a8   :  { %v3094_v13 = vsel %vm3093_vm5, %v4139_v58, %v3090_v19  ;;  %v3126_v30 = vmul.f32 %v4143_v56, %v3077_v10 }
 0x7a9   :  { %v3099_v49 = vsel %vm3096_vm7, %v3098_v60, %v3094_v13  ;;  %v3118_v0 = vsel %vm3117_vm10, %v4141_v57, %v3114_v22 }
 0x7aa   :  { %v3125_v55 = vmul.f32 %v3099_v49, %v6163_v1  ;;  %v3123_v21 = vsel %vm3120_vm11, %v3122_v31, %v3118_v0 }
 0x7ac   :  { %v6235_v50 = vadd.f32 %v3126_v30, %v3125_v55 }
 0x7ae   :  { %4144 = vtanh.f32 %v6235_v50 }
 0x7b4   :  { %v4145_v61 = vpop.eup %4144 }
 0x7b5   :  { %v3129_v58 = vmul.f32 %v4145_v61, %v3123_v21 }
 0x7b7   :  { %3146 = vmatmul.f32.vlgmr.msrb.gmra.mxu2 %v3129_v58  ;;  %3166 = vmatmul.f32.vlgmr.msrb.gmra.mxu3 %v3129_v58 }
 0x7b8   :  { %3186 = vmatmul.f32.vlgmr.msra.gmra.mxu0 %v3129_v58  ;;  %3206 = vmatmul.f32.vlgmr.msra.gmra.mxu1 %v3129_v58 }
 0x7b9   :  { %3454 = vmatpush.msrb.mxu2 %v5894_v29  ;;  %3474 = vmatpush.msrb.mxu3 %v5897_v37  ;;  %v6797_v29 = vld [vmem:[#allocation34_spill] sm:$0xff] }
 0x7ba   :  { %3494 = vmatpush.msra.mxu0 %v5900_v38  ;;  %3514 = vmatpush.msra.mxu1 %v5903_v3  ;;  %v6798_v37 = vld [vmem:[#allocation38_spill] sm:$0xff]  ;;  %v6799_v38 = vld [vmem:[#allocation32_spill] sm:$0xff] }
 0x7bb   :  { %3455 = vmatpush.msrb.mxu2 %v5906_v15  ;;  %3475 = vmatpush.msrb.mxu3 %v5909_v32  ;;  %v6800_v3 = vld [vmem:[#allocation30_spill] sm:$0xff]  ;;  %v6801_v15 = vld [vmem:[#allocation23_spill] sm:$0xff]  ;;  %v6802_v32 = vld [vmem:[#allocation41_spill] sm:$0xff] }
 0x7bc   :  { %3495 = vmatpush.msra.mxu0 %v5912_v41  ;;  %3515 = vmatpush.msra.mxu1 %v5915_v42  ;;  %v6803_v41 = vld [vmem:[#allocation42_spill] sm:$0xff]  ;;  %v6804_v42 = vld [vmem:[#allocation35_spill] sm:$0xff] }
 0x7bd   :  { %3456 = vmatpush.msrb.mxu2 %v5918_v26  ;;  %3476 = vmatpush.msrb.mxu3 %v5921_v20  ;;  %v6805_v26 = vld [vmem:[#allocation37_spill] sm:$0xff] }
 0x7be   :  { %3496 = vmatpush.msra.mxu0 %v5924_v5  ;;  %3516 = vmatpush.msra.mxu1 %v5927_v34  ;;  %v6806_v20 = vld [vmem:[#allocation33_spill] sm:$0xff]  ;;  %v6808_v34 = vld [vmem:[#allocation46_spill] sm:$0xff] }
 0x7bf   :  { %3457 = vmatpush.msrb.mxu2 %v5930_v27  ;;  %3477 = vmatpush.msrb.mxu3 %v5933_v46  ;;  %v6807_v5 = vld [vmem:[#allocation45_spill] sm:$0xff]  ;;  %v6809_v27 = vld [vmem:[#allocation39_spill] sm:$0xff]  ;;  %v6810_v46 = vld [vmem:[#allocation36_spill] sm:$0xff] }
 0x7c0   :  { %3497 = vmatpush.msra.mxu0 %v5936_v40  ;;  %3517 = vmatpush.msra.mxu1 %v5939_v63  ;;  %v6811_v40 = vld [vmem:[#allocation49_spill] sm:$0xff]  ;;  %v6812_v63 = vld [vmem:[#allocation50_spill] sm:$0xff] }
 0x7c1   :  { %3458 = vmatpush.msrb.mxu2 %v5942_v47  ;;  %3478 = vmatpush.msrb.mxu3 %v5945_v17  ;;  %v6813_v47 = vld [vmem:[#allocation43_spill] sm:$0xff]  ;;  %v6814_v17 = vld [vmem:[#allocation40_spill] sm:$0xff] }
 0x7c2   :  { %3498 = vmatpush.msra.mxu0 %v5948_v7  ;;  %3518 = vmatpush.msra.mxu1 %v5951_v33  ;;  %v6815_v7 = vld [vmem:[#allocation52_spill] sm:$0xff]  ;;  %v6816_v33 = vld [vmem:[#allocation53_spill] sm:$0xff] }
 0x7c3   :  { %3459 = vmatpush.msrb.mxu2 %v5954_v11  ;;  %3479 = vmatpush.msrb.mxu3 %v5957_v18  ;;  %v6817_v11 = vld [vmem:[#allocation47_spill] sm:$0xff]  ;;  %v6818_v18 = vld [vmem:[#allocation44_spill] sm:$0xff] }
 0x7c4   :  { %3499 = vmatpush.msra.mxu0 %v5960_v59  ;;  %3519 = vmatpush.msra.mxu1 %v5963_v4  ;;  %v6819_v59 = vld [vmem:[#allocation54_spill] sm:$0xff]  ;;  %v6820_v4 = vld [vmem:[#allocation55_spill] sm:$0xff] }
 0x7c5   :  { %3460 = vmatpush.msrb.mxu2 %v5966_v35  ;;  %3480 = vmatpush.msrb.mxu3 %v5969_v44  ;;  %v6821_v35 = vld [vmem:[#allocation51_spill] sm:$0xff]  ;;  %v6822_v44 = vld [vmem:[#allocation48_spill] sm:$0xff] }
 0x7c6   :  { %3500 = vmatpush.msra.mxu0 %v6060_v52  ;;  %3520 = vmatpush.msra.mxu1 %v6063_v54 }
 0x7c7   :  { %3461 = vmatpush.msrb.mxu2 %v5974_v8  ;;  %3481 = vmatpush.msrb.mxu3 %v5977_v53  ;;  %v6823_v8 = vld [vmem:[#allocation56_spill] sm:$0xff] }
 0x7c8   :  { %3501 = vmatpush.msra.mxu0 %v6068_v23  ;;  %3521 = vmatpush.msra.mxu1 %v6071_v16 }
 0x7c9   :  { %3462 = vmatpush.msrb.mxu2 %v5982_v25  ;;  %3482 = vmatpush.msrb.mxu3 %v5985_v48 }
 0x7ca   :  { %3502 = vmatpush.msra.mxu0 %v6076_v45  ;;  %3522 = vmatpush.msra.mxu1 %v6079_v51 }
 0x7cb   :  { %3463 = vmatpush.msrb.mxu2 %v5990_v6  ;;  %3483 = vmatpush.msrb.mxu3 %v6797_v29 }
 0x7cc   :  { %3503 = vmatpush.msra.mxu0 %v6798_v37  ;;  %3523 = vmatpush.msra.mxu1 %v6799_v38 }
 0x7cd   :  { %3464 = vmatpush.msrb.mxu2 %v6800_v3  ;;  %3484 = vmatpush.msrb.mxu3 %v6801_v15 }
 0x7ce   :  { %3504 = vmatpush.msra.mxu0 %v6802_v32  ;;  %3524 = vmatpush.msra.mxu1 %v6803_v41 }
 0x7cf   :  { %3465 = vmatpush.msrb.mxu2 %v6804_v42  ;;  %3485 = vmatpush.msrb.mxu3 %v6805_v26 }
 0x7d0   :  { %3505 = vmatpush.msra.mxu0 %v6806_v20  ;;  %3525 = vmatpush.msra.mxu1 %v6807_v5 }
 0x7d1   :  { %3466 = vmatpush.msrb.mxu2 %v6808_v34  ;;  %3486 = vmatpush.msrb.mxu3 %v6809_v27 }
 0x7d2   :  { %3506 = vmatpush.msra.mxu0 %v6810_v46  ;;  %3526 = vmatpush.msra.mxu1 %v6811_v40 }
 0x7d3   :  { %3467 = vmatpush.msrb.mxu2 %v6812_v63  ;;  %3487 = vmatpush.msrb.mxu3 %v6813_v47 }
 0x7d4   :  { %3507 = vmatpush.msra.mxu0 %v6814_v17  ;;  %3527 = vmatpush.msra.mxu1 %v6815_v7 }
 0x7d5   :  { %3468 = vmatpush.msrb.mxu2 %v6816_v33  ;;  %3488 = vmatpush.msrb.mxu3 %v6817_v11 }
 0x7d6   :  { %3508 = vmatpush.msra.mxu0 %v6818_v18  ;;  %3528 = vmatpush.msra.mxu1 %v6819_v59 }
 0x7d7   :  { %3469 = vmatpush.msrb.mxu2 %v6820_v4  ;;  %3489 = vmatpush.msrb.mxu3 %v6821_v35 }
 0x7d8   :  { %3509 = vmatpush.msra.mxu0 %v6822_v44  ;;  %3529 = vmatpush.msra.mxu1 %v6823_v8 }
 0x835   :  { %v3187_v53 = vpop.f32.mrf.mxu0  ;;  %v3207_v25 = vpop.f32.mrf.mxu1 }
 0x836   :  { %v3215_v48 = vrot.slane %v3187_v53, 4  ;;  %v3216_v6 = vrot.slane %v3207_v25, 2 }
 0x838   :  { %v3218_v10 = vsel %vm759_vm6, %v3215_v48, %v3216_v6 }
 0x83a   :  { %v3167_v1 = vpop.f32.mrf.mxu3  ;;  %v3147_v56 = vpop.f32.mrf.mxu2 }
 0x83b   :  { %v3214_v22 = vrot.slane %v3167_v1, 6 }
 0x83d   :  { %v3217_v57 = vsel %vm523_vm4, %v3147_v56, %v3214_v22 }
 0x83e   :  { %v3219_v14 = vsel %vm359_vm0, %v3217_v57, %v3218_v10 }
 0x83f   :  { %v3221_v28 = vadd.f32 %v3219_v14, %v1919_v36 }
 0x841   :  { %v4021_v39 = vmul.f32 -1.442695, %v3221_v28  ;;  %v3242_v12 = vrot.slane %v3221_v28, 2  ;;  %v3266_v9 = vrot.slane %v3221_v28, 6  ;;  %v3263_v61 = vrot.slane %v3221_v28, 4 }
 0x843   :  { %4146 = vpow2.f32 %v4021_v39  ;;  %v4022_v19 = vmul.f32 -1.442695, %v3242_v12  ;;  %v4023_v60 = vmul.f32 -1.442695, %v3266_v9 }
 0x845   :  { %4148 = vpow2.f32 %v4022_v19 }
 0x846   :  { %4150 = vpow2.f32 %v4023_v60 }
 0x849   :  { %v4147_v13 = vpop.eup %4146 }
 0x84a   :  { %v3225_v49 = vadd.f32 1.0, %v4147_v13 }
 0x84b   :  { %v4149_v43 = vpop.eup %4148 }
 0x84c   :  { %v4151_v55 = vpop.eup %4150  ;;  %4152 = vrcp.f32 %v3225_v49  ;;  %v3247_v30 = vadd.f32 1.0, %v4149_v43  ;;  %v3237_v15 = vand.u32 2147483648, %v3225_v49  ;;  %v3235_v48 = vand.u32 2147483647, %v3225_v49 }
 0x84d   :  { %v3271_v2 = vadd.f32 1.0, %v4151_v55  ;;  %vm3231_vm13 = vweird.f32 %v3225_v49 }
 0x84e   :  { %4154 = vrcp.f32 %v3247_v30  ;;  %v3259_v6 = vand.u32 2147483648, %v3247_v30  ;;  %v3257_v56 = vand.u32 2147483647, %v3247_v30  ;;  %v3238_v10 = vor.u32 1.1754944e-38, %v3237_v15  ;;  %v6322_v15 = vld [vmem:[#allocation8 + $0x1c0] sm:$0xff] }
 0x84f   :  { %4156 = vrcp.f32 %v3271_v2  ;;  %vm3236_vm1 = vcmp.eq.f32.partialorder %v3235_v48, 8.507059e+37  ;;  %vm3253_vm2 = vweird.f32 %v3247_v30  ;;  %v3283_v55 = vand.u32 2147483648, %v3271_v2  ;;  %v6334_v48 = vld [vmem:[#allocation8 + $0x1a0] sm:$0xff] }
 0x850   :  { %4158 = vtanh.f32 %v3263_v61  ;;  %v3260_v28 = vor.u32 1.1754944e-38, %v3259_v6  ;;  %vm3258_vm5 = vcmp.eq.f32.partialorder %v3257_v56, 8.507059e+37  ;;  %vm3277_vm8 = vweird.f32 %v3271_v2  ;;  %v6337_v6 = vld [vmem:[#allocation8 + $0x1a8] sm:$0xff]  ;;  %v6346_v56 = vld [vmem:[#allocation8 + $0x180] sm:$0xff] }
 0x852   :  { %v4153_v24 = vpop.eup %4152 }
 0x853   :  { %v3227_v0 = vmul.f32 %v4153_v24, %v3225_v49  ;;  %vm3232_vm12 = vweird.f32 %v4153_v24 }
 0x854   :  { %v4155_v31 = vpop.eup %4154  ;;  %vm3233_vm15 = vmor %vm3231_vm13, %vm3232_vm12 }
 0x855   :  { %v4157_v21 = vpop.eup %4156  ;;  %v3228_v58 = vsub.f32 1.0, %v3227_v0  ;;  %v3249_v29 = vmul.f32 %v4155_v31, %v3247_v30  ;;  %vm3254_vm14 = vweird.f32 %v4155_v31  ;;  %v3281_v30 = vand.u32 2147483647, %v3271_v2 }
 0x856   :  { %v3273_v26 = vmul.f32 %v4157_v21, %v3271_v2  ;;  %vm3255_vm3 = vmor %vm3253_vm2, %vm3254_vm14  ;;  %v4159_v12 = vpop.eup %4158  ;;  %vm3278_vm7 = vweird.f32 %v4157_v21  ;;  %v3284_v0 = vor.u32 1.1754944e-38, %v3283_v55  ;;  %v6316_v2 = vld [vmem:[#allocation8 + $0x1f0] sm:$0xff]  ;;  %v6390_v55 = vld [vmem:[#allocation8 + $0x100] sm:$0xff] }
 0x857   :  { %v3250_v53 = vsub.f32 1.0, %v3249_v29  ;;  %v3229_v25 = vmul.f32 %v4153_v24, %v3228_v58  ;;  %vm3279_vm9 = vmor %vm3277_vm8, %vm3278_vm7  ;;  %vm3282_vm10 = vcmp.eq.f32.partialorder %v3281_v30, 8.507059e+37  ;;  %v6313_v29 = vld [vmem:[#allocation8 + $0x1e8] sm:$0xff] }
 0x858   :  { %v3274_v62 = vsub.f32 1.0, %v3273_v26  ;;  %v6325_v26 = vld [vmem:[#allocation8 + $0x1c8] sm:$0xff] }
 0x859   :  { %v3230_v1 = vadd.f32 %v4153_v24, %v3229_v25  ;;  %v3251_v22 = vmul.f32 %v4155_v31, %v3250_v53  ;;  %v6328_v53 = vld [vmem:[#allocation8 + $0x1d0] sm:$0xff]  ;;  %v6331_v25 = vld [vmem:[#allocation8 + $0x1d8] sm:$0xff]  ;;  %v6393_v30 = vld [vmem:[#allocation8 + $0x108] sm:$0xff] }
 0x85a   :  { %v3275_v19 = vmul.f32 %v4157_v21, %v3274_v62  ;;  %v6352_v62 = vld [vmem:[#allocation8 + $0x190] sm:$0xff] }
 0x85b   :  { %v3234_v36 = vsel %vm3233_vm15, %v4153_v24, %v3230_v1  ;;  %v3252_v57 = vadd.f32 %v4155_v31, %v3251_v22  ;;  %v6340_v1 = vld [vmem:[#allocation8 + $0x1b0] sm:$0xff]  ;;  %v6343_v22 = vld [vmem:[#allocation8 + $0x1b8] sm:$0xff] }
 0x85c   :  { %v3239_v14 = vsel %vm3236_vm1, %v3238_v10, %v3234_v36  ;;  %v3276_v43 = vadd.f32 %v4157_v21, %v3275_v19  ;;  %v6349_v10 = vld [vmem:[#allocation8 + $0x188] sm:$0xff]  ;;  %v6355_v36 = vld [vmem:[#allocation8 + $0x198] sm:$0xff]  ;;  %v6376_v19 = vld [vmem:[#allocation8 + $0x150] sm:$0xff] }
 0x85d   :  { %v3256_v39 = vsel %vm3255_vm3, %v4155_v31, %v3252_v57  ;;  %v3288_v13 = vmul.f32 %v4159_v12, %v3239_v14  ;;  %v6358_v57 = vld [vmem:[#allocation8 + $0x160] sm:$0xff]  ;;  %v6361_v14 = vld [vmem:[#allocation8 + $0x168] sm:$0xff] }
 0x85e   :  { %v3261_v9 = vsel %vm3258_vm5, %v3260_v28, %v3256_v39  ;;  %v3280_v24 = vsel %vm3279_vm9, %v4157_v21, %v3276_v43  ;;  %v6319_v21 = vld [vmem:[#allocation8 + $0x1f8] sm:$0xff]  ;;  %v6364_v28 = vld [vmem:[#allocation8 + $0x170] sm:$0xff]  ;;  %v6370_v12 = vld [vmem:[#allocation8 + $0x140] sm:$0xff] }
 0x85f   :  { %v3287_v60 = vmul.f32 %v3261_v9, %v6235_v50  ;;  %v3285_v61 = vsel %vm3282_vm10, %v3284_v0, %v3280_v24  ;;  %v6310_v50 = vld [vmem:[#allocation8 + $0x1e0] sm:$0xff]  ;;  %v6367_v39 = vld [vmem:[#allocation8 + $0x178] sm:$0xff]  ;;  %v6373_v9 = vld [vmem:[#allocation8 + $0x148] sm:$0xff] }
 0x860   :  { %v6385_v43 = vld [vmem:[#allocation8 + $0x128] sm:$0xff]  ;;  %v6398_v24 = vld [vmem:[#allocation8 + $0xe0] sm:$0xff] }
 0x861   :  { %v6307_v49 = vadd.f32 %v3288_v13, %v3287_v60  ;;  %v6379_v60 = vld [vmem:[#allocation8 + $0x158] sm:$0xff]  ;;  %v6382_v13 = vld [vmem:[#allocation8 + $0x120] sm:$0xff]  ;;  %v6401_v0 = vld [vmem:[#allocation8 + $0xe8] sm:$0xff] }
 0x863   :  { %4160 = vtanh.f32 %v6307_v49 }
 0x869   :  { %v4161_v31 = vpop.eup %4160 }
 0x86a   :  { %v3291_v58 = vmul.f32 %v4161_v31, %v3285_v61 }
 0x86c   :  { %3308 = vmatmul.f32.vlgmr.msra.gmra.mxu2 %v3291_v58  ;;  %3328 = vmatmul.f32.vlgmr.msra.gmra.mxu3 %v3291_v58 }
 0x86d   :  { %3348 = vmatmul.f32.vlgmr.msrb.gmra.mxu0 %v3291_v58  ;;  %3368 = vmatmul.f32.vlgmr.msrb.gmra.mxu1 %v3291_v58 }
 0x86e   :  { %3616 = vmatpush.msra.mxu2 %v6310_v50  ;;  %3636 = vmatpush.msra.mxu3 %v6313_v29 }
 0x86f   :  { %3656 = vmatpush.msrb.mxu0 %v6316_v2  ;;  %3676 = vmatpush.msrb.mxu1 %v6319_v21 }
 0x870   :  { %3617 = vmatpush.msra.mxu2 %v6322_v15  ;;  %3637 = vmatpush.msra.mxu3 %v6325_v26 }
 0x871   :  { %3657 = vmatpush.msrb.mxu0 %v6328_v53  ;;  %3677 = vmatpush.msrb.mxu1 %v6331_v25 }
 0x872   :  { %3618 = vmatpush.msra.mxu2 %v6334_v48  ;;  %3638 = vmatpush.msra.mxu3 %v6337_v6 }
 0x873   :  { %3658 = vmatpush.msrb.mxu0 %v6340_v1  ;;  %3678 = vmatpush.msrb.mxu1 %v6343_v22 }
 0x874   :  { %3619 = vmatpush.msra.mxu2 %v6346_v56  ;;  %3639 = vmatpush.msra.mxu3 %v6349_v10 }
 0x875   :  { %3659 = vmatpush.msrb.mxu0 %v6352_v62  ;;  %3679 = vmatpush.msrb.mxu1 %v6355_v36 }
 0x876   :  { %3620 = vmatpush.msra.mxu2 %v6358_v57  ;;  %3640 = vmatpush.msra.mxu3 %v6361_v14 }
 0x877   :  { %3660 = vmatpush.msrb.mxu0 %v6364_v28  ;;  %3680 = vmatpush.msrb.mxu1 %v6367_v39 }
 0x878   :  { %3621 = vmatpush.msra.mxu2 %v6370_v12  ;;  %3641 = vmatpush.msra.mxu3 %v6373_v9 }
 0x879   :  { %3661 = vmatpush.msrb.mxu0 %v6376_v19  ;;  %3681 = vmatpush.msrb.mxu1 %v6379_v60 }
 0x87a   :  { %3622 = vmatpush.msra.mxu2 %v6382_v13  ;;  %3642 = vmatpush.msra.mxu3 %v6385_v43 }
 0x87b   :  { %3662 = vmatpush.msrb.mxu0 %v6060_v52  ;;  %3682 = vmatpush.msrb.mxu1 %v6063_v54  ;;  %v6406_v52 = vld [vmem:[#allocation8 + $0xc0] sm:$0xff]  ;;  %v6409_v54 = vld [vmem:[#allocation8 + $0xc8] sm:$0xff] }
 0x87c   :  { %3623 = vmatpush.msra.mxu2 %v6390_v55  ;;  %3643 = vmatpush.msra.mxu3 %v6393_v30 }
 0x87d   :  { %3663 = vmatpush.msrb.mxu0 %v6068_v23  ;;  %3683 = vmatpush.msrb.mxu1 %v6071_v16  ;;  %v6415_v23 = vld [vmem:[#allocation8 + $0xa8] sm:$0xff] }
 0x87e   :  { %3624 = vmatpush.msra.mxu2 %v6398_v24  ;;  %3644 = vmatpush.msra.mxu3 %v6401_v0  ;;  %v6421_v16 = vld [vmem:[#allocation8 + $0x88] sm:$0xff] }
 0x87f   :  { %3664 = vmatpush.msrb.mxu0 %v6076_v45  ;;  %3684 = vmatpush.msrb.mxu1 %v6079_v51 }
 0x880   :  { %3625 = vmatpush.msra.mxu2 %v6406_v52  ;;  %3645 = vmatpush.msra.mxu3 %v6409_v54 }
 0x881   :  { %3665 = vmatpush.msrb.mxu0 %v6798_v37  ;;  %3685 = vmatpush.msrb.mxu1 %v6799_v38 }
 0x882   :  { %3626 = vmatpush.msra.mxu2 %v6800_v3  ;;  %3646 = vmatpush.msra.mxu3 %v6415_v23 }
 0x883   :  { %3666 = vmatpush.msrb.mxu0 %v6802_v32  ;;  %3686 = vmatpush.msrb.mxu1 %v6803_v41 }
 0x884   :  { %3627 = vmatpush.msra.mxu2 %v6804_v42  ;;  %3647 = vmatpush.msra.mxu3 %v6421_v16 }
 0x885   :  { %3667 = vmatpush.msrb.mxu0 %v6806_v20  ;;  %3687 = vmatpush.msrb.mxu1 %v6807_v5  ;;  %v6825_v20 = vld [vmem:[#allocation24_spill] sm:$0xff] }
 0x886   :  { %3628 = vmatpush.msra.mxu2 %v6808_v34  ;;  %3648 = vmatpush.msra.mxu3 %v6809_v27  ;;  %v1923_v5 = vrot.slane %v6825_v20, 4 }
 0x887   :  { %3668 = vmatpush.msrb.mxu0 %v6810_v46  ;;  %3688 = vmatpush.msrb.mxu1 %v6811_v40 }
 0x888   :  { %3629 = vmatpush.msra.mxu2 %v6812_v63  ;;  %3649 = vmatpush.msra.mxu3 %v6813_v47 }
 0x889   :  { %3669 = vmatpush.msrb.mxu0 %v6814_v17  ;;  %3689 = vmatpush.msrb.mxu1 %v6815_v7 }
 0x88a   :  { %3630 = vmatpush.msra.mxu2 %v6816_v33  ;;  %3650 = vmatpush.msra.mxu3 %v6817_v11 }
 0x88b   :  { %3670 = vmatpush.msrb.mxu0 %v6818_v18  ;;  %3690 = vmatpush.msrb.mxu1 %v6819_v59 }
 0x88c   :  { %3631 = vmatpush.msra.mxu2 %v6820_v4  ;;  %3651 = vmatpush.msra.mxu3 %v6821_v35 }
 0x88d   :  { %3671 = vmatpush.msrb.mxu0 %v6822_v44  ;;  %3691 = vmatpush.msrb.mxu1 %v6823_v8 }
 0x8ea   :  { %v3349_v45 = vpop.f32.mrf.mxu0  ;;  %v3369_v51 = vpop.f32.mrf.mxu1 }
 0x8eb   :  { %v3377_v37 = vrot.slane %v3349_v45, 4  ;;  %v3378_v38 = vrot.slane %v3369_v51, 2 }
 0x8ed   :  { %v3380_v42 = vsel %vm759_vm6, %v3377_v37, %v3378_v38 }
 0x8ef   :  { %v3329_v3 = vpop.f32.mrf.mxu3  ;;  %v3309_v41 = vpop.f32.mrf.mxu2 }
 0x8f0   :  { %v3376_v32 = vrot.slane %v3329_v3, 6 }
 0x8f2   :  { %v3379_v34 = vsel %vm523_vm4, %v3309_v41, %v3376_v32 }
 0x8f3   :  { %v3381_v27 = vsel %vm359_vm0, %v3379_v34, %v3380_v42 }
 0x8f4   :  { %v3383_v46 = vadd.f32 %v3381_v27, %v1923_v5 }
 0x8f6   :  { %v4024_v40 = vmul.f32 -1.442695, %v3383_v46  ;;  %v3404_v63 = vrot.slane %v3383_v46, 2  ;;  %v3428_v47 = vrot.slane %v3383_v46, 6  ;;  %v3425_v61 = vrot.slane %v3383_v46, 4 }
 0x8f8   :  { %4162 = vpow2.f32 %v4024_v40  ;;  %v4025_v17 = vmul.f32 -1.442695, %v3404_v63  ;;  %v4026_v7 = vmul.f32 -1.442695, %v3428_v47 }
 0x8fa   :  { %4164 = vpow2.f32 %v4025_v17 }
 0x8fb   :  { %4166 = vpow2.f32 %v4026_v7 }
 0x8fe   :  { %v4163_v33 = vpop.eup %4162 }
 0x8ff   :  { %v3387_v11 = vadd.f32 1.0, %v4163_v33 }
 0x900   :  { %v4165_v18 = vpop.eup %4164 }
 0x901   :  { %v4167_v59 = vpop.eup %4166  ;;  %4168 = vrcp.f32 %v3387_v11  ;;  %v3409_v4 = vadd.f32 1.0, %v4165_v18  ;;  %v3399_v37 = vand.u32 2147483648, %v3387_v11  ;;  %v3397_v41 = vand.u32 2147483647, %v3387_v11 }
 0x902   :  { %v3433_v35 = vadd.f32 1.0, %v4167_v59  ;;  %vm3393_vm12 = vweird.f32 %v3387_v11 }
 0x903   :  { %4170 = vrcp.f32 %v3409_v4  ;;  %v3421_v42 = vand.u32 2147483648, %v3409_v4  ;;  %v3419_v34 = vand.u32 2147483647, %v3409_v4  ;;  %v3400_v27 = vor.u32 1.1754944e-38, %v3399_v37 }
 0x904   :  { %4172 = vrcp.f32 %v3433_v35  ;;  %vm3398_vm15 = vcmp.eq.f32.partialorder %v3397_v41, 8.507059e+37  ;;  %vm3415_vm1 = vweird.f32 %v3409_v4  ;;  %vm3439_vm7 = vweird.f32 %v3433_v35  ;;  %v6826_v41 = vld [vmem:[#allocation27_spill] sm:$0xff] }
 0x905   :  { %4174 = vtanh.f32 %v3425_v61  ;;  %v3422_v17 = vor.u32 1.1754944e-38, %v3421_v42  ;;  %vm3420_vm3 = vcmp.eq.f32.partialorder %v3419_v34, 8.507059e+37  ;;  %v1927_v42 = vrot.slane %v6826_v41, 6 }
 0x907   :  { %v4169_v44 = vpop.eup %4168 }
 0x908   :  { %v3389_v8 = vmul.f32 %v4169_v44, %v3387_v11  ;;  %vm3394_vm11 = vweird.f32 %v4169_v44 }
 0x909   :  { %v4171_v31 = vpop.eup %4170  ;;  %vm3395_vm14 = vmor %vm3393_vm12, %vm3394_vm11 }
 0x90a   :  { %v4173_v58 = vpop.eup %4172  ;;  %v3390_v45 = vsub.f32 1.0, %v3389_v8  ;;  %v3411_v51 = vmul.f32 %v4171_v31, %v3409_v4  ;;  %vm3416_vm13 = vweird.f32 %v4171_v31  ;;  %v3443_v4 = vand.u32 2147483647, %v3433_v35 }
 0x90b   :  { %v3435_v38 = vmul.f32 %v4173_v58, %v3433_v35  ;;  %vm3417_vm2 = vmor %vm3415_vm1, %vm3416_vm13  ;;  %v4175_v33 = vpop.eup %4174  ;;  %vm3440_vm5 = vweird.f32 %v4173_v58 }
 0x90c   :  { %v3412_v3 = vsub.f32 1.0, %v3411_v51  ;;  %v3391_v32 = vmul.f32 %v4169_v44, %v3390_v45  ;;  %v3445_v51 = vand.u32 2147483648, %v3433_v35  ;;  %vm3441_vm8 = vmor %vm3439_vm7, %vm3440_vm5  ;;  %vm3444_vm9 = vcmp.eq.f32.partialorder %v3443_v4, 8.507059e+37 }
 0x90d   :  { %v3436_v40 = vsub.f32 1.0, %v3435_v38 }
 0x90e   :  { %v3392_v20 = vadd.f32 %v4169_v44, %v3391_v32  ;;  %v3413_v5 = vmul.f32 %v4171_v31, %v3412_v3  ;;  %v3446_v37 = vor.u32 1.1754944e-38, %v3445_v51 }
 0x90f   :  { %v3437_v11 = vmul.f32 %v4173_v58, %v3436_v40 }
 0x910   :  { %v3396_v46 = vsel %vm3395_vm14, %v4169_v44, %v3392_v20  ;;  %v3414_v63 = vadd.f32 %v4171_v31, %v3413_v5 }
 0x911   :  { %v3401_v47 = vsel %vm3398_vm15, %v3400_v27, %v3396_v46  ;;  %v3438_v45 = vadd.f32 %v4173_v58, %v3437_v11 }
 0x912   :  { %v3418_v7 = vsel %vm3417_vm2, %v4171_v31, %v3414_v63  ;;  %v3450_v8 = vmul.f32 %v4175_v33, %v3401_v47 }
 0x913   :  { %v3423_v18 = vsel %vm3420_vm3, %v3422_v17, %v3418_v7  ;;  %v3442_v44 = vsel %vm3441_vm8, %v4173_v58, %v3438_v45 }
 0x914   :  { %v3449_v59 = vmul.f32 %v3423_v18, %v6307_v49  ;;  %v3447_v38 = vsel %vm3444_vm9, %v3446_v37, %v3442_v44  ;;  %v4324_v49 = vld [vmem:[#allocation8 + $0x130] sm:$0xff] }
 0x916   :  { %v6447_v61 = vadd.f32 %v3450_v8, %v3449_v59 }
 0x918   :  { %4176 = vtanh.f32 %v6447_v61 }
 0x91e   :  { %v4177_v31 = vpop.eup %4176 }
 0x91f   :  { %v3453_v3 = vmul.f32 %v4177_v31, %v3447_v38 }
 0x921   :  { %3470 = vmatmul.f32.vlgmr.msrb.gmra.mxu2 %v3453_v3  ;;  %3490 = vmatmul.f32.vlgmr.msrb.gmra.mxu3 %v3453_v3 }
 0x922   :  { %3510 = vmatmul.f32.vlgmr.msra.gmra.mxu0 %v3453_v3  ;;  %3530 = vmatmul.f32.vlgmr.msra.gmra.mxu1 %v3453_v3 }
 0x923   :  { %3778 = vmatpush.msrb.mxu2 %v6310_v50  ;;  %3798 = vmatpush.msrb.mxu3 %v6313_v29  ;;  %v4325_v50 = vld [vmem:[#allocation8 + $0x138] sm:$0xff]  ;;  %v4326_v29 = vld [vmem:[#allocation8 + $0x110] sm:$0xff] }
 0x924   :  { %3818 = vmatpush.msra.mxu0 %v6316_v2  ;;  %3838 = vmatpush.msra.mxu1 %v6319_v21  ;;  %v4327_v2 = vld [vmem:[#allocation8 + $0x118] sm:$0xff]  ;;  %v4328_v21 = vld [vmem:[#allocation8 + $0xf0] sm:$0xff] }
 0x925   :  { %3779 = vmatpush.msrb.mxu2 %v6322_v15  ;;  %3799 = vmatpush.msrb.mxu3 %v6325_v26  ;;  %v4329_v15 = vld [vmem:[#allocation8 + $0xf8] sm:$0xff]  ;;  %v4330_v26 = vld [vmem:[#allocation8 + $0xd0] sm:$0xff] }
 0x926   :  { %3819 = vmatpush.msra.mxu0 %v6328_v53  ;;  %3839 = vmatpush.msra.mxu1 %v6331_v25  ;;  %v4331_v53 = vld [vmem:[#allocation8 + $0xd8] sm:$0xff]  ;;  %v4332_v25 = vld [vmem:[#allocation8 + $0xa0] sm:$0xff] }
 0x927   :  { %3780 = vmatpush.msrb.mxu2 %v6334_v48  ;;  %3800 = vmatpush.msrb.mxu3 %v6337_v6  ;;  %v4333_v48 = vld [vmem:[#allocation8 + $0xb0] sm:$0xff]  ;;  %v4334_v6 = vld [vmem:[#allocation8 + $0xb8] sm:$0xff] }
 0x928   :  { %3820 = vmatpush.msra.mxu0 %v6340_v1  ;;  %3840 = vmatpush.msra.mxu1 %v6343_v22  ;;  %v4335_v1 = vld [vmem:[#allocation8 + $0x80] sm:$0xff]  ;;  %v4336_v22 = vld [vmem:[#allocation8 + $0x90] sm:$0xff] }
 0x929   :  { %3781 = vmatpush.msrb.mxu2 %v6346_v56  ;;  %3801 = vmatpush.msrb.mxu3 %v6349_v10  ;;  %v4337_v56 = vld [vmem:[#allocation8 + $0x98] sm:$0xff]  ;;  %v4338_v10 = vld [vmem:[#allocation8 + $0x60] sm:$0xff] }
 0x92a   :  { %3821 = vmatpush.msra.mxu0 %v6352_v62  ;;  %3841 = vmatpush.msra.mxu1 %v6355_v36  ;;  %v4339_v62 = vld [vmem:[#allocation8 + $0x68] sm:$0xff]  ;;  %v4340_v36 = vld [vmem:[#allocation8 + $0x70] sm:$0xff] }
 0x92b   :  { %3782 = vmatpush.msrb.mxu2 %v6358_v57  ;;  %3802 = vmatpush.msrb.mxu3 %v6361_v14  ;;  %v4341_v57 = vld [vmem:[#allocation8 + $0x78] sm:$0xff]  ;;  %v4342_v14 = vld [vmem:[#allocation8 + $0x40] sm:$0xff] }
 0x92c   :  { %3822 = vmatpush.msra.mxu0 %v6364_v28  ;;  %3842 = vmatpush.msra.mxu1 %v6367_v39  ;;  %v4343_v28 = vld [vmem:[#allocation8 + $0x48] sm:$0xff]  ;;  %v4344_v39 = vld [vmem:[#allocation8 + $0x50] sm:$0xff] }
 0x92d   :  { %3783 = vmatpush.msrb.mxu2 %v6370_v12  ;;  %3803 = vmatpush.msrb.mxu3 %v6373_v9  ;;  %v4345_v12 = vld [vmem:[#allocation8 + $0x58] sm:$0xff]  ;;  %v4346_v9 = vld [vmem:[#allocation8 + $0x20] sm:$0xff] }
 0x92e   :  { %3823 = vmatpush.msra.mxu0 %v6376_v19  ;;  %3843 = vmatpush.msra.mxu1 %v6379_v60  ;;  %v4347_v19 = vld [vmem:[#allocation8 + $0x28] sm:$0xff]  ;;  %v4348_v60 = vld [vmem:[#allocation8 + $0x30] sm:$0xff] }
 0x92f   :  { %3784 = vmatpush.msrb.mxu2 %v6382_v13  ;;  %3804 = vmatpush.msrb.mxu3 %v6385_v43  ;;  %v4349_v13 = vld [vmem:[#allocation8 + $0x38] sm:$0xff]  ;;  %v4350_v43 = vld [vmem:[#allocation8] sm:$0xff] }
 0x930   :  { %3824 = vmatpush.msra.mxu0 %v4324_v49  ;;  %3844 = vmatpush.msra.mxu1 %v4325_v50 }
 0x931   :  { %3785 = vmatpush.msrb.mxu2 %v6390_v55  ;;  %3805 = vmatpush.msrb.mxu3 %v6393_v30  ;;  %v4351_v55 = vld [vmem:[#allocation8 + $0x8] sm:$0xff]  ;;  %v4352_v30 = vld [vmem:[#allocation8 + $0x10] sm:$0xff] }
 0x932   :  { %3825 = vmatpush.msra.mxu0 %v4326_v29  ;;  %3845 = vmatpush.msra.mxu1 %v4327_v2 }
 0x933   :  { %3786 = vmatpush.msrb.mxu2 %v6398_v24  ;;  %3806 = vmatpush.msrb.mxu3 %v6401_v0  ;;  %v4353_v24 = vld [vmem:[#allocation8 + $0x18] sm:$0xff] }
 0x934   :  { %3826 = vmatpush.msra.mxu0 %v4328_v21  ;;  %3846 = vmatpush.msra.mxu1 %v4329_v15 }
 0x935   :  { %3787 = vmatpush.msrb.mxu2 %v6406_v52  ;;  %3807 = vmatpush.msrb.mxu3 %v6409_v54 }
 0x936   :  { %3827 = vmatpush.msra.mxu0 %v4330_v26  ;;  %3847 = vmatpush.msra.mxu1 %v4331_v53 }
 0x937   :  { %3788 = vmatpush.msrb.mxu2 %v4332_v25  ;;  %3808 = vmatpush.msrb.mxu3 %v6415_v23 }
 0x938   :  { %3828 = vmatpush.msra.mxu0 %v4333_v48  ;;  %3848 = vmatpush.msra.mxu1 %v4334_v6 }
 0x939   :  { %3789 = vmatpush.msrb.mxu2 %v4335_v1  ;;  %3809 = vmatpush.msrb.mxu3 %v6421_v16 }
 0x93a   :  { %3829 = vmatpush.msra.mxu0 %v4336_v22  ;;  %3849 = vmatpush.msra.mxu1 %v4337_v56 }
 0x93b   :  { %3790 = vmatpush.msrb.mxu2 %v4338_v10  ;;  %3810 = vmatpush.msrb.mxu3 %v4339_v62 }
 0x93c   :  { %3830 = vmatpush.msra.mxu0 %v4340_v36  ;;  %3850 = vmatpush.msra.mxu1 %v4341_v57 }
 0x93d   :  { %3791 = vmatpush.msrb.mxu2 %v4342_v14  ;;  %3811 = vmatpush.msrb.mxu3 %v4343_v28 }
 0x93e   :  { %3831 = vmatpush.msra.mxu0 %v4344_v39  ;;  %3851 = vmatpush.msra.mxu1 %v4345_v12 }
 0x93f   :  { %3792 = vmatpush.msrb.mxu2 %v4346_v9  ;;  %3812 = vmatpush.msrb.mxu3 %v4347_v19 }
 0x940   :  { %3832 = vmatpush.msra.mxu0 %v4348_v60  ;;  %3852 = vmatpush.msra.mxu1 %v4349_v13 }
 0x941   :  { %3793 = vmatpush.msrb.mxu2 %v4350_v43  ;;  %3813 = vmatpush.msrb.mxu3 %v4351_v55 }
 0x942   :  { %3833 = vmatpush.msra.mxu0 %v4352_v30  ;;  %3853 = vmatpush.msra.mxu1 %v4353_v24 }
 0x99f   :  { %v3511_v0 = vpop.f32.mrf.mxu0  ;;  %v3531_v52 = vpop.f32.mrf.mxu1 }
 0x9a0   :  { %v3539_v54 = vrot.slane %v3511_v0, 4  ;;  %v3540_v23 = vrot.slane %v3531_v52, 2 }
 0x9a2   :  { %v3542_v32 = vsel %vm759_vm6, %v3539_v54, %v3540_v23 }
 0x9a4   :  { %v3491_v16 = vpop.f32.mrf.mxu3  ;;  %v3471_v58 = vpop.f32.mrf.mxu2 }
 0x9a5   :  { %v3538_v35 = vrot.slane %v3491_v16, 6 }
 0x9a7   :  { %v3541_v20 = vsel %vm523_vm4, %v3471_v58, %v3538_v35 }
 0x9a8   :  { %v3543_v5 = vsel %vm359_vm0, %v3541_v20, %v3542_v32  ;;  %v6827_v32 = vld [vmem:[#allocation28_spill] sm:$0xff] }
 0x9a9   :  { %v3545_v34 = vadd.f32 %v3543_v5, %v1927_v42 }
 0x9ab   :  { %v4027_v27 = vmul.f32 -1.442695, %v3545_v34  ;;  %v3566_v40 = vrot.slane %v3545_v34, 2  ;;  %v3590_v46 = vrot.slane %v3545_v34, 6  ;;  %v3587_v4 = vrot.slane %v3545_v34, 4 }
 0x9ad   :  { %4178 = vpow2.f32 %v4027_v27  ;;  %v4028_v63 = vmul.f32 -1.442695, %v3566_v40  ;;  %v4029_v47 = vmul.f32 -1.442695, %v3590_v46 }
 0x9af   :  { %4180 = vpow2.f32 %v4028_v63 }
 0x9b0   :  { %4182 = vpow2.f32 %v4029_v47 }
 0x9b3   :  { %v4179_v17 = vpop.eup %4178 }
 0x9b4   :  { %v3549_v7 = vadd.f32 1.0, %v4179_v17 }
 0x9b5   :  { %v4181_v33 = vpop.eup %4180 }
 0x9b6   :  { %v4183_v18 = vpop.eup %4182  ;;  %4184 = vrcp.f32 %v3549_v7  ;;  %v3571_v11 = vadd.f32 1.0, %v4181_v33  ;;  %v3561_v38 = vand.u32 2147483648, %v3549_v7  ;;  %v3559_v29 = vand.u32 2147483647, %v3549_v7 }
 0x9b7   :  { %v3595_v59 = vadd.f32 1.0, %v4183_v18  ;;  %vm3555_vm11 = vweird.f32 %v3549_v7 }
 0x9b8   :  { %4186 = vrcp.f32 %v3571_v11  ;;  %v3583_v2 = vand.u32 2147483648, %v3571_v11  ;;  %v3581_v26 = vand.u32 2147483647, %v3571_v11  ;;  %v3562_v53 = vor.u32 1.1754944e-38, %v3561_v38 }
 0x9b9   :  { %4188 = vrcp.f32 %v3595_v59  ;;  %vm3560_vm14 = vcmp.eq.f32.partialorder %v3559_v29, 8.507059e+37  ;;  %vm3577_vm15 = vweird.f32 %v3571_v11  ;;  %v3607_v12 = vand.u32 2147483648, %v3595_v59 }
 0x9ba   :  { %4190 = vtanh.f32 %v3587_v4  ;;  %v3584_v22 = vor.u32 1.1754944e-38, %v3583_v2  ;;  %vm3582_vm2 = vcmp.eq.f32.partialorder %v3581_v26, 8.507059e+37  ;;  %vm3601_vm5 = vweird.f32 %v3595_v59 }
 0x9bb   :  { %v3605_v9 = vand.u32 2147483647, %v3595_v59  ;;  %v3608_v60 = vor.u32 1.1754944e-38, %v3607_v12 }
 0x9bc   :  { %v4185_v8 = vpop.eup %4184 }
 0x9bd   :  { %v3551_v45 = vmul.f32 %v4185_v8, %v3549_v7  ;;  %vm3556_vm10 = vweird.f32 %v4185_v8  ;;  %vm3606_vm8 = vcmp.eq.f32.partialorder %v3605_v9, 8.507059e+37 }
 0x9be   :  { %v4187_v51 = vpop.eup %4186  ;;  %vm3557_vm13 = vmor %vm3555_vm11, %vm3556_vm10 }
 0x9bf   :  { %v4189_v44 = vpop.eup %4188  ;;  %v3552_v37 = vsub.f32 1.0, %v3551_v45  ;;  %v3573_v31 = vmul.f32 %v4187_v51, %v3571_v11  ;;  %vm3578_vm12 = vweird.f32 %v4187_v51 }
 0x9c0   :  { %v3597_v3 = vmul.f32 %v4189_v44, %v3595_v59  ;;  %vm3579_vm1 = vmor %vm3577_vm15, %vm3578_vm12  ;;  %v4191_v10 = vpop.eup %4190  ;;  %vm3602_vm3 = vweird.f32 %v4189_v44 }
 0x9c1   :  { %v3574_v49 = vsub.f32 1.0, %v3573_v31  ;;  %v3553_v50 = vmul.f32 %v4185_v8, %v3552_v37  ;;  %vm3603_vm7 = vmor %vm3601_vm5, %vm3602_vm3 }
 0x9c2   :  { %v3598_v25 = vsub.f32 1.0, %v3597_v3 }
 0x9c3   :  { %v3554_v21 = vadd.f32 %v4185_v8, %v3553_v50  ;;  %v3575_v15 = vmul.f32 %v4187_v51, %v3574_v49 }
 0x9c4   :  { %v3599_v36 = vmul.f32 %v4189_v44, %v3598_v25 }
 0x9c5   :  { %v3558_v48 = vsel %vm3557_vm13, %v4185_v8, %v3554_v21  ;;  %v3576_v6 = vadd.f32 %v4187_v51, %v3575_v15 }
 0x9c6   :  { %v3563_v1 = vsel %vm3560_vm14, %v3562_v53, %v3558_v48  ;;  %v3600_v39 = vadd.f32 %v4189_v44, %v3599_v36 }
 0x9c7   :  { %v3580_v56 = vsel %vm3579_vm1, %v4187_v51, %v3576_v6  ;;  %v3612_v14 = vmul.f32 %v4191_v10, %v3563_v1 }
 0x9c8   :  { %v3585_v62 = vsel %vm3582_vm2, %v3584_v22, %v3580_v56  ;;  %v3604_v19 = vsel %vm3603_vm7, %v4189_v44, %v3600_v39 }
 0x9c9   :  { %v3611_v57 = vmul.f32 %v3585_v62, %v6447_v61  ;;  %v3609_v43 = vsel %vm3606_vm8, %v3608_v60, %v3604_v19 }
 0x9cb   :  { %v6489_v28 = vadd.f32 %v3612_v14, %v3611_v57 }
 0x9cd   :  { %4192 = vtanh.f32 %v6489_v28 }
 0x9d3   :  { %v4193_v13 = vpop.eup %4192 }
 0x9d4   :  { %v3615_v55 = vmul.f32 %v4193_v13, %v3609_v43  ;;  %v3955_v43 = vld [vmem:[#allocation11 + $0x78] sm:$0xff] }
 0x9d6   :  { %3632 = vmatmul.f32.vlgmr.msra.gmra.mxu2 %v3615_v55  ;;  %3652 = vmatmul.f32.vlgmr.msra.gmra.mxu3 %v3615_v55 }
 0x9d7   :  { %3672 = vmatmul.f32.vlgmr.msrb.gmra.mxu0 %v3615_v55  ;;  %3692 = vmatmul.f32.vlgmr.msrb.gmra.mxu1 %v3615_v55  ;;  %v3954_v55 = vld [vmem:[#allocation11 + $0x70] sm:$0xff] }
 0x9d8   :  { %3956 = vmatpush.msra.mxu2 %v3955_v43 }
 0x9da   :  { %3957 = vmatpush.msra.mxu2 %v3954_v55 }
 0xa54   :  { %v3673_v61 = vpop.f32.mrf.mxu0  ;;  %v3693_v30 = vpop.f32.mrf.mxu1 }
 0xa55   :  { %v3701_v24 = vrot.slane %v3673_v61, 4  ;;  %v3702_v0 = vrot.slane %v3693_v30, 2 }
 0xa57   :  { %v3704_v16 = vsel %vm759_vm6, %v3701_v24, %v3702_v0  ;;  %v3953_v24 = vld [vmem:[#allocation11 + $0x68] sm:$0xff] }
 0xa58   :  { %3958 = vmatpush.msra.mxu2 %v3953_v24 }
 0xa59   :  { %v3653_v52 = vpop.f32.mrf.mxu3  ;;  %v3633_v23 = vpop.f32.mrf.mxu2 }
 0xa5a   :  { %v3700_v54 = vrot.slane %v3653_v52, 6 }
 0xa5c   :  { %v3703_v35 = vsel %vm523_vm4, %v3633_v23, %v3700_v54  ;;  %v3952_v54 = vld [vmem:[#allocation11 + $0x60] sm:$0xff] }
 0xa5d   :  { %v3705_v58 = vsel %vm359_vm0, %v3703_v35, %v3704_v16  ;;  %v6828_v16 = vld [vmem:[#allocation29_spill] sm:$0xff]  ;;  %3959 = vmatpush.msra.mxu2 %v3952_v54 }
 0xa5e   :  { %v3707_v41 = vadd.f32 %v3705_v58, %v6827_v32  ;;  %v1934_v35 = vrot.slane %v6828_v16, 2 }
 0xa60   :  { %v4030_v42 = vmul.f32 -1.442695, %v3707_v41  ;;  %v3728_v20 = vrot.slane %v3707_v41, 2  ;;  %v3752_v5 = vrot.slane %v3707_v41, 6  ;;  %v3749_v59 = vrot.slane %v3707_v41, 4  ;;  %v3951_v41 = vld [vmem:[#allocation11 + $0x58] sm:$0xff] }
 0xa61   :  { %3960 = vmatpush.msra.mxu2 %v3951_v41 }
 0xa62   :  { %4194 = vpow2.f32 %v4030_v42  ;;  %v4031_v34 = vmul.f32 -1.442695, %v3728_v20  ;;  %v4032_v27 = vmul.f32 -1.442695, %v3752_v5  ;;  %v3950_v5 = vld [vmem:[#allocation11 + $0x50] sm:$0xff] }
 0xa63   :  { %3961 = vmatpush.msra.mxu2 %v3950_v5 }
 0xa64   :  { %4196 = vpow2.f32 %v4031_v34 }
 0xa65   :  { %4198 = vpow2.f32 %v4032_v27 }
 0xa68   :  { %v4195_v40 = vpop.eup %4194 }
 0xa69   :  { %v3711_v46 = vadd.f32 1.0, %v4195_v40 }
 0xa6a   :  { %v4197_v63 = vpop.eup %4196 }
 0xa6b   :  { %v4199_v47 = vpop.eup %4198  ;;  %4200 = vrcp.f32 %v3711_v46  ;;  %v3733_v17 = vadd.f32 1.0, %v4197_v63  ;;  %v3723_v4 = vand.u32 2147483648, %v3711_v46  ;;  %v3721_v38 = vand.u32 2147483647, %v3711_v46 }
 0xa6c   :  { %v3757_v7 = vadd.f32 1.0, %v4199_v47  ;;  %vm3717_vm10 = vweird.f32 %v3711_v46 }
 0xa6d   :  { %4202 = vrcp.f32 %v3733_v17  ;;  %v3745_v3 = vand.u32 2147483648, %v3733_v17  ;;  %v3743_v29 = vand.u32 2147483647, %v3733_v17  ;;  %v3724_v2 = vor.u32 1.1754944e-38, %v3723_v4 }
 0xa6e   :  { %4204 = vrcp.f32 %v3757_v7  ;;  %vm3722_vm13 = vcmp.eq.f32.partialorder %v3721_v38, 8.507059e+37  ;;  %vm3739_vm14 = vweird.f32 %v3733_v17  ;;  %v3769_v57 = vand.u32 2147483648, %v3757_v7  ;;  %v3941_v38 = vld [vmem:[#allocation11 + $0x8] sm:$0xff] }
 0xa6f   :  { %4206 = vtanh.f32 %v3749_v59  ;;  %v3746_v25 = vor.u32 1.1754944e-38, %v3745_v3  ;;  %vm3744_vm1 = vcmp.eq.f32.partialorder %v3743_v29, 8.507059e+37  ;;  %vm3763_vm3 = vweird.f32 %v3757_v7 }
 0xa70   :  { %v3767_v14 = vand.u32 2147483647, %v3757_v7  ;;  %v3770_v12 = vor.u32 1.1754944e-38, %v3769_v57 }
 0xa71   :  { %v4201_v33 = vpop.eup %4200 }
 0xa72   :  { %v3713_v18 = vmul.f32 %v4201_v33, %v3711_v46  ;;  %vm3718_vm9 = vweird.f32 %v4201_v33  ;;  %vm3768_vm7 = vcmp.eq.f32.partialorder %v3767_v14, 8.507059e+37  ;;  %v3949_v46 = vld [vmem:[#allocation11 + $0x48] sm:$0xff] }
 0xa73   :  { %v4203_v11 = vpop.eup %4202  ;;  %vm3719_vm12 = vmor %vm3717_vm10, %vm3718_vm9  ;;  %3962 = vmatpush.msra.mxu2 %v3949_v46 }
 0xa74   :  { %v4205_v8 = vpop.eup %4204  ;;  %v3714_v45 = vsub.f32 1.0, %v3713_v18  ;;  %v3735_v51 = vmul.f32 %v4203_v11, %v3733_v17  ;;  %vm3740_vm11 = vweird.f32 %v4203_v11  ;;  %v3948_v17 = vld [vmem:[#allocation11 + $0x40] sm:$0xff] }
 0xa75   :  { %v3759_v44 = vmul.f32 %v4205_v8, %v3757_v7  ;;  %vm3741_vm15 = vmor %vm3739_vm14, %vm3740_vm11  ;;  %v4207_v6 = vpop.eup %4206  ;;  %vm3764_vm2 = vweird.f32 %v4205_v8  ;;  %v3947_v7 = vld [vmem:[#allocation11 + $0x38] sm:$0xff]  ;;  %3963 = vmatpush.msra.mxu2 %v3948_v17 }
 0xa76   :  { %v3736_v37 = vsub.f32 1.0, %v3735_v51  ;;  %v3715_v31 = vmul.f32 %v4201_v33, %v3714_v45  ;;  %vm3765_vm5 = vmor %vm3763_vm3, %vm3764_vm2  ;;  %v3944_v45 = vld [vmem:[#allocation11 + $0x20] sm:$0xff] }
 0xa77   :  { %v3760_v21 = vsub.f32 1.0, %v3759_v44  ;;  %3964 = vmatpush.msra.mxu2 %v3947_v7 }
 0xa78   :  { %v3716_v49 = vadd.f32 %v4201_v33, %v3715_v31  ;;  %v3737_v50 = vmul.f32 %v4203_v11, %v3736_v37  ;;  %v3943_v37 = vld [vmem:[#allocation11 + $0x18] sm:$0xff]  ;;  %v3942_v31 = vld [vmem:[#allocation11 + $0x10] sm:$0xff] }
 0xa79   :  { %v3761_v22 = vmul.f32 %v4205_v8, %v3760_v21 }
 0xa7a   :  { %v3720_v15 = vsel %vm3719_vm12, %v4201_v33, %v3716_v49  ;;  %v3738_v26 = vadd.f32 %v4203_v11, %v3737_v50  ;;  %v3946_v33 = vld [vmem:[#allocation11 + $0x30] sm:$0xff]  ;;  %v3940_v50 = vld [vmem:[#allocation11] sm:$0xff] }
 0xa7b   :  { %v3725_v53 = vsel %vm3722_vm13, %v3724_v2, %v3720_v15  ;;  %v3762_v36 = vadd.f32 %v4205_v8, %v3761_v22  ;;  %3965 = vmatpush.msra.mxu2 %v3946_v33 }
 0xa7c   :  { %v3742_v48 = vsel %vm3741_vm15, %v4203_v11, %v3738_v26  ;;  %v3774_v10 = vmul.f32 %v4207_v6, %v3725_v53  ;;  %v3945_v11 = vld [vmem:[#allocation11 + $0x28] sm:$0xff] }
 0xa7d   :  { %v3747_v1 = vsel %vm3744_vm1, %v3746_v25, %v3742_v48  ;;  %v3766_v39 = vsel %vm3765_vm5, %v4205_v8, %v3762_v36  ;;  %3966 = vmatpush.msra.mxu2 %v3945_v11 }
 0xa7e   :  { %v3773_v56 = vmul.f32 %v3747_v1, %v6489_v28  ;;  %v3771_v19 = vsel %vm3768_vm7, %v3770_v12, %v3766_v39 }
 0xa7f   :  { %3967 = vmatpush.msra.mxu2 %v3944_v45 }
 0xa80   :  { %v6497_v62 = vadd.f32 %v3774_v10, %v3773_v56 }
 0xa81   :  { %3968 = vmatpush.msra.mxu2 %v3943_v37 }
 0xa82   :  { %4208 = vtanh.f32 %v6497_v62 }
 0xa83   :  { %3969 = vmatpush.msra.mxu2 %v3942_v31 }
 0xa85   :  { %3970 = vmatpush.msra.mxu2 %v3941_v38 }
 0xa87   :  { %3971 = vmatpush.msra.mxu2 %v3940_v50 }
 0xa88   :  { %v4209_v9 = vpop.eup %4208 }
 0xa89   :  { %v3777_v60 = vmul.f32 %v4209_v9, %v3771_v19 }
 0xa8b   :  { %3794 = vmatmul.f32.vlgmr.msrb.gmra.mxu2 %v3777_v60  ;;  %3814 = vmatmul.f32.vlgmr.msrb.gmra.mxu3 %v3777_v60 }
 0xa8c   :  { %3834 = vmatmul.f32.vlgmr.msra.gmra.mxu0 %v3777_v60  ;;  %3854 = vmatmul.f32.vlgmr.msra.gmra.mxu1 %v3777_v60 }
 0xb09   :  { %v3835_v28 = vpop.f32.mrf.mxu0  ;;  %v3855_v13 = vpop.f32.mrf.mxu1 }
 0xb0a   :  { %v3863_v61 = vrot.slane %v3835_v28, 4  ;;  %v3864_v30 = vrot.slane %v3855_v13, 2 }
 0xb0c   :  { %v3866_v58 = vsel %vm759_vm6, %v3863_v61, %v3864_v30 }
 0xb0e   :  { %v3815_v0 = vpop.f32.mrf.mxu3  ;;  %v3795_v23 = vpop.f32.mrf.mxu2 }
 0xb0f   :  { %v3862_v52 = vrot.slane %v3815_v0, 6 }
 0xb11   :  { %v3865_v32 = vsel %vm523_vm4, %v3795_v23, %v3862_v52 }
 0xb12   :  { %v3867_v42 = vsel %vm359_vm0, %v3865_v32, %v3866_v58  ;;  %v6830_v32 = vld [vmem:[#allocation31_spill] sm:$0xff] }
 0xb13   :  { %v3869_v20 = vadd.f32 %v3867_v42, %v1934_v35 }
 0xb15   :  { %v4033_v34 = vmul.f32 -1.442695, %v3869_v20  ;;  %v3890_v27 = vrot.slane %v3869_v20, 2  ;;  %v3914_v40 = vrot.slane %v3869_v20, 6  ;;  %v3911_v2 = vrot.slane %v3869_v20, 4 }
 0xb17   :  { %4210 = vpow2.f32 %v4033_v34  ;;  %v4034_v63 = vmul.f32 -1.442695, %v3890_v27  ;;  %v4035_v47 = vmul.f32 -1.442695, %v3914_v40 }
 0xb19   :  { %4212 = vpow2.f32 %v4034_v63 }
 0xb1a   :  { %4214 = vpow2.f32 %v4035_v47 }
 0xb1d   :  { %v4211_v18 = vpop.eup %4210 }
 0xb1e   :  { %v3873_v59 = vadd.f32 1.0, %v4211_v18 }
 0xb1f   :  { %v4213_v8 = vpop.eup %4212 }
 0xb20   :  { %v4215_v51 = vpop.eup %4214  ;;  %4216 = vrcp.f32 %v3873_v59  ;;  %v3895_v4 = vadd.f32 1.0, %v4213_v8  ;;  %v3885_v53 = vand.u32 2147483648, %v3873_v59  ;;  %v3883_v1 = vand.u32 2147483647, %v3873_v59 }
 0xb21   :  { %v3919_v44 = vadd.f32 1.0, %v4215_v51  ;;  %vm3879_vm4 = vweird.f32 %v3873_v59 }
 0xb22   :  { %4218 = vrcp.f32 %v3895_v4  ;;  %v3907_v22 = vand.u32 2147483648, %v3895_v4  ;;  %v3905_v36 = vand.u32 2147483647, %v3895_v4  ;;  %v3886_v57 = vor.u32 1.1754944e-38, %v3885_v53 }
 0xb23   :  { %4220 = vrcp.f32 %v3919_v44  ;;  %vm3884_vm9 = vcmp.eq.f32.partialorder %v3883_v1, 8.507059e+37  ;;  %vm3901_vm10 = vweird.f32 %v3895_v4  ;;  %v3931_v0 = vand.u32 2147483648, %v3919_v44 }
 0xb24   :  { %4222 = vtanh.f32 %v3911_v2  ;;  %v3908_v19 = vor.u32 1.1754944e-38, %v3907_v22  ;;  %vm3906_vm12 = vcmp.eq.f32.partialorder %v3905_v36, 8.507059e+37  ;;  %vm3925_vm14 = vweird.f32 %v3919_v44 }
 0xb25   :  { %v3929_v52 = vand.u32 2147483647, %v3919_v44  ;;  %v3932_v23 = vor.u32 1.1754944e-38, %v3931_v0 }
 0xb26   :  { %v4217_v3 = vpop.eup %4216 }
 0xb27   :  { %v3875_v49 = vmul.f32 %v4217_v3, %v3873_v59  ;;  %vm3880_vm0 = vweird.f32 %v4217_v3  ;;  %vm3930_vm1 = vcmp.eq.f32.partialorder %v3929_v52, 8.507059e+37 }
 0xb28   :  { %v4219_v29 = vpop.eup %4218  ;;  %vm3881_vm8 = vmor %vm3879_vm4, %vm3880_vm0 }
 0xb29   :  { %v4221_v21 = vpop.eup %4220  ;;  %v3876_v15 = vsub.f32 1.0, %v3875_v49  ;;  %v3897_v26 = vmul.f32 %v4219_v29, %v3895_v4  ;;  %vm3902_vm6 = vweird.f32 %v4219_v29 }
 0xb2a   :  { %v3921_v25 = vmul.f32 %v4221_v21, %v3919_v44  ;;  %vm3903_vm11 = vmor %vm3901_vm10, %vm3902_vm6  ;;  %v4223_v28 = vpop.eup %4222  ;;  %vm3926_vm13 = vweird.f32 %v4221_v21 }
 0xb2b   :  { %v3898_v48 = vsub.f32 1.0, %v3897_v26  ;;  %v3877_v6 = vmul.f32 %v4217_v3, %v3876_v15  ;;  %vm3927_vm15 = vmor %vm3925_vm14, %vm3926_vm13 }
 0xb2c   :  { %v3922_v14 = vsub.f32 1.0, %v3921_v25 }
 0xb2d   :  { %v3878_v56 = vadd.f32 %v4217_v3, %v3877_v6  ;;  %v3899_v10 = vmul.f32 %v4219_v29, %v3898_v48 }
 0xb2e   :  { %v3923_v43 = vmul.f32 %v4221_v21, %v3922_v14 }
 0xb2f   :  { %v3882_v39 = vsel %vm3881_vm8, %v4217_v3, %v3878_v56  ;;  %v3900_v12 = vadd.f32 %v4219_v29, %v3899_v10 }
 0xb30   :  { %v3887_v9 = vsel %vm3884_vm9, %v3886_v57, %v3882_v39  ;;  %v3924_v24 = vadd.f32 %v4221_v21, %v3923_v43 }
 0xb31   :  { %v3904_v60 = vsel %vm3903_vm11, %v4219_v29, %v3900_v12  ;;  %v3936_v61 = vmul.f32 %v4223_v28, %v3887_v9 }
 0xb32   :  { %v3909_v13 = vsel %vm3906_vm12, %v3908_v19, %v3904_v60  ;;  %v3928_v54 = vsel %vm3927_vm15, %v4221_v21, %v3924_v24 }
 0xb33   :  { %v3935_v55 = vmul.f32 %v3909_v13, %v6497_v62  ;;  %v3933_v35 = vsel %vm3930_vm1, %v3932_v23, %v3928_v54  ;;  %v4053_v62 = vld [vmem:[%s6526_s14] ss:$0 sm:$0xff] }
 0xb34   :  { %v2254_v41 = vadd.f32 %v4053_v62, %v6830_v32 }
 0xb35   :  { %v3937_v30 = vadd.f32 %v3936_v61, %v3935_v55 }
 0xb37   :  { %4224 = vtanh.f32 %v3937_v30 }
 0xb3d   :  { %v4225_v16 = vpop.eup %4224 }
 0xb3e   :  { %v3939_v58 = vmul.f32 %v4225_v16, %v3933_v35 }
 0xb40   :  { %3972 = vmatmul.f32.vlgmr.msra.gmra.mxu2 %v3939_v58 }
 0xbc3   :  { %v3973_v42 = vpop.f32.mrf.mxu2 }
 0xbc4   :  { %v3976_v20 = vadd.f32 %v3973_v42, %v2254_v41 }
 0xbc6   :  { %3977 = vst [vmem:[#allocation14] sm:$0x3] %v3976_v20 }
 0xbc7   :  { %3988 = dma.vmem_to_hbm [thread:$0]  %s3984_s10, 32, %s3986_s24, [#allocation4]  }
 0xbc8   :  { %4554 = dma.done.wait [#allocation4], 32  }
 0xbc9   :  { %4555 = vsyncadd [#allocation4], 4294967264 }
 0xbca   :  { %3993 = vsyncpa [#allocation3], 1 }
 0xbcb   :  { %3994 = vsyncpa [#allocation6], 1 }
 0xbcc   :  { %3995 = vsyncpa [#allocation9], 1 }
 0xbcd   :  { %3996 = vsyncpa [#allocation12], 1 }
 0xbce   :  { %3997 = vsyncpa [#allocation4], 1 }

</bundles_post_ra>
